<compile_context>
chip_gen: v7x
topology: tpu7x:2x2x1
jax: 0.10.0
libtpu: 0.0.40
codegen_flags: <defaults>
</compile_context>

<pallas_src>
import functools

import jax
import jax.numpy as jnp
from jax import lax
from jax.experimental import pallas as pl
from jax.experimental.pallas import tpu as pltpu

LEAKY_SLOPE = 0.2
BN_EPS = 1e-5
KSIZE = 4


# ----------------------------------------------------------------------------
# Per-generation sizing helpers.
# ----------------------------------------------------------------------------
@functools.lru_cache(maxsize=None)
def _vmem_limit_bytes():
    """Scoped VMEM request sized per chip generation (v7x has only 64 MiB)."""
    cap = 64 * 1024 * 1024
    try:
        info = pltpu.get_tpu_info()
        cap = int(getattr(info, "vmem_capacity_bytes", cap))
    except Exception:
        pass
    return min(96 * 1024 * 1024, max(int(cap * 0.7), 16 * 1024 * 1024))


def _cparams():
    return pltpu.CompilerParams(dimension_semantics=("parallel",),
                                vmem_limit_bytes=_vmem_limit_bytes())


def _pick_rows(total_rows, in_cols, out_cols):
    """Largest row tile dividing total_rows, multiple of 16 (bf16), byte-sized."""
    # double-buffered bf16 input + output tiles; weights / stats are small.
    per_row = 2 * 2 * (in_cols + out_cols)
    target = max(8, min(total_rows, (_vmem_limit_bytes() // 3) // per_row))
    for step in (16, 8):
        t = (min(target, total_rows) // step) * step
        while t >= step:
            if total_rows % t == 0:
                return t
            t -= step
    return total_rows  # small / odd row counts: single full-extent block


# ----------------------------------------------------------------------------
# Kernels.
# ----------------------------------------------------------------------------
def _conv_head_kernel(p_ref, w_ref, o_ref):
    """Layer 1: lane-dense GEMM only (bias+LeakyReLU fused into layer 2)."""
    z = jnp.dot(p_ref[...], w_ref[...], preferred_element_type=jnp.float32)
    o_ref[...] = z.astype(o_ref.dtype)


def _act_conv_stats_kernel(p_ref, s_ref, t_ref, w_ref, o_ref, stats_ref):
    """Layers 2-4: previous layer's affine (bias or BN) + LeakyReLU applied to
    the patch tile, lane-dense GEMM, plus per-tile column sum / sum-of-squares
    partials for this layer's BatchNorm statistics."""
    x = p_ref[...].astype(jnp.float32) * s_ref[...] + t_ref[...]
    x = jnp.maximum(x, LEAKY_SLOPE * x)
    z = jnp.dot(x.astype(jnp.bfloat16), w_ref[...],
                preferred_element_type=jnp.float32)
    zb = z.astype(o_ref.dtype)
    o_ref[...] = zb
    zf = zb.astype(jnp.float32)          # stats on the values actually stored
    colsum = jnp.sum(zf, axis=0, keepdims=True)
    colsq = jnp.sum(zf * zf, axis=0, keepdims=True)
    pad = jnp.zeros((6, colsum.shape[1]), jnp.float32)
    stats_ref[0] = jnp.concatenate([colsum, colsq, pad], axis=0)


# ----------------------------------------------------------------------------
# pallas_call wrappers.
# ----------------------------------------------------------------------------
def conv_head(patches, w_big, out_cols):
    rows, in_cols = patches.shape
    tr = _pick_rows(rows, in_cols, out_cols)
    return pl.pallas_call(
        _conv_head_kernel,
        out_shape=jax.ShapeDtypeStruct((rows, out_cols), jnp.bfloat16),
        grid_spec=pltpu.PrefetchScalarGridSpec(
            num_scalar_prefetch=0,
            grid=(rows // tr,),
            in_specs=[pl.BlockSpec((tr, in_cols), lambda i: (i, 0)),
                      pl.BlockSpec((in_cols, out_cols), lambda i: (0, 0))],
            out_specs=pl.BlockSpec((tr, out_cols), lambda i: (i, 0))),
        compiler_params=_cparams(),
    )(patches, w_big)


def act_conv_stats(patches, scale_cols, shift_cols, w_big, out_cols):
    rows, in_cols = patches.shape
    tr = _pick_rows(rows, in_cols, out_cols)
    grid_n = rows // tr
    y, stats = pl.pallas_call(
        _act_conv_stats_kernel,
        out_shape=(jax.ShapeDtypeStruct((rows, out_cols), jnp.bfloat16),
                   jax.ShapeDtypeStruct((grid_n, 8, out_cols), jnp.float32)),
        grid_spec=pltpu.PrefetchScalarGridSpec(
            num_scalar_prefetch=0,
            grid=(grid_n,),
            in_specs=[pl.BlockSpec((tr, in_cols), lambda i: (i, 0)),
                      pl.BlockSpec((1, in_cols), lambda i: (0, 0)),
                      pl.BlockSpec((1, in_cols), lambda i: (0, 0)),
                      pl.BlockSpec((in_cols, out_cols), lambda i: (0, 0))],
            out_specs=[pl.BlockSpec((tr, out_cols), lambda i: (i, 0)),
                       pl.BlockSpec((1, 8, out_cols), lambda i: (i, 0, 0))]),
        compiler_params=_cparams(),
    )(patches, scale_cols, shift_cols, w_big)
    return y, stats


# ----------------------------------------------------------------------------
# Glue: im2col, block-diagonal weights, BN statistics, forward pass.
# ----------------------------------------------------------------------------
def im2col_ld(x_nhwc, k, stride, pad):
    """kxk stride-s patches in lane-dense form: [N*Ho, Wo*k*k*C]."""
    N, H, W, C = x_nhwc.shape
    xp = jnp.pad(x_nhwc, ((0, 0), (pad, pad), (pad, pad), (0, 0)))
    Ho = (H + 2 * pad - k) // stride + 1
    Wo = (W + 2 * pad - k) // stride + 1
    slabs = [xp[:, i:i + Ho * stride:stride, j:j + Wo * stride:stride, :]
             for i in range(k) for j in range(k)]
    p = jnp.stack(slabs, axis=3)                  # (N, Ho, Wo, k*k, C)
    return p.reshape(N * Ho, Wo * k * k * C), N, Ho, Wo


def _block_diag_weight(w2d, wo):
    """(K, C) conv weight -> (Wo*K, Wo*C) block diagonal so the GEMM writes a
    lane-dense (rows, Wo*C) output directly (no in-kernel relayout)."""
    return jnp.kron(jnp.eye(wo, dtype=jnp.float32),
                    w2d.astype(jnp.float32)).astype(jnp.bfloat16)


def _bn_affine(stats, wo, c, count, gamma, beta):
    """Fold per-tile column partials into per-channel BN scale / shift."""
    colsum = stats[:, 0, :].sum(axis=0)
    colsq = stats[:, 1, :].sum(axis=0)
    ch_sum = colsum.reshape(wo, c).sum(axis=0)
    ch_sq = colsq.reshape(wo, c).sum(axis=0)
    mean = ch_sum / count
    # Single-pass E[x^2] - mean^2 in f32 (clamped); see review correctness note.
    var = jnp.maximum(ch_sq / count - mean * mean, 0.0)
    scale = gamma * lax.rsqrt(var + BN_EPS)
    shift = beta - mean * scale
    return scale, shift


def init_params(key, img_channels, features_disc):
    """Deterministic synthetic parameters (shapes implied by __init__)."""
    F = features_disc
    chans = [(img_channels, F), (F, 2 * F), (2 * F, 4 * F), (4 * F, 8 * F), (8 * F, 1)]
    modes = ["bias", "bn", "bn", "bn", "bias"]
    params = []
    for (cin, cout), mode in zip(chans, modes):
        key, k1, k2, k3 = jax.random.split(key, 4)
        w = 0.02 * jax.random.normal(k1, (KSIZE, KSIZE, cin, cout), jnp.float32)
        w2d = w.reshape(KSIZE * KSIZE * cin, cout)       # (16*Cin, Cout) f32
        if mode == "bias":
            b = 0.02 * jax.random.normal(k2, (cout,), jnp.float32)
            params.append((w2d, b))
        else:
            g = 1.0 + 0.02 * jax.random.normal(k2, (cout,), jnp.float32)
            bt = 0.02 * jax.random.normal(k3, (cout,), jnp.float32)
            params.append((w2d, g, bt))
    return params


@jax.jit
def dcgan_discriminator_forward(x_nchw, params):
    (w1, b1), (w2, g2, bt2), (w3, g3, bt3), (w4, g4, bt4), (w5, b5) = params
    N = x_nchw.shape[0]

    # NCHW -> NHWC, bf16 GEMM operands.
    x = jnp.transpose(x_nchw, (0, 2, 3, 1)).astype(jnp.bfloat16)

    # Layer 1: Conv(Cimg -> F, 4,2,1).  Its bias + LeakyReLU are fused into
    # layer 2's kernel as a per-column affine on the patches.
    F1 = w1.shape[1]
    p, _, Ho, Wo = im2col_ld(x, KSIZE, 2, 1)
    y = conv_head(p, _block_diag_weight(w1, Wo), Wo * F1)      # (N*Ho, Wo*F1)

    # Pending elementwise epilogue of the *previous* layer (per channel).
    scale_c = jnp.ones((F1,), jnp.float32)
    shift_c = b1.astype(jnp.float32)
    C_prev, Ho_prev, Wo_prev = F1, Ho, Wo

    # Layers 2-4: Conv(4,2,1, bias=False) + BatchNorm(batch stats) + LeakyReLU.
    for (w, g, bt) in ((w2, g2, bt2), (w3, g3, bt3), (w4, g4, bt4)):
        a_img = y.reshape(N, Ho_prev, Wo_prev, C_prev)          # free reshape
        p, _, Ho, Wo = im2col_ld(a_img, KSIZE, 2, 1)
        reps = Wo * KSIZE * KSIZE
        s_cols = jnp.tile(scale_c, reps)[None, :]
        t_cols = jnp.tile(shift_c, reps)[None, :]
        C = w.shape[1]
        y, stats = act_conv_stats(p, s_cols, t_cols,
                                  _block_diag_weight(w, Wo), Wo * C)
        scale_c, shift_c = _bn_affine(stats, Wo, C, float(N * Ho * Wo), g, bt)
        C_prev, Ho_prev, Wo_prev = C, Ho, Wo

    # Layer 4's BatchNorm+LeakyReLU and the final Conv(8F -> 1, 4,2,0) over a
    # 4x4 input (a per-sample GEMV) run in XLA: per the perf review the Pallas
    # launch overhead would dwarf the few-hundred-FLOP compute, and its im2col
    # is a free reshape of layer 4's lane-dense output.
    assert Ho_prev == KSIZE and Wo_prev == KSIZE, "expects 64x64 input"
    a4 = (y.astype(jnp.float32) * jnp.tile(scale_c, Wo_prev)[None, :]
          + jnp.tile(shift_c, Wo_prev)[None, :])
    a4 = jnp.maximum(a4, LEAKY_SLOPE * a4)
    a4 = a4.reshape(N, KSIZE * KSIZE * C_prev)
    logits = a4 @ w5.astype(jnp.float32) + b5.astype(jnp.float32)

    # Raw logits, NCHW (N, 1, 1, 1): the reference module has no Sigmoid.
    return logits.reshape(N, 1, 1, 1)


if __name__ == "__main__":
    key = jax.random.PRNGKey(0)
    kx, kp = jax.random.split(key)

    img_channels = 1      # MNIST
    features_disc = 8     # small F
    batch = 2
    # DCGAN discriminator requires 64x64 input for the final 4x4/s2/p0 conv -> 1x1.
    x = jax.random.normal(kx, (batch, img_channels, 64, 64), jnp.float32)
    params = init_params(kp, img_channels, features_disc)

    out = dcgan_discriminator_forward(x, params)
    out = jax.block_until_ready(out)
    assert out.shape == (batch, 1, 1, 1), out.shape
    assert bool(jnp.all(jnp.isfinite(out)))
    print("KERNEL_OK")
</pallas_src>

<mosaic_0001>
module attributes {stable_mosaic.version = 11 : i64} {
  func.func @_conv_head_kernel(%arg0: i32, %arg1: memref<64x512xbf16, #tpu.memory_space<vmem>>, %arg2: memref<512x256xbf16, #tpu.memory_space<vmem>>, %arg3: memref<64x256xbf16, #tpu.memory_space<vmem>>) attributes {dimension_semantics = [#tpu.dimension_semantics<parallel>], iteration_bounds = array<i64: 1>, scalar_prefetch = 0 : i64, scratch_operands = 0 : i64, tpu.core_type = #tpu.core_type<tc>, window_params = [{transform_indices = @transform_0, window_bounds = array<i64: 64, 512>}, {pipeline_mode = #tpu.pipeline_mode<synchronous>, transform_indices = @transform_1, window_bounds = array<i64: 512, 256>}, {transform_indices = @transform_2, window_bounds = array<i64: 64, 256>}]} {
    %c0 = arith.constant 0 : index
    %c0_0 = arith.constant 0 : index
    %0 = vector.load %arg1[%c0, %c0_0] : memref<64x512xbf16, #tpu.memory_space<vmem>>, vector<64x512xbf16>
    %c0_1 = arith.constant 0 : index
    %c0_2 = arith.constant 0 : index
    %1 = vector.load %arg2[%c0_1, %c0_2] : memref<512x256xbf16, #tpu.memory_space<vmem>>, vector<512x256xbf16>
    %cst = arith.constant dense<0.000000e+00> : vector<64x256xf32>
    %2 = tpu.matmul %0, %1, %cst {dimension_numbers = #tpu.dot_dimension_numbers<[1], [0], [0], [1], [0, 0, 1, 1], [], []>} : vector<64x512xbf16>, vector<512x256xbf16>, vector<64x256xf32> -> vector<64x256xf32>
    %3 = arith.truncf %2 : vector<64x256xf32> to vector<64x256xbf16>
    %c0_3 = arith.constant 0 : index
    %c0_4 = arith.constant 0 : index
    %4 = vector.load %arg3[%c0_3, %c0_4] : memref<64x256xbf16, #tpu.memory_space<vmem>>, vector<64x256xbf16>
    tpu.vector_store %arg3[%c0_3, %c0_4], %3 {strides = array<i32>} : memref<64x256xbf16, #tpu.memory_space<vmem>>, vector<64x256xbf16>,
    return
  }
  func.func @transform_0(%arg0: i32) -> (i32, i32) {
    %c0_i32 = arith.constant 0 : i32
    %c0_i32_0 = arith.constant 0 : i32
    return %arg0, %c0_i32 : i32, i32
  }
  func.func @transform_1(%arg0: i32) -> (i32, i32) {
    %c0_i32 = arith.constant 0 : i32
    %c0_i32_0 = arith.constant 0 : i32
    %c0_i32_1 = arith.constant 0 : i32
    return %c0_i32, %c0_i32_0 : i32, i32
  }
  func.func @transform_2(%arg0: i32) -> (i32, i32) {
    %c0_i32 = arith.constant 0 : i32
    %c0_i32_0 = arith.constant 0 : i32
    return %arg0, %c0_i32 : i32, i32
  }
}

module attributes {stable_mosaic.version = 11 : i64} {
  func.func @_act_conv_stats_kernel(%arg0: i32, %arg1: memref<32x2048xbf16, #tpu.memory_space<vmem>>, %arg2: memref<1x2048xf32, #tpu.memory_space<vmem>>, %arg3: memref<1x2048xf32, #tpu.memory_space<vmem>>, %arg4: memref<2048x256xbf16, #tpu.memory_space<vmem>>, %arg5: memref<32x256xbf16, #tpu.memory_space<vmem>>, %arg6: memref<1x8x256xf32, #tpu.memory_space<vmem>>) attributes {dimension_semantics = [#tpu.dimension_semantics<parallel>], iteration_bounds = array<i64: 1>, scalar_prefetch = 0 : i64, scratch_operands = 0 : i64, tpu.core_type = #tpu.core_type<tc>, window_params = [{transform_indices = @transform_0, window_bounds = array<i64: 32, 2048>}, {pipeline_mode = #tpu.pipeline_mode<synchronous>, transform_indices = @transform_1, window_bounds = array<i64: 1, 2048>}, {pipeline_mode = #tpu.pipeline_mode<synchronous>, transform_indices = @transform_2, window_bounds = array<i64: 1, 2048>}, {pipeline_mode = #tpu.pipeline_mode<synchronous>, transform_indices = @transform_3, window_bounds = array<i64: 2048, 256>}, {transform_indices = @transform_4, window_bounds = array<i64: 32, 256>}, {transform_indices = @transform_5, window_bounds = array<i64: 1, 8, 256>}]} {
    %c0 = arith.constant 0 : index
    %c0_0 = arith.constant 0 : index
    %0 = vector.load %arg1[%c0, %c0_0] : memref<32x2048xbf16, #tpu.memory_space<vmem>>, vector<32x2048xbf16>
    %1 = arith.extf %0 : vector<32x2048xbf16> to vector<32x2048xf32>
    %c0_1 = arith.constant 0 : index
    %c0_2 = arith.constant 0 : index
    %2 = vector.load %arg2[%c0_1, %c0_2] : memref<1x2048xf32, #tpu.memory_space<vmem>>, vector<1x2048xf32>
    %3 = vector.broadcast %2 : vector<1x2048xf32> to vector<32x2048xf32>
    %4 = arith.mulf %1, %3 : vector<32x2048xf32>
    %c0_3 = arith.constant 0 : index
    %c0_4 = arith.constant 0 : index
    %5 = vector.load %arg3[%c0_3, %c0_4] : memref<1x2048xf32, #tpu.memory_space<vmem>>, vector<1x2048xf32>
    %6 = vector.broadcast %5 : vector<1x2048xf32> to vector<32x2048xf32>
    %7 = arith.addf %4, %6 : vector<32x2048xf32>
    %cst = arith.constant 2.000000e-01 : f32
    %8 = vector.broadcast %cst : f32 to vector<32x2048xf32>
    %9 = arith.mulf %8, %7 : vector<32x2048xf32>
    %10 = arith.maximumf %7, %9 : vector<32x2048xf32>
    %11 = arith.truncf %10 : vector<32x2048xf32> to vector<32x2048xbf16>
    %c0_5 = arith.constant 0 : index
    %c0_6 = arith.constant 0 : index
    %12 = vector.load %arg4[%c0_5, %c0_6] : memref<2048x256xbf16, #tpu.memory_space<vmem>>, vector<2048x256xbf16>
    %cst_7 = arith.constant dense<0.000000e+00> : vector<32x256xf32>
    %13 = tpu.matmul %11, %12, %cst_7 {dimension_numbers = #tpu.dot_dimension_numbers<[1], [0], [0], [1], [0, 0, 1, 1], [], []>} : vector<32x2048xbf16>, vector<2048x256xbf16>, vector<32x256xf32> -> vector<32x256xf32>
    %14 = arith.truncf %13 : vector<32x256xf32> to vector<32x256xbf16>
    %c0_8 = arith.constant 0 : index
    %c0_9 = arith.constant 0 : index
    %15 = vector.load %arg5[%c0_8, %c0_9] : memref<32x256xbf16, #tpu.memory_space<vmem>>, vector<32x256xbf16>
    tpu.vector_store %arg5[%c0_8, %c0_9], %14 {strides = array<i32>} : memref<32x256xbf16, #tpu.memory_space<vmem>>, vector<32x256xbf16>,
    %16 = arith.extf %14 : vector<32x256xbf16> to vector<32x256xf32>
    %cst_10 = arith.constant dense<0.000000e+00> : vector<256xf32>
    %17 = vector.multi_reduction <add>, %16, %cst_10 [0] : vector<32x256xf32> to vector<256xf32>
    %18 = vector.shape_cast %17 : vector<256xf32> to vector<1x256xf32>
    %19 = arith.mulf %16, %16 : vector<32x256xf32>
    %cst_11 = arith.constant dense<0.000000e+00> : vector<256xf32>
    %20 = vector.multi_reduction <add>, %19, %cst_11 [0] : vector<32x256xf32> to vector<256xf32>
    %21 = vector.shape_cast %20 : vector<256xf32> to vector<1x256xf32>
    %cst_12 = arith.constant 0.000000e+00 : f32
    %22 = vector.broadcast %cst_12 : f32 to vector<6x256xf32>
    %23 = tpu.concatenate %18, %21, %22 in 0 : vector<1x256xf32>, vector<1x256xf32>, vector<6x256xf32> -> vector<8x256xf32>
    %c0_13 = arith.constant 0 : index
    %c0_14 = arith.constant 0 : index
    %c0_15 = arith.constant 0 : index
    %24 = vector.load %arg6[%c0_13, %c0_14, %c0_15] : memref<1x8x256xf32, #tpu.memory_space<vmem>>, vector<1x8x256xf32>
    %25 = vector.shape_cast %24 : vector<1x8x256xf32> to vector<8x256xf32>
    %26 = vector.shape_cast %23 : vector<8x256xf32> to vector<1x8x256xf32>
    tpu.vector_store %arg6[%c0_13, %c0_14, %c0_15], %26 {strides = array<i32>} : memref<1x8x256xf32, #tpu.memory_space<vmem>>, vector<1x8x256xf32>,
    return
  }
  func.func @transform_0(%arg0: i32) -> (i32, i32) {
    %c0_i32 = arith.constant 0 : i32
    %c0_i32_0 = arith.constant 0 : i32
    return %arg0, %c0_i32 : i32, i32
  }
  func.func @transform_1(%arg0: i32) -> (i32, i32) {
    %c0_i32 = arith.constant 0 : i32
    %c0_i32_0 = arith.constant 0 : i32
    %c0_i32_1 = arith.constant 0 : i32
    return %c0_i32, %c0_i32_0 : i32, i32
  }
  func.func @transform_2(%arg0: i32) -> (i32, i32) {
    %c0_i32 = arith.constant 0 : i32
    %c0_i32_0 = arith.constant 0 : i32
    %c0_i32_1 = arith.constant 0 : i32
    return %c0_i32, %c0_i32_0 : i32, i32
  }
  func.func @transform_3(%arg0: i32) -> (i32, i32) {
    %c0_i32 = arith.constant 0 : i32
    %c0_i32_0 = arith.constant 0 : i32
    %c0_i32_1 = arith.constant 0 : i32
    return %c0_i32, %c0_i32_0 : i32, i32
  }
  func.func @transform_4(%arg0: i32) -> (i32, i32) {
    %c0_i32 = arith.constant 0 : i32
    %c0_i32_0 = arith.constant 0 : i32
    return %arg0, %c0_i32 : i32, i32
  }
  func.func @transform_5(%arg0: i32) -> (i32, i32, i32) {
    %c0_i32 = arith.constant 0 : i32
    %c0_i32_0 = arith.constant 0 : i32
    %c0_i32_1 = arith.constant 0 : i32
    return %arg0, %c0_i32, %c0_i32_0 : i32, i32, i32
  }
}

module attributes {stable_mosaic.version = 11 : i64} {
  func.func @_act_conv_stats_kernel(%arg0: i32, %arg1: memref<16x2048xbf16, #tpu.memory_space<vmem>>, %arg2: memref<1x2048xf32, #tpu.memory_space<vmem>>, %arg3: memref<1x2048xf32, #tpu.memory_space<vmem>>, %arg4: memref<2048x256xbf16, #tpu.memory_space<vmem>>, %arg5: memref<16x256xbf16, #tpu.memory_space<vmem>>, %arg6: memref<1x8x256xf32, #tpu.memory_space<vmem>>) attributes {dimension_semantics = [#tpu.dimension_semantics<parallel>], iteration_bounds = array<i64: 1>, scalar_prefetch = 0 : i64, scratch_operands = 0 : i64, tpu.core_type = #tpu.core_type<tc>, window_params = [{transform_indices = @transform_0, window_bounds = array<i64: 16, 2048>}, {pipeline_mode = #tpu.pipeline_mode<synchronous>, transform_indices = @transform_1, window_bounds = array<i64: 1, 2048>}, {pipeline_mode = #tpu.pipeline_mode<synchronous>, transform_indices = @transform_2, window_bounds = array<i64: 1, 2048>}, {pipeline_mode = #tpu.pipeline_mode<synchronous>, transform_indices = @transform_3, window_bounds = array<i64: 2048, 256>}, {transform_indices = @transform_4, window_bounds = array<i64: 16, 256>}, {transform_indices = @transform_5, window_bounds = array<i64: 1, 8, 256>}]} {
    %c0 = arith.constant 0 : index
    %c0_0 = arith.constant 0 : index
    %0 = vector.load %arg1[%c0, %c0_0] : memref<16x2048xbf16, #tpu.memory_space<vmem>>, vector<16x2048xbf16>
    %1 = arith.extf %0 : vector<16x2048xbf16> to vector<16x2048xf32>
    %c0_1 = arith.constant 0 : index
    %c0_2 = arith.constant 0 : index
    %2 = vector.load %arg2[%c0_1, %c0_2] : memref<1x2048xf32, #tpu.memory_space<vmem>>, vector<1x2048xf32>
    %3 = vector.broadcast %2 : vector<1x2048xf32> to vector<16x2048xf32>
    %4 = arith.mulf %1, %3 : vector<16x2048xf32>
    %c0_3 = arith.constant 0 : index
    %c0_4 = arith.constant 0 : index
    %5 = vector.load %arg3[%c0_3, %c0_4] : memref<1x2048xf32, #tpu.memory_space<vmem>>, vector<1x2048xf32>
    %6 = vector.broadcast %5 : vector<1x2048xf32> to vector<16x2048xf32>
    %7 = arith.addf %4, %6 : vector<16x2048xf32>
    %cst = arith.constant 2.000000e-01 : f32
    %8 = vector.broadcast %cst : f32 to vector<16x2048xf32>
    %9 = arith.mulf %8, %7 : vector<16x2048xf32>
    %10 = arith.maximumf %7, %9 : vector<16x2048xf32>
    %11 = arith.truncf %10 : vector<16x2048xf32> to vector<16x2048xbf16>
    %c0_5 = arith.constant 0 : index
    %c0_6 = arith.constant 0 : index
    %12 = vector.load %arg4[%c0_5, %c0_6] : memref<2048x256xbf16, #tpu.memory_space<vmem>>, vector<2048x256xbf16>
    %cst_7 = arith.constant dense<0.000000e+00> : vector<16x256xf32>
    %13 = tpu.matmul %11, %12, %cst_7 {dimension_numbers = #tpu.dot_dimension_numbers<[1], [0], [0], [1], [0, 0, 1, 1], [], []>} : vector<16x2048xbf16>, vector<2048x256xbf16>, vector<16x256xf32> -> vector<16x256xf32>
    %14 = arith.truncf %13 : vector<16x256xf32> to vector<16x256xbf16>
    %c0_8 = arith.constant 0 : index
    %c0_9 = arith.constant 0 : index
    %15 = vector.load %arg5[%c0_8, %c0_9] : memref<16x256xbf16, #tpu.memory_space<vmem>>, vector<16x256xbf16>
    tpu.vector_store %arg5[%c0_8, %c0_9], %14 {strides = array<i32>} : memref<16x256xbf16, #tpu.memory_space<vmem>>, vector<16x256xbf16>,
    %16 = arith.extf %14 : vector<16x256xbf16> to vector<16x256xf32>
    %cst_10 = arith.constant dense<0.000000e+00> : vector<256xf32>
    %17 = vector.multi_reduction <add>, %16, %cst_10 [0] : vector<16x256xf32> to vector<256xf32>
    %18 = vector.shape_cast %17 : vector<256xf32> to vector<1x256xf32>
    %19 = arith.mulf %16, %16 : vector<16x256xf32>
    %cst_11 = arith.constant dense<0.000000e+00> : vector<256xf32>
    %20 = vector.multi_reduction <add>, %19, %cst_11 [0] : vector<16x256xf32> to vector<256xf32>
    %21 = vector.shape_cast %20 : vector<256xf32> to vector<1x256xf32>
    %cst_12 = arith.constant 0.000000e+00 : f32
    %22 = vector.broadcast %cst_12 : f32 to vector<6x256xf32>
    %23 = tpu.concatenate %18, %21, %22 in 0 : vector<1x256xf32>, vector<1x256xf32>, vector<6x256xf32> -> vector<8x256xf32>
    %c0_13 = arith.constant 0 : index
    %c0_14 = arith.constant 0 : index
    %c0_15 = arith.constant 0 : index
    %24 = vector.load %arg6[%c0_13, %c0_14, %c0_15] : memref<1x8x256xf32, #tpu.memory_space<vmem>>, vector<1x8x256xf32>
    %25 = vector.shape_cast %24 : vector<1x8x256xf32> to vector<8x256xf32>
    %26 = vector.shape_cast %23 : vector<8x256xf32> to vector<1x8x256xf32>
    tpu.vector_store %arg6[%c0_13, %c0_14, %c0_15], %26 {strides = array<i32>} : memref<1x8x256xf32, #tpu.memory_space<vmem>>, vector<1x8x256xf32>,
    return
  }
  func.func @transform_0(%arg0: i32) -> (i32, i32) {
    %c0_i32 = arith.constant 0 : i32
    %c0_i32_0 = arith.constant 0 : i32
    return %arg0, %c0_i32 : i32, i32
  }
  func.func @transform_1(%arg0: i32) -> (i32, i32) {
    %c0_i32 = arith.constant 0 : i32
    %c0_i32_0 = arith.constant 0 : i32
    %c0_i32_1 = arith.constant 0 : i32
    return %c0_i32, %c0_i32_0 : i32, i32
  }
  func.func @transform_2(%arg0: i32) -> (i32, i32) {
    %c0_i32 = arith.constant 0 : i32
    %c0_i32_0 = arith.constant 0 : i32
    %c0_i32_1 = arith.constant 0 : i32
    return %c0_i32, %c0_i32_0 : i32, i32
  }
  func.func @transform_3(%arg0: i32) -> (i32, i32) {
    %c0_i32 = arith.constant 0 : i32
    %c0_i32_0 = arith.constant 0 : i32
    %c0_i32_1 = arith.constant 0 : i32
    return %c0_i32, %c0_i32_0 : i32, i32
  }
  func.func @transform_4(%arg0: i32) -> (i32, i32) {
    %c0_i32 = arith.constant 0 : i32
    %c0_i32_0 = arith.constant 0 : i32
    return %arg0, %c0_i32 : i32, i32
  }
  func.func @transform_5(%arg0: i32) -> (i32, i32, i32) {
    %c0_i32 = arith.constant 0 : i32
    %c0_i32_0 = arith.constant 0 : i32
    %c0_i32_1 = arith.constant 0 : i32
    return %arg0, %c0_i32, %c0_i32_0 : i32, i32, i32
  }
}

module attributes {stable_mosaic.version = 11 : i64} {
  func.func @_act_conv_stats_kernel(%arg0: i32, %arg1: memref<8x2048xbf16, #tpu.memory_space<vmem>>, %arg2: memref<1x2048xf32, #tpu.memory_space<vmem>>, %arg3: memref<1x2048xf32, #tpu.memory_space<vmem>>, %arg4: memref<2048x256xbf16, #tpu.memory_space<vmem>>, %arg5: memref<8x256xbf16, #tpu.memory_space<vmem>>, %arg6: memref<1x8x256xf32, #tpu.memory_space<vmem>>) attributes {dimension_semantics = [#tpu.dimension_semantics<parallel>], iteration_bounds = array<i64: 1>, scalar_prefetch = 0 : i64, scratch_operands = 0 : i64, tpu.core_type = #tpu.core_type<tc>, window_params = [{transform_indices = @transform_0, window_bounds = array<i64: 8, 2048>}, {pipeline_mode = #tpu.pipeline_mode<synchronous>, transform_indices = @transform_1, window_bounds = array<i64: 1, 2048>}, {pipeline_mode = #tpu.pipeline_mode<synchronous>, transform_indices = @transform_2, window_bounds = array<i64: 1, 2048>}, {pipeline_mode = #tpu.pipeline_mode<synchronous>, transform_indices = @transform_3, window_bounds = array<i64: 2048, 256>}, {transform_indices = @transform_4, window_bounds = array<i64: 8, 256>}, {transform_indices = @transform_5, window_bounds = array<i64: 1, 8, 256>}]} {
    %c0 = arith.constant 0 : index
    %c0_0 = arith.constant 0 : index
    %0 = vector.load %arg1[%c0, %c0_0] : memref<8x2048xbf16, #tpu.memory_space<vmem>>, vector<8x2048xbf16>
    %1 = arith.extf %0 : vector<8x2048xbf16> to vector<8x2048xf32>
    %c0_1 = arith.constant 0 : index
    %c0_2 = arith.constant 0 : index
    %2 = vector.load %arg2[%c0_1, %c0_2] : memref<1x2048xf32, #tpu.memory_space<vmem>>, vector<1x2048xf32>
    %3 = vector.broadcast %2 : vector<1x2048xf32> to vector<8x2048xf32>
    %4 = arith.mulf %1, %3 : vector<8x2048xf32>
    %c0_3 = arith.constant 0 : index
    %c0_4 = arith.constant 0 : index
    %5 = vector.load %arg3[%c0_3, %c0_4] : memref<1x2048xf32, #tpu.memory_space<vmem>>, vector<1x2048xf32>
    %6 = vector.broadcast %5 : vector<1x2048xf32> to vector<8x2048xf32>
    %7 = arith.addf %4, %6 : vector<8x2048xf32>
    %cst = arith.constant 2.000000e-01 : f32
    %8 = vector.broadcast %cst : f32 to vector<8x2048xf32>
    %9 = arith.mulf %8, %7 : vector<8x2048xf32>
    %10 = arith.maximumf %7, %9 : vector<8x2048xf32>
    %11 = arith.truncf %10 : vector<8x2048xf32> to vector<8x2048xbf16>
    %c0_5 = arith.constant 0 : index
    %c0_6 = arith.constant 0 : index
    %12 = vector.load %arg4[%c0_5, %c0_6] : memref<2048x256xbf16, #tpu.memory_space<vmem>>, vector<2048x256xbf16>
    %cst_7 = arith.constant dense<0.000000e+00> : vector<8x256xf32>
    %13 = tpu.matmul %11, %12, %cst_7 {dimension_numbers = #tpu.dot_dimension_numbers<[1], [0], [0], [1], [0, 0, 1, 1], [], []>} : vector<8x2048xbf16>, vector<2048x256xbf16>, vector<8x256xf32> -> vector<8x256xf32>
    %14 = arith.truncf %13 : vector<8x256xf32> to vector<8x256xbf16>
    %c0_8 = arith.constant 0 : index
    %c0_9 = arith.constant 0 : index
    %15 = vector.load %arg5[%c0_8, %c0_9] : memref<8x256xbf16, #tpu.memory_space<vmem>>, vector<8x256xbf16>
    tpu.vector_store %arg5[%c0_8, %c0_9], %14 {strides = array<i32>} : memref<8x256xbf16, #tpu.memory_space<vmem>>, vector<8x256xbf16>,
    %16 = arith.extf %14 : vector<8x256xbf16> to vector<8x256xf32>
    %cst_10 = arith.constant dense<0.000000e+00> : vector<256xf32>
    %17 = vector.multi_reduction <add>, %16, %cst_10 [0] : vector<8x256xf32> to vector<256xf32>
    %18 = vector.shape_cast %17 : vector<256xf32> to vector<1x256xf32>
    %19 = arith.mulf %16, %16 : vector<8x256xf32>
    %cst_11 = arith.constant dense<0.000000e+00> : vector<256xf32>
    %20 = vector.multi_reduction <add>, %19, %cst_11 [0] : vector<8x256xf32> to vector<256xf32>
    %21 = vector.shape_cast %20 : vector<256xf32> to vector<1x256xf32>
    %cst_12 = arith.constant 0.000000e+00 : f32
    %22 = vector.broadcast %cst_12 : f32 to vector<6x256xf32>
    %23 = tpu.concatenate %18, %21, %22 in 0 : vector<1x256xf32>, vector<1x256xf32>, vector<6x256xf32> -> vector<8x256xf32>
    %c0_13 = arith.constant 0 : index
    %c0_14 = arith.constant 0 : index
    %c0_15 = arith.constant 0 : index
    %24 = vector.load %arg6[%c0_13, %c0_14, %c0_15] : memref<1x8x256xf32, #tpu.memory_space<vmem>>, vector<1x8x256xf32>
    %25 = vector.shape_cast %24 : vector<1x8x256xf32> to vector<8x256xf32>
    %26 = vector.shape_cast %23 : vector<8x256xf32> to vector<1x8x256xf32>
    tpu.vector_store %arg6[%c0_13, %c0_14, %c0_15], %26 {strides = array<i32>} : memref<1x8x256xf32, #tpu.memory_space<vmem>>, vector<1x8x256xf32>,
    return
  }
  func.func @transform_0(%arg0: i32) -> (i32, i32) {
    %c0_i32 = arith.constant 0 : i32
    %c0_i32_0 = arith.constant 0 : i32
    return %arg0, %c0_i32 : i32, i32
  }
  func.func @transform_1(%arg0: i32) -> (i32, i32) {
    %c0_i32 = arith.constant 0 : i32
    %c0_i32_0 = arith.constant 0 : i32
    %c0_i32_1 = arith.constant 0 : i32
    return %c0_i32, %c0_i32_0 : i32, i32
  }
  func.func @transform_2(%arg0: i32) -> (i32, i32) {
    %c0_i32 = arith.constant 0 : i32
    %c0_i32_0 = arith.constant 0 : i32
    %c0_i32_1 = arith.constant 0 : i32
    return %c0_i32, %c0_i32_0 : i32, i32
  }
  func.func @transform_3(%arg0: i32) -> (i32, i32) {
    %c0_i32 = arith.constant 0 : i32
    %c0_i32_0 = arith.constant 0 : i32
    %c0_i32_1 = arith.constant 0 : i32
    return %c0_i32, %c0_i32_0 : i32, i32
  }
  func.func @transform_4(%arg0: i32) -> (i32, i32) {
    %c0_i32 = arith.constant 0 : i32
    %c0_i32_0 = arith.constant 0 : i32
    return %arg0, %c0_i32 : i32, i32
  }
  func.func @transform_5(%arg0: i32) -> (i32, i32, i32) {
    %c0_i32 = arith.constant 0 : i32
    %c0_i32_0 = arith.constant 0 : i32
    %c0_i32_1 = arith.constant 0 : i32
    return %arg0, %c0_i32, %c0_i32_0 : i32, i32, i32
  }
}

</mosaic_0001>

<bundles_post_ra>
// kernel: dcgan_discriminator_forward.4
= control target key start
LH: loop header
LB: loop body
LE: loop exit
PB: predicated region body
PF: predicated region fallthrough
CT: control target
= control target key end

     0   :  { %s1208_s1 = inlined_call_operand.vmem [shape: bf16[512,256], index: 1, kind: input, shape index: {}]   ;;  %s1209_s0 = inlined_call_operand.vmem [shape: bf16[64,512], index: 0, kind: input, shape index: {}]   ;;  %s1210_s2 = inlined_call_operand.vmem [shape: bf16[64,256], index: 2, kind: output, shape index: {}]  }
   0x1   :  { %v809_v0 = vld [vmem:[%s1208_s1 + $0x4] ss:$8 sps:$4 sm:$0xff]   ;;  %v813_v2 = vld [vmem:[%s1208_s1] ss:$8 sps:$4 sm:$0xff]   ;;  %v815_v4 = vld [vmem:[%s1208_s1 + $0x14] ss:$8 sps:$4 sm:$0xff]  }
   0x2   :  { %v811_v1 = vld [vmem:[%s1208_s1 + $0x104] ss:$8 sps:$4 sm:$0xff]   ;;  %491 = vmatprep.subr.bf16.mxu1 %v809_v0  ;;  %v814_v3 = vld [vmem:[%s1208_s1 + $0x100] ss:$8 sps:$4 sm:$0xff]   ;;  %v817_v5 = vld [vmem:[%s1208_s1 + $0x114] ss:$8 sps:$4 sm:$0xff]  }
   0x3   :  { %564 = vmatprep.subr.bf16.mxu0 %v811_v1  ;;  %492 = vmatpush1.bf16.msra.mxu1 %v813_v2  ;;  %v819_v6 = vld [vmem:[%s1208_s1 + $0x10] ss:$8 sps:$4 sm:$0xff]   ;;  %v821_v8 = vld [vmem:[%s1208_s1 + $0x24] ss:$8 sps:$4 sm:$0xff]   ;;  %v825_v10 = vld [vmem:[%s1208_s1 + $0x20] ss:$8 sps:$4 sm:$0xff]  }
   0x4   :  { %565 = vmatpush1.bf16.msra.mxu0 %v814_v3  ;;  %493 = vmatprep.subr.bf16.mxu1 %v815_v4  ;;  %v820_v7 = vld [vmem:[%s1208_s1 + $0x110] ss:$8 sps:$4 sm:$0xff]   ;;  %v823_v9 = vld [vmem:[%s1208_s1 + $0x124] ss:$8 sps:$4 sm:$0xff]   ;;  %v826_v11 = vld [vmem:[%s1208_s1 + $0x120] ss:$8 sps:$4 sm:$0xff]  }
   0x5   :  { %566 = vmatprep.subr.bf16.mxu0 %v817_v5  ;;  %v827_v12 = vld [vmem:[%s1208_s1 + $0x34] ss:$8 sps:$4 sm:$0xff]   ;;  %v831_v14 = vld [vmem:[%s1208_s1 + $0x30] ss:$8 sps:$4 sm:$0xff]   ;;  %v833_v16 = vld [vmem:[%s1208_s1 + $0x44] ss:$8 sps:$4 sm:$0xff]  }
   0x6   :  { %v829_v13 = vld [vmem:[%s1208_s1 + $0x134] ss:$8 sps:$4 sm:$0xff]   ;;  %v832_v15 = vld [vmem:[%s1208_s1 + $0x130] ss:$8 sps:$4 sm:$0xff]   ;;  %v835_v17 = vld [vmem:[%s1208_s1 + $0x144] ss:$8 sps:$4 sm:$0xff]  }
   0x7   :  { %494 = vmatpush1.bf16.msra.mxu1 %v819_v6  ;;  %v837_v18 = vld [vmem:[%s1208_s1 + $0x40] ss:$8 sps:$4 sm:$0xff]   ;;  %v839_v20 = vld [vmem:[%s1208_s1 + $0x54] ss:$8 sps:$4 sm:$0xff]   ;;  %v843_v22 = vld [vmem:[%s1208_s1 + $0x50] ss:$8 sps:$4 sm:$0xff]  }
   0x8   :  { %567 = vmatpush1.bf16.msra.mxu0 %v820_v7  ;;  %495 = vmatprep.subr.bf16.mxu1 %v821_v8  ;;  %v838_v19 = vld [vmem:[%s1208_s1 + $0x140] ss:$8 sps:$4 sm:$0xff]   ;;  %v841_v21 = vld [vmem:[%s1208_s1 + $0x154] ss:$8 sps:$4 sm:$0xff]   ;;  %v844_v23 = vld [vmem:[%s1208_s1 + $0x150] ss:$8 sps:$4 sm:$0xff]  }
   0x9   :  { %568 = vmatprep.subr.bf16.mxu0 %v823_v9  ;;  %v845_v24 = vld [vmem:[%s1208_s1 + $0x64] ss:$8 sps:$4 sm:$0xff]   ;;  %v849_v26 = vld [vmem:[%s1208_s1 + $0x60] ss:$8 sps:$4 sm:$0xff]   ;;  %v851_v28 = vld [vmem:[%s1208_s1 + $0x74] ss:$8 sps:$4 sm:$0xff]  }
   0xa   :  { %v847_v25 = vld [vmem:[%s1208_s1 + $0x164] ss:$8 sps:$4 sm:$0xff]   ;;  %v850_v27 = vld [vmem:[%s1208_s1 + $0x160] ss:$8 sps:$4 sm:$0xff]   ;;  %v853_v29 = vld [vmem:[%s1208_s1 + $0x174] ss:$8 sps:$4 sm:$0xff]  }
   0xb   :  { %496 = vmatpush1.bf16.msra.mxu1 %v825_v10  ;;  %v855_v30 = vld [vmem:[%s1208_s1 + $0x70] ss:$8 sps:$4 sm:$0xff]   ;;  %v857_v32 = vld [vmem:[%s1208_s1 + $0x84] ss:$8 sps:$4 sm:$0xff]   ;;  %v861_v34 = vld [vmem:[%s1208_s1 + $0x80] ss:$8 sps:$4 sm:$0xff]  }
   0xc   :  { %569 = vmatpush1.bf16.msra.mxu0 %v826_v11  ;;  %497 = vmatprep.subr.bf16.mxu1 %v827_v12  ;;  %v856_v31 = vld [vmem:[%s1208_s1 + $0x170] ss:$8 sps:$4 sm:$0xff]   ;;  %v859_v33 = vld [vmem:[%s1208_s1 + $0x184] ss:$8 sps:$4 sm:$0xff]   ;;  %v862_v35 = vld [vmem:[%s1208_s1 + $0x180] ss:$8 sps:$4 sm:$0xff]  }
   0xd   :  { %570 = vmatprep.subr.bf16.mxu0 %v829_v13  ;;  %v863_v36 = vld [vmem:[%s1208_s1 + $0x94] ss:$8 sps:$4 sm:$0xff]   ;;  %v867_v38 = vld [vmem:[%s1208_s1 + $0x90] ss:$8 sps:$4 sm:$0xff]   ;;  %v869_v40 = vld [vmem:[%s1208_s1 + $0xa4] ss:$8 sps:$4 sm:$0xff]  }
   0xe   :  { %v865_v37 = vld [vmem:[%s1208_s1 + $0x194] ss:$8 sps:$4 sm:$0xff]   ;;  %v868_v39 = vld [vmem:[%s1208_s1 + $0x190] ss:$8 sps:$4 sm:$0xff]   ;;  %v871_v41 = vld [vmem:[%s1208_s1 + $0x1a4] ss:$8 sps:$4 sm:$0xff]  }
   0xf   :  { %498 = vmatpush1.bf16.msra.mxu1 %v831_v14  ;;  %v873_v42 = vld [vmem:[%s1208_s1 + $0xa0] ss:$8 sps:$4 sm:$0xff]   ;;  %v875_v44 = vld [vmem:[%s1208_s1 + $0xb4] ss:$8 sps:$4 sm:$0xff]   ;;  %v879_v46 = vld [vmem:[%s1208_s1 + $0xb0] ss:$8 sps:$4 sm:$0xff]  }
  0x10   :  { %571 = vmatpush1.bf16.msra.mxu0 %v832_v15  ;;  %499 = vmatprep.subr.bf16.mxu1 %v833_v16  ;;  %v874_v43 = vld [vmem:[%s1208_s1 + $0x1a0] ss:$8 sps:$4 sm:$0xff]   ;;  %v877_v45 = vld [vmem:[%s1208_s1 + $0x1b4] ss:$8 sps:$4 sm:$0xff]   ;;  %v880_v47 = vld [vmem:[%s1208_s1 + $0x1b0] ss:$8 sps:$4 sm:$0xff]  }
  0x11   :  { %572 = vmatprep.subr.bf16.mxu0 %v835_v17  ;;  %v881_v48 = vld [vmem:[%s1208_s1 + $0xc4] ss:$8 sps:$4 sm:$0xff]   ;;  %v885_v52 = vld [vmem:[%s1208_s1 + $0xc0] ss:$8 sps:$4 sm:$0xff]   ;;  %v887_v54 = vld [vmem:[%s1208_s1 + $0xd4] ss:$8 sps:$4 sm:$0xff]  }
  0x12   :  { %v907_v49 = vld [vmem:[%s1209_s0 + $0x4] ss:$16 sps:$4 sm:$0xff]   ;;  %v910_v51 = vld [vmem:[%s1209_s0 + $0xc] ss:$16 sps:$4 sm:$0xff]   ;;  %v886_v53 = vld [vmem:[%s1208_s1 + $0x1c0] ss:$8 sps:$4 sm:$0xff]  }
  0x13   :  { %500 = vmatpush1.bf16.msra.mxu1 %v837_v18  ;;  %v883_v50 = vld [vmem:[%s1208_s1 + $0x1c4] ss:$8 sps:$4 sm:$0xff]   ;;  %523 = vmatprep.mubr.bf16.mxu1 %v907_v49  ;;  %v889_v55 = vld [vmem:[%s1208_s1 + $0x1d4] ss:$8 sps:$4 sm:$0xff]   ;;  %v891_v56 = vld [vmem:[%s1208_s1 + $0xd0] ss:$8 sps:$4 sm:$0xff]  }
  0x14   :  { %573 = vmatpush1.bf16.msra.mxu0 %v838_v19  ;;  %501 = vmatprep.subr.bf16.mxu1 %v839_v20  ;;  %v892_v57 = vld [vmem:[%s1208_s1 + $0x1d0] ss:$8 sps:$4 sm:$0xff]   ;;  %v893_v58 = vld [vmem:[%s1208_s1 + $0xe4] ss:$8 sps:$4 sm:$0xff]   ;;  %v897_v60 = vld [vmem:[%s1208_s1 + $0xe0] ss:$8 sps:$4 sm:$0xff]  }
  0x15   :  { %574 = vmatprep.subr.bf16.mxu0 %v841_v21  ;;  %596 = vmatprep.mubr.bf16.mxu0 %v910_v51  ;;  %v895_v59 = vld [vmem:[%s1208_s1 + $0x1e4] ss:$8 sps:$4 sm:$0xff]   ;;  %v898_v61 = vld [vmem:[%s1208_s1 + $0x1e0] ss:$8 sps:$4 sm:$0xff]   ;;  %v899_v62 = vld [vmem:[%s1208_s1 + $0xf4] ss:$8 sps:$4 sm:$0xff]  }
  0x16   :  { %v901_v63 = vld [vmem:[%s1208_s1 + $0x1f4] ss:$8 sps:$4 sm:$0xff]   ;;  %v903_v0 = vld [vmem:[%s1208_s1 + $0xf0] ss:$8 sps:$4 sm:$0xff]  }
  0x17   :  { %502 = vmatpush1.bf16.msra.mxu1 %v843_v22  ;;  %v904_v1 = vld [vmem:[%s1208_s1 + $0x1f0] ss:$8 sps:$4 sm:$0xff]   ;;  %v911_v4 = vld [vmem:[%s1209_s0 + $0x24] ss:$16 sps:$4 sm:$0xff]   ;;  %v913_v5 = vld [vmem:[%s1209_s0 + $0x2c] ss:$16 sps:$4 sm:$0xff]  }
  0x18   :  { %575 = vmatpush1.bf16.msra.mxu0 %v844_v23  ;;  %503 = vmatprep.subr.bf16.mxu1 %v845_v24  ;;  %v905_v2 = vld [vmem:[%s1209_s0] ss:$16 sps:$4 sm:$0xff]   ;;  %v908_v3 = vld [vmem:[%s1209_s0 + $0x8] ss:$16 sps:$4 sm:$0xff]   ;;  %v917_v8 = vld [vmem:[%s1209_s0 + $0x44] ss:$16 sps:$4 sm:$0xff]  }
  0x19   :  { %576 = vmatprep.subr.bf16.mxu0 %v847_v25  ;;  %v915_v6 = vld [vmem:[%s1209_s0 + $0x20] ss:$16 sps:$4 sm:$0xff]   ;;  %v916_v7 = vld [vmem:[%s1209_s0 + $0x28] ss:$16 sps:$4 sm:$0xff]   ;;  %v919_v9 = vld [vmem:[%s1209_s0 + $0x4c] ss:$16 sps:$4 sm:$0xff]  }
  0x1a   :  { %v921_v10 = vld [vmem:[%s1209_s0 + $0x40] ss:$16 sps:$4 sm:$0xff]   ;;  %v922_v11 = vld [vmem:[%s1209_s0 + $0x48] ss:$16 sps:$4 sm:$0xff]   ;;  %v923_v12 = vld [vmem:[%s1209_s0 + $0x64] ss:$16 sps:$4 sm:$0xff]  }
  0x1b   :  { %504 = vmatpush1.bf16.msra.mxu1 %v849_v26  ;;  %v925_v13 = vld [vmem:[%s1209_s0 + $0x6c] ss:$16 sps:$4 sm:$0xff]   ;;  %v927_v14 = vld [vmem:[%s1209_s0 + $0x60] ss:$16 sps:$4 sm:$0xff]   ;;  %v928_v15 = vld [vmem:[%s1209_s0 + $0x68] ss:$16 sps:$4 sm:$0xff]  }
  0x1c   :  { %577 = vmatpush1.bf16.msra.mxu0 %v850_v27  ;;  %505 = vmatprep.subr.bf16.mxu1 %v851_v28 }
  0x1d   :  { %578 = vmatprep.subr.bf16.mxu0 %v853_v29 }
  0x1f   :  { %506 = vmatpush1.bf16.msra.mxu1 %v855_v30 }
  0x20   :  { %579 = vmatpush1.bf16.msra.mxu0 %v856_v31  ;;  %507 = vmatprep.subr.bf16.mxu1 %v857_v32 }
  0x21   :  { %580 = vmatprep.subr.bf16.mxu0 %v859_v33 }
  0x23   :  { %508 = vmatpush1.bf16.msra.mxu1 %v861_v34 }
  0x24   :  { %581 = vmatpush1.bf16.msra.mxu0 %v862_v35  ;;  %509 = vmatprep.subr.bf16.mxu1 %v863_v36 }
  0x25   :  { %582 = vmatprep.subr.bf16.mxu0 %v865_v37 }
  0x27   :  { %510 = vmatpush1.bf16.msra.mxu1 %v867_v38 }
  0x28   :  { %583 = vmatpush1.bf16.msra.mxu0 %v868_v39  ;;  %511 = vmatprep.subr.bf16.mxu1 %v869_v40 }
  0x29   :  { %584 = vmatprep.subr.bf16.mxu0 %v871_v41 }
  0x2b   :  { %512 = vmatpush1.bf16.msra.mxu1 %v873_v42 }
  0x2c   :  { %585 = vmatpush1.bf16.msra.mxu0 %v874_v43  ;;  %513 = vmatprep.subr.bf16.mxu1 %v875_v44 }
  0x2d   :  { %586 = vmatprep.subr.bf16.mxu0 %v877_v45 }
  0x2f   :  { %514 = vmatpush1.bf16.msra.mxu1 %v879_v46 }
  0x30   :  { %587 = vmatpush1.bf16.msra.mxu0 %v880_v47  ;;  %515 = vmatprep.subr.bf16.mxu1 %v881_v48 }
  0x31   :  { %588 = vmatprep.subr.bf16.mxu0 %v883_v50 }
  0x33   :  { %516 = vmatpush1.bf16.msra.mxu1 %v885_v52 }
  0x34   :  { %589 = vmatpush1.bf16.msra.mxu0 %v886_v53  ;;  %517 = vmatprep.subr.bf16.mxu1 %v887_v54 }
  0x35   :  { %590 = vmatprep.subr.bf16.mxu0 %v889_v55 }
  0x37   :  { %518 = vmatpush1.bf16.msra.mxu1 %v891_v56 }
  0x38   :  { %591 = vmatpush1.bf16.msra.mxu0 %v892_v57  ;;  %519 = vmatprep.subr.bf16.mxu1 %v893_v58 }
  0x39   :  { %592 = vmatprep.subr.bf16.mxu0 %v895_v59 }
  0x3b   :  { %520 = vmatpush1.bf16.msra.mxu1 %v897_v60 }
  0x3c   :  { %593 = vmatpush1.bf16.msra.mxu0 %v898_v61  ;;  %521 = vmatprep.subr.bf16.mxu1 %v899_v62 }
  0x3d   :  { %594 = vmatprep.subr.bf16.mxu0 %v901_v63 }
  0x3f   :  { %522 = vmatpush1.bf16.msra.mxu1 %v903_v0 }
  0x40   :  { %595 = vmatpush1.bf16.msra.mxu0 %v904_v1 }
  0x42   :  { %524 = vmatmul.mubr.bf16.vlgmr.msra.gmra.mrb[0].mxu1 %v905_v2 }
  0x43   :  { %597 = vmatmul.mubr.bf16.vlgmr.msra.gmra.mrb[0].mxu0 %v908_v3  ;;  %533 = vmatprep.mubr.bf16.mxu1 %v911_v4 }
  0x44   :  { %606 = vmatprep.mubr.bf16.mxu0 %v913_v5 }
  0x4a   :  { %534 = vmatmul.mubr.bf16.gmra.mrb[4].mxu1 %v915_v6 }
  0x4b   :  { %607 = vmatmul.mubr.bf16.gmra.mrb[4].mxu0 %v916_v7  ;;  %543 = vmatprep.mubr.bf16.mxu1 %v917_v8 }
  0x4c   :  { %616 = vmatprep.mubr.bf16.mxu0 %v919_v9 }
  0x52   :  { %544 = vmatmul.mubr.bf16.gmra.mrb[8].mxu1 %v921_v10 }
  0x53   :  { %617 = vmatmul.mubr.bf16.gmra.mrb[8].mxu0 %v922_v11  ;;  %553 = vmatprep.mubr.bf16.mxu1 %v923_v12 }
  0x54   :  { %626 = vmatprep.mubr.bf16.mxu0 %v925_v13 }
  0x5a   :  { %554 = vmatmul.mubr.bf16.gmra.mrb[12].mxu1 %v927_v14 }
  0x5b   :  { %627 = vmatmul.mubr.bf16.gmra.mrb[12].mxu0 %v928_v15 }
 0x115   :  { %v525_v16 = vpop.f32.mrb[0].mxu1 }
 0x116   :  { %v598_v17 = vpop.f32.mrb[0].mxu0  ;;  %v527_v19 = vpop.f32.mrb[1].mxu1 }
 0x117   :  { %v599_v18 = vadd.f32 %v598_v17, %v525_v16  ;;  %v600_v20 = vpop.f32.mrb[1].mxu0  ;;  %v529_v22 = vpop.f32.mrb[2].mxu1 }
 0x118   :  { %v601_v21 = vadd.f32 %v600_v20, %v527_v19  ;;  %v602_v23 = vpop.f32.mrb[2].mxu0  ;;  %v531_v25 = vpop.f32.mrb[3].mxu1 }
 0x119   :  { %v603_v24 = vadd.f32 %v602_v23, %v529_v22  ;;  %v604_v26 = vpop.f32.mrb[3].mxu0 }
 0x11a   :  { %v785_v27 = vpack.c.bf16 %v601_v21, %v599_v18  ;;  %v605_v28 = vadd.f32 %v604_v26, %v531_v25 }
 0x11c   :  { %685 = vst [vmem:[%s1210_s2] sm:$0xff] %v785_v27  ;;  %v786_v29 = vpack.c.bf16 %v605_v28, %v603_v24 }
 0x11d   :  { %v535_v30 = vpop.f32.mrb[4].mxu1 }
 0x11e   :  { %686 = vst [vmem:[%s1210_s2 + $0x8] sm:$0xff] %v786_v29  ;;  %v608_v31 = vpop.f32.mrb[4].mxu0  ;;  %v537_v33 = vpop.f32.mrb[5].mxu1 }
 0x11f   :  { %v609_v32 = vadd.f32 %v608_v31, %v535_v30  ;;  %v610_v34 = vpop.f32.mrb[5].mxu0  ;;  %v539_v36 = vpop.f32.mrb[6].mxu1 }
 0x120   :  { %v611_v35 = vadd.f32 %v610_v34, %v537_v33  ;;  %v612_v37 = vpop.f32.mrb[6].mxu0  ;;  %v541_v39 = vpop.f32.mrb[7].mxu1 }
 0x121   :  { %v613_v38 = vadd.f32 %v612_v37, %v539_v36  ;;  %v614_v40 = vpop.f32.mrb[7].mxu0 }
 0x122   :  { %v787_v41 = vpack.c.bf16 %v611_v35, %v609_v32  ;;  %v615_v42 = vadd.f32 %v614_v40, %v541_v39 }
 0x124   :  { %687 = vst [vmem:[%s1210_s2 + $0x10] sm:$0xff] %v787_v41  ;;  %v788_v43 = vpack.c.bf16 %v615_v42, %v613_v38 }
 0x125   :  { %v545_v44 = vpop.f32.mrb[8].mxu1 }
 0x126   :  { %688 = vst [vmem:[%s1210_s2 + $0x18] sm:$0xff] %v788_v43  ;;  %v618_v45 = vpop.f32.mrb[8].mxu0  ;;  %v547_v47 = vpop.f32.mrb[9].mxu1 }
 0x127   :  { %v619_v46 = vadd.f32 %v618_v45, %v545_v44  ;;  %v620_v48 = vpop.f32.mrb[9].mxu0  ;;  %v549_v50 = vpop.f32.mrb[10].mxu1 }
 0x128   :  { %v621_v49 = vadd.f32 %v620_v48, %v547_v47  ;;  %v622_v51 = vpop.f32.mrb[10].mxu0  ;;  %v551_v53 = vpop.f32.mrb[11].mxu1 }
 0x129   :  { %v623_v52 = vadd.f32 %v622_v51, %v549_v50  ;;  %v624_v54 = vpop.f32.mrb[11].mxu0 }
 0x12a   :  { %v789_v55 = vpack.c.bf16 %v621_v49, %v619_v46  ;;  %v625_v56 = vadd.f32 %v624_v54, %v551_v53 }
 0x12c   :  { %689 = vst [vmem:[%s1210_s2 + $0x20] sm:$0xff] %v789_v55  ;;  %v790_v57 = vpack.c.bf16 %v625_v56, %v623_v52 }
 0x12d   :  { %v555_v58 = vpop.f32.mrb[12].mxu1 }
 0x12e   :  { %690 = vst [vmem:[%s1210_s2 + $0x28] sm:$0xff] %v790_v57  ;;  %v628_v59 = vpop.f32.mrb[12].mxu0  ;;  %v557_v61 = vpop.f32.mrb[13].mxu1 }
 0x12f   :  { %v629_v60 = vadd.f32 %v628_v59, %v555_v58  ;;  %v630_v62 = vpop.f32.mrb[13].mxu0  ;;  %v559_v0 = vpop.f32.mrb[14].mxu1 }
 0x130   :  { %v631_v63 = vadd.f32 %v630_v62, %v557_v61  ;;  %v632_v1 = vpop.f32.mrb[14].mxu0  ;;  %v561_v3 = vpop.f32.mrb[15].mxu1 }
 0x131   :  { %v633_v2 = vadd.f32 %v632_v1, %v559_v0  ;;  %v634_v4 = vpop.f32.mrb[15].mxu0 }
 0x132   :  { %v791_v5 = vpack.c.bf16 %v631_v63, %v629_v60  ;;  %v635_v6 = vadd.f32 %v634_v4, %v561_v3 }
 0x134   :  { %691 = vst [vmem:[%s1210_s2 + $0x30] sm:$0xff] %v791_v5  ;;  %v792_v7 = vpack.c.bf16 %v635_v6, %v633_v2 }
 0x136   :  { %692 = vst [vmem:[%s1210_s2 + $0x38] sm:$0xff] %v792_v7 }

// kernel: tile.40
= control target key start
LH: loop header
LB: loop body
LE: loop exit
PB: predicated region body
PF: predicated region fallthrough
CT: control target
= control target key end

     0   :  { %s208_s0 = inlined_call_operand.vmem [shape: f32[8], index: 0, kind: input, shape index: {}]   ;;  %s209_s1 = inlined_call_operand.vmem [shape: f32[256,8], index: 1, kind: output, shape index: {}]  }
   0x1   :  { %v4_v0 = vld [vmem:[%s208_s0] ss:$0 sm:$0xff] }
   0x2   :  { %5 = vst [vmem:[%s209_s1] sm:$0xff] %v4_v0  ;;  %68 = vst [vmem:[%s209_s1 + $0x8] sm:$0xff] %v4_v0 }
   0x3   :  { %69 = vst [vmem:[%s209_s1 + $0x10] sm:$0xff] %v4_v0  ;;  %70 = vst [vmem:[%s209_s1 + $0x18] sm:$0xff] %v4_v0 }
   0x4   :  { %71 = vst [vmem:[%s209_s1 + $0x20] sm:$0xff] %v4_v0  ;;  %72 = vst [vmem:[%s209_s1 + $0x28] sm:$0xff] %v4_v0 }
   0x5   :  { %73 = vst [vmem:[%s209_s1 + $0x30] sm:$0xff] %v4_v0  ;;  %74 = vst [vmem:[%s209_s1 + $0x38] sm:$0xff] %v4_v0 }
   0x6   :  { %75 = vst [vmem:[%s209_s1 + $0x40] sm:$0xff] %v4_v0  ;;  %76 = vst [vmem:[%s209_s1 + $0x48] sm:$0xff] %v4_v0 }
   0x7   :  { %77 = vst [vmem:[%s209_s1 + $0x50] sm:$0xff] %v4_v0  ;;  %78 = vst [vmem:[%s209_s1 + $0x58] sm:$0xff] %v4_v0 }
   0x8   :  { %79 = vst [vmem:[%s209_s1 + $0x60] sm:$0xff] %v4_v0  ;;  %80 = vst [vmem:[%s209_s1 + $0x68] sm:$0xff] %v4_v0 }
   0x9   :  { %81 = vst [vmem:[%s209_s1 + $0x70] sm:$0xff] %v4_v0  ;;  %82 = vst [vmem:[%s209_s1 + $0x78] sm:$0xff] %v4_v0 }
   0xa   :  { %83 = vst [vmem:[%s209_s1 + $0x80] sm:$0xff] %v4_v0  ;;  %84 = vst [vmem:[%s209_s1 + $0x88] sm:$0xff] %v4_v0 }
   0xb   :  { %85 = vst [vmem:[%s209_s1 + $0x90] sm:$0xff] %v4_v0  ;;  %86 = vst [vmem:[%s209_s1 + $0x98] sm:$0xff] %v4_v0 }
   0xc   :  { %87 = vst [vmem:[%s209_s1 + $0xa0] sm:$0xff] %v4_v0  ;;  %88 = vst [vmem:[%s209_s1 + $0xa8] sm:$0xff] %v4_v0 }
   0xd   :  { %89 = vst [vmem:[%s209_s1 + $0xb0] sm:$0xff] %v4_v0  ;;  %90 = vst [vmem:[%s209_s1 + $0xb8] sm:$0xff] %v4_v0 }
   0xe   :  { %91 = vst [vmem:[%s209_s1 + $0xc0] sm:$0xff] %v4_v0  ;;  %92 = vst [vmem:[%s209_s1 + $0xc8] sm:$0xff] %v4_v0 }
   0xf   :  { %93 = vst [vmem:[%s209_s1 + $0xd0] sm:$0xff] %v4_v0  ;;  %94 = vst [vmem:[%s209_s1 + $0xd8] sm:$0xff] %v4_v0 }
  0x10   :  { %95 = vst [vmem:[%s209_s1 + $0xe0] sm:$0xff] %v4_v0  ;;  %96 = vst [vmem:[%s209_s1 + $0xe8] sm:$0xff] %v4_v0 }
  0x11   :  { %97 = vst [vmem:[%s209_s1 + $0xf0] sm:$0xff] %v4_v0  ;;  %98 = vst [vmem:[%s209_s1 + $0xf8] sm:$0xff] %v4_v0 }

// kernel: tile.41
= control target key start
LH: loop header
LB: loop body
LE: loop exit
PB: predicated region body
PF: predicated region fallthrough
CT: control target
= control target key end

     0   :  { %vm6_vm0 = vcmask 1043458   ;;  %vm10_vm1 = vcmask 1045508   ;;  %vm14_vm2 = vcmask 1047558   ;;  %s91_s6 = smov 3  ;;  %s94_s7 = smov 12  ;;  %vm16_vm3 = vcmask 64512   ;;  %s1578_s0 = inlined_call_operand.vmem [shape: f32[256,8], index: 0, kind: input, shape index: {}]   ;;  %s1579_s1 = inlined_call_operand.vmem [shape: f32[1,2048], index: 1, kind: output, shape index: {}]  }
   0x1   :  { %v883_v0 = vld [vmem:[%s1578_s0 + $0xe] ss:$16 sm:%s91_s6]   ;;  %s99_s12 = smov 48  ;;  %s104_s13 = smov 192  ;;  %vm62_vm4 = vcmask 1048512   ;;  %vm110_vm5 = vcmask 982912  }
   0x2   :  { %v884_v1 = vld [vmem:[%s1578_s0 + $0xe] ss:$16 sm:%s94_s7]   ;;  %s43_s18 = smov 3  ;;  %s46_s21 = smov 12  ;;  %vm158_vm6 = vcmask 917312   ;;  %vm206_vm7 = vcmask 851712  }
   0x3   :  { %v97_v2 = vsel %vm6_vm0, %v884_v1, %v883_v0  ;;  %v885_v3 = vld [vmem:[%s1578_s0 + $0xe] ss:$16 sm:%s99_s12]   ;;  %v875_v6 = vld [vmem:[%s1578_s0 + $0xf] ss:$16 sm:%s43_s18]   ;;  %s51_s22 = smov 48  ;;  %s56_s27 = smov 192 }
   0x4   :  { %v886_v4 = vld [vmem:[%s1578_s0 + $0xe] ss:$16 sm:%s104_s13]   ;;  %v102_v5 = vsel %vm10_vm1, %v885_v3, %v97_v2  ;;  %v876_v8 = vld [vmem:[%s1578_s0 + $0xf] ss:$16 sm:%s46_s21]   ;;  %s1025_s28 = smov 112   ;;  %s114_s2 = smov 3 }
   0x5   :  { %v107_v7 = vsel %vm14_vm2, %v886_v4, %v102_v5  ;;  %v877_v9 = vld [vmem:[%s1578_s0 + $0xf] ss:$16 sm:%s51_s22]   ;;  %v49_v10 = vsel %vm6_vm0, %v876_v8, %v875_v6  ;;  %s117_s3 = smov 12  ;;  %v887_v13 = vld [vmem:[%s1578_s0 + $0x8e] ss:$16 sm:%s114_s2]   ;;  %s122_s8 = smov 48 }
   0x6   :  { %108 = vrot.lane.b32.xlu1 %v107_v7, %s1025_s28  ;;  %v878_v11 = vld [vmem:[%s1578_s0 + $0xf] ss:$16 sm:%s56_s27]   ;;  %v54_v12 = vsel %vm10_vm1, %v877_v9, %v49_v10  ;;  %s127_s9 = smov 192  ;;  %s66_s14 = smov 3  ;;  %vm254_vm8 = vcmask 786112   ;;  %vm302_vm9 = vcmask 720512  }
   0x7   :  { %v888_v14 = vld [vmem:[%s1578_s0 + $0x8e] ss:$16 sm:%s117_s3]   ;;  %v59_v15 = vsel %vm14_vm2, %v878_v11, %v54_v12  ;;  %s69_s15 = smov 12  ;;  %s1026_s16 = smov 120   ;;  %v879_v20 = vld [vmem:[%s1578_s0 + $0x8f] ss:$16 sm:%s66_s14]  }
   0x8   :  { %v120_v16 = vsel %vm6_vm0, %v888_v14, %v887_v13  ;;  %v889_v17 = vld [vmem:[%s1578_s0 + $0x8e] ss:$16 sm:%s122_s8]   ;;  %60 = vrot.lane.b32.xlu0 %v59_v15, %s1026_s16  ;;  %s74_s19 = smov 48  ;;  %s79_s20 = smov 192  ;;  %vm350_vm10 = vcmask 654912   ;;  %vm398_vm11 = vcmask 589312  }
   0x9   :  { %v890_v18 = vld [vmem:[%s1578_s0 + $0x8e] ss:$16 sm:%s127_s9]   ;;  %v125_v19 = vsel %vm10_vm1, %v889_v17, %v120_v16  ;;  %v880_v22 = vld [vmem:[%s1578_s0 + $0x8f] ss:$16 sm:%s69_s15]   ;;  %s162_s25 = smov 3  ;;  %s170_s29 = smov 48 }
   0xa   :  { %v130_v21 = vsel %vm14_vm2, %v890_v18, %v125_v19  ;;  %v881_v23 = vld [vmem:[%s1578_s0 + $0x8f] ss:$16 sm:%s74_s19]   ;;  %v72_v24 = vsel %vm6_vm0, %v880_v22, %v879_v20  ;;  %v895_v27 = vld [vmem:[%s1578_s0 + $0x8d] ss:$16 sm:%s162_s25]   ;;  %s175_s5 = smov 192  ;;  %s139_s6 = smov 3 }
   0xb   :  { %131 = vrot.lane.b32.xlu1 %v130_v21, %s1025_s28  ;;  %v882_v25 = vld [vmem:[%s1578_s0 + $0x8f] ss:$16 sm:%s79_s20]   ;;  %s165_s28 = smov 12  ;;  %v77_v26 = vsel %vm10_vm1, %v881_v23, %v72_v24  ;;  %s142_s11 = smov 12  ;;  %vm446_vm12 = vcmask 523712   ;;  %vm494_vm13 = vcmask 458112  }
   0xc   :  { %v896_v28 = vld [vmem:[%s1578_s0 + $0x8d] ss:$16 sm:%s165_s28]   ;;  %v82_v29 = vsel %vm14_vm2, %v882_v25, %v77_v26  ;;  %s147_s12 = smov 48  ;;  %s152_s15 = smov 192  ;;  %vm542_vm14 = vcmask 392512   ;;  %vm590_vm15 = vcmask 326912  }
   0xd   :  { %v168_v30 = vsel %vm6_vm0, %v896_v28, %v895_v27  ;;  %v897_v31 = vld [vmem:[%s1578_s0 + $0x8d] ss:$16 sm:%s170_s29]   ;;  %83 = vrot.lane.b32.xlu0 %v82_v29, %s1026_s16  ;;  %s210_s20 = smov 3  ;;  %s213_s21 = smov 12 }
   0xe   :  { %v898_v32 = vld [vmem:[%s1578_s0 + $0x8d] ss:$16 sm:%s175_s5]   ;;  %v173_v33 = vsel %vm10_vm1, %v897_v31, %v168_v30  ;;  %s1027_s22 = smov 104   ;;  %s218_s25 = smov 48  ;;  %v903_v41 = vld [vmem:[%s1578_s0 + $0x8c] ss:$16 sm:%s210_s20]  }
   0xf   :  { %v891_v34 = vld [vmem:[%s1578_s0 + $0xd] ss:$16 sm:%s139_s6]   ;;  %v178_v35 = vsel %vm14_vm2, %v898_v32, %v173_v33  ;;  %s223_s26 = smov 192  ;;  %v904_v42 = vld [vmem:[%s1578_s0 + $0x8c] ss:$16 sm:%s213_s21]   ;;  %s187_s2 = smov 3 }
  0x10   :  { %v892_v36 = vld [vmem:[%s1578_s0 + $0xd] ss:$16 sm:%s142_s11]   ;;  %179 = vrot.lane.b32.xlu1 %v178_v35, %s1027_s22  ;;  %s190_s3 = smov 12  ;;  %v216_v44 = vsel %vm6_vm0, %v904_v42, %v903_v41  ;;  %s195_s8 = smov 48 }
  0x11   :  { %v893_v37 = vld [vmem:[%s1578_s0 + $0xd] ss:$16 sm:%s147_s12]   ;;  %v145_v38 = vsel %vm6_vm0, %v892_v36, %v891_v34  ;;  %v905_v45 = vld [vmem:[%s1578_s0 + $0x8c] ss:$16 sm:%s218_s25]   ;;  %s200_s9 = smov 192  ;;  %s258_s12 = smov 3 }
  0x12   :  { %v894_v39 = vld [vmem:[%s1578_s0 + $0xd] ss:$16 sm:%s152_s15]   ;;  %v150_v40 = vsel %vm10_vm1, %v893_v37, %v145_v38  ;;  %v906_v46 = vld [vmem:[%s1578_s0 + $0x8c] ss:$16 sm:%s223_s26]   ;;  %v221_v47 = vsel %vm10_vm1, %v905_v45, %v216_v44  ;;  %s261_s17 = smov 12  ;;  %s266_s18 = smov 48 }
  0x13   :  { %v155_v43 = vsel %vm14_vm2, %v894_v39, %v150_v40  ;;  %v899_v48 = vld [vmem:[%s1578_s0 + $0xc] ss:$16 sm:%s187_s2]   ;;  %v226_v49 = vsel %vm14_vm2, %v906_v46, %v221_v47  ;;  %s1028_s19 = smov 96   ;;  %s235_s23 = smov 3  ;;  %v911_v55 = vld [vmem:[%s1578_s0 + $0x8b] ss:$16 sm:%s258_s12]  }
  0x14   :  { %156 = vrot.lane.b32.xlu0 %v155_v43, %s1027_s22  ;;  %v900_v50 = vld [vmem:[%s1578_s0 + $0xc] ss:$16 sm:%s190_s3]   ;;  %227 = vrot.lane.b32.xlu1 %v226_v49, %s1028_s19  ;;  %s271_s22 = smov 192  ;;  %s238_s28 = smov 12 }
  0x15   :  { %v901_v51 = vld [vmem:[%s1578_s0 + $0xc] ss:$16 sm:%s195_s8]   ;;  %v193_v52 = vsel %vm6_vm0, %v900_v50, %v899_v48  ;;  %v912_v56 = vld [vmem:[%s1578_s0 + $0x8b] ss:$16 sm:%s261_s17]   ;;  %s243_s29 = smov 48  ;;  %s248_s5 = smov 192 }
  0x16   :  { %v902_v53 = vld [vmem:[%s1578_s0 + $0xc] ss:$16 sm:%s200_s9]   ;;  %v198_v54 = vsel %vm10_vm1, %v901_v51, %v193_v52  ;;  %v264_v58 = vsel %vm6_vm0, %v912_v56, %v911_v55  ;;  %v913_v59 = vld [vmem:[%s1578_s0 + $0x8b] ss:$16 sm:%s266_s18]   ;;  %s306_s8 = smov 3  ;;  %s309_s9 = smov 12 }
  0x17   :  { %v203_v57 = vsel %vm14_vm2, %v902_v53, %v198_v54  ;;  %v914_v60 = vld [vmem:[%s1578_s0 + $0x8b] ss:$16 sm:%s271_s22]   ;;  %v269_v61 = vsel %vm10_vm1, %v913_v59, %v264_v58  ;;  %s314_s14 = smov 48  ;;  %s319_s15 = smov 192  ;;  %v919_v5 = vld [vmem:[%s1578_s0 + $0x8a] ss:$16 sm:%s306_s8]  }
  0x18   :  { %204 = vrot.lane.b32.xlu0 %v203_v57, %s1028_s19  ;;  %v907_v62 = vld [vmem:[%s1578_s0 + $0xb] ss:$16 sm:%s235_s23]   ;;  %v274_v63 = vsel %vm14_vm2, %v914_v60, %v269_v61  ;;  %s1029_s16 = smov 88   ;;  %s283_s19 = smov 3 }
  0x19   :  { %v908_v0 = vld [vmem:[%s1578_s0 + $0xb] ss:$16 sm:%s238_s28]   ;;  %275 = vrot.lane.b32.xlu1 %v274_v63, %s1029_s16  ;;  %s286_s24 = smov 12  ;;  %s291_s25 = smov 48 }
  0x1a   :  { %v909_v1 = vld [vmem:[%s1578_s0 + $0xb] ss:$16 sm:%s243_s29]   ;;  %v241_v2 = vsel %vm6_vm0, %v908_v0, %v907_v62  ;;  %v920_v6 = vld [vmem:[%s1578_s0 + $0x8a] ss:$16 sm:%s309_s9]   ;;  %s296_s30 = smov 192  ;;  %s354_s4 = smov 3 }
  0x1b   :  { %v910_v3 = vld [vmem:[%s1578_s0 + $0xb] ss:$16 sm:%s248_s5]   ;;  %v246_v4 = vsel %vm10_vm1, %v909_v1, %v241_v2  ;;  %v312_v8 = vsel %vm6_vm0, %v920_v6, %v919_v5  ;;  %v921_v9 = vld [vmem:[%s1578_s0 + $0x8a] ss:$16 sm:%s314_s14]   ;;  %s357_s5 = smov 12  ;;  %s362_s10 = smov 48 }
  0x1c   :  { %v251_v7 = vsel %vm14_vm2, %v910_v3, %v246_v4  ;;  %v922_v10 = vld [vmem:[%s1578_s0 + $0x8a] ss:$16 sm:%s319_s15]   ;;  %v317_v11 = vsel %vm10_vm1, %v921_v9, %v312_v8  ;;  %s367_s11 = smov 192  ;;  %s1030_s12 = smov 80   ;;  %v927_v19 = vld [vmem:[%s1578_s0 + $0x89] ss:$16 sm:%s354_s4]  }
  0x1d   :  { %252 = vrot.lane.b32.xlu0 %v251_v7, %s1029_s16  ;;  %v915_v12 = vld [vmem:[%s1578_s0 + $0xa] ss:$16 sm:%s283_s19]   ;;  %v322_v13 = vsel %vm14_vm2, %v922_v10, %v317_v11  ;;  %s331_s15 = smov 3  ;;  %s334_s20 = smov 12 }
  0x1e   :  { %v916_v14 = vld [vmem:[%s1578_s0 + $0xa] ss:$16 sm:%s286_s24]   ;;  %323 = vrot.lane.b32.xlu1 %v322_v13, %s1030_s12  ;;  %s339_s21 = smov 48  ;;  %s344_s26 = smov 192 }
  0x1f   :  { %v917_v15 = vld [vmem:[%s1578_s0 + $0xa] ss:$16 sm:%s291_s25]   ;;  %v289_v16 = vsel %vm6_vm0, %v916_v14, %v915_v12  ;;  %v928_v20 = vld [vmem:[%s1578_s0 + $0x89] ss:$16 sm:%s357_s5]   ;;  %s402_s29 = smov 3  ;;  %s410_s6 = smov 48 }
  0x20   :  { %v918_v17 = vld [vmem:[%s1578_s0 + $0xa] ss:$16 sm:%s296_s30]   ;;  %v294_v18 = vsel %vm10_vm1, %v917_v15, %v289_v16  ;;  %v360_v22 = vsel %vm6_vm0, %v928_v20, %v927_v19  ;;  %v929_v23 = vld [vmem:[%s1578_s0 + $0x89] ss:$16 sm:%s362_s10]   ;;  %s405_s30 = smov 12  ;;  %s415_s7 = smov 192 }
  0x21   :  { %v299_v21 = vsel %vm14_vm2, %v918_v17, %v294_v18  ;;  %v930_v24 = vld [vmem:[%s1578_s0 + $0x89] ss:$16 sm:%s367_s11]   ;;  %v365_v25 = vsel %vm10_vm1, %v929_v23, %v360_v22  ;;  %s1031_s8 = smov 72   ;;  %s379_s11 = smov 3  ;;  %v935_v33 = vld [vmem:[%s1578_s0 + $0x88] ss:$16 sm:%s402_s29]  }
  0x22   :  { %300 = vrot.lane.b32.xlu0 %v299_v21, %s1030_s12  ;;  %v923_v26 = vld [vmem:[%s1578_s0 + $0x9] ss:$16 sm:%s331_s15]   ;;  %v370_v27 = vsel %vm14_vm2, %v930_v24, %v365_v25  ;;  %s382_s16 = smov 12  ;;  %s387_s17 = smov 48 }
  0x23   :  { %v924_v28 = vld [vmem:[%s1578_s0 + $0x9] ss:$16 sm:%s334_s20]   ;;  %371 = vrot.lane.b32.xlu1 %v370_v27, %s1031_s8  ;;  %s392_s22 = smov 192  ;;  %s450_s25 = smov 3 }
  0x24   :  { %v925_v29 = vld [vmem:[%s1578_s0 + $0x9] ss:$16 sm:%s339_s21]   ;;  %v337_v30 = vsel %vm6_vm0, %v924_v28, %v923_v26  ;;  %v936_v34 = vld [vmem:[%s1578_s0 + $0x88] ss:$16 sm:%s405_s30]   ;;  %s458_s2 = smov 48  ;;  %s463_s3 = smov 192 }
  0x25   :  { %v926_v31 = vld [vmem:[%s1578_s0 + $0x9] ss:$16 sm:%s344_s26]   ;;  %v342_v32 = vsel %vm10_vm1, %v925_v29, %v337_v30  ;;  %v408_v36 = vsel %vm6_vm0, %v936_v34, %v935_v33  ;;  %v937_v37 = vld [vmem:[%s1578_s0 + $0x88] ss:$16 sm:%s410_s6]   ;;  %s453_s26 = smov 12  ;;  %s1032_s4 = smov 64  }
  0x26   :  { %v347_v35 = vsel %vm14_vm2, %v926_v31, %v342_v32  ;;  %v938_v38 = vld [vmem:[%s1578_s0 + $0x88] ss:$16 sm:%s415_s7]   ;;  %v413_v39 = vsel %vm10_vm1, %v937_v37, %v408_v36  ;;  %s427_s7 = smov 3  ;;  %v943_v47 = vld [vmem:[%s1578_s0 + $0x87] ss:$16 sm:%s450_s25]   ;;  %s430_s12 = smov 12 }
  0x27   :  { %348 = vrot.lane.b32.xlu0 %v347_v35, %s1031_s8  ;;  %v931_v40 = vld [vmem:[%s1578_s0 + $0x8] ss:$16 sm:%s379_s11]   ;;  %v418_v41 = vsel %vm14_vm2, %v938_v38, %v413_v39  ;;  %s435_s13 = smov 48  ;;  %s440_s18 = smov 192 }
  0x28   :  { %v932_v42 = vld [vmem:[%s1578_s0 + $0x8] ss:$16 sm:%s382_s16]   ;;  %419 = vrot.lane.b32.xlu1 %v418_v41, %s1032_s4  ;;  %s498_s21 = smov 3  ;;  %s506_s27 = smov 48 }
  0x29   :  { %v933_v43 = vld [vmem:[%s1578_s0 + $0x8] ss:$16 sm:%s387_s17]   ;;  %v385_v44 = vsel %vm6_vm0, %v932_v42, %v931_v40  ;;  %v944_v48 = vld [vmem:[%s1578_s0 + $0x87] ss:$16 sm:%s453_s26]   ;;  %s511_s28 = smov 192  ;;  %s1033_s29 = smov 56  }
  0x2a   :  { %v934_v45 = vld [vmem:[%s1578_s0 + $0x8] ss:$16 sm:%s392_s22]   ;;  %v390_v46 = vsel %vm10_vm1, %v933_v43, %v385_v44  ;;  %v456_v50 = vsel %vm6_vm0, %v944_v48, %v943_v47  ;;  %v945_v51 = vld [vmem:[%s1578_s0 + $0x87] ss:$16 sm:%s458_s2]   ;;  %s501_s22 = smov 12  ;;  %s478_s8 = smov 12 }
  0x2b   :  { %v395_v49 = vsel %vm14_vm2, %v934_v45, %v390_v46  ;;  %v946_v52 = vld [vmem:[%s1578_s0 + $0x87] ss:$16 sm:%s463_s3]   ;;  %v461_v53 = vsel %vm10_vm1, %v945_v51, %v456_v50  ;;  %s475_s3 = smov 3  ;;  %v951_v61 = vld [vmem:[%s1578_s0 + $0x86] ss:$16 sm:%s498_s21]   ;;  %s483_s9 = smov 48 }
  0x2c   :  { %396 = vrot.lane.b32.xlu0 %v395_v49, %s1032_s4  ;;  %v939_v54 = vld [vmem:[%s1578_s0 + $0x7] ss:$16 sm:%s427_s7]   ;;  %v466_v55 = vsel %vm14_vm2, %v946_v52, %v461_v53  ;;  %s488_s14 = smov 192  ;;  %s546_s17 = smov 3 }
  0x2d   :  { %v940_v56 = vld [vmem:[%s1578_s0 + $0x7] ss:$16 sm:%s430_s12]   ;;  %467 = vrot.lane.b32.xlu1 %v466_v55, %s1033_s29  ;;  %s554_s23 = smov 48  ;;  %s559_s24 = smov 192 }
  0x2e   :  { %v941_v57 = vld [vmem:[%s1578_s0 + $0x7] ss:$16 sm:%s435_s13]   ;;  %v433_v58 = vsel %vm6_vm0, %v940_v56, %v939_v54  ;;  %v952_v62 = vld [vmem:[%s1578_s0 + $0x86] ss:$16 sm:%s501_s22]   ;;  %s1034_s25 = smov 48   ;;  %s526_s4 = smov 12 }
  0x2f   :  { %v942_v59 = vld [vmem:[%s1578_s0 + $0x7] ss:$16 sm:%s440_s18]   ;;  %v438_v60 = vsel %vm10_vm1, %v941_v57, %v433_v58  ;;  %v504_v0 = vsel %vm6_vm0, %v952_v62, %v951_v61  ;;  %v953_v1 = vld [vmem:[%s1578_s0 + $0x86] ss:$16 sm:%s506_s27]   ;;  %s549_s18 = smov 12  ;;  %s531_s5 = smov 48 }
  0x30   :  { %v443_v63 = vsel %vm14_vm2, %v942_v59, %v438_v60  ;;  %v954_v2 = vld [vmem:[%s1578_s0 + $0x86] ss:$16 sm:%s511_s28]   ;;  %v509_v3 = vsel %vm10_vm1, %v953_v1, %v504_v0  ;;  %s523_s28 = smov 3  ;;  %v959_v11 = vld [vmem:[%s1578_s0 + $0x85] ss:$16 sm:%s546_s17]   ;;  %s536_s10 = smov 192 }
  0x31   :  { %444 = vrot.lane.b32.xlu0 %v443_v63, %s1033_s29  ;;  %v947_v4 = vld [vmem:[%s1578_s0 + $0x6] ss:$16 sm:%s475_s3]   ;;  %v514_v5 = vsel %vm14_vm2, %v954_v2, %v509_v3  ;;  %s594_s13 = smov 3  ;;  %s602_s19 = smov 48 }
  0x32   :  { %v948_v6 = vld [vmem:[%s1578_s0 + $0x6] ss:$16 sm:%s478_s8]   ;;  %515 = vrot.lane.b32.xlu1 %v514_v5, %s1034_s25  ;;  %s607_s20 = smov 192  ;;  %s1035_s21 = smov 40  }
  0x33   :  { %v949_v7 = vld [vmem:[%s1578_s0 + $0x6] ss:$16 sm:%s483_s9]   ;;  %v481_v8 = vsel %vm6_vm0, %v948_v6, %v947_v4  ;;  %v960_v12 = vld [vmem:[%s1578_s0 + $0x85] ss:$16 sm:%s549_s18]   ;;  %s574_s29 = smov 12  ;;  %s579_s30 = smov 48 }
  0x34   :  { %v950_v9 = vld [vmem:[%s1578_s0 + $0x6] ss:$16 sm:%s488_s14]   ;;  %v486_v10 = vsel %vm10_vm1, %v949_v7, %v481_v8  ;;  %v552_v14 = vsel %vm6_vm0, %v960_v12, %v959_v11  ;;  %v961_v15 = vld [vmem:[%s1578_s0 + $0x85] ss:$16 sm:%s554_s23]   ;;  %s597_s14 = smov 12  ;;  %s584_s6 = smov 192 }
  0x35   :  { %v491_v13 = vsel %vm14_vm2, %v950_v9, %v486_v10  ;;  %v962_v16 = vld [vmem:[%s1578_s0 + $0x85] ss:$16 sm:%s559_s24]   ;;  %v557_v17 = vsel %vm10_vm1, %v961_v15, %v552_v14  ;;  %s571_s24 = smov 3  ;;  %v967_v25 = vld [vmem:[%s1578_s0 + $0x84] ss:$16 sm:%s594_s13]   ;;  %s642_s9 = smov 3 }
  0x36   :  { %492 = vrot.lane.b32.xlu0 %v491_v13, %s1034_s25  ;;  %v955_v18 = vld [vmem:[%s1578_s0 + $0x5] ss:$16 sm:%s523_s28]   ;;  %v562_v19 = vsel %vm14_vm2, %v962_v16, %v557_v17  ;;  %s650_s15 = smov 48  ;;  %s655_s16 = smov 192 }
  0x37   :  { %v956_v20 = vld [vmem:[%s1578_s0 + $0x5] ss:$16 sm:%s526_s4]   ;;  %563 = vrot.lane.b32.xlu1 %v562_v19, %s1035_s21  ;;  %s1036_s17 = smov 32   ;;  %s622_s25 = smov 12 }
  0x38   :  { %v957_v21 = vld [vmem:[%s1578_s0 + $0x5] ss:$16 sm:%s531_s5]   ;;  %v529_v22 = vsel %vm6_vm0, %v956_v20, %v955_v18  ;;  %v968_v26 = vld [vmem:[%s1578_s0 + $0x84] ss:$16 sm:%s597_s14]   ;;  %s627_s26 = smov 48  ;;  %s632_s2 = smov 192 }
  0x39   :  { %v958_v23 = vld [vmem:[%s1578_s0 + $0x5] ss:$16 sm:%s536_s10]   ;;  %v534_v24 = vsel %vm10_vm1, %v957_v21, %v529_v22  ;;  %v600_v28 = vsel %vm6_vm0, %v968_v26, %v967_v25  ;;  %v969_v29 = vld [vmem:[%s1578_s0 + $0x84] ss:$16 sm:%s602_s19]   ;;  %s645_s10 = smov 12  ;;  %s690_s5 = smov 3 }
  0x3a   :  { %v539_v27 = vsel %vm14_vm2, %v958_v23, %v534_v24  ;;  %v970_v30 = vld [vmem:[%s1578_s0 + $0x84] ss:$16 sm:%s607_s20]   ;;  %v605_v31 = vsel %vm10_vm1, %v969_v29, %v600_v28  ;;  %s619_s20 = smov 3  ;;  %v975_v39 = vld [vmem:[%s1578_s0 + $0x83] ss:$16 sm:%s642_s9]   ;;  %s698_s11 = smov 48 }
  0x3b   :  { %540 = vrot.lane.b32.xlu0 %v539_v27, %s1035_s21  ;;  %v963_v32 = vld [vmem:[%s1578_s0 + $0x4] ss:$16 sm:%s571_s24]   ;;  %v610_v33 = vsel %vm14_vm2, %v970_v30, %v605_v31  ;;  %s703_s12 = smov 192  ;;  %s1037_s13 = smov 24  }
  0x3c   :  { %v964_v34 = vld [vmem:[%s1578_s0 + $0x4] ss:$16 sm:%s574_s29]   ;;  %611 = vrot.lane.b32.xlu1 %v610_v33, %s1036_s17  ;;  %s670_s21 = smov 12  ;;  %s675_s22 = smov 48 }
  0x3d   :  { %v965_v35 = vld [vmem:[%s1578_s0 + $0x4] ss:$16 sm:%s579_s30]   ;;  %v577_v36 = vsel %vm6_vm0, %v964_v34, %v963_v32  ;;  %v976_v40 = vld [vmem:[%s1578_s0 + $0x83] ss:$16 sm:%s645_s10]   ;;  %s680_s27 = smov 192  ;;  %s738_s30 = smov 3 }
  0x3e   :  { %v966_v37 = vld [vmem:[%s1578_s0 + $0x4] ss:$16 sm:%s584_s6]   ;;  %v582_v38 = vsel %vm10_vm1, %v965_v35, %v577_v36  ;;  %v648_v42 = vsel %vm6_vm0, %v976_v40, %v975_v39  ;;  %v977_v43 = vld [vmem:[%s1578_s0 + $0x83] ss:$16 sm:%s650_s15]   ;;  %s693_s6 = smov 12  ;;  %s746_s7 = smov 48 }
  0x3f   :  { %v587_v41 = vsel %vm14_vm2, %v966_v37, %v582_v38  ;;  %v978_v44 = vld [vmem:[%s1578_s0 + $0x83] ss:$16 sm:%s655_s16]   ;;  %v653_v45 = vsel %vm10_vm1, %v977_v43, %v648_v42  ;;  %s667_s16 = smov 3  ;;  %v983_v53 = vld [vmem:[%s1578_s0 + $0x82] ss:$16 sm:%s690_s5]   ;;  %s751_s8 = smov 192 }
  0x40   :  { %588 = vrot.lane.b32.xlu0 %v587_v41, %s1036_s17  ;;  %v971_v46 = vld [vmem:[%s1578_s0 + $0x3] ss:$16 sm:%s619_s20]   ;;  %v658_v47 = vsel %vm14_vm2, %v978_v44, %v653_v45  ;;  %s1038_s9 = smov 16   ;;  %s718_s17 = smov 12 }
  0x41   :  { %v972_v48 = vld [vmem:[%s1578_s0 + $0x3] ss:$16 sm:%s622_s25]   ;;  %659 = vrot.lane.b32.xlu1 %v658_v47, %s1037_s13  ;;  %s723_s18 = smov 48  ;;  %s728_s23 = smov 192 }
  0x42   :  { %v973_v49 = vld [vmem:[%s1578_s0 + $0x3] ss:$16 sm:%s627_s26]   ;;  %v625_v50 = vsel %vm6_vm0, %v972_v48, %v971_v46  ;;  %v984_v54 = vld [vmem:[%s1578_s0 + $0x82] ss:$16 sm:%s693_s6]   ;;  %s8_s26 = smov 48  ;;  %s2_s3 = smov 3 }
  0x43   :  { %v974_v51 = vld [vmem:[%s1578_s0 + $0x3] ss:$16 sm:%s632_s2]   ;;  %v630_v52 = vsel %vm10_vm1, %v973_v49, %v625_v50  ;;  %v696_v56 = vsel %vm6_vm0, %v984_v54, %v983_v53  ;;  %v985_v57 = vld [vmem:[%s1578_s0 + $0x82] ss:$16 sm:%s698_s11]   ;;  %s741_s2 = smov 12  ;;  %s4_s4 = smov 12 }
  0x44   :  { %v635_v55 = vsel %vm14_vm2, %v974_v51, %v630_v52  ;;  %v986_v58 = vld [vmem:[%s1578_s0 + $0x82] ss:$16 sm:%s703_s12]   ;;  %v701_v59 = vsel %vm10_vm1, %v985_v57, %v696_v56  ;;  %s715_s12 = smov 3  ;;  %v991_v3 = vld [vmem:[%s1578_s0 + $0x81] ss:$16 sm:%s738_s30]   ;;  %s1039_s5 = smov 8  }
  0x45   :  { %636 = vrot.lane.b32.xlu0 %v635_v55, %s1037_s13  ;;  %v979_v60 = vld [vmem:[%s1578_s0 + $0x2] ss:$16 sm:%s667_s16]   ;;  %v706_v61 = vsel %vm14_vm2, %v986_v58, %v701_v59  ;;  %s23_s13 = smov 12  ;;  %s28_s14 = smov 48 }
  0x46   :  { %v980_v62 = vld [vmem:[%s1578_s0 + $0x2] ss:$16 sm:%s670_s21]   ;;  %707 = vrot.lane.b32.xlu1 %v706_v61, %s1038_s9  ;;  %s33_s19 = smov 192 }
  0x47   :  { %v981_v63 = vld [vmem:[%s1578_s0 + $0x2] ss:$16 sm:%s675_s22]   ;;  %v673_v0 = vsel %vm6_vm0, %v980_v62, %v979_v60  ;;  %v992_v4 = vld [vmem:[%s1578_s0 + $0x81] ss:$16 sm:%s741_s2]  }
  0x48   :  { %v982_v1 = vld [vmem:[%s1578_s0 + $0x2] ss:$16 sm:%s680_s27]   ;;  %v678_v2 = vsel %vm10_vm1, %v981_v63, %v673_v0  ;;  %v744_v6 = vsel %vm6_vm0, %v992_v4, %v991_v3  ;;  %v993_v7 = vld [vmem:[%s1578_s0 + $0x81] ss:$16 sm:%s746_s7]   ;;  %s12_s27 = smov 192 }
  0x49   :  { %v683_v5 = vsel %vm14_vm2, %v982_v1, %v678_v2  ;;  %v994_v8 = vld [vmem:[%s1578_s0 + $0x81] ss:$16 sm:%s751_s8]   ;;  %v749_v9 = vsel %vm10_vm1, %v993_v7, %v744_v6  ;;  %s20_s8 = smov 3  ;;  %v9_v17 = vld [vmem:[%s1578_s0] ss:$16 sm:%s8_s26]  }
  0x4a   :  { %684 = vrot.lane.b32.xlu0 %v683_v5, %s1038_s9  ;;  %v987_v10 = vld [vmem:[%s1578_s0 + $0x1] ss:$16 sm:%s715_s12]   ;;  %v754_v11 = vsel %vm14_vm2, %v994_v8, %v749_v9 }
  0x4b   :  { %v988_v12 = vld [vmem:[%s1578_s0 + $0x1] ss:$16 sm:%s718_s17]   ;;  %755 = vrot.lane.b32.xlu1 %v754_v11, %s1039_s5 }
  0x4c   :  { %v989_v13 = vld [vmem:[%s1578_s0 + $0x1] ss:$16 sm:%s723_s18]   ;;  %v721_v14 = vsel %vm6_vm0, %v988_v12, %v987_v10  ;;  %v13_v18 = vld [vmem:[%s1578_s0] ss:$16 sm:%s12_s27]  }
  0x4d   :  { %v990_v15 = vld [vmem:[%s1578_s0 + $0x1] ss:$16 sm:%s728_s23]   ;;  %v726_v16 = vsel %vm10_vm1, %v989_v13, %v721_v14  ;;  %v3_v20 = vld [vmem:[%s1578_s0] ss:$16 sm:%s2_s3]  }
  0x4e   :  { %v731_v19 = vsel %vm14_vm2, %v990_v15, %v726_v16  ;;  %v5_v21 = vld [vmem:[%s1578_s0] ss:$16 sm:%s4_s4]  }
  0x4f   :  { %732 = vrot.lane.b32.xlu0 %v731_v19, %s1039_s5  ;;  %v7_v22 = vsel %vm6_vm0, %v5_v21, %v3_v20  ;;  %v871_v23 = vld [vmem:[%s1578_s0 + $0x80] ss:$16 sm:%s20_s8]  }
  0x50   :  { %v11_v24 = vsel %vm10_vm1, %v9_v17, %v7_v22  ;;  %v872_v25 = vld [vmem:[%s1578_s0 + $0x80] ss:$16 sm:%s23_s13]  }
  0x51   :  { %v873_v26 = vld [vmem:[%s1578_s0 + $0x80] ss:$16 sm:%s28_s14]   ;;  %v15_v27 = vsel %vm14_vm2, %v13_v18, %v11_v24  ;;  %v26_v29 = vsel %vm6_vm0, %v872_v25, %v871_v23  ;;  %vm638_vm0 = vcmask 261312  }
  0x52   :  { %v874_v28 = vld [vmem:[%s1578_s0 + $0x80] ss:$16 sm:%s33_s19]   ;;  %17 = vst.msk [vmem:[#allocation0] ss:$8 sm:$0xf] %vm16_vm3, %v15_v27   ;;  %v31_v30 = vsel %vm10_vm1, %v873_v26, %v26_v29  ;;  %vm686_vm1 = vcmask 195712  }
  0x53   :  { %18 = vst.msk [vmem:[#allocation0] ss:$8 sm:$0xf0] %vm16_vm3, %v15_v27   ;;  %v36_v31 = vsel %vm14_vm2, %v874_v28, %v31_v30  ;;  %vm734_vm2 = vcmask 130112  }
  0x54   :  { %39 = vst.msk [vmem:[#allocation0 + $0x40] ss:$8 sm:$0xf] %vm16_vm3, %v36_v31   ;;  %41 = vst.msk [vmem:[#allocation0 + $0x40] ss:$8 sm:$0xf0] %vm16_vm3, %v36_v31  }
  0x78   :  { %v109_v32 = vpop.permute.xlu1 %108  }
  0x7a   :  { %v61_v33 = vpop.permute.xlu0 %60  }
  0x7b   :  { %63 = vst.msk [vmem:[#allocation0] ss:$8 sm:$0xf] %vm62_vm4, %v61_v33   ;;  %64 = vst.msk [vmem:[#allocation0] ss:$8 sm:$0xf0] %vm62_vm4, %v61_v33  }
  0x7c   :  { %111 = vst.msk [vmem:[#allocation0] ss:$8 sm:$0xf] %vm110_vm5, %v109_v32   ;;  %112 = vst.msk [vmem:[#allocation0] ss:$8 sm:$0xf0] %vm110_vm5, %v109_v32  }
  0x7d   :  { %v132_v34 = vpop.permute.xlu1 %131  }
  0x7f   :  { %v84_v35 = vpop.permute.xlu0 %83  }
  0x80   :  { %87 = vst.msk [vmem:[#allocation0 + $0x40] ss:$8 sm:$0xf] %vm62_vm4, %v84_v35   ;;  %89 = vst.msk [vmem:[#allocation0 + $0x40] ss:$8 sm:$0xf0] %vm62_vm4, %v84_v35  }
  0x81   :  { %135 = vst.msk [vmem:[#allocation0 + $0x40] ss:$8 sm:$0xf] %vm110_vm5, %v132_v34   ;;  %137 = vst.msk [vmem:[#allocation0 + $0x40] ss:$8 sm:$0xf0] %vm110_vm5, %v132_v34  }
  0x82   :  { %v180_v36 = vpop.permute.xlu1 %179  }
  0x83   :  { %183 = vst.msk [vmem:[#allocation0 + $0x40] ss:$8 sm:$0xf] %vm158_vm6, %v180_v36   ;;  %185 = vst.msk [vmem:[#allocation0 + $0x40] ss:$8 sm:$0xf0] %vm158_vm6, %v180_v36  }
  0x86   :  { %v157_v37 = vpop.permute.xlu0 %156   ;;  %v228_v38 = vpop.permute.xlu1 %227  }
  0x87   :  { %159 = vst.msk [vmem:[#allocation0] ss:$8 sm:$0xf] %vm158_vm6, %v157_v37   ;;  %160 = vst.msk [vmem:[#allocation0] ss:$8 sm:$0xf0] %vm158_vm6, %v157_v37  }
  0x88   :  { %231 = vst.msk [vmem:[#allocation0 + $0x40] ss:$8 sm:$0xf] %vm206_vm7, %v228_v38   ;;  %233 = vst.msk [vmem:[#allocation0 + $0x40] ss:$8 sm:$0xf0] %vm206_vm7, %v228_v38  }
  0x8a   :  { %v205_v39 = vpop.permute.xlu0 %204  }
  0x8b   :  { %207 = vst.msk [vmem:[#allocation0] ss:$8 sm:$0xf] %vm206_vm7, %v205_v39   ;;  %208 = vst.msk [vmem:[#allocation0] ss:$8 sm:$0xf0] %vm206_vm7, %v205_v39   ;;  %v276_v40 = vpop.permute.xlu1 %275  }
  0x8c   :  { %279 = vst.msk [vmem:[#allocation0 + $0x40] ss:$8 sm:$0xf] %vm254_vm8, %v276_v40   ;;  %281 = vst.msk [vmem:[#allocation0 + $0x40] ss:$8 sm:$0xf0] %vm254_vm8, %v276_v40  }
  0x8f   :  { %v253_v41 = vpop.permute.xlu0 %252  }
  0x90   :  { %255 = vst.msk [vmem:[#allocation0] ss:$8 sm:$0xf] %vm254_vm8, %v253_v41   ;;  %256 = vst.msk [vmem:[#allocation0] ss:$8 sm:$0xf0] %vm254_vm8, %v253_v41   ;;  %v324_v42 = vpop.permute.xlu1 %323  }
  0x91   :  { %327 = vst.msk [vmem:[#allocation0 + $0x40] ss:$8 sm:$0xf] %vm302_vm9, %v324_v42   ;;  %329 = vst.msk [vmem:[#allocation0 + $0x40] ss:$8 sm:$0xf0] %vm302_vm9, %v324_v42  }
  0x94   :  { %v301_v43 = vpop.permute.xlu0 %300  }
  0x95   :  { %303 = vst.msk [vmem:[#allocation0] ss:$8 sm:$0xf] %vm302_vm9, %v301_v43   ;;  %304 = vst.msk [vmem:[#allocation0] ss:$8 sm:$0xf0] %vm302_vm9, %v301_v43   ;;  %v372_v44 = vpop.permute.xlu1 %371  }
  0x96   :  { %375 = vst.msk [vmem:[#allocation0 + $0x40] ss:$8 sm:$0xf] %vm350_vm10, %v372_v44   ;;  %377 = vst.msk [vmem:[#allocation0 + $0x40] ss:$8 sm:$0xf0] %vm350_vm10, %v372_v44  }
  0x99   :  { %v349_v45 = vpop.permute.xlu0 %348  }
  0x9a   :  { %351 = vst.msk [vmem:[#allocation0] ss:$8 sm:$0xf] %vm350_vm10, %v349_v45   ;;  %352 = vst.msk [vmem:[#allocation0] ss:$8 sm:$0xf0] %vm350_vm10, %v349_v45   ;;  %v420_v46 = vpop.permute.xlu1 %419  }
  0x9b   :  { %423 = vst.msk [vmem:[#allocation0 + $0x40] ss:$8 sm:$0xf] %vm398_vm11, %v420_v46   ;;  %425 = vst.msk [vmem:[#allocation0 + $0x40] ss:$8 sm:$0xf0] %vm398_vm11, %v420_v46  }
  0x9e   :  { %v397_v47 = vpop.permute.xlu0 %396  }
  0x9f   :  { %399 = vst.msk [vmem:[#allocation0] ss:$8 sm:$0xf] %vm398_vm11, %v397_v47   ;;  %400 = vst.msk [vmem:[#allocation0] ss:$8 sm:$0xf0] %vm398_vm11, %v397_v47   ;;  %v468_v48 = vpop.permute.xlu1 %467  }
  0xa0   :  { %471 = vst.msk [vmem:[#allocation0 + $0x40] ss:$8 sm:$0xf] %vm446_vm12, %v468_v48   ;;  %473 = vst.msk [vmem:[#allocation0 + $0x40] ss:$8 sm:$0xf0] %vm446_vm12, %v468_v48  }
  0xa3   :  { %v445_v49 = vpop.permute.xlu0 %444  }
  0xa4   :  { %447 = vst.msk [vmem:[#allocation0] ss:$8 sm:$0xf] %vm446_vm12, %v445_v49   ;;  %448 = vst.msk [vmem:[#allocation0] ss:$8 sm:$0xf0] %vm446_vm12, %v445_v49   ;;  %v516_v50 = vpop.permute.xlu1 %515  }
  0xa5   :  { %519 = vst.msk [vmem:[#allocation0 + $0x40] ss:$8 sm:$0xf] %vm494_vm13, %v516_v50   ;;  %521 = vst.msk [vmem:[#allocation0 + $0x40] ss:$8 sm:$0xf0] %vm494_vm13, %v516_v50  }
  0xa8   :  { %v493_v51 = vpop.permute.xlu0 %492  }
  0xa9   :  { %495 = vst.msk [vmem:[#allocation0] ss:$8 sm:$0xf] %vm494_vm13, %v493_v51   ;;  %496 = vst.msk [vmem:[#allocation0] ss:$8 sm:$0xf0] %vm494_vm13, %v493_v51   ;;  %v564_v52 = vpop.permute.xlu1 %563  }
  0xaa   :  { %567 = vst.msk [vmem:[#allocation0 + $0x40] ss:$8 sm:$0xf] %vm542_vm14, %v564_v52   ;;  %569 = vst.msk [vmem:[#allocation0 + $0x40] ss:$8 sm:$0xf0] %vm542_vm14, %v564_v52  }
  0xad   :  { %v541_v53 = vpop.permute.xlu0 %540  }
  0xae   :  { %543 = vst.msk [vmem:[#allocation0] ss:$8 sm:$0xf] %vm542_vm14, %v541_v53   ;;  %544 = vst.msk [vmem:[#allocation0] ss:$8 sm:$0xf0] %vm542_vm14, %v541_v53   ;;  %v612_v54 = vpop.permute.xlu1 %611  }
  0xaf   :  { %615 = vst.msk [vmem:[#allocation0 + $0x40] ss:$8 sm:$0xf] %vm590_vm15, %v612_v54   ;;  %617 = vst.msk [vmem:[#allocation0 + $0x40] ss:$8 sm:$0xf0] %vm590_vm15, %v612_v54  }
  0xb2   :  { %v589_v55 = vpop.permute.xlu0 %588  }
  0xb3   :  { %591 = vst.msk [vmem:[#allocation0] ss:$8 sm:$0xf] %vm590_vm15, %v589_v55   ;;  %592 = vst.msk [vmem:[#allocation0] ss:$8 sm:$0xf0] %vm590_vm15, %v589_v55   ;;  %v660_v56 = vpop.permute.xlu1 %659  }
  0xb4   :  { %663 = vst.msk [vmem:[#allocation0 + $0x40] ss:$8 sm:$0xf] %vm638_vm0, %v660_v56   ;;  %665 = vst.msk [vmem:[#allocation0 + $0x40] ss:$8 sm:$0xf0] %vm638_vm0, %v660_v56  }
  0xb7   :  { %v637_v57 = vpop.permute.xlu0 %636  }
  0xb8   :  { %639 = vst.msk [vmem:[#allocation0] ss:$8 sm:$0xf] %vm638_vm0, %v637_v57   ;;  %640 = vst.msk [vmem:[#allocation0] ss:$8 sm:$0xf0] %vm638_vm0, %v637_v57   ;;  %v708_v58 = vpop.permute.xlu1 %707  }
  0xb9   :  { %711 = vst.msk [vmem:[#allocation0 + $0x40] ss:$8 sm:$0xf] %vm686_vm1, %v708_v58   ;;  %713 = vst.msk [vmem:[#allocation0 + $0x40] ss:$8 sm:$0xf0] %vm686_vm1, %v708_v58  }
  0xbc   :  { %v685_v59 = vpop.permute.xlu0 %684  }
  0xbd   :  { %687 = vst.msk [vmem:[#allocation0] ss:$8 sm:$0xf] %vm686_vm1, %v685_v59   ;;  %688 = vst.msk [vmem:[#allocation0] ss:$8 sm:$0xf0] %vm686_vm1, %v685_v59   ;;  %v756_v60 = vpop.permute.xlu1 %755  }
  0xbe   :  { %759 = vst.msk [vmem:[#allocation0 + $0x40] ss:$8 sm:$0xf] %vm734_vm2, %v756_v60   ;;  %761 = vst.msk [vmem:[#allocation0 + $0x40] ss:$8 sm:$0xf0] %vm734_vm2, %v756_v60  }
  0xc1   :  { %v733_v61 = vpop.permute.xlu0 %732  }
  0xc2   :  { %735 = vst.msk [vmem:[#allocation0] ss:$8 sm:$0xf] %vm734_vm2, %v733_v61   ;;  %736 = vst.msk [vmem:[#allocation0] ss:$8 sm:$0xf0] %vm734_vm2, %v733_v61  }
  0xc5   :  { %v810_v62 = vld [vmem:[#allocation0 + $0x40] sm:$0x1]  ;;  %v816_v63 = vld [vmem:[#allocation0 + $0x48] sm:$0x1]  ;;  %v822_v0 = vld [vmem:[#allocation0 + $0x50] sm:$0x1] }
  0xc6   :  { %1002 = vst [vmem:[%s1579_s1 + $0x8] sm:$0x1] %v810_v62  ;;  %1003 = vst [vmem:[%s1579_s1 + $0x9] sm:$0x1] %v816_v63  ;;  %v828_v1 = vld [vmem:[#allocation0 + $0x58] sm:$0x1] }
  0xc7   :  { %1004 = vst [vmem:[%s1579_s1 + $0xa] sm:$0x1] %v822_v0  ;;  %v834_v2 = vld [vmem:[#allocation0 + $0x60] sm:$0x1]  ;;  %v840_v3 = vld [vmem:[#allocation0 + $0x68] sm:$0x1] }
  0xc8   :  { %1005 = vst [vmem:[%s1579_s1 + $0xb] sm:$0x1] %v828_v1  ;;  %1006 = vst [vmem:[%s1579_s1 + $0xc] sm:$0x1] %v834_v2  ;;  %v846_v4 = vld [vmem:[#allocation0 + $0x70] sm:$0x1] }
  0xc9   :  { %1007 = vst [vmem:[%s1579_s1 + $0xd] sm:$0x1] %v840_v3  ;;  %v852_v5 = vld [vmem:[#allocation0 + $0x78] sm:$0x1]  ;;  %1008 = vst [vmem:[%s1579_s1 + $0xe] sm:$0x1] %v846_v4 }
  0xca   :  { %1009 = vst [vmem:[%s1579_s1 + $0xf] sm:$0x1] %v852_v5  ;;  %v765_v6 = vld [vmem:[#allocation0] sm:$0x1]  ;;  %v769_v7 = vld [vmem:[#allocation0 + $0x8] sm:$0x1] }
  0xcb   :  { %v774_v8 = vld [vmem:[#allocation0 + $0x10] sm:$0x1]  ;;  %767 = vst [vmem:[%s1579_s1] sm:$0x1] %v765_v6  ;;  %995 = vst [vmem:[%s1579_s1 + $0x1] sm:$0x1] %v769_v7 }
  0xcc   :  { %996 = vst [vmem:[%s1579_s1 + $0x2] sm:$0x1] %v774_v8  ;;  %v780_v9 = vld [vmem:[#allocation0 + $0x18] sm:$0x1]  ;;  %v786_v10 = vld [vmem:[#allocation0 + $0x20] sm:$0x1] }
  0xcd   :  { %v792_v11 = vld [vmem:[#allocation0 + $0x28] sm:$0x1]  ;;  %997 = vst [vmem:[%s1579_s1 + $0x3] sm:$0x1] %v780_v9  ;;  %998 = vst [vmem:[%s1579_s1 + $0x4] sm:$0x1] %v786_v10 }
  0xce   :  { %999 = vst [vmem:[%s1579_s1 + $0x5] sm:$0x1] %v792_v11  ;;  %v798_v12 = vld [vmem:[#allocation0 + $0x30] sm:$0x1]  ;;  %v804_v13 = vld [vmem:[#allocation0 + $0x38] sm:$0x1] }
  0xcf   :  { %1000 = vst [vmem:[%s1579_s1 + $0x6] sm:$0x1] %v798_v12  ;;  %1001 = vst [vmem:[%s1579_s1 + $0x7] sm:$0x1] %v804_v13 }

// kernel: tile.36
= control target key start
LH: loop header
LB: loop body
LE: loop exit
PB: predicated region body
PF: predicated region fallthrough
CT: control target
= control target key end

     0   :  { %s110_s0 = inlined_call_operand.<no memory space> [shape: f32[], index: 0, kind: input, shape index: {}]   ;;  %s111_s1 = inlined_call_operand.vmem [shape: f32[1,2048], index: 1, kind: output, shape index: {}]  }
   0x1   :  { %v2_v0 = vstv %s110_s0 }
   0x2   :  { %3 = vst [vmem:[%s111_s1] sm:$0x1] %v2_v0  ;;  %34 = vst [vmem:[%s111_s1 + $0x1] sm:$0x1] %v2_v0 }
   0x3   :  { %35 = vst [vmem:[%s111_s1 + $0x2] sm:$0x1] %v2_v0  ;;  %36 = vst [vmem:[%s111_s1 + $0x3] sm:$0x1] %v2_v0 }
   0x4   :  { %37 = vst [vmem:[%s111_s1 + $0x4] sm:$0x1] %v2_v0  ;;  %38 = vst [vmem:[%s111_s1 + $0x5] sm:$0x1] %v2_v0 }
   0x5   :  { %39 = vst [vmem:[%s111_s1 + $0x6] sm:$0x1] %v2_v0  ;;  %40 = vst [vmem:[%s111_s1 + $0x7] sm:$0x1] %v2_v0 }
   0x6   :  { %41 = vst [vmem:[%s111_s1 + $0x8] sm:$0x1] %v2_v0  ;;  %42 = vst [vmem:[%s111_s1 + $0x9] sm:$0x1] %v2_v0 }
   0x7   :  { %43 = vst [vmem:[%s111_s1 + $0xa] sm:$0x1] %v2_v0  ;;  %44 = vst [vmem:[%s111_s1 + $0xb] sm:$0x1] %v2_v0 }
   0x8   :  { %45 = vst [vmem:[%s111_s1 + $0xc] sm:$0x1] %v2_v0  ;;  %46 = vst [vmem:[%s111_s1 + $0xd] sm:$0x1] %v2_v0 }
   0x9   :  { %47 = vst [vmem:[%s111_s1 + $0xe] sm:$0x1] %v2_v0  ;;  %48 = vst [vmem:[%s111_s1 + $0xf] sm:$0x1] %v2_v0 }

// kernel: dcgan_discriminator_forward.5
= control target key start
LH: loop header
LB: loop body
LE: loop exit
PB: predicated region body
PF: predicated region fallthrough
CT: control target
= control target key end

     0   :  { %v119_v37 = vlaneseq  ;;  %vm2611_vm0 = vcmask 1040384   ;;  %vm2614_vm1 = vcmask 1041408   ;;  %s4597_s3 = inlined_call_operand.vmem [shape: bf16[2048,256], index: 3, kind: input, shape index: {}]   ;;  %s4598_s0 = inlined_call_operand.vmem [shape: bf16[32,2048], index: 0, kind: input, shape index: {}]   ;;  %s4599_s1 = inlined_call_operand.vmem [shape: f32[1,2048], index: 1, kind: input, shape index: {}]   ;;  %s4600_s2 = inlined_call_operand.vmem [shape: f32[1,2048], index: 2, kind: input, shape index: {}]   ;;  %s4601_s4 = inlined_call_operand.vmem [shape: bf16[32,256], index: 4, kind: output, shape index: {0}]   ;;  %s4602_s5 = inlined_call_operand.vmem [shape: f32[1,8,256], index: 5, kind: output, shape index: {1}]  }
   0x1   :  { %v2947_v0 = vld [vmem:[%s4597_s3 + $0x4] ss:$8 sps:$4 sm:$0xff]   ;;  %v2951_v2 = vld [vmem:[%s4597_s3] ss:$8 sps:$4 sm:$0xff]   ;;  %v2953_v4 = vld [vmem:[%s4597_s3 + $0x14] ss:$8 sps:$4 sm:$0xff]  }
   0x2   :  { %v2949_v1 = vld [vmem:[%s4597_s3 + $0x404] ss:$8 sps:$4 sm:$0xff]   ;;  %2107 = vmatprep.subr.bf16.mxu1 %v2947_v0  ;;  %v2952_v3 = vld [vmem:[%s4597_s3 + $0x400] ss:$8 sps:$4 sm:$0xff]   ;;  %v2955_v5 = vld [vmem:[%s4597_s3 + $0x414] ss:$8 sps:$4 sm:$0xff]  }
   0x3   :  { %2319 = vmatprep.subr.bf16.mxu0 %v2949_v1  ;;  %2108 = vmatpush1.bf16.msra.mxu1 %v2951_v2  ;;  %v2957_v6 = vld [vmem:[%s4597_s3 + $0x10] ss:$8 sps:$4 sm:$0xff]   ;;  %v2959_v8 = vld [vmem:[%s4597_s3 + $0x24] ss:$8 sps:$4 sm:$0xff]   ;;  %v2963_v10 = vld [vmem:[%s4597_s3 + $0x20] ss:$8 sps:$4 sm:$0xff]  }
   0x4   :  { %2320 = vmatpush1.bf16.msra.mxu0 %v2952_v3  ;;  %2109 = vmatprep.subr.bf16.mxu1 %v2953_v4  ;;  %v2958_v7 = vld [vmem:[%s4597_s3 + $0x410] ss:$8 sps:$4 sm:$0xff]   ;;  %v2961_v9 = vld [vmem:[%s4597_s3 + $0x424] ss:$8 sps:$4 sm:$0xff]   ;;  %v2964_v11 = vld [vmem:[%s4597_s3 + $0x420] ss:$8 sps:$4 sm:$0xff]  }
   0x5   :  { %2321 = vmatprep.subr.bf16.mxu0 %v2955_v5  ;;  %v2965_v12 = vld [vmem:[%s4597_s3 + $0x34] ss:$8 sps:$4 sm:$0xff]   ;;  %v2969_v14 = vld [vmem:[%s4597_s3 + $0x30] ss:$8 sps:$4 sm:$0xff]   ;;  %v2971_v16 = vld [vmem:[%s4597_s3 + $0x44] ss:$8 sps:$4 sm:$0xff]  }
   0x6   :  { %v2967_v13 = vld [vmem:[%s4597_s3 + $0x434] ss:$8 sps:$4 sm:$0xff]   ;;  %v2970_v15 = vld [vmem:[%s4597_s3 + $0x430] ss:$8 sps:$4 sm:$0xff]   ;;  %v2973_v17 = vld [vmem:[%s4597_s3 + $0x444] ss:$8 sps:$4 sm:$0xff]  }
   0x7   :  { %2110 = vmatpush1.bf16.msra.mxu1 %v2957_v6  ;;  %v2975_v18 = vld [vmem:[%s4597_s3 + $0x40] ss:$8 sps:$4 sm:$0xff]   ;;  %v2977_v20 = vld [vmem:[%s4597_s3 + $0x54] ss:$8 sps:$4 sm:$0xff]   ;;  %v2981_v22 = vld [vmem:[%s4597_s3 + $0x50] ss:$8 sps:$4 sm:$0xff]  }
   0x8   :  { %2322 = vmatpush1.bf16.msra.mxu0 %v2958_v7  ;;  %2111 = vmatprep.subr.bf16.mxu1 %v2959_v8  ;;  %v2976_v19 = vld [vmem:[%s4597_s3 + $0x440] ss:$8 sps:$4 sm:$0xff]   ;;  %v2979_v21 = vld [vmem:[%s4597_s3 + $0x454] ss:$8 sps:$4 sm:$0xff]   ;;  %v2982_v23 = vld [vmem:[%s4597_s3 + $0x450] ss:$8 sps:$4 sm:$0xff]  }
   0x9   :  { %2323 = vmatprep.subr.bf16.mxu0 %v2961_v9  ;;  %v2983_v24 = vld [vmem:[%s4597_s3 + $0x64] ss:$8 sps:$4 sm:$0xff]   ;;  %v2987_v26 = vld [vmem:[%s4597_s3 + $0x60] ss:$8 sps:$4 sm:$0xff]   ;;  %v2989_v28 = vld [vmem:[%s4597_s3 + $0x74] ss:$8 sps:$4 sm:$0xff]  }
   0xa   :  { %v2985_v25 = vld [vmem:[%s4597_s3 + $0x464] ss:$8 sps:$4 sm:$0xff]   ;;  %v2988_v27 = vld [vmem:[%s4597_s3 + $0x460] ss:$8 sps:$4 sm:$0xff]   ;;  %v2991_v29 = vld [vmem:[%s4597_s3 + $0x474] ss:$8 sps:$4 sm:$0xff]  }
   0xb   :  { %2112 = vmatpush1.bf16.msra.mxu1 %v2963_v10  ;;  %v2993_v30 = vld [vmem:[%s4597_s3 + $0x70] ss:$8 sps:$4 sm:$0xff]   ;;  %v2995_v32 = vld [vmem:[%s4597_s3 + $0x84] ss:$8 sps:$4 sm:$0xff]   ;;  %v2999_v34 = vld [vmem:[%s4597_s3 + $0x80] ss:$8 sps:$4 sm:$0xff]  }
   0xc   :  { %2324 = vmatpush1.bf16.msra.mxu0 %v2964_v11  ;;  %2113 = vmatprep.subr.bf16.mxu1 %v2965_v12  ;;  %v2994_v31 = vld [vmem:[%s4597_s3 + $0x470] ss:$8 sps:$4 sm:$0xff]   ;;  %v2997_v33 = vld [vmem:[%s4597_s3 + $0x484] ss:$8 sps:$4 sm:$0xff]   ;;  %v3000_v35 = vld [vmem:[%s4597_s3 + $0x480] ss:$8 sps:$4 sm:$0xff]  }
   0xd   :  { %2325 = vmatprep.subr.bf16.mxu0 %v2967_v13  ;;  %v3001_v36 = vld [vmem:[%s4597_s3 + $0x94] ss:$8 sps:$4 sm:$0xff]   ;;  %v3005_v39 = vld [vmem:[%s4597_s3 + $0x90] ss:$8 sps:$4 sm:$0xff]   ;;  %v3007_v41 = vld [vmem:[%s4597_s3 + $0xa4] ss:$8 sps:$4 sm:$0xff]  }
   0xe   :  { %v3003_v38 = vld [vmem:[%s4597_s3 + $0x494] ss:$8 sps:$4 sm:$0xff]   ;;  %v3006_v40 = vld [vmem:[%s4597_s3 + $0x490] ss:$8 sps:$4 sm:$0xff]   ;;  %v3488_v42 = vshrl.u32 %v119_v37, 7  ;;  %v19_v52 = vld [vmem:[%s4598_s0] sm:$0xff] }
   0xf   :  { %2114 = vmatpush1.bf16.msra.mxu1 %v2969_v14  ;;  %v3009_v43 = vld [vmem:[%s4597_s3 + $0x4a4] ss:$8 sps:$4 sm:$0xff]   ;;  %v3011_v44 = vld [vmem:[%s4597_s3 + $0xa0] ss:$8 sps:$4 sm:$0xff]   ;;  %v3013_v46 = vld [vmem:[%s4597_s3 + $0xb4] ss:$8 sps:$4 sm:$0xff]   ;;  %v52_v54 = vunpack.c.h.bf16 %v19_v52  ;;  %v51_v58 = vunpack.c.l.bf16 %v19_v52 }
  0x10   :  { %2326 = vmatpush1.bf16.msra.mxu0 %v2970_v15  ;;  %2115 = vmatprep.subr.bf16.mxu1 %v2971_v16  ;;  %v3012_v45 = vld [vmem:[%s4597_s3 + $0x4a0] ss:$8 sps:$4 sm:$0xff]   ;;  %v125_v47 = vsub.s32 1, %v3488_v42  ;;  %v3015_v48 = vld [vmem:[%s4597_s3 + $0x4b4] ss:$8 sps:$4 sm:$0xff]   ;;  %v121_v49 = vsub.s32 0, %v3488_v42 }
  0x11   :  { %2327 = vmatprep.subr.bf16.mxu0 %v2973_v17  ;;  %v3017_v50 = vld [vmem:[%s4597_s3 + $0xb0] ss:$8 sps:$4 sm:$0xff]   ;;  %v27_v53 = vld [vmem:[%s4598_s0 + $0x40] sm:$0xff]  ;;  %v3555_v6 = vld [vmem:[%s4599_s1 + $0x8] sm:$0xff] }
  0x12   :  { %v3018_v51 = vld [vmem:[%s4597_s3 + $0x4b0] ss:$8 sps:$4 sm:$0xff]   ;;  %v3522_v55 = vld [vmem:[%s4599_s1] sm:$0xff]  ;;  %v68_v59 = vunpack.c.h.bf16 %v27_v53  ;;  %v67_v63 = vunpack.c.l.bf16 %v27_v53  ;;  %v3560_v7 = vld [vmem:[%s4600_s2 + $0x8] sm:$0xff]  ;;  %v3572_v12 = vrot.slane %v3555_v6, %v125_v47 }
  0x13   :  { %2116 = vmatpush1.bf16.msra.mxu1 %v2975_v18  ;;  %v3527_v56 = vld [vmem:[%s4600_s2] sm:$0xff]  ;;  %v3533_v60 = vrot.slane %v3522_v55, %v125_v47  ;;  %v3548_v2 = vrot.slane %v3522_v55, %v121_v49  ;;  %v3575_v13 = vrot.slane %v3560_v7, %v125_v47  ;;  %v3025_v14 = vld [vmem:[%s4597_s3 + $0xd4] ss:$8 sps:$4 sm:$0xff]  }
  0x14   :  { %2328 = vmatpush1.bf16.msra.mxu0 %v2976_v19  ;;  %2117 = vmatprep.subr.bf16.mxu1 %v2977_v20  ;;  %v3019_v57 = vld [vmem:[%s4597_s3 + $0xc4] ss:$8 sps:$4 sm:$0xff]   ;;  %v3536_v61 = vrot.slane %v3527_v56, %v125_v47  ;;  %v3563_v8 = vrot.slane %v3527_v56, %v121_v49  ;;  %v3023_v9 = vld [vmem:[%s4597_s3 + $0xc0] ss:$8 sps:$4 sm:$0xff]   ;;  %v3027_v19 = vld [vmem:[%s4597_s3 + $0x4d4] ss:$8 sps:$4 sm:$0xff]  }
  0x15   :  { %2329 = vmatprep.subr.bf16.mxu0 %v2979_v21  ;;  %v3021_v62 = vld [vmem:[%s4597_s3 + $0x4c4] ss:$8 sps:$4 sm:$0xff]   ;;  %v200_v3 = vmul.f32 %v3533_v60, %v52_v54  ;;  %v216_v4 = vmul.f32 %v3533_v60, %v68_v59  ;;  %v3024_v10 = vld [vmem:[%s4597_s3 + $0x4c0] ss:$8 sps:$4 sm:$0xff]   ;;  %v199_v18 = vmul.f32 %v3548_v2, %v51_v58  ;;  %v3037_v52 = vld [vmem:[%s4597_s3 + $0xf4] ss:$8 sps:$4 sm:$0xff]  }
  0x16   :  { %v23_v0 = vld [vmem:[%s4598_s0 + $0x20] sm:$0xff]  ;;  %v3039_v54 = vld [vmem:[%s4597_s3 + $0x4f4] ss:$8 sps:$4 sm:$0xff]   ;;  %v3041_v59 = vld [vmem:[%s4597_s3 + $0xf0] ss:$8 sps:$4 sm:$0xff]  }
  0x17   :  { %2118 = vmatpush1.bf16.msra.mxu1 %v2981_v22  ;;  %v31_v1 = vld [vmem:[%s4598_s0 + $0x60] sm:$0xff]  ;;  %v60_v5 = vunpack.c.h.bf16 %v23_v0  ;;  %v348_v15 = vadd.f32 %v3536_v61, %v200_v3  ;;  %v364_v16 = vadd.f32 %v3536_v61, %v216_v4  ;;  %v59_v17 = vunpack.c.l.bf16 %v23_v0  ;;  %v3042_v3 = vld [vmem:[%s4597_s3 + $0x4f0] ss:$8 sps:$4 sm:$0xff]  }
  0x18   :  { %2330 = vmatpush1.bf16.msra.mxu0 %v2982_v23  ;;  %2119 = vmatprep.subr.bf16.mxu1 %v2983_v24  ;;  %v76_v11 = vunpack.c.h.bf16 %v31_v1  ;;  %v75_v20 = vunpack.c.l.bf16 %v31_v1  ;;  %v215_v23 = vmul.f32 %v3548_v2, %v67_v63  ;;  %v3045_v4 = vld [vmem:[%s4597_s3 + $0x104] ss:$8 sps:$4 sm:$0xff]  }
  0x19   :  { %2331 = vmatprep.subr.bf16.mxu0 %v2985_v25  ;;  %v208_v21 = vmul.f32 %v3572_v12, %v60_v5  ;;  %v412_v24 = vmul.f32 0.2, %v348_v15  ;;  %v428_v25 = vmul.f32 0.2, %v364_v16  ;;  %v3048_v5 = vld [vmem:[%s4597_s3 + $0x504] ss:$8 sps:$4 sm:$0xff]  }
  0x1a   :  { %v224_v22 = vmul.f32 %v3572_v12, %v76_v11 }
  0x1b   :  { %2120 = vmatpush1.bf16.msra.mxu1 %v2987_v26  ;;  %v347_v26 = vadd.f32 %v3563_v8, %v199_v18  ;;  %v3052_v18 = vld [vmem:[%s4597_s3 + $0x510] ss:$8 sps:$4 sm:$0xff]  }
  0x1c   :  { %2332 = vmatpush1.bf16.msra.mxu0 %v2988_v27  ;;  %2121 = vmatprep.subr.bf16.mxu1 %v2989_v28  ;;  %v3591_v27 = vrot.slane %v3555_v6, %v121_v49  ;;  %v356_v28 = vadd.f32 %v3575_v13, %v208_v21  ;;  %v3055_v21 = vld [vmem:[%s4597_s3 + $0x120] ss:$8 sps:$4 sm:$0xff]  }
  0x1d   :  { %2333 = vmatprep.subr.bf16.mxu0 %v2991_v29  ;;  %v372_v29 = vadd.f32 %v3575_v13, %v224_v22  ;;  %v3058_v22 = vld [vmem:[%s4597_s3 + $0x520] ss:$8 sps:$4 sm:$0xff]  }
  0x1e   :  { %v207_v37 = vmul.f32 %v3591_v27, %v59_v17  ;;  %v3049_v17 = vld [vmem:[%s4597_s3 + $0x110] ss:$8 sps:$4 sm:$0xff]  }
  0x1f   :  { %2122 = vmatpush1.bf16.msra.mxu1 %v2993_v30  ;;  %v363_v30 = vadd.f32 %v3563_v8, %v215_v23  ;;  %v3063_v23 = vld [vmem:[%s4597_s3 + $0x134] ss:$8 sps:$4 sm:$0xff]  }
  0x20   :  { %2334 = vmatpush1.bf16.msra.mxu0 %v2994_v31  ;;  %2123 = vmatprep.subr.bf16.mxu1 %v2995_v32  ;;  %v3597_v31 = vrot.slane %v3560_v7, %v121_v49  ;;  %v3029_v32 = vld [vmem:[%s4597_s3 + $0xd0] ss:$8 sps:$4 sm:$0xff]  }
  0x21   :  { %2335 = vmatprep.subr.bf16.mxu0 %v2997_v33  ;;  %v3030_v33 = vld [vmem:[%s4597_s3 + $0x4d0] ss:$8 sps:$4 sm:$0xff]   ;;  %v427_v49 = vmul.f32 0.2, %v363_v30 }
  0x23   :  { %2124 = vmatpush1.bf16.msra.mxu1 %v2999_v34  ;;  %v3031_v34 = vld [vmem:[%s4597_s3 + $0xe4] ss:$8 sps:$4 sm:$0xff]   ;;  %v491_v63 = vmax.f32 %v363_v30, %v427_v49  ;;  %v3067_v30 = vld [vmem:[%s4597_s3 + $0x140] ss:$8 sps:$4 sm:$0xff]  }
  0x24   :  { %2336 = vmatpush1.bf16.msra.mxu0 %v3000_v35  ;;  %2125 = vmatprep.subr.bf16.mxu1 %v3001_v36  ;;  %v476_v35 = vmax.f32 %v348_v15, %v412_v24  ;;  %v492_v36 = vmax.f32 %v364_v16, %v428_v25  ;;  %v3051_v15 = vld [vmem:[%s4597_s3 + $0x114] ss:$8 sps:$4 sm:$0xff]   ;;  %v3061_v25 = vld [vmem:[%s4597_s3 + $0x130] ss:$8 sps:$4 sm:$0xff]   ;;  %v47_v49 = vld [vmem:[%s4598_s0 + $0xe0] sm:$0xff] }
  0x25   :  { %2337 = vmatprep.subr.bf16.mxu0 %v3003_v38  ;;  %v3033_v38 = vld [vmem:[%s4597_s3 + $0x4e4] ss:$8 sps:$4 sm:$0xff]   ;;  %v3054_v16 = vld [vmem:[%s4597_s3 + $0x514] ss:$8 sps:$4 sm:$0xff]  }
  0x26   :  { %v3066_v24 = vld [vmem:[%s4597_s3 + $0x534] ss:$8 sps:$4 sm:$0xff]  }
  0x27   :  { %2126 = vmatpush1.bf16.msra.mxu1 %v3005_v39  ;;  %v420_v39 = vmul.f32 0.2, %v356_v28 }
  0x28   :  { %2338 = vmatpush1.bf16.msra.mxu0 %v3006_v40  ;;  %2127 = vmatprep.subr.bf16.mxu1 %v3007_v41  ;;  %v436_v40 = vmul.f32 0.2, %v372_v29  ;;  %v223_v41 = vmul.f32 %v3591_v27, %v75_v20  ;;  %v3060_v20 = vld [vmem:[%s4597_s3 + $0x524] ss:$8 sps:$4 sm:$0xff]  }
  0x29   :  { %2339 = vmatprep.subr.bf16.mxu0 %v3009_v43  ;;  %v540_v43 = vpack.c.bf16 %v492_v36, %v476_v35  ;;  %v484_v47 = vmax.f32 %v356_v28, %v420_v39  ;;  %v3069_v28 = vld [vmem:[%s4597_s3 + $0x144] ss:$8 sps:$4 sm:$0xff]   ;;  %v3073_v35 = vld [vmem:[%s4597_s3 + $0x150] ss:$8 sps:$4 sm:$0xff]  }
  0x2a   :  { %v3076_v36 = vld [vmem:[%s4597_s3 + $0x550] ss:$8 sps:$4 sm:$0xff]   ;;  %v3084_v39 = vld [vmem:[%s4597_s3 + $0x564] ss:$8 sps:$4 sm:$0xff]  }
  0x2b   :  { %2128 = vmatpush1.bf16.msra.mxu1 %v3011_v44  ;;  %v411_v44 = vmul.f32 0.2, %v347_v26  ;;  %2139 = vmatprep.mubr.bf16.mxu1 %v540_v43  ;;  %v3079_v43 = vld [vmem:[%s4597_s3 + $0x160] ss:$8 sps:$4 sm:$0xff]  }
  0x2c   :  { %2340 = vmatpush1.bf16.msra.mxu0 %v3012_v45  ;;  %2129 = vmatprep.subr.bf16.mxu1 %v3013_v46  ;;  %v355_v45 = vadd.f32 %v3597_v31, %v207_v37  ;;  %v3035_v46 = vld [vmem:[%s4597_s3 + $0xe0] ss:$8 sps:$4 sm:$0xff]   ;;  %v3706_v37 = vsub.s32 3, %v3488_v42 }
  0x2d   :  { %2341 = vmatprep.subr.bf16.mxu0 %v3015_v48  ;;  %v500_v48 = vmax.f32 %v372_v29, %v436_v40  ;;  %v3072_v29 = vld [vmem:[%s4597_s3 + $0x544] ss:$8 sps:$4 sm:$0xff]  }
  0x2e   :  { %v419_v53 = vmul.f32 0.2, %v355_v45  ;;  %v35_v40 = vld [vmem:[%s4598_s0 + $0x80] sm:$0xff] }
  0x2f   :  { %2130 = vmatpush1.bf16.msra.mxu1 %v3017_v50  ;;  %v371_v50 = vadd.f32 %v3597_v31, %v223_v41  ;;  %v43_v41 = vld [vmem:[%s4598_s0 + $0xc0] sm:$0xff] }
  0x30   :  { %2342 = vmatpush1.bf16.msra.mxu0 %v3018_v51  ;;  %2131 = vmatprep.subr.bf16.mxu1 %v3019_v57  ;;  %v3036_v51 = vld [vmem:[%s4597_s3 + $0x4e0] ss:$8 sps:$4 sm:$0xff]   ;;  %v548_v57 = vpack.c.bf16 %v500_v48, %v484_v47  ;;  %v483_v0 = vmax.f32 %v355_v45, %v419_v53  ;;  %v100_v45 = vunpack.c.h.bf16 %v43_v41  ;;  %v99_v47 = vunpack.c.l.bf16 %v43_v41 }
  0x31   :  { %2343 = vmatprep.subr.bf16.mxu0 %v3021_v62  ;;  %v435_v58 = vmul.f32 0.2, %v371_v50  ;;  %v475_v62 = vmax.f32 %v347_v26, %v411_v44  ;;  %v3064_v26 = vld [vmem:[%s4597_s3 + $0x530] ss:$8 sps:$4 sm:$0xff]   ;;  %v84_v44 = vunpack.c.h.bf16 %v35_v40  ;;  %v39_v48 = vld [vmem:[%s4598_s0 + $0xa0] sm:$0xff]  ;;  %v3800_v41 = vld [vmem:[%s4598_s0 + $0x28] sm:$0xff] }
  0x32   :  { %2351 = vmatprep.mubr.bf16.mxu0 %v548_v57  ;;  %v3082_v53 = vld [vmem:[%s4597_s3 + $0x560] ss:$8 sps:$4 sm:$0xff]  }
  0x33   :  { %2132 = vmatpush1.bf16.msra.mxu1 %v3023_v9  ;;  %v499_v1 = vmax.f32 %v371_v50, %v435_v58  ;;  %v3043_v9 = vld [vmem:[%s4597_s3 + $0x100] ss:$8 sps:$4 sm:$0xff]   ;;  %v3731_v50 = vrot.slane %v3522_v55, %v3706_v37  ;;  %v232_v57 = vmul.f32 %v3533_v60, %v84_v44  ;;  %v248_v58 = vmul.f32 %v3533_v60, %v100_v45 }
  0x34   :  { %2344 = vmatpush1.bf16.msra.mxu0 %v3024_v10  ;;  %2133 = vmatprep.subr.bf16.mxu1 %v3025_v14  ;;  %v539_v10 = vpack.c.bf16 %v491_v63, %v475_v62  ;;  %v3046_v14 = vld [vmem:[%s4597_s3 + $0x500] ss:$8 sps:$4 sm:$0xff]   ;;  %v108_v62 = vunpack.c.h.bf16 %v47_v49  ;;  %v3090_v63 = vld [vmem:[%s4597_s3 + $0x574] ss:$8 sps:$4 sm:$0xff]  }
  0x35   :  { %2345 = vmatprep.subr.bf16.mxu0 %v3027_v19  ;;  %v547_v11 = vpack.c.bf16 %v499_v1, %v483_v0  ;;  %v3057_v19 = vld [vmem:[%s4597_s3 + $0x124] ss:$8 sps:$4 sm:$0xff]   ;;  %v247_v1 = vmul.f32 %v3548_v2, %v99_v47  ;;  %v380_v60 = vadd.f32 %v3536_v61, %v232_v57 }
  0x37   :  { %2134 = vmatpush1.bf16.msra.mxu1 %v3029_v32  ;;  %v3070_v32 = vld [vmem:[%s4597_s3 + $0x540] ss:$8 sps:$4 sm:$0xff]  }
  0x38   :  { %2346 = vmatpush1.bf16.msra.mxu0 %v3030_v33  ;;  %2135 = vmatprep.subr.bf16.mxu1 %v3031_v34  ;;  %v3075_v33 = vld [vmem:[%s4597_s3 + $0x154] ss:$8 sps:$4 sm:$0xff]  }
  0x39   :  { %2347 = vmatprep.subr.bf16.mxu0 %v3033_v38  ;;  %v3078_v34 = vld [vmem:[%s4597_s3 + $0x554] ss:$8 sps:$4 sm:$0xff]   ;;  %v3081_v38 = vld [vmem:[%s4597_s3 + $0x164] ss:$8 sps:$4 sm:$0xff]  }
  0x3b   :  { %2136 = vmatpush1.bf16.msra.mxu1 %v3035_v46  ;;  %v83_v46 = vunpack.c.l.bf16 %v35_v40 }
  0x3c   :  { %2348 = vmatpush1.bf16.msra.mxu0 %v3036_v51  ;;  %2137 = vmatprep.subr.bf16.mxu1 %v3037_v52  ;;  %v3735_v51 = vrot.slane %v3527_v56, %v3706_v37  ;;  %v3739_v52 = vrot.slane %v3555_v6, %v3706_v37 }
  0x3d   :  { %2349 = vmatprep.subr.bf16.mxu0 %v3039_v54  ;;  %v3087_v54 = vld [vmem:[%s4597_s3 + $0x174] ss:$8 sps:$4 sm:$0xff]   ;;  %v231_v0 = vmul.f32 %v3548_v2, %v83_v46  ;;  %v3093_v2 = vld [vmem:[%s4597_s3 + $0x184] ss:$8 sps:$4 sm:$0xff]  }
  0x3f   :  { %2138 = vmatpush1.bf16.msra.mxu1 %v3041_v59  ;;  %v92_v59 = vunpack.c.h.bf16 %v39_v48 }
  0x40   :  { %2350 = vmatpush1.bf16.msra.mxu0 %v3042_v3  ;;  %2160 = vmatprep.subr.bf16.mxu1 %v3045_v4  ;;  %v91_v3 = vunpack.c.l.bf16 %v39_v48  ;;  %v107_v4 = vunpack.c.l.bf16 %v47_v49  ;;  %v3809_v48 = vld [vmem:[%s4598_s0 + $0x68] sm:$0xff] }
  0x41   :  { %2372 = vmatprep.subr.bf16.mxu0 %v3048_v5  ;;  %v3085_v5 = vld [vmem:[%s4597_s3 + $0x170] ss:$8 sps:$4 sm:$0xff]  }
  0x42   :  { %2140 = vmatmul.mubr.bf16.vlgmr.msra.gmra.mrb[0].mxu1 %v539_v10  ;;  %v240_v10 = vmul.f32 %v3572_v12, %v92_v59  ;;  %v62_v59 = vunpack.c.h.bf16 %v3800_v41 }
  0x43   :  { %2352 = vmatmul.mubr.bf16.vlgmr.msra.gmra.mrb[0].mxu0 %v547_v11  ;;  %2161 = vmatpush1.bf16.msra.mxu1 %v3043_v9  ;;  %v396_v9 = vadd.f32 %v3536_v61, %v248_v58  ;;  %v256_v11 = vmul.f32 %v3572_v12, %v108_v62  ;;  %v395_v61 = vadd.f32 %v3563_v8, %v247_v1  ;;  %v78_v1 = vunpack.c.h.bf16 %v3809_v48 }
  0x44   :  { %2373 = vmatpush1.bf16.msra.mxu0 %v3046_v14  ;;  %2162 = vmatprep.subr.bf16.mxu1 %v3051_v15  ;;  %v3088_v14 = vld [vmem:[%s4597_s3 + $0x570] ss:$8 sps:$4 sm:$0xff]   ;;  %v3096_v15 = vld [vmem:[%s4597_s3 + $0x584] ss:$8 sps:$4 sm:$0xff]   ;;  %v255_v12 = vmul.f32 %v3591_v27, %v107_v4  ;;  %v3819_v62 = vrot.slane %v3560_v7, %v3706_v37  ;;  %v129_v4 = vsub.s32 2, %v3488_v42 }
  0x45   :  { %2374 = vmatprep.subr.bf16.mxu0 %v3054_v16  ;;  %v379_v16 = vadd.f32 %v3563_v8, %v231_v0  ;;  %v3108_v37 = vld [vmem:[%s4597_s3 + $0x5a4] ss:$8 sps:$4 sm:$0xff]  }
  0x46   :  { %v403_v8 = vadd.f32 %v3597_v31, %v255_v12  ;;  %v3114_v12 = vld [vmem:[%s4597_s3 + $0x5b4] ss:$8 sps:$4 sm:$0xff]  }
  0x47   :  { %2163 = vmatpush1.bf16.msra.mxu1 %v3049_v17  ;;  %v239_v17 = vmul.f32 %v3591_v27, %v91_v3  ;;  %v3091_v27 = vld [vmem:[%s4597_s3 + $0x180] ss:$8 sps:$4 sm:$0xff]   ;;  %v3105_v3 = vld [vmem:[%s4597_s3 + $0x1a4] ss:$8 sps:$4 sm:$0xff]  }
  0x48   :  { %2375 = vmatpush1.bf16.msra.mxu0 %v3052_v18  ;;  %2164 = vmatprep.subr.bf16.mxu1 %v3057_v19  ;;  %v444_v18 = vmul.f32 0.2, %v380_v60  ;;  %v460_v19 = vmul.f32 0.2, %v396_v9 }
  0x49   :  { %2376 = vmatprep.subr.bf16.mxu0 %v3060_v20  ;;  %v388_v20 = vadd.f32 %v3575_v13, %v240_v10  ;;  %v226_v10 = vmul.f32 %v3739_v52, %v78_v1  ;;  %v3130_v1 = vld [vmem:[%s4597_s3 + $0x5e0] ss:$8 sps:$4 sm:$0xff]  }
  0x4b   :  { %2165 = vmatpush1.bf16.msra.mxu1 %v3055_v21  ;;  %v404_v21 = vadd.f32 %v3575_v13, %v256_v11 }
  0x4c   :  { %2377 = vmatpush1.bf16.msra.mxu0 %v3058_v22  ;;  %2166 = vmatprep.subr.bf16.mxu1 %v3063_v23  ;;  %v443_v22 = vmul.f32 0.2, %v379_v16  ;;  %v459_v23 = vmul.f32 0.2, %v395_v61 }
  0x4d   :  { %2378 = vmatprep.subr.bf16.mxu0 %v3066_v24  ;;  %v387_v24 = vadd.f32 %v3597_v31, %v239_v17  ;;  %v468_v13 = vmul.f32 0.2, %v404_v21  ;;  %v3099_v31 = vld [vmem:[%s4597_s3 + $0x194] ss:$8 sps:$4 sm:$0xff]  }
  0x4e   :  { %v3111_v17 = vld [vmem:[%s4597_s3 + $0x1b4] ss:$8 sps:$4 sm:$0xff]  }
  0x4f   :  { %2167 = vmatpush1.bf16.msra.mxu1 %v3061_v25  ;;  %v3094_v25 = vld [vmem:[%s4597_s3 + $0x580] ss:$8 sps:$4 sm:$0xff]   ;;  %v532_v40 = vmax.f32 %v404_v21, %v468_v13  ;;  %v3117_v13 = vld [vmem:[%s4597_s3 + $0x1c4] ss:$8 sps:$4 sm:$0xff]  }
  0x50   :  { %2379 = vmatpush1.bf16.msra.mxu0 %v3064_v26  ;;  %2168 = vmatprep.subr.bf16.mxu1 %v3069_v28  ;;  %v508_v26 = vmax.f32 %v380_v60, %v444_v18  ;;  %v524_v28 = vmax.f32 %v396_v9, %v460_v19  ;;  %v210_v60 = vmul.f32 %v3739_v52, %v62_v59 }
  0x51   :  { %2380 = vmatprep.subr.bf16.mxu0 %v3072_v29  ;;  %v452_v29 = vmul.f32 0.2, %v388_v20  ;;  %v3852_v18 = vrot.slane %v3522_v55, %v129_v4 }
  0x53   :  { %2169 = vmatpush1.bf16.msra.mxu1 %v3067_v30  ;;  %v3787_v30 = vld [vmem:[%s4598_s0 + $0x8] sm:$0xff] }
  0x54   :  { %2381 = vmatpush1.bf16.msra.mxu0 %v3070_v32  ;;  %2170 = vmatprep.subr.bf16.mxu1 %v3075_v33  ;;  %v507_v32 = vmax.f32 %v379_v16, %v443_v22  ;;  %v523_v33 = vmax.f32 %v395_v61, %v459_v23  ;;  %v54_v47 = vunpack.c.h.bf16 %v3787_v30  ;;  %v374_v61 = vadd.f32 %v3819_v62, %v226_v10 }
  0x55   :  { %2382 = vmatprep.subr.bf16.mxu0 %v3078_v34  ;;  %v451_v34 = vmul.f32 0.2, %v387_v24  ;;  %v53_v21 = vunpack.c.l.bf16 %v3787_v30 }
  0x56   :  { %v555_v44 = vpack.c.bf16 %v523_v33, %v507_v32  ;;  %v202_v58 = vmul.f32 %v3731_v50, %v54_v47 }
  0x57   :  { %2171 = vmatpush1.bf16.msra.mxu1 %v3073_v35  ;;  %v467_v35 = vmul.f32 0.2, %v403_v8  ;;  %v515_v45 = vmax.f32 %v387_v24, %v451_v34  ;;  %v438_v24 = vmul.f32 0.2, %v374_v61  ;;  %v201_v32 = vmul.f32 %v3852_v18, %v53_v21  ;;  %v3148_v21 = vld [vmem:[%s4597_s3 + $0x610] ss:$8 sps:$4 sm:$0xff]  }
  0x58   :  { %2383 = vmatpush1.bf16.msra.mxu0 %v3076_v36  ;;  %2172 = vmatprep.subr.bf16.mxu1 %v3081_v38  ;;  %v3795_v36 = vld [vmem:[%s4598_s0 + $0x48] sm:$0xff]  ;;  %v556_v38 = vpack.c.bf16 %v524_v28, %v508_v26  ;;  %v3862_v26 = vrot.slane %v3555_v6, %v129_v4 }
  0x59   :  { %2384 = vmatprep.subr.bf16.mxu0 %v3084_v39  ;;  %v516_v39 = vmax.f32 %v388_v20, %v452_v29  ;;  %v531_v46 = vmax.f32 %v403_v8, %v467_v35  ;;  %v69_v22 = vunpack.c.l.bf16 %v3795_v36  ;;  %v3109_v8 = vld [vmem:[%s4597_s3 + $0x1b0] ss:$8 sps:$4 sm:$0xff]   ;;  %v3120_v6 = vld [vmem:[%s4597_s3 + $0x5c4] ss:$8 sps:$4 sm:$0xff]   ;;  %v3876_v35 = vrot.slane %v3527_v56, %v129_v4 }
  0x5a   :  { %2149 = vmatprep.mubr.bf16.mxu1 %v556_v38  ;;  %v3112_v29 = vld [vmem:[%s4597_s3 + $0x5b0] ss:$8 sps:$4 sm:$0xff]  }
  0x5b   :  { %2173 = vmatpush1.bf16.msra.mxu1 %v3079_v43  ;;  %v3102_v43 = vld [vmem:[%s4597_s3 + $0x594] ss:$8 sps:$4 sm:$0xff]   ;;  %v564_v49 = vpack.c.bf16 %v532_v40, %v516_v39  ;;  %v563_v57 = vpack.c.bf16 %v531_v46, %v515_v45  ;;  %v217_v33 = vmul.f32 %v3852_v18, %v69_v22  ;;  %v3884_v40 = vrot.slane %v3560_v7, %v129_v4  ;;  %v3121_v46 = vld [vmem:[%s4597_s3 + $0x1d0] ss:$8 sps:$4 sm:$0xff]   ;;  %v3153_v22 = vld [vmem:[%s4597_s3 + $0x224] ss:$8 sps:$4 sm:$0xff]  }
  0x5c   :  { %2385 = vmatpush1.bf16.msra.mxu0 %v3082_v53  ;;  %2174 = vmatprep.subr.bf16.mxu1 %v3087_v54  ;;  %v70_v53 = vunpack.c.h.bf16 %v3795_v36  ;;  %v3097_v54 = vld [vmem:[%s4597_s3 + $0x190] ss:$8 sps:$4 sm:$0xff]   ;;  %v3115_v36 = vld [vmem:[%s4597_s3 + $0x1c0] ss:$8 sps:$4 sm:$0xff]   ;;  %v349_v7 = vadd.f32 %v3876_v35, %v201_v32 }
  0x5d   :  { %2386 = vmatprep.subr.bf16.mxu0 %v3090_v63  ;;  %2150 = vmatmul.mubr.bf16.gmra.mrb[4].mxu1 %v555_v44  ;;  %v3100_v63 = vld [vmem:[%s4597_s3 + $0x590] ss:$8 sps:$4 sm:$0xff]   ;;  %v3126_v44 = vld [vmem:[%s4597_s3 + $0x5d4] ss:$8 sps:$4 sm:$0xff]   ;;  %v365_v45 = vadd.f32 %v3876_v35, %v217_v33  ;;  %v40_v32 = vld [vmem:[%s4598_s0 + $0xa8] sm:$0xff] }
  0x5e   :  { %v218_v0 = vmul.f32 %v3731_v50, %v70_v53  ;;  %2361 = vmatprep.mubr.bf16.mxu0 %v564_v49  ;;  %v3124_v49 = vld [vmem:[%s4597_s3 + $0x5d0] ss:$8 sps:$4 sm:$0xff]   ;;  %v3129_v53 = vld [vmem:[%s4597_s3 + $0x1e4] ss:$8 sps:$4 sm:$0xff]  }
  0x5f   :  { %2175 = vmatpush1.bf16.msra.mxu1 %v3085_v5  ;;  %v350_v5 = vadd.f32 %v3735_v51, %v202_v58  ;;  %2362 = vmatmul.mubr.bf16.gmra.mrb[4].mxu0 %v563_v57  ;;  %v3127_v57 = vld [vmem:[%s4597_s3 + $0x1e0] ss:$8 sps:$4 sm:$0xff]   ;;  %v413_v58 = vmul.f32 0.2, %v349_v7  ;;  %v429_v59 = vmul.f32 0.2, %v365_v45 }
  0x60   :  { %2387 = vmatpush1.bf16.msra.mxu0 %v3088_v14  ;;  %2176 = vmatprep.subr.bf16.mxu1 %v3093_v2  ;;  %v366_v9 = vadd.f32 %v3735_v51, %v218_v0  ;;  %v358_v14 = vadd.f32 %v3819_v62, %v210_v60  ;;  %v3103_v2 = vld [vmem:[%s4597_s3 + $0x1a0] ss:$8 sps:$4 sm:$0xff]   ;;  %v3133_v4 = vld [vmem:[%s4597_s3 + $0x1f0] ss:$8 sps:$4 sm:$0xff]  }
  0x61   :  { %2388 = vmatprep.subr.bf16.mxu0 %v3096_v15  ;;  %v414_v11 = vmul.f32 0.2, %v350_v5  ;;  %v3106_v15 = vld [vmem:[%s4597_s3 + $0x5a0] ss:$8 sps:$4 sm:$0xff]   ;;  %v493_v60 = vmax.f32 %v365_v45, %v429_v59  ;;  %v93_v45 = vunpack.c.l.bf16 %v40_v32 }
  0x62   :  { %v430_v16 = vmul.f32 0.2, %v366_v9  ;;  %v422_v20 = vmul.f32 0.2, %v358_v14  ;;  %v48_v33 = vld [vmem:[%s4598_s0 + $0xe8] sm:$0xff] }
  0x63   :  { %2177 = vmatpush1.bf16.msra.mxu1 %v3091_v27  ;;  %v478_v19 = vmax.f32 %v350_v5, %v414_v11  ;;  %v61_v27 = vunpack.c.l.bf16 %v3800_v41  ;;  %v3118_v41 = vld [vmem:[%s4597_s3 + $0x5c0] ss:$8 sps:$4 sm:$0xff]   ;;  %v477_v5 = vmax.f32 %v349_v7, %v413_v58  ;;  %v3136_v11 = vld [vmem:[%s4597_s3 + $0x5f0] ss:$8 sps:$4 sm:$0xff]  }
  0x64   :  { %2389 = vmatpush1.bf16.msra.mxu0 %v3094_v25  ;;  %2178 = vmatprep.subr.bf16.mxu1 %v3099_v31  ;;  %v494_v23 = vmax.f32 %v366_v9, %v430_v16  ;;  %v77_v25 = vunpack.c.l.bf16 %v3809_v48  ;;  %v486_v28 = vmax.f32 %v358_v14, %v422_v20  ;;  %v502_v31 = vmax.f32 %v374_v61, %v438_v24  ;;  %v3141_v14 = vld [vmem:[%s4597_s3 + $0x204] ss:$8 sps:$4 sm:$0xff]   ;;  %v3145_v20 = vld [vmem:[%s4597_s3 + $0x210] ss:$8 sps:$4 sm:$0xff]  }
  0x65   :  { %2390 = vmatprep.subr.bf16.mxu0 %v3102_v43  ;;  %v209_v38 = vmul.f32 %v3862_v26, %v61_v27  ;;  %v3123_v43 = vld [vmem:[%s4597_s3 + $0x1d4] ss:$8 sps:$4 sm:$0xff]   ;;  %v541_v16 = vpack.c.bf16 %v493_v60, %v477_v5  ;;  %v3156_v24 = vld [vmem:[%s4597_s3 + $0x624] ss:$8 sps:$4 sm:$0xff]  }
  0x66   :  { %v542_v30 = vpack.c.bf16 %v494_v23, %v478_v19  ;;  %v550_v34 = vpack.c.bf16 %v502_v31, %v486_v28  ;;  %v225_v39 = vmul.f32 %v3862_v26, %v77_v25  ;;  %v3150_v19 = vld [vmem:[%s4597_s3 + $0x614] ss:$8 sps:$4 sm:$0xff]   ;;  %v3957_v23 = vsub.s32 5, %v3488_v42  ;;  %v36_v27 = vld [vmem:[%s4598_s0 + $0x88] sm:$0xff] }
  0x67   :  { %2179 = vmatpush1.bf16.msra.mxu1 %v3097_v54  ;;  %v357_v47 = vadd.f32 %v3884_v40, %v209_v38  ;;  %v3132_v54 = vld [vmem:[%s4597_s3 + $0x5e4] ss:$8 sps:$4 sm:$0xff]   ;;  %v3154_v28 = vld [vmem:[%s4597_s3 + $0x620] ss:$8 sps:$4 sm:$0xff]   ;;  %v3162_v38 = vld [vmem:[%s4597_s3 + $0x634] ss:$8 sps:$4 sm:$0xff]  }
  0x68   :  { %2391 = vmatpush1.bf16.msra.mxu0 %v3100_v63  ;;  %2180 = vmatprep.subr.bf16.mxu1 %v3105_v3  ;;  %v373_v48 = vadd.f32 %v3884_v40, %v225_v39  ;;  %v3135_v3 = vld [vmem:[%s4597_s3 + $0x1f4] ss:$8 sps:$4 sm:$0xff]   ;;  %v44_v25 = vld [vmem:[%s4598_s0 + $0xc8] sm:$0xff] }
  0x69   :  { %2392 = vmatprep.subr.bf16.mxu0 %v3108_v37  ;;  %2192 = vmatprep.mubr.bf16.mxu1 %v542_v30  ;;  %v421_v63 = vmul.f32 0.2, %v357_v47  ;;  %v3138_v37 = vld [vmem:[%s4597_s3 + $0x5f4] ss:$8 sps:$4 sm:$0xff]   ;;  %v85_v30 = vunpack.c.l.bf16 %v36_v27  ;;  %v101_v31 = vunpack.c.l.bf16 %v44_v25 }
  0x6a   :  { %2404 = vmatprep.mubr.bf16.mxu0 %v550_v34  ;;  %v437_v0 = vmul.f32 0.2, %v373_v48  ;;  %v3985_v34 = vrot.slane %v3522_v55, %v3957_v23  ;;  %v3171_v60 = vld [vmem:[%s4597_s3 + $0x254] ss:$8 sps:$4 sm:$0xff]  }
  0x6b   :  { %2181 = vmatpush1.bf16.msra.mxu1 %v3103_v2  ;;  %v485_v9 = vmax.f32 %v357_v47, %v421_v63  ;;  %v3144_v2 = vld [vmem:[%s4597_s3 + $0x604] ss:$8 sps:$4 sm:$0xff]   ;;  %v233_v7 = vmul.f32 %v3852_v18, %v85_v30  ;;  %v249_v55 = vmul.f32 %v3852_v18, %v101_v31  ;;  %v3160_v18 = vld [vmem:[%s4597_s3 + $0x630] ss:$8 sps:$4 sm:$0xff]  }
  0x6c   :  { %2393 = vmatpush1.bf16.msra.mxu0 %v3106_v15  ;;  %2182 = vmatprep.subr.bf16.mxu1 %v3111_v17  ;;  %v501_v10 = vmax.f32 %v373_v48, %v437_v0  ;;  %v3139_v15 = vld [vmem:[%s4597_s3 + $0x200] ss:$8 sps:$4 sm:$0xff]   ;;  %v3172_v31 = vld [vmem:[%s4597_s3 + $0x650] ss:$8 sps:$4 sm:$0xff]  }
  0x6d   :  { %2394 = vmatprep.subr.bf16.mxu0 %v3114_v12  ;;  %v3142_v17 = vld [vmem:[%s4597_s3 + $0x600] ss:$8 sps:$4 sm:$0xff]   ;;  %v3147_v12 = vld [vmem:[%s4597_s3 + $0x214] ss:$8 sps:$4 sm:$0xff]  }
  0x6e   :  { %v549_v61 = vpack.c.bf16 %v501_v10, %v485_v9 }
  0x6f   :  { %2183 = vmatpush1.bf16.msra.mxu1 %v3109_v8  ;;  %v3151_v8 = vld [vmem:[%s4597_s3 + $0x220] ss:$8 sps:$4 sm:$0xff]  }
  0x70   :  { %2395 = vmatpush1.bf16.msra.mxu0 %v3112_v29  ;;  %2184 = vmatprep.subr.bf16.mxu1 %v3117_v13  ;;  %v86_v29 = vunpack.c.h.bf16 %v36_v27  ;;  %v102_v13 = vunpack.c.h.bf16 %v44_v25  ;;  %v4053_v27 = vld [vmem:[%s4598_s0 + $0x70] sm:$0xff] }
  0x71   :  { %2396 = vmatprep.subr.bf16.mxu0 %v3120_v6  ;;  %v3159_v6 = vld [vmem:[%s4597_s3 + $0x234] ss:$8 sps:$4 sm:$0xff]   ;;  %v3169_v25 = vld [vmem:[%s4597_s3 + $0x250] ss:$8 sps:$4 sm:$0xff]  }
  0x72   :  { %v234_v39 = vmul.f32 %v3731_v50, %v86_v29 }
  0x73   :  { %2185 = vmatpush1.bf16.msra.mxu1 %v3115_v36  ;;  %v3989_v36 = vrot.slane %v3527_v56, %v3957_v23  ;;  %v3157_v56 = vld [vmem:[%s4597_s3 + $0x230] ss:$8 sps:$4 sm:$0xff]  }
  0x74   :  { %2397 = vmatpush1.bf16.msra.mxu0 %v3118_v41  ;;  %2186 = vmatprep.subr.bf16.mxu1 %v3123_v43  ;;  %v250_v41 = vmul.f32 %v3731_v50, %v102_v13  ;;  %v94_v43 = vunpack.c.h.bf16 %v40_v32  ;;  %v382_v47 = vadd.f32 %v3735_v51, %v234_v39  ;;  %v4062_v13 = vld [vmem:[%s4599_s1 + $0x8] sm:$0xff] }
  0x75   :  { %2398 = vmatprep.subr.bf16.mxu0 %v3126_v44  ;;  %v110_v44 = vunpack.c.h.bf16 %v48_v33  ;;  %v4066_v30 = vrot.slane %v4062_v13, %v3957_v23  ;;  %v3180_v39 = vld [vmem:[%s4597_s3 + $0x664] ss:$8 sps:$4 sm:$0xff]  }
  0x76   :  { %v398_v48 = vadd.f32 %v3735_v51, %v250_v41  ;;  %v241_v51 = vmul.f32 %v3862_v26, %v93_v45  ;;  %v446_v58 = vmul.f32 0.2, %v382_v47 }
  0x77   :  { %2187 = vmatpush1.bf16.msra.mxu1 %v3121_v46  ;;  %v109_v46 = vunpack.c.l.bf16 %v48_v33  ;;  %v258_v50 = vmul.f32 %v3739_v52, %v110_v44  ;;  %v4084_v44 = vld [vmem:[%s4600_s2 + $0x8] sm:$0xff] }
  0x78   :  { %2399 = vmatpush1.bf16.msra.mxu0 %v3124_v49  ;;  %2188 = vmatprep.subr.bf16.mxu1 %v3129_v53  ;;  %v242_v49 = vmul.f32 %v3739_v52, %v94_v43  ;;  %v3165_v53 = vld [vmem:[%s4597_s3 + $0x244] ss:$8 sps:$4 sm:$0xff]   ;;  %v462_v59 = vmul.f32 0.2, %v398_v48  ;;  %v389_v5 = vadd.f32 %v3884_v40, %v241_v51  ;;  %v510_v9 = vmax.f32 %v382_v47, %v446_v58 }
  0x79   :  { %2400 = vmatprep.subr.bf16.mxu0 %v3132_v54  ;;  %v381_v54 = vadd.f32 %v3876_v35, %v233_v7  ;;  %v3168_v52 = vld [vmem:[%s4597_s3 + $0x644] ss:$8 sps:$4 sm:$0xff]   ;;  %v406_v0 = vadd.f32 %v3819_v62, %v258_v50  ;;  %v80_v43 = vunpack.c.h.bf16 %v4053_v27  ;;  %v4088_v7 = vrot.slane %v4084_v44, %v3957_v23 }
  0x7a   :  { %v390_v63 = vadd.f32 %v3819_v62, %v242_v49  ;;  %v526_v62 = vmax.f32 %v398_v48, %v462_v59  ;;  %v3183_v49 = vld [vmem:[%s4597_s3 + $0x274] ss:$8 sps:$4 sm:$0xff]  }
  0x7b   :  { %2189 = vmatpush1.bf16.msra.mxu1 %v3127_v57  ;;  %v397_v57 = vadd.f32 %v3876_v35, %v249_v55  ;;  %v3166_v35 = vld [vmem:[%s4597_s3 + $0x640] ss:$8 sps:$4 sm:$0xff]   ;;  %v228_v23 = vmul.f32 %v4066_v30, %v80_v43 }
  0x7c   :  { %2401 = vmatpush1.bf16.msra.mxu0 %v3130_v1  ;;  %2190 = vmatprep.subr.bf16.mxu1 %v3135_v3  ;;  %v3163_v1 = vld [vmem:[%s4597_s3 + $0x240] ss:$8 sps:$4 sm:$0xff]   ;;  %v445_v3 = vmul.f32 0.2, %v381_v54  ;;  %v454_v10 = vmul.f32 0.2, %v390_v63 }
  0x7d   :  { %2402 = vmatprep.subr.bf16.mxu0 %v3138_v37  ;;  %v461_v37 = vmul.f32 0.2, %v397_v57 }
  0x7f   :  { %2191 = vmatpush1.bf16.msra.mxu1 %v3133_v4  ;;  %v257_v4 = vmul.f32 %v3862_v26, %v109_v46  ;;  %v3174_v26 = vld [vmem:[%s4597_s3 + $0x654] ss:$8 sps:$4 sm:$0xff]   ;;  %v3175_v46 = vld [vmem:[%s4597_s3 + $0x260] ss:$8 sps:$4 sm:$0xff]  }
  0x80   :  { %2403 = vmatpush1.bf16.msra.mxu0 %v3136_v11  ;;  %2213 = vmatprep.subr.bf16.mxu1 %v3141_v14  ;;  %v470_v11 = vmul.f32 0.2, %v406_v0  ;;  %v4033_v14 = vld [vmem:[%s4598_s0 + $0x10] sm:$0xff] }
  0x81   :  { %2425 = vmatprep.subr.bf16.mxu0 %v3144_v2  ;;  %v509_v2 = vmax.f32 %v381_v54, %v445_v3 }
  0x82   :  { %2193 = vmatmul.mubr.bf16.vlgmr.msra.gmra.mrb[0].mxu1 %v541_v16  ;;  %v405_v16 = vadd.f32 %v3884_v40, %v257_v4  ;;  %v56_v40 = vunpack.c.h.bf16 %v4033_v14 }
  0x83   :  { %2405 = vmatmul.mubr.bf16.vlgmr.msra.gmra.mrb[0].mxu0 %v549_v61  ;;  %2214 = vmatpush1.bf16.msra.mxu1 %v3139_v15  ;;  %v525_v15 = vmax.f32 %v397_v57, %v461_v37  ;;  %v453_v61 = vmul.f32 0.2, %v389_v5  ;;  %v376_v57 = vadd.f32 %v4088_v7, %v228_v23 }
  0x84   :  { %2426 = vmatpush1.bf16.msra.mxu0 %v3142_v17  ;;  %2215 = vmatprep.subr.bf16.mxu1 %v3147_v12  ;;  %v4042_v17 = vld [vmem:[%s4598_s0 + $0x50] sm:$0xff]  ;;  %v558_v12 = vpack.c.bf16 %v526_v62, %v510_v9  ;;  %v204_v33 = vmul.f32 %v3985_v34, %v56_v40  ;;  %v3190_v62 = vld [vmem:[%s4597_s3 + $0x680] ss:$8 sps:$4 sm:$0xff]  }
  0x85   :  { %2427 = vmatprep.subr.bf16.mxu0 %v3150_v19  ;;  %v518_v19 = vmax.f32 %v390_v63, %v454_v10  ;;  %v72_v29 = vunpack.c.h.bf16 %v4042_v17  ;;  %v440_v59 = vmul.f32 0.2, %v376_v57  ;;  %v3181_v63 = vld [vmem:[%s4597_s3 + $0x270] ss:$8 sps:$4 sm:$0xff]   ;;  %v3195_v10 = vld [vmem:[%s4597_s3 + $0x294] ss:$8 sps:$4 sm:$0xff]  }
  0x86   :  { %2202 = vmatprep.mubr.bf16.mxu1 %v558_v12  ;;  %v352_v45 = vadd.f32 %v3989_v36, %v204_v33 }
  0x87   :  { %2216 = vmatpush1.bf16.msra.mxu1 %v3145_v20  ;;  %v534_v20 = vmax.f32 %v406_v0, %v470_v11  ;;  %v220_v41 = vmul.f32 %v3985_v34, %v72_v29  ;;  %v3184_v0 = vld [vmem:[%s4597_s3 + $0x670] ss:$8 sps:$4 sm:$0xff]   ;;  %v504_v4 = vmax.f32 %v376_v57, %v440_v59  ;;  %v3198_v11 = vld [vmem:[%s4597_s3 + $0x694] ss:$8 sps:$4 sm:$0xff]  }
  0x88   :  { %2428 = vmatpush1.bf16.msra.mxu0 %v3148_v21  ;;  %2217 = vmatprep.subr.bf16.mxu1 %v3153_v22  ;;  %v4047_v21 = vld [vmem:[%s4598_s0 + $0x30] sm:$0xff]  ;;  %v557_v22 = vpack.c.bf16 %v525_v15, %v509_v2  ;;  %v416_v50 = vmul.f32 0.2, %v352_v45  ;;  %v71_v2 = vunpack.c.l.bf16 %v4042_v17  ;;  %v4138_v15 = vld [vmem:[%s4599_s1] sm:$0xff] }
  0x89   :  { %2429 = vmatprep.subr.bf16.mxu0 %v3156_v24  ;;  %v469_v24 = vmul.f32 0.2, %v405_v16  ;;  %v368_v47 = vadd.f32 %v3989_v36, %v220_v41  ;;  %v63_v12 = vunpack.c.l.bf16 %v4047_v21  ;;  %v3196_v17 = vld [vmem:[%s4597_s3 + $0x690] ss:$8 sps:$4 sm:$0xff]  }
  0x8a   :  { %2203 = vmatmul.mubr.bf16.gmra.mrb[4].mxu1 %v557_v22  ;;  %v480_v51 = vmax.f32 %v352_v45, %v416_v50  ;;  %v3213_v45 = vld [vmem:[%s4597_s3 + $0x2c4] ss:$8 sps:$4 sm:$0xff]   ;;  %v3214_v50 = vld [vmem:[%s4597_s3 + $0x6c0] ss:$8 sps:$4 sm:$0xff]   ;;  %v3217_v57 = vld [vmem:[%s4597_s3 + $0x2d0] ss:$8 sps:$4 sm:$0xff]  }
  0x8b   :  { %2218 = vmatpush1.bf16.msra.mxu1 %v3151_v8  ;;  %v517_v8 = vmax.f32 %v389_v5, %v453_v61  ;;  %v533_v32 = vmax.f32 %v405_v16, %v469_v24  ;;  %v137_v5 = vsub.s32 4, %v3488_v42  ;;  %v3193_v61 = vld [vmem:[%s4597_s3 + $0x290] ss:$8 sps:$4 sm:$0xff]  }
  0x8c   :  { %2430 = vmatpush1.bf16.msra.mxu0 %v3154_v28  ;;  %2219 = vmatprep.subr.bf16.mxu1 %v3159_v6  ;;  %v566_v28 = vpack.c.bf16 %v534_v20, %v518_v19  ;;  %v3177_v6 = vld [vmem:[%s4597_s3 + $0x264] ss:$8 sps:$4 sm:$0xff]   ;;  %v79_v19 = vunpack.c.l.bf16 %v4053_v27  ;;  %v3199_v27 = vld [vmem:[%s4597_s3 + $0x2a0] ss:$8 sps:$4 sm:$0xff]  }
  0x8d   :  { %2431 = vmatprep.subr.bf16.mxu0 %v3162_v38  ;;  %v64_v38 = vunpack.c.h.bf16 %v4047_v21  ;;  %v565_v55 = vpack.c.bf16 %v533_v32, %v517_v8  ;;  %v4141_v16 = vrot.slane %v4138_v15, %v137_v5  ;;  %v3201_v20 = vld [vmem:[%s4597_s3 + $0x2a4] ss:$8 sps:$4 sm:$0xff]   ;;  %v4176_v29 = vrot.slane %v4084_v44, %v137_v5  ;;  %v3210_v32 = vld [vmem:[%s4597_s3 + $0x6b4] ss:$8 sps:$4 sm:$0xff]  }
  0x8e   :  { %2414 = vmatprep.mubr.bf16.mxu0 %v566_v28  ;;  %v3204_v21 = vld [vmem:[%s4597_s3 + $0x6a4] ss:$8 sps:$4 sm:$0xff]  }
  0x8f   :  { %2220 = vmatpush1.bf16.msra.mxu1 %v3157_v56  ;;  %v3178_v56 = vld [vmem:[%s4597_s3 + $0x660] ss:$8 sps:$4 sm:$0xff]   ;;  %v212_v48 = vmul.f32 %v4066_v30, %v64_v38  ;;  %2415 = vmatmul.mubr.bf16.gmra.mrb[4].mxu0 %v565_v55  ;;  %v219_v24 = vmul.f32 %v4141_v16, %v71_v2  ;;  %v3208_v55 = vld [vmem:[%s4597_s3 + $0x6b0] ss:$8 sps:$4 sm:$0xff]  }
  0x90   :  { %2432 = vmatpush1.bf16.msra.mxu0 %v3160_v18  ;;  %2221 = vmatprep.subr.bf16.mxu1 %v3165_v53  ;;  %v3186_v18 = vld [vmem:[%s4597_s3 + $0x674] ss:$8 sps:$4 sm:$0xff]   ;;  %v432_v53 = vmul.f32 0.2, %v368_v47  ;;  %v4165_v8 = vld [vmem:[%s4600_s2] sm:$0xff] }
  0x91   :  { %2433 = vmatprep.subr.bf16.mxu0 %v3168_v52  ;;  %v360_v54 = vadd.f32 %v4088_v7, %v212_v48  ;;  %v4168_v40 = vrot.slane %v4165_v8, %v137_v5 }
  0x92   :  { %v496_v52 = vmax.f32 %v368_v47, %v432_v53  ;;  %v3222_v53 = vld [vmem:[%s4597_s3 + $0x6d4] ss:$8 sps:$4 sm:$0xff]  }
  0x93   :  { %2222 = vmatpush1.bf16.msra.mxu1 %v3163_v1  ;;  %v424_v58 = vmul.f32 0.2, %v360_v54  ;;  %v3189_v1 = vld [vmem:[%s4597_s3 + $0x284] ss:$8 sps:$4 sm:$0xff]   ;;  %v367_v38 = vadd.f32 %v4168_v40, %v219_v24 }
  0x94   :  { %2434 = vmatpush1.bf16.msra.mxu0 %v3166_v35  ;;  %2223 = vmatprep.subr.bf16.mxu1 %v3171_v60  ;;  %v3192_v35 = vld [vmem:[%s4597_s3 + $0x684] ss:$8 sps:$4 sm:$0xff]   ;;  %v544_v3 = vpack.c.bf16 %v496_v52, %v480_v51  ;;  %v3187_v60 = vld [vmem:[%s4597_s3 + $0x280] ss:$8 sps:$4 sm:$0xff]  }
  0x95   :  { %2435 = vmatprep.subr.bf16.mxu0 %v3174_v26  ;;  %v488_v37 = vmax.f32 %v360_v54, %v424_v58  ;;  %v55_v26 = vunpack.c.l.bf16 %v4033_v14  ;;  %v4149_v14 = vrot.slane %v4062_v13, %v137_v5  ;;  %v431_v48 = vmul.f32 0.2, %v367_v38  ;;  %v37_v5 = vld [vmem:[%s4598_s0 + $0x90] sm:$0xff] }
  0x96   :  { %2245 = vmatprep.mubr.bf16.mxu1 %v544_v3  ;;  %v4216_v54 = vsub.s32 7, %v3488_v42  ;;  %v3226_v3 = vld [vmem:[%s4597_s3 + $0x6e0] ss:$8 sps:$4 sm:$0xff]  }
  0x97   :  { %2224 = vmatpush1.bf16.msra.mxu1 %v3169_v25  ;;  %v552_v9 = vpack.c.bf16 %v504_v4, %v488_v37  ;;  %v203_v22 = vmul.f32 %v4141_v16, %v55_v26  ;;  %v211_v25 = vmul.f32 %v4149_v14, %v63_v12  ;;  %v227_v28 = vmul.f32 %v4149_v14, %v79_v19  ;;  %v49_v26 = vld [vmem:[%s4598_s0 + $0xf0] sm:$0xff] }
  0x98   :  { %2436 = vmatpush1.bf16.msra.mxu0 %v3172_v31  ;;  %2225 = vmatprep.subr.bf16.mxu1 %v3177_v6  ;;  %v3202_v31 = vld [vmem:[%s4597_s3 + $0x6a0] ss:$8 sps:$4 sm:$0xff]   ;;  %v3207_v6 = vld [vmem:[%s4597_s3 + $0x2b4] ss:$8 sps:$4 sm:$0xff]   ;;  %v495_v52 = vmax.f32 %v367_v38, %v431_v48 }
  0x99   :  { %2437 = vmatprep.subr.bf16.mxu0 %v3180_v39  ;;  %2457 = vmatprep.mubr.bf16.mxu0 %v552_v9  ;;  %v351_v33 = vadd.f32 %v4168_v40, %v203_v22  ;;  %v3205_v39 = vld [vmem:[%s4597_s3 + $0x2b0] ss:$8 sps:$4 sm:$0xff]   ;;  %v359_v41 = vadd.f32 %v4176_v29, %v211_v25  ;;  %v375_v43 = vadd.f32 %v4176_v29, %v227_v28  ;;  %v3231_v12 = vld [vmem:[%s4597_s3 + $0x2f4] ss:$8 sps:$4 sm:$0xff]   ;;  %v111_v22 = vunpack.c.l.bf16 %v49_v26 }
  0x9a   :  { %v41_v9 = vld [vmem:[%s4598_s0 + $0xb0] sm:$0xff] }
  0x9b   :  { %2226 = vmatpush1.bf16.msra.mxu1 %v3175_v46  ;;  %v3216_v46 = vld [vmem:[%s4597_s3 + $0x6c4] ss:$8 sps:$4 sm:$0xff]   ;;  %v415_v47 = vmul.f32 0.2, %v351_v33  ;;  %v423_v23 = vmul.f32 0.2, %v359_v41  ;;  %v96_v2 = vunpack.c.h.bf16 %v41_v9  ;;  %v259_v38 = vmul.f32 %v4149_v14, %v111_v22 }
  0x9c   :  { %2438 = vmatpush1.bf16.msra.mxu0 %v3178_v56  ;;  %2227 = vmatprep.subr.bf16.mxu1 %v3183_v49  ;;  %v3211_v56 = vld [vmem:[%s4597_s3 + $0x2c0] ss:$8 sps:$4 sm:$0xff]   ;;  %v439_v49 = vmul.f32 0.2, %v375_v43  ;;  %v3234_v19 = vld [vmem:[%s4597_s3 + $0x6f4] ss:$8 sps:$4 sm:$0xff]   ;;  %v4350_v22 = vrot.slane %v4084_v44, %v4216_v54 }
  0x9d   :  { %2439 = vmatprep.subr.bf16.mxu0 %v3186_v18  ;;  %v3219_v18 = vld [vmem:[%s4597_s3 + $0x2d4] ss:$8 sps:$4 sm:$0xff]   ;;  %v479_v51 = vmax.f32 %v351_v33, %v415_v47  ;;  %v487_v58 = vmax.f32 %v359_v41, %v423_v23  ;;  %v244_v25 = vmul.f32 %v4066_v30, %v96_v2 }
  0x9e   :  { %v503_v59 = vmax.f32 %v375_v43, %v439_v49 }
  0x9f   :  { %2228 = vmatpush1.bf16.msra.mxu1 %v3181_v63  ;;  %v3220_v63 = vld [vmem:[%s4597_s3 + $0x6d0] ss:$8 sps:$4 sm:$0xff]   ;;  %v4236_v37 = vpack.c.bf16 %v495_v52, %v479_v51  ;;  %v392_v43 = vadd.f32 %v4088_v7, %v244_v25 }
  0xa0   :  { %2440 = vmatpush1.bf16.msra.mxu0 %v3184_v0  ;;  %2229 = vmatprep.subr.bf16.mxu1 %v3189_v1  ;;  %v3225_v0 = vld [vmem:[%s4597_s3 + $0x2e4] ss:$8 sps:$4 sm:$0xff]   ;;  %v4238_v4 = vpack.c.bf16 %v503_v59, %v487_v58 }
  0xa1   :  { %2441 = vmatprep.subr.bf16.mxu0 %v3192_v35  ;;  %v3228_v1 = vld [vmem:[%s4597_s3 + $0x6e4] ss:$8 sps:$4 sm:$0xff]   ;;  %v3223_v35 = vld [vmem:[%s4597_s3 + $0x2e0] ss:$8 sps:$4 sm:$0xff]   ;;  %v456_v48 = vmul.f32 0.2, %v392_v43 }
  0xa3   :  { %2230 = vmatpush1.bf16.msra.mxu1 %v3187_v60  ;;  %v45_v60 = vld [vmem:[%s4598_s0 + $0xd0] sm:$0xff]  ;;  %v520_v52 = vmax.f32 %v392_v43, %v456_v48  ;;  %v3261_v48 = vld [vmem:[%s4597_s3 + $0x344] ss:$8 sps:$4 sm:$0xff]  }
  0xa4   :  { %2442 = vmatpush1.bf16.msra.mxu0 %v3190_v62  ;;  %2231 = vmatprep.subr.bf16.mxu1 %v3195_v10  ;;  %v4251_v62 = vrot.slane %v4138_v15, %v4216_v54  ;;  %v88_v10 = vunpack.c.h.bf16 %v37_v5 }
  0xa5   :  { %2443 = vmatprep.subr.bf16.mxu0 %v3198_v11  ;;  %v104_v11 = vunpack.c.h.bf16 %v45_v60 }
  0xa6   :  { %v236_v24 = vmul.f32 %v3985_v34, %v88_v10  ;;  %v4324_v10 = vld [vmem:[%s4598_s0 + $0x38] sm:$0xff] }
  0xa7   :  { %2232 = vmatpush1.bf16.msra.mxu1 %v3193_v61  ;;  %v87_v61 = vunpack.c.l.bf16 %v37_v5 }
  0xa8   :  { %2444 = vmatpush1.bf16.msra.mxu0 %v3196_v17  ;;  %2233 = vmatprep.subr.bf16.mxu1 %v3201_v20  ;;  %v112_v17 = vunpack.c.h.bf16 %v49_v26  ;;  %v103_v20 = vunpack.c.l.bf16 %v45_v60 }
  0xa9   :  { %2445 = vmatprep.subr.bf16.mxu0 %v3204_v21  ;;  %v95_v21 = vunpack.c.l.bf16 %v41_v9  ;;  %v235_v28 = vmul.f32 %v4141_v16, %v87_v61  ;;  %v4331_v61 = vld [vmem:[%s4598_s0 + $0x78] sm:$0xff] }
  0xaa   :  { %v82_v25 = vunpack.c.h.bf16 %v4331_v61 }
  0xab   :  { %2234 = vmatpush1.bf16.msra.mxu1 %v3199_v27  ;;  %v252_v27 = vmul.f32 %v3985_v34, %v104_v11  ;;  %v243_v33 = vmul.f32 %v4149_v14, %v95_v21  ;;  %v3232_v34 = vld [vmem:[%s4597_s3 + $0x6f0] ss:$8 sps:$4 sm:$0xff]   ;;  %v66_v21 = vunpack.c.h.bf16 %v4324_v10 }
  0xac   :  { %2446 = vmatpush1.bf16.msra.mxu0 %v3202_v31  ;;  %2235 = vmatprep.subr.bf16.mxu1 %v3207_v6  ;;  %v3229_v31 = vld [vmem:[%s4597_s3 + $0x2f0] ss:$8 sps:$4 sm:$0xff]   ;;  %v260_v6 = vmul.f32 %v4066_v30, %v112_v17  ;;  %v3237_v30 = vld [vmem:[%s4597_s3 + $0x304] ss:$8 sps:$4 sm:$0xff]  }
  0xad   :  { %2447 = vmatprep.subr.bf16.mxu0 %v3210_v32  ;;  %v251_v32 = vmul.f32 %v4141_v16, %v103_v20  ;;  %v400_v41 = vadd.f32 %v3989_v36, %v252_v27  ;;  %v3240_v16 = vld [vmem:[%s4597_s3 + $0x704] ss:$8 sps:$4 sm:$0xff]   ;;  %v391_v23 = vadd.f32 %v4176_v29, %v243_v33 }
  0xae   :  { %v408_v14 = vadd.f32 %v4088_v7, %v260_v6  ;;  %v3249_v17 = vld [vmem:[%s4597_s3 + $0x324] ss:$8 sps:$4 sm:$0xff]  }
  0xaf   :  { %2236 = vmatpush1.bf16.msra.mxu1 %v3205_v39  ;;  %v384_v39 = vadd.f32 %v3989_v36, %v236_v24  ;;  %v4291_v36 = vld [vmem:[%s4598_s0 + $0x18] sm:$0xff]  ;;  %v464_v47 = vmul.f32 0.2, %v400_v41  ;;  %v455_v58 = vmul.f32 0.2, %v391_v23 }
  0xb0   :  { %2448 = vmatpush1.bf16.msra.mxu0 %v3208_v55  ;;  %2237 = vmatprep.subr.bf16.mxu1 %v3213_v45  ;;  %v383_v55 = vadd.f32 %v4168_v40, %v235_v28  ;;  %v399_v45 = vadd.f32 %v4168_v40, %v251_v32  ;;  %v472_v49 = vmul.f32 0.2, %v408_v14  ;;  %v3238_v40 = vld [vmem:[%s4597_s3 + $0x700] ss:$8 sps:$4 sm:$0xff]   ;;  %v58_v9 = vunpack.c.h.bf16 %v4291_v36  ;;  %v3252_v20 = vld [vmem:[%s4597_s3 + $0x724] ss:$8 sps:$4 sm:$0xff]  }
  0xb1   :  { %2449 = vmatprep.subr.bf16.mxu0 %v3216_v46  ;;  %v3235_v46 = vld [vmem:[%s4597_s3 + $0x300] ss:$8 sps:$4 sm:$0xff]   ;;  %v528_v51 = vmax.f32 %v400_v41, %v464_v47  ;;  %v519_v26 = vmax.f32 %v391_v23, %v455_v58  ;;  %v3258_v41 = vld [vmem:[%s4597_s3 + $0x734] ss:$8 sps:$4 sm:$0xff]   ;;  %v3264_v23 = vld [vmem:[%s4597_s3 + $0x744] ss:$8 sps:$4 sm:$0xff]  }
  0xb2   :  { %v447_v7 = vmul.f32 0.2, %v383_v55  ;;  %v536_v59 = vmax.f32 %v408_v14, %v472_v49  ;;  %v3247_v32 = vld [vmem:[%s4597_s3 + $0x320] ss:$8 sps:$4 sm:$0xff]   ;;  %v3268_v58 = vld [vmem:[%s4597_s3 + $0x750] ss:$8 sps:$4 sm:$0xff]  }
  0xb3   :  { %2238 = vmatpush1.bf16.msra.mxu1 %v3211_v56  ;;  %v448_v56 = vmul.f32 0.2, %v384_v39 }
  0xb4   :  { %2450 = vmatpush1.bf16.msra.mxu0 %v3214_v50  ;;  %2239 = vmatprep.subr.bf16.mxu1 %v3219_v18  ;;  %v463_v50 = vmul.f32 0.2, %v399_v45  ;;  %v407_v18 = vadd.f32 %v4176_v29, %v259_v38  ;;  %v3246_v29 = vld [vmem:[%s4597_s3 + $0x714] ss:$8 sps:$4 sm:$0xff]   ;;  %v511_v5 = vmax.f32 %v383_v55, %v447_v7  ;;  %v568_v11 = vpack.c.bf16 %v536_v59, %v520_v52  ;;  %v3265_v52 = vld [vmem:[%s4597_s3 + $0x350] ss:$8 sps:$4 sm:$0xff]  }
  0xb5   :  { %2451 = vmatprep.subr.bf16.mxu0 %v3222_v53  ;;  %v3243_v53 = vld [vmem:[%s4597_s3 + $0x314] ss:$8 sps:$4 sm:$0xff]   ;;  %v3276_v59 = vld [vmem:[%s4597_s3 + $0x764] ss:$8 sps:$4 sm:$0xff]  }
  0xb6   :  { %v527_v60 = vmax.f32 %v399_v45, %v463_v50  ;;  %v3253_v45 = vld [vmem:[%s4597_s3 + $0x330] ss:$8 sps:$4 sm:$0xff]  }
  0xb7   :  { %2240 = vmatpush1.bf16.msra.mxu1 %v3217_v57  ;;  %v512_v57 = vmax.f32 %v384_v39, %v448_v56  ;;  %v3255_v39 = vld [vmem:[%s4597_s3 + $0x334] ss:$8 sps:$4 sm:$0xff]  }
  0xb8   :  { %2452 = vmatpush1.bf16.msra.mxu0 %v3220_v63  ;;  %2241 = vmatprep.subr.bf16.mxu1 %v3225_v0  ;;  %v471_v63 = vmul.f32 0.2, %v407_v18  ;;  %v4310_v0 = vld [vmem:[%s4598_s0 + $0x58] sm:$0xff]  ;;  %v559_v28 = vpack.c.bf16 %v527_v60, %v511_v5 }
  0xb9   :  { %2453 = vmatprep.subr.bf16.mxu0 %v3228_v1  ;;  %v4314_v1 = vrot.slane %v4165_v8, %v4216_v54  ;;  %v3279_v5 = vld [vmem:[%s4597_s3 + $0x374] ss:$8 sps:$4 sm:$0xff]  }
  0xba   :  { %v535_v2 = vmax.f32 %v407_v18, %v471_v63  ;;  %v3259_v18 = vld [vmem:[%s4597_s3 + $0x340] ss:$8 sps:$4 sm:$0xff]   ;;  %v3282_v60 = vld [vmem:[%s4597_s3 + $0x774] ss:$8 sps:$4 sm:$0xff]  }
  0xbb   :  { %2242 = vmatpush1.bf16.msra.mxu1 %v3223_v35  ;;  %v4318_v35 = vrot.slane %v4062_v13, %v4216_v54  ;;  %v3250_v54 = vld [vmem:[%s4597_s3 + $0x720] ss:$8 sps:$4 sm:$0xff]  }
  0xbc   :  { %2454 = vmatpush1.bf16.msra.mxu0 %v3226_v3  ;;  %2243 = vmatprep.subr.bf16.mxu1 %v3231_v12  ;;  %v560_v3 = vpack.c.bf16 %v528_v51, %v512_v57  ;;  %v3241_v12 = vld [vmem:[%s4597_s3 + $0x310] ss:$8 sps:$4 sm:$0xff]   ;;  %v3267_v57 = vld [vmem:[%s4597_s3 + $0x354] ss:$8 sps:$4 sm:$0xff]   ;;  %v3271_v63 = vld [vmem:[%s4597_s3 + $0x360] ss:$8 sps:$4 sm:$0xff]  }
  0xbd   :  { %2455 = vmatprep.subr.bf16.mxu0 %v3234_v19  ;;  %v206_v19 = vmul.f32 %v4251_v62, %v58_v9  ;;  %v214_v6 = vmul.f32 %v4318_v35, %v66_v21  ;;  %v3270_v51 = vld [vmem:[%s4597_s3 + $0x754] ss:$8 sps:$4 sm:$0xff]   ;;  %v3277_v9 = vld [vmem:[%s4597_s3 + $0x370] ss:$8 sps:$4 sm:$0xff]   ;;  %v3297_v21 = vld [vmem:[%s4597_s3 + $0x3a4] ss:$8 sps:$4 sm:$0xff]  }
  0xbf   :  { %2244 = vmatpush1.bf16.msra.mxu1 %v3229_v31  ;;  %v354_v27 = vadd.f32 %v4314_v1, %v206_v19  ;;  %v567_v31 = vpack.c.bf16 %v535_v2, %v519_v26  ;;  %v362_v43 = vadd.f32 %v4350_v22, %v214_v6  ;;  %v3285_v26 = vld [vmem:[%s4597_s3 + $0x384] ss:$8 sps:$4 sm:$0xff]   ;;  %v3294_v19 = vld [vmem:[%s4597_s3 + $0x794] ss:$8 sps:$4 sm:$0xff]  }
  0xc0   :  { %2456 = vmatpush1.bf16.msra.mxu0 %v3232_v34  ;;  %2266 = vmatprep.subr.bf16.mxu1 %v3237_v30  ;;  %v230_v34 = vmul.f32 %v4318_v35, %v82_v25  ;;  %v3288_v2 = vld [vmem:[%s4597_s3 + $0x784] ss:$8 sps:$4 sm:$0xff]   ;;  %v3295_v25 = vld [vmem:[%s4597_s3 + $0x3a0] ss:$8 sps:$4 sm:$0xff]   ;;  %v3306_v6 = vld [vmem:[%s4597_s3 + $0x7b4] ss:$8 sps:$4 sm:$0xff]  }
  0xc1   :  { %2478 = vmatprep.subr.bf16.mxu0 %v3240_v16  ;;  %v418_v38 = vmul.f32 0.2, %v354_v27  ;;  %v426_v55 = vmul.f32 0.2, %v362_v43 }
  0xc2   :  { %2246 = vmatmul.mubr.bf16.vlgmr.msra.gmra.mrb[0].mxu1 %v4236_v37  ;;  %v3244_v37 = vld [vmem:[%s4597_s3 + $0x710] ss:$8 sps:$4 sm:$0xff]   ;;  %v378_v14 = vadd.f32 %v4350_v22, %v230_v34 }
  0xc3   :  { %2458 = vmatmul.mubr.bf16.vlgmr.msra.gmra.mrb[0].mxu0 %v4238_v4  ;;  %2267 = vmatpush1.bf16.msra.mxu1 %v3235_v46  ;;  %v74_v4 = vunpack.c.h.bf16 %v4310_v0  ;;  %v482_v16 = vmax.f32 %v354_v27, %v418_v38  ;;  %v3256_v46 = vld [vmem:[%s4597_s3 + $0x730] ss:$8 sps:$4 sm:$0xff]   ;;  %v490_v49 = vmax.f32 %v362_v43, %v426_v55  ;;  %v145_v27 = vsub.s32 6, %v3488_v42 }
  0xc4   :  { %2479 = vmatpush1.bf16.msra.mxu0 %v3238_v40  ;;  %2268 = vmatprep.subr.bf16.mxu1 %v3243_v53  ;;  %v442_v47 = vmul.f32 0.2, %v378_v14  ;;  %v3262_v40 = vld [vmem:[%s4597_s3 + $0x740] ss:$8 sps:$4 sm:$0xff]   ;;  %v4472_v42 = vld [vmem:[%s4598_s0 + $0x98] sm:$0xff] }
  0xc5   :  { %2480 = vmatprep.subr.bf16.mxu0 %v3246_v29  ;;  %2255 = vmatprep.mubr.bf16.mxu1 %v560_v3  ;;  %v222_v24 = vmul.f32 %v4251_v62, %v74_v4  ;;  %v3273_v29 = vld [vmem:[%s4597_s3 + $0x364] ss:$8 sps:$4 sm:$0xff]   ;;  %v3274_v3 = vld [vmem:[%s4597_s3 + $0x760] ss:$8 sps:$4 sm:$0xff]   ;;  %v3291_v4 = vld [vmem:[%s4597_s3 + $0x394] ss:$8 sps:$4 sm:$0xff]   ;;  %v90_v43 = vunpack.c.h.bf16 %v4472_v42 }
  0xc6   :  { %2467 = vmatprep.mubr.bf16.mxu0 %v568_v11  ;;  %v506_v50 = vmax.f32 %v378_v14, %v442_v47  ;;  %v3280_v11 = vld [vmem:[%s4597_s3 + $0x770] ss:$8 sps:$4 sm:$0xff]   ;;  %v3312_v14 = vld [vmem:[%s4597_s3 + $0x7c4] ss:$8 sps:$4 sm:$0xff]  }
  0xc7   :  { %2269 = vmatpush1.bf16.msra.mxu1 %v3241_v12  ;;  %v370_v33 = vadd.f32 %v4314_v1, %v222_v24  ;;  %v3283_v12 = vld [vmem:[%s4597_s3 + $0x380] ss:$8 sps:$4 sm:$0xff]   ;;  %v3300_v24 = vld [vmem:[%s4597_s3 + $0x7a4] ss:$8 sps:$4 sm:$0xff]   ;;  %v4486_v38 = vld [vmem:[%s4598_s0 + $0xb8] sm:$0xff] }
  0xc8   :  { %2481 = vmatpush1.bf16.msra.mxu0 %v3244_v37  ;;  %2270 = vmatprep.subr.bf16.mxu1 %v3249_v17  ;;  %v554_v53 = vpack.c.bf16 %v506_v50, %v490_v49  ;;  %v3286_v37 = vld [vmem:[%s4597_s3 + $0x780] ss:$8 sps:$4 sm:$0xff]   ;;  %v3289_v17 = vld [vmem:[%s4597_s3 + $0x390] ss:$8 sps:$4 sm:$0xff]  }
  0xc9   :  { %2482 = vmatprep.subr.bf16.mxu0 %v3252_v20  ;;  %v434_v30 = vmul.f32 0.2, %v370_v33  ;;  %v3292_v20 = vld [vmem:[%s4597_s3 + $0x790] ss:$8 sps:$4 sm:$0xff]   ;;  %v3307_v49 = vld [vmem:[%s4597_s3 + $0x3c0] ss:$8 sps:$4 sm:$0xff]  }
  0xca   :  { %2256 = vmatmul.mubr.bf16.gmra.mrb[4].mxu1 %v559_v28  ;;  %v3298_v28 = vld [vmem:[%s4597_s3 + $0x7a0] ss:$8 sps:$4 sm:$0xff]   ;;  %v4491_v34 = vld [vmem:[%s4598_s0 + $0xf8] sm:$0xff] }
  0xcb   :  { %2468 = vmatmul.mubr.bf16.gmra.mrb[4].mxu0 %v567_v31  ;;  %2271 = vmatpush1.bf16.msra.mxu1 %v3247_v32  ;;  %v498_v56 = vmax.f32 %v370_v33, %v434_v30  ;;  %v3303_v31 = vld [vmem:[%s4597_s3 + $0x3b4] ss:$8 sps:$4 sm:$0xff]   ;;  %v57_v32 = vunpack.c.l.bf16 %v4291_v36  ;;  %v73_v36 = vunpack.c.l.bf16 %v4310_v0  ;;  %v3301_v30 = vld [vmem:[%s4597_s3 + $0x3b0] ss:$8 sps:$4 sm:$0xff]  }
  0xcc   :  { %2483 = vmatpush1.bf16.msra.mxu0 %v3250_v54  ;;  %2272 = vmatprep.subr.bf16.mxu1 %v3255_v39  ;;  %v4476_v54 = vrot.slane %v4138_v15, %v145_v27  ;;  %v4481_v33 = vld [vmem:[%s4598_s0 + $0xd8] sm:$0xff]  ;;  %v65_v15 = vunpack.c.l.bf16 %v4324_v10  ;;  %v81_v39 = vunpack.c.l.bf16 %v4331_v61  ;;  %v98_v10 = vunpack.c.h.bf16 %v4486_v38 }
  0xcd   :  { %2484 = vmatprep.subr.bf16.mxu0 %v3258_v41  ;;  %v546_v7 = vpack.c.bf16 %v498_v56, %v482_v16  ;;  %2510 = vmatprep.mubr.bf16.mxu0 %v554_v53  ;;  %v178_v41 = vrot.slane %v4062_v13, %v145_v27  ;;  %v3304_v16 = vld [vmem:[%s4597_s3 + $0x7b0] ss:$8 sps:$4 sm:$0xff]   ;;  %v106_v0 = vunpack.c.h.bf16 %v4481_v33  ;;  %v114_v61 = vunpack.c.h.bf16 %v4491_v34  ;;  %v3309_v13 = vld [vmem:[%s4597_s3 + $0x3c4] ss:$8 sps:$4 sm:$0xff]  }
  0xce   :  { %v205_v55 = vmul.f32 %v4476_v54, %v57_v32  ;;  %v246_v50 = vmul.f32 %v4318_v35, %v98_v10 }
  0xcf   :  { %2273 = vmatpush1.bf16.msra.mxu1 %v3253_v45  ;;  %2298 = vmatprep.mubr.bf16.mxu1 %v546_v7  ;;  %v4515_v45 = vrot.slane %v4165_v8, %v145_v27  ;;  %v213_v56 = vmul.f32 %v178_v41, %v65_v15  ;;  %v229_v47 = vmul.f32 %v178_v41, %v81_v39  ;;  %v3310_v7 = vld [vmem:[%s4597_s3 + $0x7c0] ss:$8 sps:$4 sm:$0xff]  }
  0xd0   :  { %2485 = vmatpush1.bf16.msra.mxu0 %v3256_v46  ;;  %2274 = vmatprep.subr.bf16.mxu1 %v3261_v48  ;;  %v221_v46 = vmul.f32 %v4476_v54, %v73_v36  ;;  %v326_v48 = vrot.slane %v4084_v44, %v145_v27  ;;  %v254_v8 = vmul.f32 %v4251_v62, %v106_v0  ;;  %v3315_v44 = vld [vmem:[%s4597_s3 + $0x3d4] ss:$8 sps:$4 sm:$0xff]  }
  0xd1   :  { %2486 = vmatprep.subr.bf16.mxu0 %v3264_v23  ;;  %v238_v23 = vmul.f32 %v4251_v62, %v90_v43  ;;  %v353_v53 = vadd.f32 %v4515_v45, %v205_v55  ;;  %v3328_v43 = vld [vmem:[%s4597_s3 + $0x7f0] ss:$8 sps:$4 sm:$0xff]  }
  0xd2   :  { %v377_v62 = vadd.f32 %v326_v48, %v229_v47 }
  0xd3   :  { %2275 = vmatpush1.bf16.msra.mxu1 %v3259_v18  ;;  %v262_v18 = vmul.f32 %v4318_v35, %v114_v61  ;;  %v386_v35 = vadd.f32 %v4314_v1, %v238_v23 }
  0xd4   :  { %2487 = vmatpush1.bf16.msra.mxu0 %v3262_v40  ;;  %2276 = vmatprep.subr.bf16.mxu1 %v3267_v57  ;;  %v3318_v40 = vld [vmem:[%s4597_s3 + $0x7d4] ss:$8 sps:$4 sm:$0xff]   ;;  %v369_v57 = vadd.f32 %v4515_v45, %v221_v46 }
  0xd5   :  { %2488 = vmatprep.subr.bf16.mxu0 %v3270_v51  ;;  %v361_v51 = vadd.f32 %v326_v48, %v213_v56 }
  0xd7   :  { %2277 = vmatpush1.bf16.msra.mxu1 %v3265_v52  ;;  %v89_v52 = vunpack.c.l.bf16 %v4472_v42 }
  0xd8   :  { %2489 = vmatpush1.bf16.msra.mxu0 %v3268_v58  ;;  %2278 = vmatprep.subr.bf16.mxu1 %v3273_v29  ;;  %v105_v58 = vunpack.c.l.bf16 %v4481_v33  ;;  %v97_v29 = vunpack.c.l.bf16 %v4486_v38 }
  0xd9   :  { %2490 = vmatprep.subr.bf16.mxu0 %v3276_v59  ;;  %v113_v59 = vunpack.c.l.bf16 %v4491_v34 }
  0xdb   :  { %2279 = vmatpush1.bf16.msra.mxu1 %v3271_v63  ;;  %v3313_v63 = vld [vmem:[%s4597_s3 + $0x3d0] ss:$8 sps:$4 sm:$0xff]  }
  0xdc   :  { %2491 = vmatpush1.bf16.msra.mxu0 %v3274_v3  ;;  %2280 = vmatprep.subr.bf16.mxu1 %v3279_v5  ;;  %v3316_v3 = vld [vmem:[%s4597_s3 + $0x7d0] ss:$8 sps:$4 sm:$0xff]   ;;  %v402_v5 = vadd.f32 %v4314_v1, %v254_v8  ;;  %v237_v1 = vmul.f32 %v4476_v54, %v89_v52 }
  0xdd   :  { %2492 = vmatprep.subr.bf16.mxu0 %v3282_v60  ;;  %v394_v60 = vadd.f32 %v4350_v22, %v246_v50 }
  0xde   :  { %v466_v27 = vmul.f32 0.2, %v402_v5  ;;  %v385_v38 = vadd.f32 %v4515_v45, %v237_v1 }
  0xdf   :  { %2281 = vmatpush1.bf16.msra.mxu1 %v3277_v9  ;;  %v410_v9 = vadd.f32 %v4350_v22, %v262_v18  ;;  %v3319_v22 = vld [vmem:[%s4597_s3 + $0x3e0] ss:$8 sps:$4 sm:$0xff]  }
  0xe0   :  { %2493 = vmatpush1.bf16.msra.mxu0 %v3280_v11  ;;  %2282 = vmatprep.subr.bf16.mxu1 %v3285_v26  ;;  %v3321_v11 = vld [vmem:[%s4597_s3 + $0x3e4] ss:$8 sps:$4 sm:$0xff]   ;;  %v449_v61 = vmul.f32 0.2, %v385_v38 }
  0xe1   :  { %2494 = vmatprep.subr.bf16.mxu0 %v3288_v2  ;;  %v3324_v26 = vld [vmem:[%s4597_s3 + $0x7e4] ss:$8 sps:$4 sm:$0xff]   ;;  %v417_v2 = vmul.f32 0.2, %v353_v53 }
  0xe2   :  { %v513_v47 = vmax.f32 %v385_v38, %v449_v61 }
  0xe3   :  { %2283 = vmatpush1.bf16.msra.mxu1 %v3283_v12  ;;  %v433_v12 = vmul.f32 0.2, %v369_v57  ;;  %v481_v42 = vmax.f32 %v353_v53, %v417_v2 }
  0xe4   :  { %2495 = vmatpush1.bf16.msra.mxu0 %v3286_v37  ;;  %2284 = vmatprep.subr.bf16.mxu1 %v3291_v4  ;;  %v425_v37 = vmul.f32 0.2, %v361_v51  ;;  %v441_v4 = vmul.f32 0.2, %v377_v62 }
  0xe5   :  { %2496 = vmatprep.subr.bf16.mxu0 %v3294_v19  ;;  %v3322_v19 = vld [vmem:[%s4597_s3 + $0x7e0] ss:$8 sps:$4 sm:$0xff]   ;;  %v497_v32 = vmax.f32 %v369_v57, %v433_v12 }
  0xe6   :  { %v505_v33 = vmax.f32 %v377_v62, %v441_v4 }
  0xe7   :  { %2285 = vmatpush1.bf16.msra.mxu1 %v3289_v17  ;;  %v450_v17 = vmul.f32 0.2, %v386_v35  ;;  %v545_v10 = vpack.c.bf16 %v497_v32, %v481_v42 }
  0xe8   :  { %2497 = vmatpush1.bf16.msra.mxu0 %v3292_v20  ;;  %2286 = vmatprep.subr.bf16.mxu1 %v3297_v21  ;;  %v253_v20 = vmul.f32 %v4476_v54, %v105_v58  ;;  %v245_v21 = vmul.f32 %v178_v41, %v97_v29  ;;  %v489_v54 = vmax.f32 %v361_v51, %v425_v37 }
  0xe9   :  { %2498 = vmatprep.subr.bf16.mxu0 %v3300_v24  ;;  %v261_v24 = vmul.f32 %v178_v41, %v113_v59  ;;  %v514_v34 = vmax.f32 %v386_v35, %v450_v17  ;;  %v3325_v41 = vld [vmem:[%s4597_s3 + $0x3f0] ss:$8 sps:$4 sm:$0xff]  }
  0xea   :  { %v401_v36 = vadd.f32 %v4515_v45, %v253_v20  ;;  %v393_v15 = vadd.f32 %v326_v48, %v245_v21 }
  0xeb   :  { %2287 = vmatpush1.bf16.msra.mxu1 %v3295_v25  ;;  %v458_v25 = vmul.f32 0.2, %v394_v60  ;;  %v409_v39 = vadd.f32 %v326_v48, %v261_v24 }
  0xec   :  { %2499 = vmatpush1.bf16.msra.mxu0 %v3298_v28  ;;  %2288 = vmatprep.subr.bf16.mxu1 %v3303_v31  ;;  %v474_v28 = vmul.f32 0.2, %v410_v9  ;;  %v3327_v31 = vld [vmem:[%s4597_s3 + $0x3f4] ss:$8 sps:$4 sm:$0xff]   ;;  %v457_v55 = vmul.f32 0.2, %v393_v15 }
  0xed   :  { %2500 = vmatprep.subr.bf16.mxu0 %v3306_v6  ;;  %v3330_v6 = vld [vmem:[%s4597_s3 + $0x7f4] ss:$8 sps:$4 sm:$0xff]   ;;  %v473_v45 = vmul.f32 0.2, %v409_v39 }
  0xee   :  { %v538_v0 = vmax.f32 %v410_v9, %v474_v28  ;;  %v521_v23 = vmax.f32 %v393_v15, %v457_v55 }
  0xef   :  { %2289 = vmatpush1.bf16.msra.mxu1 %v3301_v30  ;;  %v530_v30 = vmax.f32 %v402_v5, %v466_v27 }
  0xf0   :  { %2501 = vmatpush1.bf16.msra.mxu0 %v3304_v16  ;;  %2290 = vmatprep.subr.bf16.mxu1 %v3309_v13  ;;  %v522_v16 = vmax.f32 %v394_v60, %v458_v25  ;;  %v553_v13 = vpack.c.bf16 %v505_v33, %v489_v54 }
  0xf1   :  { %2502 = vmatprep.subr.bf16.mxu0 %v3312_v14  ;;  %v465_v14 = vmul.f32 0.2, %v401_v36  ;;  %v562_v46 = vpack.c.bf16 %v530_v30, %v514_v34 }
  0xf2   :  { %v570_v56 = vpack.c.bf16 %v538_v0, %v522_v16 }
  0xf3   :  { %2291 = vmatpush1.bf16.msra.mxu1 %v3307_v49  ;;  %v529_v48 = vmax.f32 %v401_v36, %v465_v14  ;;  %v537_v49 = vmax.f32 %v409_v39, %v473_v45 }
  0xf4   :  { %2503 = vmatpush1.bf16.msra.mxu0 %v3310_v7  ;;  %2292 = vmatprep.subr.bf16.mxu1 %v3315_v44 }
  0xf5   :  { %2504 = vmatprep.subr.bf16.mxu0 %v3318_v40  ;;  %v561_v7 = vpack.c.bf16 %v529_v48, %v513_v47  ;;  %v569_v8 = vpack.c.bf16 %v537_v49, %v521_v23 }
  0xf7   :  { %2293 = vmatpush1.bf16.msra.mxu1 %v3313_v63 }
  0xf8   :  { %2505 = vmatpush1.bf16.msra.mxu0 %v3316_v3  ;;  %2294 = vmatprep.subr.bf16.mxu1 %v3321_v11 }
  0xf9   :  { %2506 = vmatprep.subr.bf16.mxu0 %v3324_v26 }
  0xfb   :  { %2295 = vmatpush1.bf16.msra.mxu1 %v3319_v22 }
  0xfc   :  { %2507 = vmatpush1.bf16.msra.mxu0 %v3322_v19  ;;  %2296 = vmatprep.subr.bf16.mxu1 %v3327_v31 }
  0xfd   :  { %2508 = vmatprep.subr.bf16.mxu0 %v3330_v6 }
  0xff   :  { %2297 = vmatpush1.bf16.msra.mxu1 %v3325_v41 }
 0x100   :  { %2509 = vmatpush1.bf16.msra.mxu0 %v3328_v43 }
 0x102   :  { %2299 = vmatmul.mubr.bf16.vlgmr.msra.gmra.mrb[0].mxu1 %v545_v10 }
 0x103   :  { %2511 = vmatmul.mubr.bf16.vlgmr.msra.gmra.mrb[0].mxu0 %v553_v13  ;;  %2308 = vmatprep.mubr.bf16.mxu1 %v562_v46 }
 0x104   :  { %2520 = vmatprep.mubr.bf16.mxu0 %v570_v56 }
 0x10a   :  { %2309 = vmatmul.mubr.bf16.gmra.mrb[4].mxu1 %v561_v7 }
 0x10b   :  { %2521 = vmatmul.mubr.bf16.gmra.mrb[4].mxu0 %v569_v8 }
 0x1d5   :  { %v2300_v50 = vpop.f32.mrb[0].mxu1 }
 0x1d6   :  { %v2512_v18 = vpop.f32.mrb[0].mxu0  ;;  %v2302_v40 = vpop.f32.mrb[1].mxu1 }
 0x1d7   :  { %v2891_v44 = vadd.f32 %v2512_v18, %v2300_v50  ;;  %v2514_v53 = vpop.f32.mrb[1].mxu0  ;;  %v2304_v51 = vpop.f32.mrb[2].mxu1 }
 0x1d8   :  { %v2892_v57 = vadd.f32 %v2514_v53, %v2302_v40  ;;  %v2516_v62 = vpop.f32.mrb[2].mxu0  ;;  %v2306_v35 = vpop.f32.mrb[3].mxu1 }
 0x1d9   :  { %v2893_v52 = vadd.f32 %v2516_v62, %v2304_v51  ;;  %v2518_v58 = vpop.f32.mrb[3].mxu0 }
 0x1da   :  { %v2887_v29 = vpack.c.bf16 %v2892_v57, %v2891_v44  ;;  %v2894_v59 = vadd.f32 %v2518_v58, %v2306_v35 }
 0x1db   :  { %v2531_v63 = vpack.c.bf16 %v2893_v52, %v2891_v44 }
 0x1dc   :  { %2555 = vst [vmem:[%s4601_s4] sm:$0xff] %v2887_v29  ;;  %v2532_v3 = vpack.c.bf16 %v2894_v59, %v2892_v57  ;;  %v2888_v5 = vpack.c.bf16 %v2894_v59, %v2893_v52 }
 0x1dd   :  { %v2310_v60 = vpop.f32.mrb[4].mxu1  ;;  %v2559_v11 = vunpack.c.l.bf16 %v2531_v63  ;;  %v2561_v26 = vunpack.c.h.bf16 %v2531_v63 }
 0x1de   :  { %2556 = vst [vmem:[%s4601_s4 + $0x8] sm:$0xff] %v2888_v5  ;;  %v2522_v9 = vpop.f32.mrb[4].mxu0  ;;  %v2312_v12 = vpop.f32.mrb[5].mxu1  ;;  %v2560_v4 = vunpack.c.l.bf16 %v2532_v3  ;;  %v2562_v1 = vunpack.c.h.bf16 %v2532_v3 }
 0x1df   :  { %v2895_v2 = vadd.f32 %v2522_v9, %v2310_v60  ;;  %v2524_v37 = vpop.f32.mrb[5].mxu0  ;;  %v2314_v19 = vpop.f32.mrb[6].mxu1  ;;  %v2585_v28 = vmul.f32 %v2559_v11, %v2559_v11  ;;  %v2587_v31 = vmul.f32 %v2561_v26, %v2561_v26  ;;  %v2567_v38 = vadd.f32 %v2561_v26, %v2559_v11 }
 0x1e0   :  { %v2896_v22 = vadd.f32 %v2524_v37, %v2312_v12  ;;  %v2526_v17 = vpop.f32.mrb[6].mxu0  ;;  %v2316_v21 = vpop.f32.mrb[7].mxu1  ;;  %v2586_v42 = vmul.f32 %v2560_v4, %v2560_v4  ;;  %v2588_v32 = vmul.f32 %v2562_v1, %v2562_v1  ;;  %v2576_v15 = vadd.f32 %v2562_v1, %v2560_v4 }
 0x1e1   :  { %v2897_v20 = vadd.f32 %v2526_v17, %v2314_v19  ;;  %v2528_v24 = vpop.f32.mrb[7].mxu0  ;;  %v2593_v43 = vadd.f32 %v2587_v31, %v2585_v28 }
 0x1e2   :  { %v2889_v27 = vpack.c.bf16 %v2896_v22, %v2895_v2  ;;  %v2898_v25 = vadd.f32 %v2528_v24, %v2316_v21  ;;  %v2602_v0 = vadd.f32 %v2588_v32, %v2586_v42 }
 0x1e3   :  { %v2533_v6 = vpack.c.bf16 %v2897_v20, %v2895_v2 }
 0x1e4   :  { %2557 = vst [vmem:[%s4601_s4 + $0x10] sm:$0xff] %v2889_v27  ;;  %v2534_v54 = vpack.c.bf16 %v2898_v25, %v2896_v22  ;;  %v2890_v33 = vpack.c.bf16 %v2898_v25, %v2897_v20 }
 0x1e5   :  { %v2563_v34 = vunpack.c.l.bf16 %v2533_v6  ;;  %v2565_v36 = vunpack.c.h.bf16 %v2533_v6 }
 0x1e6   :  { %2558 = vst [vmem:[%s4601_s4 + $0x18] sm:$0xff] %v2890_v33  ;;  %v2564_v39 = vunpack.c.l.bf16 %v2534_v54  ;;  %v2566_v41 = vunpack.c.h.bf16 %v2534_v54 }
 0x1e7   :  { %v2568_v30 = vadd.f32 %v2567_v38, %v2563_v34  ;;  %v2589_v16 = vmul.f32 %v2563_v34, %v2563_v34  ;;  %v2591_v14 = vmul.f32 %v2565_v36, %v2565_v36 }
 0x1e8   :  { %v2577_v10 = vadd.f32 %v2576_v15, %v2564_v39  ;;  %v2590_v61 = vmul.f32 %v2564_v39, %v2564_v39  ;;  %v2592_v46 = vmul.f32 %v2566_v41, %v2566_v41 }
 0x1e9   :  { %v2569_v13 = vadd.f32 %v2568_v30, %v2565_v36  ;;  %v2594_v55 = vadd.f32 %v2593_v43, %v2589_v16 }
 0x1ea   :  { %v2578_v45 = vadd.f32 %v2577_v10, %v2566_v41  ;;  %v2603_v56 = vadd.f32 %v2602_v0, %v2590_v61 }
 0x1eb   :  { %v2570_v47 = vrot.slane %v2569_v13, 4  ;;  %v2595_v48 = vadd.f32 %v2594_v55, %v2591_v14 }
 0x1ec   :  { %v2579_v23 = vrot.slane %v2578_v45, 4  ;;  %v2604_v49 = vadd.f32 %v2603_v56, %v2592_v46 }
 0x1ed   :  { %v2571_v7 = vadd.f32 %v2570_v47, %v2569_v13  ;;  %v2596_v8 = vrot.slane %v2595_v48, 4 }
 0x1ee   :  { %v2580_v50 = vadd.f32 %v2579_v23, %v2578_v45  ;;  %v2605_v18 = vrot.slane %v2604_v49, 4 }
 0x1ef   :  { %v2572_v44 = vrot.slane %v2571_v7, 2  ;;  %v2597_v40 = vadd.f32 %v2596_v8, %v2595_v48 }
 0x1f0   :  { %v2581_v53 = vrot.slane %v2580_v50, 2  ;;  %v2606_v57 = vadd.f32 %v2605_v18, %v2604_v49 }
 0x1f1   :  { %v2573_v51 = vadd.f32 %v2572_v44, %v2571_v7  ;;  %v2598_v62 = vrot.slane %v2597_v40, 2 }
 0x1f2   :  { %v2582_v52 = vadd.f32 %v2581_v53, %v2580_v50  ;;  %v2607_v35 = vrot.slane %v2606_v57, 2 }
 0x1f3   :  { %v2574_v58 = vrot.slane %v2573_v51, 1  ;;  %v2599_v29 = vadd.f32 %v2598_v62, %v2597_v40 }
 0x1f4   :  { %v2583_v59 = vrot.slane %v2582_v52, 1  ;;  %v2608_v63 = vadd.f32 %v2607_v35, %v2606_v57 }
 0x1f5   :  { %v2600_v3 = vrot.slane %v2599_v29, 1  ;;  %v2575_v60 = vadd.f32 %v2574_v58, %v2573_v51 }
 0x1f6   :  { %v2609_v5 = vrot.slane %v2608_v63, 1  ;;  %v2584_v11 = vadd.f32 %v2583_v59, %v2582_v52 }
 0x1f7   :  { %v2601_v9 = vadd.f32 %v2600_v3, %v2599_v29 }
 0x1f8   :  { %v2610_v26 = vadd.f32 %v2609_v5, %v2608_v63 }
 0x1f9   :  { %v2612_v2 = vsel %vm2611_vm0, %v2575_v60, %v2601_v9 }
 0x1fa   :  { %v2615_v12 = vsel %vm2614_vm1, %v2612_v2, 0.0  ;;  %v2613_v37 = vsel %vm2611_vm0, %v2584_v11, %v2610_v26 }
 0x1fb   :  { %2617 = vst [vmem:[%s4602_s5] sm:$0xff] %v2615_v12  ;;  %v2616_v4 = vsel %vm2614_vm1, %v2613_v37, 0.0 }
 0x1fc   :  { %2618 = vst [vmem:[%s4602_s5 + $0x8] sm:$0xff] %v2616_v4 }

// kernel: tile.45
= control target key start
LH: loop header
LB: loop body
LE: loop exit
PB: predicated region body
PF: predicated region fallthrough
CT: control target
= control target key end

     0   :  { %s112_s0 = inlined_call_operand.vmem [shape: f32[16], index: 0, kind: input, shape index: {}]   ;;  %s113_s1 = inlined_call_operand.vmem [shape: f32[128,16], index: 1, kind: output, shape index: {}]  }
   0x1   :  { %v4_v0 = vld [vmem:[%s112_s0] ss:$0 sm:$0xff] }
   0x2   :  { %5 = vst [vmem:[%s113_s1] sm:$0xff] %v4_v0  ;;  %36 = vst [vmem:[%s113_s1 + $0x8] sm:$0xff] %v4_v0 }
   0x3   :  { %37 = vst [vmem:[%s113_s1 + $0x10] sm:$0xff] %v4_v0  ;;  %38 = vst [vmem:[%s113_s1 + $0x18] sm:$0xff] %v4_v0 }
   0x4   :  { %39 = vst [vmem:[%s113_s1 + $0x20] sm:$0xff] %v4_v0  ;;  %40 = vst [vmem:[%s113_s1 + $0x28] sm:$0xff] %v4_v0 }
   0x5   :  { %41 = vst [vmem:[%s113_s1 + $0x30] sm:$0xff] %v4_v0  ;;  %42 = vst [vmem:[%s113_s1 + $0x38] sm:$0xff] %v4_v0 }
   0x6   :  { %43 = vst [vmem:[%s113_s1 + $0x40] sm:$0xff] %v4_v0  ;;  %44 = vst [vmem:[%s113_s1 + $0x48] sm:$0xff] %v4_v0 }
   0x7   :  { %45 = vst [vmem:[%s113_s1 + $0x50] sm:$0xff] %v4_v0  ;;  %46 = vst [vmem:[%s113_s1 + $0x58] sm:$0xff] %v4_v0 }
   0x8   :  { %47 = vst [vmem:[%s113_s1 + $0x60] sm:$0xff] %v4_v0  ;;  %48 = vst [vmem:[%s113_s1 + $0x68] sm:$0xff] %v4_v0 }
   0x9   :  { %49 = vst [vmem:[%s113_s1 + $0x70] sm:$0xff] %v4_v0  ;;  %50 = vst [vmem:[%s113_s1 + $0x78] sm:$0xff] %v4_v0 }

// kernel: tile.46
= control target key start
LH: loop header
LB: loop body
LE: loop exit
PB: predicated region body
PF: predicated region fallthrough
CT: control target
= control target key end

     0   :  { %vm4_vm0 = vcmask 1047556   ;;  %s349_s16 = smov 96   ;;  %s350_s21 = smov 112   ;;  %vm6_vm1 = vcmask 130048   ;;  %vm28_vm2 = vcmask 1048448   ;;  %vm52_vm3 = vcmask 917248   ;;  %s530_s0 = inlined_call_operand.vmem [shape: f32[128,16], index: 0, kind: input, shape index: {}]   ;;  %s531_s1 = inlined_call_operand.vmem [shape: f32[1,2048], index: 1, kind: output, shape index: {}]  }
   0x1   :  { %v303_v0 = vld [vmem:[%s530_s0 + $0x6] ss:$8 sm:$0xf]   ;;  %v299_v2 = vld [vmem:[%s530_s0 + $0x7] ss:$8 sm:$0xf]  }
   0x2   :  { %v304_v1 = vld [vmem:[%s530_s0 + $0x6] ss:$8 sm:$0xf0]   ;;  %v300_v4 = vld [vmem:[%s530_s0 + $0x7] ss:$8 sm:$0xf0]  }
   0x3   :  { %v49_v3 = vsel %vm4_vm0, %v304_v1, %v303_v0  ;;  %v305_v5 = vld [vmem:[%s530_s0 + $0x46] ss:$8 sm:$0xf]   ;;  %v25_v6 = vsel %vm4_vm0, %v300_v4, %v299_v2  ;;  %v301_v8 = vld [vmem:[%s530_s0 + $0x47] ss:$8 sm:$0xf]  }
   0x4   :  { %50 = vrot.lane.b32.xlu1 %v49_v3, %s349_s16  ;;  %v306_v7 = vld [vmem:[%s530_s0 + $0x46] ss:$8 sm:$0xf0]   ;;  %26 = vrot.lane.b32.xlu0 %v25_v6, %s350_s21  ;;  %v302_v10 = vld [vmem:[%s530_s0 + $0x47] ss:$8 sm:$0xf0]  }
   0x5   :  { %v60_v9 = vsel %vm4_vm0, %v306_v7, %v305_v5  ;;  %v36_v11 = vsel %vm4_vm0, %v302_v10, %v301_v8  ;;  %v309_v12 = vld [vmem:[%s530_s0 + $0x45] ss:$8 sm:$0xf]   ;;  %v313_v18 = vld [vmem:[%s530_s0 + $0x44] ss:$8 sm:$0xf]  }
   0x6   :  { %v310_v13 = vld [vmem:[%s530_s0 + $0x45] ss:$8 sm:$0xf0]   ;;  %v314_v19 = vld [vmem:[%s530_s0 + $0x44] ss:$8 sm:$0xf0]  }
   0x7   :  { %v307_v14 = vld [vmem:[%s530_s0 + $0x5] ss:$8 sm:$0xf]   ;;  %v84_v16 = vsel %vm4_vm0, %v310_v13, %v309_v12  ;;  %v311_v20 = vld [vmem:[%s530_s0 + $0x4] ss:$8 sm:$0xf]   ;;  %v108_v22 = vsel %vm4_vm0, %v314_v19, %v313_v18 }
   0x8   :  { %v308_v15 = vld [vmem:[%s530_s0 + $0x5] ss:$8 sm:$0xf0]   ;;  %61 = vrot.lane.b32.xlu1 %v60_v9, %s349_s16  ;;  %37 = vrot.lane.b32.xlu0 %v36_v11, %s350_s21  ;;  %v312_v21 = vld [vmem:[%s530_s0 + $0x4] ss:$8 sm:$0xf0]  }
   0x9   :  { %v73_v17 = vsel %vm4_vm0, %v308_v15, %v307_v14  ;;  %s351_s11 = smov 80   ;;  %v317_v23 = vld [vmem:[%s530_s0 + $0x43] ss:$8 sm:$0xf]   ;;  %v97_v24 = vsel %vm4_vm0, %v312_v21, %v311_v20  ;;  %s352_s20 = smov 64   ;;  %vm76_vm4 = vcmask 786048  }
   0xa   :  { %v318_v25 = vld [vmem:[%s530_s0 + $0x43] ss:$8 sm:$0xf0]   ;;  %v321_v28 = vld [vmem:[%s530_s0 + $0x42] ss:$8 sm:$0xf]  }
   0xb   :  { %v315_v26 = vld [vmem:[%s530_s0 + $0x3] ss:$8 sm:$0xf]   ;;  %v322_v29 = vld [vmem:[%s530_s0 + $0x42] ss:$8 sm:$0xf0]   ;;  %v132_v30 = vsel %vm4_vm0, %v318_v25, %v317_v23 }
   0xc   :  { %85 = vrot.lane.b32.xlu1 %v84_v16, %s351_s11  ;;  %74 = vrot.lane.b32.xlu0 %v73_v17, %s351_s11  ;;  %v316_v27 = vld [vmem:[%s530_s0 + $0x3] ss:$8 sm:$0xf0]   ;;  %v2_v31 = vld [vmem:[%s530_s0] ss:$8 sm:$0xf]   ;;  %v156_v40 = vsel %vm4_vm0, %v322_v29, %v321_v28 }
   0xd   :  { %v3_v32 = vld [vmem:[%s530_s0] ss:$8 sm:$0xf0]   ;;  %v121_v33 = vsel %vm4_vm0, %v316_v27, %v315_v26  ;;  %v319_v37 = vld [vmem:[%s530_s0 + $0x2] ss:$8 sm:$0xf]  }
   0xe   :  { %v5_v34 = vsel %vm4_vm0, %v3_v32, %v2_v31  ;;  %v297_v35 = vld [vmem:[%s530_s0 + $0x40] ss:$8 sm:$0xf]   ;;  %v320_v38 = vld [vmem:[%s530_s0 + $0x2] ss:$8 sm:$0xf0]  }
   0xf   :  { %v298_v36 = vld [vmem:[%s530_s0 + $0x40] ss:$8 sm:$0xf0]   ;;  %7 = vst.msk [vmem:[#allocation0] ss:$8 sm:$0xf] %vm6_vm1, %v5_v34   ;;  %v145_v41 = vsel %vm4_vm0, %v320_v38, %v319_v37 }
  0x10   :  { %109 = vrot.lane.b32.xlu1 %v108_v22, %s352_s20  ;;  %98 = vrot.lane.b32.xlu0 %v97_v24, %s352_s20  ;;  %8 = vst.msk [vmem:[#allocation0] ss:$8 sm:$0xf0] %vm6_vm1, %v5_v34   ;;  %v14_v39 = vsel %vm4_vm0, %v298_v36, %v297_v35  ;;  %s353_s8 = smov 48   ;;  %s355_s17 = smov 16   ;;  %vm100_vm5 = vcmask 654848  }
  0x11   :  { %17 = vst.msk [vmem:[#allocation0 + $0x40] ss:$8 sm:$0xf] %vm6_vm1, %v14_v39   ;;  %19 = vst.msk [vmem:[#allocation0 + $0x40] ss:$8 sm:$0xf0] %vm6_vm1, %v14_v39  }
  0x12   :  { %v325_v42 = vld [vmem:[%s530_s0 + $0x41] ss:$8 sm:$0xf]   ;;  %vm124_vm6 = vcmask 523648   ;;  %vm148_vm7 = vcmask 392448   ;;  %vm172_vm8 = vcmask 261248  }
  0x13   :  { %v326_v43 = vld [vmem:[%s530_s0 + $0x41] ss:$8 sm:$0xf0]  }
  0x14   :  { %133 = vrot.lane.b32.xlu1 %v132_v30, %s353_s8  ;;  %122 = vrot.lane.b32.xlu0 %v121_v33, %s353_s8  ;;  %v323_v44 = vld [vmem:[%s530_s0 + $0x1] ss:$8 sm:$0xf]   ;;  %v180_v46 = vsel %vm4_vm0, %v326_v43, %v325_v42 }
  0x15   :  { %v324_v45 = vld [vmem:[%s530_s0 + $0x1] ss:$8 sm:$0xf0]   ;;  %s354_s0 = smov 32  }
  0x16   :  { %v169_v47 = vsel %vm4_vm0, %v324_v45, %v323_v44 }
  0x18   :  { %157 = vrot.lane.b32.xlu1 %v156_v40, %s354_s0  ;;  %146 = vrot.lane.b32.xlu0 %v145_v41, %s354_s0 }
  0x1c   :  { %181 = vrot.lane.b32.xlu1 %v180_v46, %s355_s17  ;;  %170 = vrot.lane.b32.xlu0 %v169_v47, %s355_s17 }
  0x76   :  { %v51_v48 = vpop.permute.xlu1 %50   ;;  %v27_v49 = vpop.permute.xlu0 %26  }
  0x77   :  { %29 = vst.msk [vmem:[#allocation0] ss:$8 sm:$0xf] %vm28_vm2, %v27_v49   ;;  %30 = vst.msk [vmem:[#allocation0] ss:$8 sm:$0xf0] %vm28_vm2, %v27_v49  }
  0x78   :  { %53 = vst.msk [vmem:[#allocation0] ss:$8 sm:$0xf] %vm52_vm3, %v51_v48   ;;  %54 = vst.msk [vmem:[#allocation0] ss:$8 sm:$0xf0] %vm52_vm3, %v51_v48  }
  0x7a   :  { %v62_v50 = vpop.permute.xlu1 %61   ;;  %v38_v51 = vpop.permute.xlu0 %37  }
  0x7b   :  { %41 = vst.msk [vmem:[#allocation0 + $0x40] ss:$8 sm:$0xf] %vm28_vm2, %v38_v51   ;;  %43 = vst.msk [vmem:[#allocation0 + $0x40] ss:$8 sm:$0xf0] %vm28_vm2, %v38_v51  }
  0x7c   :  { %65 = vst.msk [vmem:[#allocation0 + $0x40] ss:$8 sm:$0xf] %vm52_vm3, %v62_v50   ;;  %67 = vst.msk [vmem:[#allocation0 + $0x40] ss:$8 sm:$0xf0] %vm52_vm3, %v62_v50  }
  0x7e   :  { %v86_v52 = vpop.permute.xlu1 %85   ;;  %v75_v53 = vpop.permute.xlu0 %74  }
  0x7f   :  { %89 = vst.msk [vmem:[#allocation0 + $0x40] ss:$8 sm:$0xf] %vm76_vm4, %v86_v52   ;;  %91 = vst.msk [vmem:[#allocation0 + $0x40] ss:$8 sm:$0xf0] %vm76_vm4, %v86_v52  }
  0x80   :  { %77 = vst.msk [vmem:[#allocation0] ss:$8 sm:$0xf] %vm76_vm4, %v75_v53   ;;  %78 = vst.msk [vmem:[#allocation0] ss:$8 sm:$0xf0] %vm76_vm4, %v75_v53  }
  0x82   :  { %v110_v54 = vpop.permute.xlu1 %109   ;;  %v99_v55 = vpop.permute.xlu0 %98  }
  0x83   :  { %113 = vst.msk [vmem:[#allocation0 + $0x40] ss:$8 sm:$0xf] %vm100_vm5, %v110_v54   ;;  %115 = vst.msk [vmem:[#allocation0 + $0x40] ss:$8 sm:$0xf0] %vm100_vm5, %v110_v54  }
  0x84   :  { %101 = vst.msk [vmem:[#allocation0] ss:$8 sm:$0xf] %vm100_vm5, %v99_v55   ;;  %102 = vst.msk [vmem:[#allocation0] ss:$8 sm:$0xf0] %vm100_vm5, %v99_v55  }
  0x86   :  { %v134_v56 = vpop.permute.xlu1 %133   ;;  %v123_v57 = vpop.permute.xlu0 %122  }
  0x87   :  { %137 = vst.msk [vmem:[#allocation0 + $0x40] ss:$8 sm:$0xf] %vm124_vm6, %v134_v56   ;;  %139 = vst.msk [vmem:[#allocation0 + $0x40] ss:$8 sm:$0xf0] %vm124_vm6, %v134_v56  }
  0x88   :  { %125 = vst.msk [vmem:[#allocation0] ss:$8 sm:$0xf] %vm124_vm6, %v123_v57   ;;  %126 = vst.msk [vmem:[#allocation0] ss:$8 sm:$0xf0] %vm124_vm6, %v123_v57  }
  0x8a   :  { %v158_v58 = vpop.permute.xlu1 %157   ;;  %v147_v59 = vpop.permute.xlu0 %146  }
  0x8b   :  { %161 = vst.msk [vmem:[#allocation0 + $0x40] ss:$8 sm:$0xf] %vm148_vm7, %v158_v58   ;;  %163 = vst.msk [vmem:[#allocation0 + $0x40] ss:$8 sm:$0xf0] %vm148_vm7, %v158_v58  }
  0x8c   :  { %149 = vst.msk [vmem:[#allocation0] ss:$8 sm:$0xf] %vm148_vm7, %v147_v59   ;;  %150 = vst.msk [vmem:[#allocation0] ss:$8 sm:$0xf0] %vm148_vm7, %v147_v59  }
  0x8e   :  { %v182_v60 = vpop.permute.xlu1 %181   ;;  %v171_v61 = vpop.permute.xlu0 %170  }
  0x8f   :  { %185 = vst.msk [vmem:[#allocation0 + $0x40] ss:$8 sm:$0xf] %vm172_vm8, %v182_v60   ;;  %187 = vst.msk [vmem:[#allocation0 + $0x40] ss:$8 sm:$0xf0] %vm172_vm8, %v182_v60  }
  0x90   :  { %173 = vst.msk [vmem:[#allocation0] ss:$8 sm:$0xf] %vm172_vm8, %v171_v61   ;;  %174 = vst.msk [vmem:[#allocation0] ss:$8 sm:$0xf0] %vm172_vm8, %v171_v61  }
  0x96   :  { %v236_v62 = vld [vmem:[#allocation0 + $0x40] sm:$0x1]  ;;  %v242_v63 = vld [vmem:[#allocation0 + $0x48] sm:$0x1]  ;;  %v248_v0 = vld [vmem:[#allocation0 + $0x50] sm:$0x1] }
  0x97   :  { %334 = vst [vmem:[%s531_s1 + $0x8] sm:$0x1] %v236_v62  ;;  %335 = vst [vmem:[%s531_s1 + $0x9] sm:$0x1] %v242_v63  ;;  %v254_v1 = vld [vmem:[#allocation0 + $0x58] sm:$0x1] }
  0x98   :  { %336 = vst [vmem:[%s531_s1 + $0xa] sm:$0x1] %v248_v0  ;;  %v260_v2 = vld [vmem:[#allocation0 + $0x60] sm:$0x1]  ;;  %v266_v3 = vld [vmem:[#allocation0 + $0x68] sm:$0x1] }
  0x99   :  { %337 = vst [vmem:[%s531_s1 + $0xb] sm:$0x1] %v254_v1  ;;  %338 = vst [vmem:[%s531_s1 + $0xc] sm:$0x1] %v260_v2  ;;  %v272_v4 = vld [vmem:[#allocation0 + $0x70] sm:$0x1] }
  0x9a   :  { %339 = vst [vmem:[%s531_s1 + $0xd] sm:$0x1] %v266_v3  ;;  %v278_v5 = vld [vmem:[#allocation0 + $0x78] sm:$0x1]  ;;  %v191_v6 = vld [vmem:[#allocation0] sm:$0x1] }
  0x9b   :  { %340 = vst [vmem:[%s531_s1 + $0xe] sm:$0x1] %v272_v4  ;;  %341 = vst [vmem:[%s531_s1 + $0xf] sm:$0x1] %v278_v5  ;;  %v195_v7 = vld [vmem:[#allocation0 + $0x8] sm:$0x1] }
  0x9c   :  { %193 = vst [vmem:[%s531_s1] sm:$0x1] %v191_v6  ;;  %v200_v8 = vld [vmem:[#allocation0 + $0x10] sm:$0x1]  ;;  %v206_v9 = vld [vmem:[#allocation0 + $0x18] sm:$0x1] }
  0x9d   :  { %327 = vst [vmem:[%s531_s1 + $0x1] sm:$0x1] %v195_v7  ;;  %328 = vst [vmem:[%s531_s1 + $0x2] sm:$0x1] %v200_v8  ;;  %v212_v10 = vld [vmem:[#allocation0 + $0x20] sm:$0x1] }
  0x9e   :  { %329 = vst [vmem:[%s531_s1 + $0x3] sm:$0x1] %v206_v9  ;;  %v218_v11 = vld [vmem:[#allocation0 + $0x28] sm:$0x1]  ;;  %v224_v12 = vld [vmem:[#allocation0 + $0x30] sm:$0x1] }
  0x9f   :  { %330 = vst [vmem:[%s531_s1 + $0x4] sm:$0x1] %v212_v10  ;;  %331 = vst [vmem:[%s531_s1 + $0x5] sm:$0x1] %v218_v11  ;;  %v230_v13 = vld [vmem:[#allocation0 + $0x38] sm:$0x1] }
  0xa0   :  { %332 = vst [vmem:[%s531_s1 + $0x6] sm:$0x1] %v224_v12  ;;  %333 = vst [vmem:[%s531_s1 + $0x7] sm:$0x1] %v230_v13 }

// kernel: dcgan_discriminator_forward.6
= control target key start
LH: loop header
LB: loop body
LE: loop exit
PB: predicated region body
PF: predicated region fallthrough
CT: control target
= control target key end

     0   :  { %v71_v37 = vlaneseq  ;;  %vm2309_vm0 = vcmask 1040384   ;;  %vm2312_vm1 = vcmask 1041408   ;;  %s3989_s3 = inlined_call_operand.vmem [shape: bf16[2048,256], index: 3, kind: input, shape index: {}]   ;;  %s3990_s0 = inlined_call_operand.vmem [shape: bf16[16,2048], index: 0, kind: input, shape index: {}]   ;;  %s3991_s1 = inlined_call_operand.vmem [shape: f32[1,2048], index: 1, kind: input, shape index: {}]   ;;  %s3992_s2 = inlined_call_operand.vmem [shape: f32[1,2048], index: 2, kind: input, shape index: {}]   ;;  %s3993_s4 = inlined_call_operand.vmem [shape: bf16[16,256], index: 4, kind: output, shape index: {0}]   ;;  %s3994_s5 = inlined_call_operand.vmem [shape: f32[1,8,256], index: 5, kind: output, shape index: {1}]  }
   0x1   :  { %v2613_v0 = vld [vmem:[%s3989_s3 + $0x4] ss:$8 sps:$4 sm:$0xff]   ;;  %v2617_v2 = vld [vmem:[%s3989_s3] ss:$8 sps:$4 sm:$0xff]   ;;  %v2619_v4 = vld [vmem:[%s3989_s3 + $0x14] ss:$8 sps:$4 sm:$0xff]  }
   0x2   :  { %v2615_v1 = vld [vmem:[%s3989_s3 + $0x404] ss:$8 sps:$4 sm:$0xff]   ;;  %1915 = vmatprep.subr.bf16.mxu1 %v2613_v0  ;;  %v2618_v3 = vld [vmem:[%s3989_s3 + $0x400] ss:$8 sps:$4 sm:$0xff]   ;;  %v2621_v5 = vld [vmem:[%s3989_s3 + $0x414] ss:$8 sps:$4 sm:$0xff]  }
   0x3   :  { %2087 = vmatprep.subr.bf16.mxu0 %v2615_v1  ;;  %1916 = vmatpush1.bf16.msra.mxu1 %v2617_v2  ;;  %v2623_v6 = vld [vmem:[%s3989_s3 + $0x10] ss:$8 sps:$4 sm:$0xff]   ;;  %v2625_v8 = vld [vmem:[%s3989_s3 + $0x24] ss:$8 sps:$4 sm:$0xff]   ;;  %v2629_v10 = vld [vmem:[%s3989_s3 + $0x20] ss:$8 sps:$4 sm:$0xff]  }
   0x4   :  { %2088 = vmatpush1.bf16.msra.mxu0 %v2618_v3  ;;  %1917 = vmatprep.subr.bf16.mxu1 %v2619_v4  ;;  %v2624_v7 = vld [vmem:[%s3989_s3 + $0x410] ss:$8 sps:$4 sm:$0xff]   ;;  %v2627_v9 = vld [vmem:[%s3989_s3 + $0x424] ss:$8 sps:$4 sm:$0xff]   ;;  %v2630_v11 = vld [vmem:[%s3989_s3 + $0x420] ss:$8 sps:$4 sm:$0xff]  }
   0x5   :  { %2089 = vmatprep.subr.bf16.mxu0 %v2621_v5  ;;  %v2631_v12 = vld [vmem:[%s3989_s3 + $0x34] ss:$8 sps:$4 sm:$0xff]   ;;  %v2635_v14 = vld [vmem:[%s3989_s3 + $0x30] ss:$8 sps:$4 sm:$0xff]   ;;  %v2637_v16 = vld [vmem:[%s3989_s3 + $0x44] ss:$8 sps:$4 sm:$0xff]  }
   0x6   :  { %v2633_v13 = vld [vmem:[%s3989_s3 + $0x434] ss:$8 sps:$4 sm:$0xff]   ;;  %v2636_v15 = vld [vmem:[%s3989_s3 + $0x430] ss:$8 sps:$4 sm:$0xff]   ;;  %v2639_v17 = vld [vmem:[%s3989_s3 + $0x444] ss:$8 sps:$4 sm:$0xff]  }
   0x7   :  { %1918 = vmatpush1.bf16.msra.mxu1 %v2623_v6  ;;  %v2641_v18 = vld [vmem:[%s3989_s3 + $0x40] ss:$8 sps:$4 sm:$0xff]   ;;  %v2643_v20 = vld [vmem:[%s3989_s3 + $0x54] ss:$8 sps:$4 sm:$0xff]   ;;  %v2647_v22 = vld [vmem:[%s3989_s3 + $0x50] ss:$8 sps:$4 sm:$0xff]  }
   0x8   :  { %2090 = vmatpush1.bf16.msra.mxu0 %v2624_v7  ;;  %1919 = vmatprep.subr.bf16.mxu1 %v2625_v8  ;;  %v2642_v19 = vld [vmem:[%s3989_s3 + $0x440] ss:$8 sps:$4 sm:$0xff]   ;;  %v2645_v21 = vld [vmem:[%s3989_s3 + $0x454] ss:$8 sps:$4 sm:$0xff]   ;;  %v2648_v23 = vld [vmem:[%s3989_s3 + $0x450] ss:$8 sps:$4 sm:$0xff]  }
   0x9   :  { %2091 = vmatprep.subr.bf16.mxu0 %v2627_v9  ;;  %v2649_v24 = vld [vmem:[%s3989_s3 + $0x64] ss:$8 sps:$4 sm:$0xff]   ;;  %v2653_v26 = vld [vmem:[%s3989_s3 + $0x60] ss:$8 sps:$4 sm:$0xff]   ;;  %v2655_v28 = vld [vmem:[%s3989_s3 + $0x74] ss:$8 sps:$4 sm:$0xff]  }
   0xa   :  { %v2651_v25 = vld [vmem:[%s3989_s3 + $0x464] ss:$8 sps:$4 sm:$0xff]   ;;  %v2654_v27 = vld [vmem:[%s3989_s3 + $0x460] ss:$8 sps:$4 sm:$0xff]   ;;  %v2657_v29 = vld [vmem:[%s3989_s3 + $0x474] ss:$8 sps:$4 sm:$0xff]  }
   0xb   :  { %1920 = vmatpush1.bf16.msra.mxu1 %v2629_v10  ;;  %v2659_v30 = vld [vmem:[%s3989_s3 + $0x70] ss:$8 sps:$4 sm:$0xff]   ;;  %v2661_v32 = vld [vmem:[%s3989_s3 + $0x84] ss:$8 sps:$4 sm:$0xff]   ;;  %v2665_v34 = vld [vmem:[%s3989_s3 + $0x80] ss:$8 sps:$4 sm:$0xff]  }
   0xc   :  { %2092 = vmatpush1.bf16.msra.mxu0 %v2630_v11  ;;  %1921 = vmatprep.subr.bf16.mxu1 %v2631_v12  ;;  %v2660_v31 = vld [vmem:[%s3989_s3 + $0x470] ss:$8 sps:$4 sm:$0xff]   ;;  %v2663_v33 = vld [vmem:[%s3989_s3 + $0x484] ss:$8 sps:$4 sm:$0xff]   ;;  %v2666_v35 = vld [vmem:[%s3989_s3 + $0x480] ss:$8 sps:$4 sm:$0xff]  }
   0xd   :  { %2093 = vmatprep.subr.bf16.mxu0 %v2633_v13  ;;  %v2667_v36 = vld [vmem:[%s3989_s3 + $0x94] ss:$8 sps:$4 sm:$0xff]   ;;  %v2671_v39 = vld [vmem:[%s3989_s3 + $0x90] ss:$8 sps:$4 sm:$0xff]   ;;  %v2673_v41 = vld [vmem:[%s3989_s3 + $0xa4] ss:$8 sps:$4 sm:$0xff]  }
   0xe   :  { %v2669_v38 = vld [vmem:[%s3989_s3 + $0x494] ss:$8 sps:$4 sm:$0xff]   ;;  %v2672_v40 = vld [vmem:[%s3989_s3 + $0x490] ss:$8 sps:$4 sm:$0xff]   ;;  %v3154_v42 = vshrl.u32 %v71_v37, 7  ;;  %v19_v52 = vld [vmem:[%s3990_s0] sm:$0xff] }
   0xf   :  { %1922 = vmatpush1.bf16.msra.mxu1 %v2635_v14  ;;  %v2675_v43 = vld [vmem:[%s3989_s3 + $0x4a4] ss:$8 sps:$4 sm:$0xff]   ;;  %v2677_v44 = vld [vmem:[%s3989_s3 + $0xa0] ss:$8 sps:$4 sm:$0xff]   ;;  %v2679_v46 = vld [vmem:[%s3989_s3 + $0xb4] ss:$8 sps:$4 sm:$0xff]   ;;  %v36_v54 = vunpack.c.h.bf16 %v19_v52  ;;  %v35_v58 = vunpack.c.l.bf16 %v19_v52 }
  0x10   :  { %2094 = vmatpush1.bf16.msra.mxu0 %v2636_v15  ;;  %1923 = vmatprep.subr.bf16.mxu1 %v2637_v16  ;;  %v2678_v45 = vld [vmem:[%s3989_s3 + $0x4a0] ss:$8 sps:$4 sm:$0xff]   ;;  %v77_v47 = vsub.s32 1, %v3154_v42  ;;  %v2681_v48 = vld [vmem:[%s3989_s3 + $0x4b4] ss:$8 sps:$4 sm:$0xff]   ;;  %v73_v49 = vsub.s32 0, %v3154_v42 }
  0x11   :  { %2095 = vmatprep.subr.bf16.mxu0 %v2639_v17  ;;  %v2683_v50 = vld [vmem:[%s3989_s3 + $0xb0] ss:$8 sps:$4 sm:$0xff]   ;;  %v27_v53 = vld [vmem:[%s3990_s0 + $0x40] sm:$0xff]  ;;  %v3213_v6 = vld [vmem:[%s3991_s1 + $0x8] sm:$0xff] }
  0x12   :  { %v2684_v51 = vld [vmem:[%s3989_s3 + $0x4b0] ss:$8 sps:$4 sm:$0xff]   ;;  %v3188_v55 = vld [vmem:[%s3991_s1] sm:$0xff]  ;;  %v52_v59 = vunpack.c.h.bf16 %v27_v53  ;;  %v51_v63 = vunpack.c.l.bf16 %v27_v53  ;;  %v3218_v7 = vld [vmem:[%s3992_s2 + $0x8] sm:$0xff]  ;;  %v110_v12 = vrot.slane %v3213_v6, %v77_v47 }
  0x13   :  { %1924 = vmatpush1.bf16.msra.mxu1 %v2641_v18  ;;  %v3193_v56 = vld [vmem:[%s3992_s2] sm:$0xff]  ;;  %v78_v60 = vrot.slane %v3188_v55, %v77_v47  ;;  %v74_v2 = vrot.slane %v3188_v55, %v73_v49  ;;  %v226_v13 = vrot.slane %v3218_v7, %v77_v47  ;;  %v2691_v14 = vld [vmem:[%s3989_s3 + $0xd4] ss:$8 sps:$4 sm:$0xff]  }
  0x14   :  { %2096 = vmatpush1.bf16.msra.mxu0 %v2642_v19  ;;  %1925 = vmatprep.subr.bf16.mxu1 %v2643_v20  ;;  %v2685_v57 = vld [vmem:[%s3989_s3 + $0xc4] ss:$8 sps:$4 sm:$0xff]   ;;  %v194_v61 = vrot.slane %v3193_v56, %v77_v47  ;;  %v190_v8 = vrot.slane %v3193_v56, %v73_v49  ;;  %v2689_v9 = vld [vmem:[%s3989_s3 + $0xc0] ss:$8 sps:$4 sm:$0xff]   ;;  %v2693_v19 = vld [vmem:[%s3989_s3 + $0x4d4] ss:$8 sps:$4 sm:$0xff]  }
  0x15   :  { %2097 = vmatprep.subr.bf16.mxu0 %v2645_v21  ;;  %v2687_v62 = vld [vmem:[%s3989_s3 + $0x4c4] ss:$8 sps:$4 sm:$0xff]   ;;  %v152_v3 = vmul.f32 %v78_v60, %v36_v54  ;;  %v168_v4 = vmul.f32 %v78_v60, %v52_v59  ;;  %v2690_v10 = vld [vmem:[%s3989_s3 + $0x4c0] ss:$8 sps:$4 sm:$0xff]   ;;  %v151_v18 = vmul.f32 %v74_v2, %v35_v58  ;;  %v2703_v52 = vld [vmem:[%s3989_s3 + $0xf4] ss:$8 sps:$4 sm:$0xff]  }
  0x16   :  { %v23_v0 = vld [vmem:[%s3990_s0 + $0x20] sm:$0xff]  ;;  %v2705_v54 = vld [vmem:[%s3989_s3 + $0x4f4] ss:$8 sps:$4 sm:$0xff]   ;;  %v2707_v59 = vld [vmem:[%s3989_s3 + $0xf0] ss:$8 sps:$4 sm:$0xff]  }
  0x17   :  { %1926 = vmatpush1.bf16.msra.mxu1 %v2647_v22  ;;  %v31_v1 = vld [vmem:[%s3990_s0 + $0x60] sm:$0xff]  ;;  %v44_v5 = vunpack.c.h.bf16 %v23_v0  ;;  %v268_v15 = vadd.f32 %v194_v61, %v152_v3  ;;  %v284_v16 = vadd.f32 %v194_v61, %v168_v4  ;;  %v43_v17 = vunpack.c.l.bf16 %v23_v0  ;;  %v2708_v0 = vld [vmem:[%s3989_s3 + $0x4f0] ss:$8 sps:$4 sm:$0xff]  }
  0x18   :  { %2098 = vmatpush1.bf16.msra.mxu0 %v2648_v23  ;;  %1927 = vmatprep.subr.bf16.mxu1 %v2649_v24  ;;  %v60_v11 = vunpack.c.h.bf16 %v31_v1  ;;  %v59_v20 = vunpack.c.l.bf16 %v31_v1  ;;  %v167_v23 = vmul.f32 %v74_v2, %v51_v63  ;;  %v2711_v1 = vld [vmem:[%s3989_s3 + $0x104] ss:$8 sps:$4 sm:$0xff]   ;;  %v2709_v3 = vld [vmem:[%s3989_s3 + $0x100] ss:$8 sps:$4 sm:$0xff]  }
  0x19   :  { %2099 = vmatprep.subr.bf16.mxu0 %v2651_v25  ;;  %v160_v21 = vmul.f32 %v110_v12, %v44_v5  ;;  %v300_v24 = vmul.f32 0.2, %v268_v15  ;;  %v316_v25 = vmul.f32 0.2, %v284_v16  ;;  %v2714_v2 = vld [vmem:[%s3989_s3 + $0x504] ss:$8 sps:$4 sm:$0xff]  }
  0x1a   :  { %v176_v22 = vmul.f32 %v110_v12, %v60_v11  ;;  %v2715_v11 = vld [vmem:[%s3989_s3 + $0x110] ss:$8 sps:$4 sm:$0xff]  }
  0x1b   :  { %1928 = vmatpush1.bf16.msra.mxu1 %v2653_v26  ;;  %v267_v26 = vadd.f32 %v190_v8, %v151_v18  ;;  %v2718_v12 = vld [vmem:[%s3989_s3 + $0x510] ss:$8 sps:$4 sm:$0xff]   ;;  %v2732_v18 = vld [vmem:[%s3989_s3 + $0x534] ss:$8 sps:$4 sm:$0xff]  }
  0x1c   :  { %2100 = vmatpush1.bf16.msra.mxu0 %v2654_v27  ;;  %1929 = vmatprep.subr.bf16.mxu1 %v2655_v28  ;;  %v106_v27 = vrot.slane %v3213_v6, %v73_v49  ;;  %v276_v28 = vadd.f32 %v226_v13, %v160_v21  ;;  %v2735_v21 = vld [vmem:[%s3989_s3 + $0x144] ss:$8 sps:$4 sm:$0xff]  }
  0x1d   :  { %2101 = vmatprep.subr.bf16.mxu0 %v2657_v29  ;;  %v292_v29 = vadd.f32 %v226_v13, %v176_v22  ;;  %v2723_v13 = vld [vmem:[%s3989_s3 + $0x124] ss:$8 sps:$4 sm:$0xff]  }
  0x1e   :  { %v159_v37 = vmul.f32 %v106_v27, %v43_v17  ;;  %v2729_v17 = vld [vmem:[%s3989_s3 + $0x134] ss:$8 sps:$4 sm:$0xff]   ;;  %v2738_v22 = vld [vmem:[%s3989_s3 + $0x544] ss:$8 sps:$4 sm:$0xff]  }
  0x1f   :  { %1930 = vmatpush1.bf16.msra.mxu1 %v2659_v30  ;;  %v283_v30 = vadd.f32 %v190_v8, %v167_v23  ;;  %v2712_v8 = vld [vmem:[%s3989_s3 + $0x500] ss:$8 sps:$4 sm:$0xff]  }
  0x20   :  { %2102 = vmatpush1.bf16.msra.mxu0 %v2660_v31  ;;  %1931 = vmatprep.subr.bf16.mxu1 %v2661_v32  ;;  %v222_v31 = vrot.slane %v3218_v7, %v73_v49  ;;  %v2695_v32 = vld [vmem:[%s3989_s3 + $0xd0] ss:$8 sps:$4 sm:$0xff]   ;;  %v2733_v23 = vld [vmem:[%s3989_s3 + $0x140] ss:$8 sps:$4 sm:$0xff]  }
  0x21   :  { %2103 = vmatprep.subr.bf16.mxu0 %v2663_v33  ;;  %v2696_v33 = vld [vmem:[%s3989_s3 + $0x4d0] ss:$8 sps:$4 sm:$0xff]   ;;  %v315_v49 = vmul.f32 0.2, %v283_v30 }
  0x23   :  { %1932 = vmatpush1.bf16.msra.mxu1 %v2665_v34  ;;  %v2697_v34 = vld [vmem:[%s3989_s3 + $0xe4] ss:$8 sps:$4 sm:$0xff]   ;;  %v347_v61 = vmax.f32 %v283_v30, %v315_v49 }
  0x24   :  { %2104 = vmatpush1.bf16.msra.mxu0 %v2666_v35  ;;  %1933 = vmatprep.subr.bf16.mxu1 %v2667_v36  ;;  %v332_v35 = vmax.f32 %v268_v15, %v300_v24  ;;  %v348_v36 = vmax.f32 %v284_v16, %v316_v25  ;;  %v2721_v15 = vld [vmem:[%s3989_s3 + $0x120] ss:$8 sps:$4 sm:$0xff]   ;;  %v2741_v25 = vld [vmem:[%s3989_s3 + $0x154] ss:$8 sps:$4 sm:$0xff]   ;;  %v2750_v30 = vld [vmem:[%s3989_s3 + $0x564] ss:$8 sps:$4 sm:$0xff]  }
  0x25   :  { %2105 = vmatprep.subr.bf16.mxu0 %v2669_v38  ;;  %v2699_v38 = vld [vmem:[%s3989_s3 + $0x4e4] ss:$8 sps:$4 sm:$0xff]   ;;  %v2724_v16 = vld [vmem:[%s3989_s3 + $0x520] ss:$8 sps:$4 sm:$0xff]  }
  0x26   :  { %v2736_v24 = vld [vmem:[%s3989_s3 + $0x540] ss:$8 sps:$4 sm:$0xff]   ;;  %v2762_v49 = vld [vmem:[%s3989_s3 + $0x584] ss:$8 sps:$4 sm:$0xff]  }
  0x27   :  { %1934 = vmatpush1.bf16.msra.mxu1 %v2671_v39  ;;  %v308_v39 = vmul.f32 0.2, %v276_v28 }
  0x28   :  { %2106 = vmatpush1.bf16.msra.mxu0 %v2672_v40  ;;  %1935 = vmatprep.subr.bf16.mxu1 %v2673_v41  ;;  %v324_v40 = vmul.f32 0.2, %v292_v29  ;;  %v175_v41 = vmul.f32 %v106_v27, %v59_v20  ;;  %v2730_v20 = vld [vmem:[%s3989_s3 + $0x530] ss:$8 sps:$4 sm:$0xff]  }
  0x29   :  { %2107 = vmatprep.subr.bf16.mxu0 %v2675_v43  ;;  %v364_v43 = vpack.c.bf16 %v348_v36, %v332_v35  ;;  %v340_v47 = vmax.f32 %v276_v28, %v308_v39  ;;  %v2739_v27 = vld [vmem:[%s3989_s3 + $0x150] ss:$8 sps:$4 sm:$0xff]   ;;  %v2756_v35 = vld [vmem:[%s3989_s3 + $0x574] ss:$8 sps:$4 sm:$0xff]   ;;  %v3370_v39 = vld [vmem:[%s3990_s0 + $0x48] sm:$0xff] }
  0x2a   :  { %v2742_v28 = vld [vmem:[%s3989_s3 + $0x550] ss:$8 sps:$4 sm:$0xff]  }
  0x2b   :  { %1936 = vmatpush1.bf16.msra.mxu1 %v2677_v44  ;;  %v299_v44 = vmul.f32 0.2, %v267_v26  ;;  %1947 = vmatprep.mubr.bf16.mxu1 %v364_v43  ;;  %v54_v43 = vunpack.c.h.bf16 %v3370_v39 }
  0x2c   :  { %2108 = vmatpush1.bf16.msra.mxu0 %v2678_v45  ;;  %1937 = vmatprep.subr.bf16.mxu1 %v2679_v46  ;;  %v275_v45 = vadd.f32 %v222_v31, %v159_v37  ;;  %v2701_v46 = vld [vmem:[%s3989_s3 + $0xe0] ss:$8 sps:$4 sm:$0xff]   ;;  %v2751_v37 = vld [vmem:[%s3989_s3 + $0x170] ss:$8 sps:$4 sm:$0xff]  }
  0x2d   :  { %2109 = vmatprep.subr.bf16.mxu0 %v2681_v48  ;;  %v356_v48 = vmax.f32 %v292_v29, %v324_v40  ;;  %v331_v60 = vmax.f32 %v267_v26, %v299_v44  ;;  %v2744_v26 = vld [vmem:[%s3989_s3 + $0x554] ss:$8 sps:$4 sm:$0xff]   ;;  %v2747_v29 = vld [vmem:[%s3989_s3 + $0x164] ss:$8 sps:$4 sm:$0xff]   ;;  %v2754_v40 = vld [vmem:[%s3989_s3 + $0x570] ss:$8 sps:$4 sm:$0xff]  }
  0x2e   :  { %v307_v53 = vmul.f32 0.2, %v275_v45 }
  0x2f   :  { %1938 = vmatpush1.bf16.msra.mxu1 %v2683_v50  ;;  %v291_v50 = vadd.f32 %v222_v31, %v175_v41  ;;  %v363_v4 = vpack.c.bf16 %v347_v61, %v331_v60  ;;  %v85_v31 = vsub.s32 3, %v3154_v42 }
  0x30   :  { %2110 = vmatpush1.bf16.msra.mxu0 %v2684_v51  ;;  %1939 = vmatprep.subr.bf16.mxu1 %v2685_v57  ;;  %v2702_v51 = vld [vmem:[%s3989_s3 + $0x4e0] ss:$8 sps:$4 sm:$0xff]   ;;  %v372_v57 = vpack.c.bf16 %v356_v48, %v340_v47 }
  0x31   :  { %2111 = vmatprep.subr.bf16.mxu0 %v2687_v62  ;;  %v323_v58 = vmul.f32 0.2, %v291_v50  ;;  %v339_v62 = vmax.f32 %v275_v45, %v307_v53  ;;  %v86_v36 = vrot.slane %v3188_v55, %v85_v31  ;;  %v202_v44 = vrot.slane %v3193_v56, %v85_v31  ;;  %v3385_v47 = vld [vmem:[%s3990_s0 + $0x28] sm:$0xff] }
  0x32   :  { %2119 = vmatprep.mubr.bf16.mxu0 %v372_v57  ;;  %v118_v45 = vrot.slane %v3213_v6, %v85_v31  ;;  %v3390_v48 = vld [vmem:[%s3990_s0 + $0x68] sm:$0xff]  ;;  %v234_v53 = vrot.slane %v3218_v7, %v85_v31 }
  0x33   :  { %1940 = vmatpush1.bf16.msra.mxu1 %v2689_v9  ;;  %v355_v63 = vmax.f32 %v291_v50, %v323_v58  ;;  %v2717_v9 = vld [vmem:[%s3989_s3 + $0x114] ss:$8 sps:$4 sm:$0xff]   ;;  %v2757_v57 = vld [vmem:[%s3989_s3 + $0x180] ss:$8 sps:$4 sm:$0xff]  }
  0x34   :  { %2112 = vmatpush1.bf16.msra.mxu0 %v2690_v10  ;;  %1941 = vmatprep.subr.bf16.mxu1 %v2691_v14  ;;  %v2720_v10 = vld [vmem:[%s3989_s3 + $0x514] ss:$8 sps:$4 sm:$0xff]   ;;  %v2726_v14 = vld [vmem:[%s3989_s3 + $0x524] ss:$8 sps:$4 sm:$0xff]   ;;  %v2760_v58 = vld [vmem:[%s3989_s3 + $0x580] ss:$8 sps:$4 sm:$0xff]  }
  0x35   :  { %2113 = vmatprep.subr.bf16.mxu0 %v2693_v19  ;;  %v371_v5 = vpack.c.bf16 %v355_v63, %v339_v62  ;;  %v2727_v19 = vld [vmem:[%s3989_s3 + $0x130] ss:$8 sps:$4 sm:$0xff]   ;;  %v2765_v62 = vld [vmem:[%s3989_s3 + $0x194] ss:$8 sps:$4 sm:$0xff]  }
  0x36   :  { %v2768_v63 = vld [vmem:[%s3989_s3 + $0x594] ss:$8 sps:$4 sm:$0xff]  }
  0x37   :  { %1942 = vmatpush1.bf16.msra.mxu1 %v2695_v32  ;;  %v2745_v32 = vld [vmem:[%s3989_s3 + $0x160] ss:$8 sps:$4 sm:$0xff]  }
  0x38   :  { %2114 = vmatpush1.bf16.msra.mxu0 %v2696_v33  ;;  %1943 = vmatprep.subr.bf16.mxu1 %v2697_v34  ;;  %v2748_v33 = vld [vmem:[%s3989_s3 + $0x560] ss:$8 sps:$4 sm:$0xff]   ;;  %v2753_v34 = vld [vmem:[%s3989_s3 + $0x174] ss:$8 sps:$4 sm:$0xff]  }
  0x39   :  { %2115 = vmatprep.subr.bf16.mxu0 %v2699_v38  ;;  %v3365_v38 = vld [vmem:[%s3990_s0 + $0x8] sm:$0xff] }
  0x3a   :  { %v38_v41 = vunpack.c.h.bf16 %v3365_v38 }
  0x3b   :  { %1944 = vmatpush1.bf16.msra.mxu1 %v2701_v46  ;;  %v2759_v46 = vld [vmem:[%s3989_s3 + $0x184] ss:$8 sps:$4 sm:$0xff]  }
  0x3c   :  { %2116 = vmatpush1.bf16.msra.mxu0 %v2702_v51  ;;  %1945 = vmatprep.subr.bf16.mxu1 %v2703_v52  ;;  %v154_v50 = vmul.f32 %v86_v36, %v38_v41  ;;  %v170_v51 = vmul.f32 %v86_v36, %v54_v43  ;;  %v46_v52 = vunpack.c.h.bf16 %v3385_v47  ;;  %v2789_v43 = vld [vmem:[%s3989_s3 + $0x1d4] ss:$8 sps:$4 sm:$0xff]  }
  0x3d   :  { %2117 = vmatprep.subr.bf16.mxu0 %v2705_v54  ;;  %v62_v54 = vunpack.c.h.bf16 %v3390_v48 }
  0x3e   :  { %v286_v60 = vadd.f32 %v202_v44, %v170_v51  ;;  %v162_v61 = vmul.f32 %v118_v45, %v46_v52  ;;  %v2795_v51 = vld [vmem:[%s3989_s3 + $0x1e4] ss:$8 sps:$4 sm:$0xff]  }
  0x3f   :  { %1946 = vmatpush1.bf16.msra.mxu1 %v2707_v59  ;;  %v270_v59 = vadd.f32 %v202_v44, %v154_v50  ;;  %v2792_v44 = vld [vmem:[%s3989_s3 + $0x5d4] ss:$8 sps:$4 sm:$0xff]   ;;  %v2798_v52 = vld [vmem:[%s3989_s3 + $0x5e4] ss:$8 sps:$4 sm:$0xff]  }
  0x40   :  { %2118 = vmatpush1.bf16.msra.mxu0 %v2708_v0  ;;  %1958 = vmatprep.subr.bf16.mxu1 %v2711_v1  ;;  %v178_v0 = vmul.f32 %v118_v45, %v62_v54  ;;  %v2796_v54 = vld [vmem:[%s3989_s3 + $0x5e0] ss:$8 sps:$4 sm:$0xff]  }
  0x41   :  { %2130 = vmatprep.subr.bf16.mxu0 %v2714_v2  ;;  %v302_v1 = vmul.f32 0.2, %v270_v59  ;;  %v318_v2 = vmul.f32 0.2, %v286_v60 }
  0x42   :  { %1948 = vmatmul.mubr.bf16.vlgmr.msra.gmra.mrb[0].mxu1 %v363_v4  ;;  %v294_v4 = vadd.f32 %v234_v53, %v178_v0  ;;  %v2802_v0 = vld [vmem:[%s3989_s3 + $0x5f0] ss:$8 sps:$4 sm:$0xff]  }
  0x43   :  { %2120 = vmatmul.mubr.bf16.vlgmr.msra.gmra.mrb[0].mxu0 %v371_v5  ;;  %1959 = vmatpush1.bf16.msra.mxu1 %v2709_v3  ;;  %v278_v3 = vadd.f32 %v234_v53, %v162_v61  ;;  %v2763_v5 = vld [vmem:[%s3989_s3 + $0x190] ss:$8 sps:$4 sm:$0xff]   ;;  %v2793_v53 = vld [vmem:[%s3989_s3 + $0x1e0] ss:$8 sps:$4 sm:$0xff]   ;;  %v2801_v61 = vld [vmem:[%s3989_s3 + $0x1f4] ss:$8 sps:$4 sm:$0xff]  }
  0x44   :  { %2131 = vmatpush1.bf16.msra.mxu0 %v2712_v8  ;;  %1960 = vmatprep.subr.bf16.mxu1 %v2717_v9  ;;  %v334_v8 = vmax.f32 %v270_v59, %v302_v1  ;;  %v350_v9 = vmax.f32 %v286_v60, %v318_v2 }
  0x45   :  { %2132 = vmatprep.subr.bf16.mxu0 %v2720_v10  ;;  %v310_v10 = vmul.f32 0.2, %v278_v3 }
  0x47   :  { %1961 = vmatpush1.bf16.msra.mxu1 %v2715_v11  ;;  %v2766_v11 = vld [vmem:[%s3989_s3 + $0x590] ss:$8 sps:$4 sm:$0xff]  }
  0x48   :  { %2133 = vmatpush1.bf16.msra.mxu0 %v2718_v12  ;;  %1962 = vmatprep.subr.bf16.mxu1 %v2723_v13  ;;  %v2771_v12 = vld [vmem:[%s3989_s3 + $0x1a4] ss:$8 sps:$4 sm:$0xff]   ;;  %v326_v13 = vmul.f32 0.2, %v294_v4 }
  0x49   :  { %2134 = vmatprep.subr.bf16.mxu0 %v2726_v14  ;;  %v2774_v14 = vld [vmem:[%s3989_s3 + $0x5a4] ss:$8 sps:$4 sm:$0xff]  }
  0x4b   :  { %1963 = vmatpush1.bf16.msra.mxu1 %v2721_v15  ;;  %v366_v15 = vpack.c.bf16 %v350_v9, %v334_v8  ;;  %v2810_v8 = vld [vmem:[%s3989_s3 + $0x604] ss:$8 sps:$4 sm:$0xff]   ;;  %v2805_v9 = vld [vmem:[%s3989_s3 + $0x200] ss:$8 sps:$4 sm:$0xff]  }
  0x4c   :  { %2135 = vmatpush1.bf16.msra.mxu0 %v2724_v16  ;;  %1964 = vmatprep.subr.bf16.mxu1 %v2729_v17  ;;  %v342_v16 = vmax.f32 %v278_v3, %v310_v10  ;;  %v358_v17 = vmax.f32 %v294_v4, %v326_v13  ;;  %v2808_v10 = vld [vmem:[%s3989_s3 + $0x600] ss:$8 sps:$4 sm:$0xff]   ;;  %v2813_v13 = vld [vmem:[%s3989_s3 + $0x214] ss:$8 sps:$4 sm:$0xff]  }
  0x4d   :  { %2136 = vmatprep.subr.bf16.mxu0 %v2732_v18  ;;  %v81_v18 = vsub.s32 2, %v3154_v42  ;;  %1990 = vmatprep.mubr.bf16.mxu1 %v366_v15  ;;  %v2811_v15 = vld [vmem:[%s3989_s3 + $0x210] ss:$8 sps:$4 sm:$0xff]  }
  0x4f   :  { %1965 = vmatpush1.bf16.msra.mxu1 %v2727_v19  ;;  %v2769_v19 = vld [vmem:[%s3989_s3 + $0x1a0] ss:$8 sps:$4 sm:$0xff]   ;;  %v114_v31 = vrot.slane %v3213_v6, %v81_v18  ;;  %v198_v36 = vrot.slane %v3193_v56, %v81_v18  ;;  %v230_v41 = vrot.slane %v3218_v7, %v81_v18 }
  0x50   :  { %2137 = vmatpush1.bf16.msra.mxu0 %v2730_v20  ;;  %1966 = vmatprep.subr.bf16.mxu1 %v2735_v21  ;;  %v2772_v20 = vld [vmem:[%s3989_s3 + $0x5a0] ss:$8 sps:$4 sm:$0xff]   ;;  %v2777_v21 = vld [vmem:[%s3989_s3 + $0x1b4] ss:$8 sps:$4 sm:$0xff]  }
  0x51   :  { %2138 = vmatprep.subr.bf16.mxu0 %v2738_v22  ;;  %v374_v22 = vpack.c.bf16 %v358_v17, %v342_v16  ;;  %v2814_v16 = vld [vmem:[%s3989_s3 + $0x610] ss:$8 sps:$4 sm:$0xff]   ;;  %v93_v17 = vsub.s32 5, %v3154_v42 }
  0x53   :  { %1967 = vmatpush1.bf16.msra.mxu1 %v2733_v23  ;;  %v2780_v23 = vld [vmem:[%s3989_s3 + $0x5b4] ss:$8 sps:$4 sm:$0xff]   ;;  %2162 = vmatprep.mubr.bf16.mxu0 %v374_v22  ;;  %v94_v22 = vrot.slane %v3188_v55, %v93_v17 }
  0x54   :  { %2139 = vmatpush1.bf16.msra.mxu0 %v2736_v24  ;;  %1968 = vmatprep.subr.bf16.mxu1 %v2741_v25  ;;  %v37_v24 = vunpack.c.l.bf16 %v3365_v38  ;;  %v53_v25 = vunpack.c.l.bf16 %v3370_v39  ;;  %v2784_v38 = vld [vmem:[%s3989_s3 + $0x5c0] ss:$8 sps:$4 sm:$0xff]  }
  0x55   :  { %2140 = vmatprep.subr.bf16.mxu0 %v2744_v26  ;;  %v82_v26 = vrot.slane %v3188_v55, %v81_v18  ;;  %v2819_v18 = vld [vmem:[%s3989_s3 + $0x224] ss:$8 sps:$4 sm:$0xff]   ;;  %v2828_v55 = vld [vmem:[%s3989_s3 + $0x634] ss:$8 sps:$4 sm:$0xff]  }
  0x57   :  { %1969 = vmatpush1.bf16.msra.mxu1 %v2739_v27  ;;  %v2775_v27 = vld [vmem:[%s3989_s3 + $0x1b0] ss:$8 sps:$4 sm:$0xff]  }
  0x58   :  { %2141 = vmatpush1.bf16.msra.mxu0 %v2742_v28  ;;  %1970 = vmatprep.subr.bf16.mxu1 %v2747_v29  ;;  %v2778_v28 = vld [vmem:[%s3989_s3 + $0x5b0] ss:$8 sps:$4 sm:$0xff]   ;;  %v45_v29 = vunpack.c.l.bf16 %v3385_v47 }
  0x59   :  { %2142 = vmatprep.subr.bf16.mxu0 %v2750_v30  ;;  %v61_v30 = vunpack.c.l.bf16 %v3390_v48  ;;  %v2787_v47 = vld [vmem:[%s3989_s3 + $0x1d0] ss:$8 sps:$4 sm:$0xff]  }
  0x5a   :  { %v161_v39 = vmul.f32 %v114_v31, %v45_v29  ;;  %v2790_v48 = vld [vmem:[%s3989_s3 + $0x5d0] ss:$8 sps:$4 sm:$0xff]   ;;  %v126_v29 = vrot.slane %v3213_v6, %v93_v17 }
  0x5b   :  { %1971 = vmatpush1.bf16.msra.mxu1 %v2745_v32  ;;  %v2783_v32 = vld [vmem:[%s3989_s3 + $0x1c4] ss:$8 sps:$4 sm:$0xff]  }
  0x5c   :  { %2143 = vmatpush1.bf16.msra.mxu0 %v2748_v33  ;;  %1972 = vmatprep.subr.bf16.mxu1 %v2753_v34  ;;  %v2786_v33 = vld [vmem:[%s3989_s3 + $0x5c4] ss:$8 sps:$4 sm:$0xff]   ;;  %v153_v34 = vmul.f32 %v82_v26, %v37_v24  ;;  %v3543_v24 = vld [vmem:[%s3990_s0 + $0x50] sm:$0xff] }
  0x5d   :  { %2144 = vmatprep.subr.bf16.mxu0 %v2756_v35  ;;  %v169_v35 = vmul.f32 %v82_v26, %v53_v25  ;;  %v2825_v25 = vld [vmem:[%s3989_s3 + $0x234] ss:$8 sps:$4 sm:$0xff]  }
  0x5e   :  { %v269_v45 = vadd.f32 %v198_v36, %v153_v34 }
  0x5f   :  { %1973 = vmatpush1.bf16.msra.mxu1 %v2751_v37  ;;  %v2781_v37 = vld [vmem:[%s3989_s3 + $0x1c0] ss:$8 sps:$4 sm:$0xff]  }
  0x60   :  { %2145 = vmatpush1.bf16.msra.mxu0 %v2754_v40  ;;  %1974 = vmatprep.subr.bf16.mxu1 %v2759_v46  ;;  %v177_v40 = vmul.f32 %v114_v31, %v61_v30  ;;  %v285_v46 = vadd.f32 %v198_v36, %v169_v35  ;;  %v3558_v30 = vld [vmem:[%s3990_s0 + $0x30] sm:$0xff]  ;;  %v242_v35 = vrot.slane %v3218_v7, %v93_v17  ;;  %v2831_v36 = vld [vmem:[%s3989_s3 + $0x244] ss:$8 sps:$4 sm:$0xff]  }
  0x61   :  { %2146 = vmatprep.subr.bf16.mxu0 %v2762_v49  ;;  %v277_v49 = vadd.f32 %v230_v41, %v161_v39  ;;  %v3563_v31 = vld [vmem:[%s3990_s0 + $0x70] sm:$0xff]  ;;  %v48_v34 = vunpack.c.h.bf16 %v3558_v30 }
  0x62   :  { %v293_v50 = vadd.f32 %v230_v41, %v177_v40 }
  0x63   :  { %1975 = vmatpush1.bf16.msra.mxu1 %v2757_v57  ;;  %v301_v57 = vmul.f32 0.2, %v269_v45  ;;  %v309_v59 = vmul.f32 0.2, %v277_v49  ;;  %v164_v41 = vmul.f32 %v126_v29, %v48_v34  ;;  %v3696_v34 = vld [vmem:[%s3992_s2] sm:$0xff] }
  0x64   :  { %2147 = vmatpush1.bf16.msra.mxu0 %v2760_v58  ;;  %1976 = vmatprep.subr.bf16.mxu1 %v2765_v62  ;;  %v317_v58 = vmul.f32 0.2, %v285_v46  ;;  %v325_v60 = vmul.f32 0.2, %v293_v50  ;;  %v2804_v62 = vld [vmem:[%s3989_s3 + $0x5f4] ss:$8 sps:$4 sm:$0xff]  }
  0x65   :  { %2148 = vmatprep.subr.bf16.mxu0 %v2768_v63  ;;  %v2799_v63 = vld [vmem:[%s3989_s3 + $0x1f0] ss:$8 sps:$4 sm:$0xff]   ;;  %v333_v1 = vmax.f32 %v269_v45, %v301_v57  ;;  %v341_v3 = vmax.f32 %v277_v49, %v309_v59  ;;  %v280_v45 = vadd.f32 %v242_v35, %v164_v41 }
  0x66   :  { %v349_v2 = vmax.f32 %v285_v46, %v317_v58  ;;  %v357_v4 = vmax.f32 %v293_v50, %v325_v60  ;;  %v2829_v46 = vld [vmem:[%s3989_s3 + $0x240] ss:$8 sps:$4 sm:$0xff]   ;;  %v2840_v50 = vld [vmem:[%s3989_s3 + $0x654] ss:$8 sps:$4 sm:$0xff]   ;;  %v2835_v59 = vld [vmem:[%s3989_s3 + $0x250] ss:$8 sps:$4 sm:$0xff]  }
  0x67   :  { %1977 = vmatpush1.bf16.msra.mxu1 %v2763_v5  ;;  %v2807_v5 = vld [vmem:[%s3989_s3 + $0x204] ss:$8 sps:$4 sm:$0xff]   ;;  %v2838_v60 = vld [vmem:[%s3989_s3 + $0x650] ss:$8 sps:$4 sm:$0xff]  }
  0x68   :  { %2149 = vmatpush1.bf16.msra.mxu0 %v2766_v11  ;;  %1978 = vmatprep.subr.bf16.mxu1 %v2771_v12  ;;  %v365_v11 = vpack.c.bf16 %v349_v2, %v333_v1  ;;  %v373_v12 = vpack.c.bf16 %v357_v4, %v341_v3  ;;  %v2841_v1 = vld [vmem:[%s3989_s3 + $0x260] ss:$8 sps:$4 sm:$0xff]   ;;  %v2849_v3 = vld [vmem:[%s3989_s3 + $0x274] ss:$8 sps:$4 sm:$0xff]  }
  0x69   :  { %2150 = vmatprep.subr.bf16.mxu0 %v2774_v14  ;;  %v2816_v14 = vld [vmem:[%s3989_s3 + $0x614] ss:$8 sps:$4 sm:$0xff]   ;;  %v2844_v2 = vld [vmem:[%s3989_s3 + $0x660] ss:$8 sps:$4 sm:$0xff]  }
  0x6a   :  { %v2852_v4 = vld [vmem:[%s3989_s3 + $0x674] ss:$8 sps:$4 sm:$0xff]  }
  0x6b   :  { %1979 = vmatpush1.bf16.msra.mxu1 %v2769_v19  ;;  %v2822_v19 = vld [vmem:[%s3989_s3 + $0x624] ss:$8 sps:$4 sm:$0xff]  }
  0x6c   :  { %2151 = vmatpush1.bf16.msra.mxu0 %v2772_v20  ;;  %1980 = vmatprep.subr.bf16.mxu1 %v2777_v21  ;;  %v2817_v20 = vld [vmem:[%s3989_s3 + $0x220] ss:$8 sps:$4 sm:$0xff]  }
  0x6d   :  { %2152 = vmatprep.subr.bf16.mxu0 %v2780_v23  ;;  %v2820_v21 = vld [vmem:[%s3989_s3 + $0x620] ss:$8 sps:$4 sm:$0xff]   ;;  %v3538_v23 = vld [vmem:[%s3990_s0 + $0x10] sm:$0xff] }
  0x6e   :  { %v40_v26 = vunpack.c.h.bf16 %v3538_v23 }
  0x6f   :  { %1981 = vmatpush1.bf16.msra.mxu1 %v2775_v27  ;;  %v56_v27 = vunpack.c.h.bf16 %v3543_v24 }
  0x70   :  { %2153 = vmatpush1.bf16.msra.mxu0 %v2778_v28  ;;  %1982 = vmatprep.subr.bf16.mxu1 %v2783_v32  ;;  %v210_v28 = vrot.slane %v3193_v56, %v93_v17  ;;  %v2823_v32 = vld [vmem:[%s3989_s3 + $0x230] ss:$8 sps:$4 sm:$0xff]   ;;  %v2867_v17 = vld [vmem:[%s3989_s3 + $0x2a4] ss:$8 sps:$4 sm:$0xff]  }
  0x71   :  { %2154 = vmatprep.subr.bf16.mxu0 %v2786_v33  ;;  %v2826_v56 = vld [vmem:[%s3989_s3 + $0x630] ss:$8 sps:$4 sm:$0xff]   ;;  %v156_v33 = vmul.f32 %v94_v22, %v40_v26  ;;  %v172_v6 = vmul.f32 %v94_v22, %v56_v27  ;;  %v2873_v22 = vld [vmem:[%s3989_s3 + $0x2b4] ss:$8 sps:$4 sm:$0xff]   ;;  %v3669_v26 = vld [vmem:[%s3991_s1] sm:$0xff] }
  0x73   :  { %1983 = vmatpush1.bf16.msra.mxu1 %v2781_v37  ;;  %v64_v37 = vunpack.c.h.bf16 %v3563_v31  ;;  %v272_v39 = vadd.f32 %v210_v28, %v156_v33  ;;  %v288_v40 = vadd.f32 %v210_v28, %v172_v6  ;;  %v55_v28 = vunpack.c.l.bf16 %v3543_v24  ;;  %v2874_v24 = vld [vmem:[%s3989_s3 + $0x6b0] ss:$8 sps:$4 sm:$0xff]  }
  0x74   :  { %2155 = vmatpush1.bf16.msra.mxu0 %v2784_v38  ;;  %1984 = vmatprep.subr.bf16.mxu1 %v2789_v43  ;;  %v2834_v38 = vld [vmem:[%s3989_s3 + $0x644] ss:$8 sps:$4 sm:$0xff]  }
  0x75   :  { %2156 = vmatprep.subr.bf16.mxu0 %v2792_v44  ;;  %v180_v43 = vmul.f32 %v126_v29, %v64_v37  ;;  %v304_v44 = vmul.f32 0.2, %v272_v39  ;;  %v320_v7 = vmul.f32 0.2, %v288_v40  ;;  %v2871_v29 = vld [vmem:[%s3989_s3 + $0x2b0] ss:$8 sps:$4 sm:$0xff]  }
  0x76   :  { %v2877_v37 = vld [vmem:[%s3989_s3 + $0x2c0] ss:$8 sps:$4 sm:$0xff]  }
  0x77   :  { %1985 = vmatpush1.bf16.msra.mxu1 %v2787_v47  ;;  %v2832_v47 = vld [vmem:[%s3989_s3 + $0x640] ss:$8 sps:$4 sm:$0xff]   ;;  %v296_v49 = vadd.f32 %v242_v35, %v180_v43 }
  0x78   :  { %2157 = vmatpush1.bf16.msra.mxu0 %v2790_v48  ;;  %1986 = vmatprep.subr.bf16.mxu1 %v2795_v51  ;;  %v2837_v48 = vld [vmem:[%s3989_s3 + $0x254] ss:$8 sps:$4 sm:$0xff]   ;;  %v336_v51 = vmax.f32 %v272_v39, %v304_v44  ;;  %v2880_v43 = vld [vmem:[%s3989_s3 + $0x6c0] ss:$8 sps:$4 sm:$0xff]   ;;  %v101_v44 = vsub.s32 7, %v3154_v42 }
  0x79   :  { %2158 = vmatprep.subr.bf16.mxu0 %v2798_v52  ;;  %v352_v52 = vmax.f32 %v288_v40, %v320_v7  ;;  %v3705_v40 = vld [vmem:[%s3992_s2 + $0x8] sm:$0xff]  ;;  %v2885_v7 = vld [vmem:[%s3989_s3 + $0x2d4] ss:$8 sps:$4 sm:$0xff]  }
  0x7b   :  { %1987 = vmatpush1.bf16.msra.mxu1 %v2793_v53  ;;  %v312_v53 = vmul.f32 0.2, %v280_v45  ;;  %v368_v57 = vpack.c.bf16 %v352_v52, %v336_v51  ;;  %v2891_v52 = vld [vmem:[%s3989_s3 + $0x2e4] ss:$8 sps:$4 sm:$0xff]  }
  0x7c   :  { %2159 = vmatpush1.bf16.msra.mxu0 %v2796_v54  ;;  %1988 = vmatprep.subr.bf16.mxu1 %v2801_v61  ;;  %v328_v54 = vmul.f32 0.2, %v296_v49 }
  0x7d   :  { %2160 = vmatprep.subr.bf16.mxu0 %v2804_v62  ;;  %v344_v58 = vmax.f32 %v280_v45, %v312_v53  ;;  %v2843_v62 = vld [vmem:[%s3989_s3 + $0x264] ss:$8 sps:$4 sm:$0xff]   ;;  %v2888_v45 = vld [vmem:[%s3989_s3 + $0x6d4] ss:$8 sps:$4 sm:$0xff]   ;;  %v102_v53 = vrot.slane %v3669_v26, %v101_v44 }
  0x7e   :  { %v360_v61 = vmax.f32 %v296_v49, %v328_v54  ;;  %v2886_v49 = vld [vmem:[%s3989_s3 + $0x6d0] ss:$8 sps:$4 sm:$0xff]   ;;  %v2894_v54 = vld [vmem:[%s3989_s3 + $0x6e4] ss:$8 sps:$4 sm:$0xff]  }
  0x7f   :  { %1989 = vmatpush1.bf16.msra.mxu1 %v2799_v63  ;;  %v2846_v63 = vld [vmem:[%s3989_s3 + $0x664] ss:$8 sps:$4 sm:$0xff]  }
  0x80   :  { %2161 = vmatpush1.bf16.msra.mxu0 %v2802_v0  ;;  %2001 = vmatprep.subr.bf16.mxu1 %v2807_v5  ;;  %v376_v0 = vpack.c.bf16 %v360_v61, %v344_v58  ;;  %v2847_v5 = vld [vmem:[%s3989_s3 + $0x270] ss:$8 sps:$4 sm:$0xff]  }
  0x81   :  { %2173 = vmatprep.subr.bf16.mxu0 %v2810_v8  ;;  %v2850_v8 = vld [vmem:[%s3989_s3 + $0x670] ss:$8 sps:$4 sm:$0xff]  }
  0x82   :  { %1991 = vmatmul.mubr.bf16.vlgmr.msra.gmra.mrb[0].mxu1 %v365_v11  ;;  %v2853_v11 = vld [vmem:[%s3989_s3 + $0x280] ss:$8 sps:$4 sm:$0xff]   ;;  %v3734_v58 = vld [vmem:[%s3990_s0 + $0x18] sm:$0xff] }
  0x83   :  { %2163 = vmatmul.mubr.bf16.vlgmr.msra.gmra.mrb[0].mxu0 %v373_v12  ;;  %2002 = vmatpush1.bf16.msra.mxu1 %v2805_v9  ;;  %v2855_v9 = vld [vmem:[%s3989_s3 + $0x284] ss:$8 sps:$4 sm:$0xff]   ;;  %v2856_v12 = vld [vmem:[%s3989_s3 + $0x680] ss:$8 sps:$4 sm:$0xff]   ;;  %v3740_v61 = vld [vmem:[%s3990_s0 + $0x58] sm:$0xff] }
  0x84   :  { %2174 = vmatpush1.bf16.msra.mxu0 %v2808_v10  ;;  %2003 = vmatprep.subr.bf16.mxu1 %v2813_v13  ;;  %v2858_v10 = vld [vmem:[%s3989_s3 + $0x684] ss:$8 sps:$4 sm:$0xff]   ;;  %v2861_v13 = vld [vmem:[%s3989_s3 + $0x294] ss:$8 sps:$4 sm:$0xff]  }
  0x85   :  { %2175 = vmatprep.subr.bf16.mxu0 %v2816_v14  ;;  %2033 = vmatprep.mubr.bf16.mxu1 %v368_v57  ;;  %v2864_v14 = vld [vmem:[%s3989_s3 + $0x694] ss:$8 sps:$4 sm:$0xff]  }
  0x86   :  { %2205 = vmatprep.mubr.bf16.mxu0 %v376_v0  ;;  %v3747_v0 = vld [vmem:[%s3990_s0 + $0x38] sm:$0xff] }
  0x87   :  { %2004 = vmatpush1.bf16.msra.mxu1 %v2811_v15  ;;  %v2859_v15 = vld [vmem:[%s3989_s3 + $0x290] ss:$8 sps:$4 sm:$0xff]  }
  0x88   :  { %2176 = vmatpush1.bf16.msra.mxu0 %v2814_v16  ;;  %2005 = vmatprep.subr.bf16.mxu1 %v2819_v18  ;;  %v2862_v16 = vld [vmem:[%s3989_s3 + $0x690] ss:$8 sps:$4 sm:$0xff]   ;;  %v2870_v18 = vld [vmem:[%s3989_s3 + $0x6a4] ss:$8 sps:$4 sm:$0xff]  }
  0x89   :  { %2177 = vmatprep.subr.bf16.mxu0 %v2822_v19  ;;  %v89_v19 = vsub.s32 4, %v3154_v42 }
  0x8b   :  { %2006 = vmatpush1.bf16.msra.mxu1 %v2817_v20  ;;  %v2865_v20 = vld [vmem:[%s3989_s3 + $0x2a0] ss:$8 sps:$4 sm:$0xff]   ;;  %v90_v27 = vrot.slane %v3669_v26, %v89_v19  ;;  %v206_v35 = vrot.slane %v3696_v34, %v89_v19  ;;  %v238_v41 = vrot.slane %v3705_v40, %v89_v19 }
  0x8c   :  { %2178 = vmatpush1.bf16.msra.mxu0 %v2820_v21  ;;  %2007 = vmatprep.subr.bf16.mxu1 %v2825_v25  ;;  %v2868_v21 = vld [vmem:[%s3989_s3 + $0x6a0] ss:$8 sps:$4 sm:$0xff]   ;;  %v2876_v25 = vld [vmem:[%s3989_s3 + $0x6b4] ss:$8 sps:$4 sm:$0xff]  }
  0x8d   :  { %2179 = vmatprep.subr.bf16.mxu0 %v2828_v55  ;;  %v39_v55 = vunpack.c.l.bf16 %v3538_v23  ;;  %v3681_v23 = vld [vmem:[%s3991_s1 + $0x8] sm:$0xff] }
  0x8e   :  { %v122_v33 = vrot.slane %v3681_v23, %v89_v19 }
  0x8f   :  { %2008 = vmatpush1.bf16.msra.mxu1 %v2823_v32  ;;  %v47_v32 = vunpack.c.l.bf16 %v3558_v30  ;;  %v2879_v30 = vld [vmem:[%s3989_s3 + $0x2c4] ss:$8 sps:$4 sm:$0xff]   ;;  %v155_v6 = vmul.f32 %v90_v27, %v39_v55 }
  0x90   :  { %2180 = vmatpush1.bf16.msra.mxu0 %v2826_v56  ;;  %2009 = vmatprep.subr.bf16.mxu1 %v2831_v36  ;;  %v63_v56 = vunpack.c.l.bf16 %v3563_v31  ;;  %v2882_v31 = vld [vmem:[%s3989_s3 + $0x6c4] ss:$8 sps:$4 sm:$0xff]   ;;  %v171_v36 = vmul.f32 %v90_v27, %v55_v28  ;;  %v2898_v28 = vld [vmem:[%s3989_s3 + $0x6f0] ss:$8 sps:$4 sm:$0xff]  }
  0x91   :  { %2181 = vmatprep.subr.bf16.mxu0 %v2834_v38  ;;  %v163_v38 = vmul.f32 %v122_v33, %v47_v32 }
  0x92   :  { %v179_v39 = vmul.f32 %v122_v33, %v63_v56  ;;  %v2906_v33 = vld [vmem:[%s3989_s3 + $0x704] ss:$8 sps:$4 sm:$0xff]  }
  0x93   :  { %2010 = vmatpush1.bf16.msra.mxu1 %v2829_v46  ;;  %v271_v46 = vadd.f32 %v206_v35, %v155_v6 }
  0x94   :  { %2182 = vmatpush1.bf16.msra.mxu0 %v2832_v47  ;;  %2011 = vmatprep.subr.bf16.mxu1 %v2837_v48  ;;  %v2883_v47 = vld [vmem:[%s3989_s3 + $0x2d0] ss:$8 sps:$4 sm:$0xff]   ;;  %v287_v48 = vadd.f32 %v206_v35, %v171_v36  ;;  %v295_v51 = vadd.f32 %v238_v41, %v179_v39  ;;  %v2901_v39 = vld [vmem:[%s3989_s3 + $0x300] ss:$8 sps:$4 sm:$0xff]  }
  0x95   :  { %2183 = vmatprep.subr.bf16.mxu0 %v2840_v50  ;;  %v279_v50 = vadd.f32 %v238_v41, %v163_v38  ;;  %v303_v57 = vmul.f32 0.2, %v271_v46  ;;  %v2904_v41 = vld [vmem:[%s3989_s3 + $0x700] ss:$8 sps:$4 sm:$0xff]  }
  0x97   :  { %2012 = vmatpush1.bf16.msra.mxu1 %v2835_v59  ;;  %v134_v59 = vrot.slane %v3681_v23, %v101_v44 }
  0x98   :  { %2184 = vmatpush1.bf16.msra.mxu0 %v2838_v60  ;;  %2013 = vmatprep.subr.bf16.mxu1 %v2843_v62  ;;  %v319_v60 = vmul.f32 0.2, %v287_v48  ;;  %v42_v62 = vunpack.c.h.bf16 %v3734_v58 }
  0x99   :  { %2185 = vmatprep.subr.bf16.mxu0 %v2846_v63  ;;  %v218_v63 = vrot.slane %v3696_v34, %v101_v44 }
  0x9b   :  { %2014 = vmatpush1.bf16.msra.mxu1 %v2841_v1  ;;  %v3752_v1 = vld [vmem:[%s3990_s0 + $0x78] sm:$0xff] }
  0x9c   :  { %2186 = vmatpush1.bf16.msra.mxu0 %v2844_v2  ;;  %2015 = vmatprep.subr.bf16.mxu1 %v2849_v3  ;;  %v250_v2 = vrot.slane %v3705_v40, %v101_v44  ;;  %v311_v3 = vmul.f32 0.2, %v279_v50  ;;  %v2909_v44 = vld [vmem:[%s3989_s3 + $0x314] ss:$8 sps:$4 sm:$0xff]  }
  0x9d   :  { %2187 = vmatprep.subr.bf16.mxu0 %v2852_v4  ;;  %v327_v4 = vmul.f32 0.2, %v295_v51 }
  0x9f   :  { %2016 = vmatpush1.bf16.msra.mxu1 %v2847_v5  ;;  %v58_v5 = vunpack.c.h.bf16 %v3740_v61 }
  0xa0   :  { %2188 = vmatpush1.bf16.msra.mxu0 %v2850_v8  ;;  %2017 = vmatprep.subr.bf16.mxu1 %v2855_v9  ;;  %v50_v8 = vunpack.c.h.bf16 %v3747_v0  ;;  %v2889_v9 = vld [vmem:[%s3989_s3 + $0x2e0] ss:$8 sps:$4 sm:$0xff]  }
  0xa1   :  { %2189 = vmatprep.subr.bf16.mxu0 %v2858_v10  ;;  %v2892_v10 = vld [vmem:[%s3989_s3 + $0x6e0] ss:$8 sps:$4 sm:$0xff]  }
  0xa3   :  { %2018 = vmatpush1.bf16.msra.mxu1 %v2853_v11  ;;  %v158_v11 = vmul.f32 %v102_v53, %v42_v62  ;;  %v2930_v62 = vld [vmem:[%s3989_s3 + $0x744] ss:$8 sps:$4 sm:$0xff]  }
  0xa4   :  { %2190 = vmatpush1.bf16.msra.mxu0 %v2856_v12  ;;  %2019 = vmatprep.subr.bf16.mxu1 %v2861_v13  ;;  %v66_v12 = vunpack.c.h.bf16 %v3752_v1  ;;  %v2897_v13 = vld [vmem:[%s3989_s3 + $0x2f4] ss:$8 sps:$4 sm:$0xff]  }
  0xa5   :  { %2191 = vmatprep.subr.bf16.mxu0 %v2864_v14  ;;  %v2900_v14 = vld [vmem:[%s3989_s3 + $0x6f4] ss:$8 sps:$4 sm:$0xff]   ;;  %v274_v19 = vadd.f32 %v218_v63, %v158_v11  ;;  %v2937_v11 = vld [vmem:[%s3989_s3 + $0x360] ss:$8 sps:$4 sm:$0xff]  }
  0xa7   :  { %2020 = vmatpush1.bf16.msra.mxu1 %v2859_v15  ;;  %v174_v15 = vmul.f32 %v102_v53, %v58_v5  ;;  %v306_v32 = vmul.f32 0.2, %v274_v19  ;;  %v2921_v53 = vld [vmem:[%s3989_s3 + $0x334] ss:$8 sps:$4 sm:$0xff]   ;;  %v2931_v5 = vld [vmem:[%s3989_s3 + $0x350] ss:$8 sps:$4 sm:$0xff]  }
  0xa8   :  { %2192 = vmatpush1.bf16.msra.mxu0 %v2862_v16  ;;  %2021 = vmatprep.subr.bf16.mxu1 %v2867_v17  ;;  %v166_v16 = vmul.f32 %v134_v59, %v50_v8  ;;  %v335_v17 = vmax.f32 %v271_v46, %v303_v57  ;;  %v2919_v57 = vld [vmem:[%s3989_s3 + $0x330] ss:$8 sps:$4 sm:$0xff]  }
  0xa9   :  { %2193 = vmatprep.subr.bf16.mxu0 %v2870_v18  ;;  %v351_v18 = vmax.f32 %v287_v48, %v319_v60  ;;  %v290_v55 = vadd.f32 %v218_v63, %v174_v15  ;;  %v2910_v48 = vld [vmem:[%s3989_s3 + $0x710] ss:$8 sps:$4 sm:$0xff]   ;;  %v2927_v60 = vld [vmem:[%s3989_s3 + $0x344] ss:$8 sps:$4 sm:$0xff]   ;;  %v2925_v63 = vld [vmem:[%s3989_s3 + $0x340] ss:$8 sps:$4 sm:$0xff]  }
  0xaa   :  { %v282_v27 = vadd.f32 %v250_v2, %v166_v16  ;;  %v2934_v8 = vld [vmem:[%s3989_s3 + $0x750] ss:$8 sps:$4 sm:$0xff]  }
  0xab   :  { %2022 = vmatpush1.bf16.msra.mxu1 %v2865_v20  ;;  %v182_v20 = vmul.f32 %v134_v59, %v66_v12  ;;  %v367_v35 = vpack.c.bf16 %v351_v18, %v335_v17  ;;  %v2922_v59 = vld [vmem:[%s3989_s3 + $0x730] ss:$8 sps:$4 sm:$0xff]   ;;  %v2940_v12 = vld [vmem:[%s3989_s3 + $0x760] ss:$8 sps:$4 sm:$0xff]   ;;  %v2951_v17 = vld [vmem:[%s3989_s3 + $0x384] ss:$8 sps:$4 sm:$0xff]  }
  0xac   :  { %2194 = vmatpush1.bf16.msra.mxu0 %v2868_v21  ;;  %2023 = vmatprep.subr.bf16.mxu1 %v2873_v22  ;;  %v2895_v21 = vld [vmem:[%s3989_s3 + $0x2f0] ss:$8 sps:$4 sm:$0xff]   ;;  %v343_v22 = vmax.f32 %v279_v50, %v311_v3  ;;  %v2918_v50 = vld [vmem:[%s3989_s3 + $0x724] ss:$8 sps:$4 sm:$0xff]   ;;  %v2933_v3 = vld [vmem:[%s3989_s3 + $0x354] ss:$8 sps:$4 sm:$0xff]  }
  0xad   :  { %2195 = vmatprep.subr.bf16.mxu0 %v2876_v25  ;;  %v359_v25 = vmax.f32 %v295_v51, %v327_v4  ;;  %v298_v56 = vadd.f32 %v250_v2, %v182_v20  ;;  %v2913_v51 = vld [vmem:[%s3989_s3 + $0x320] ss:$8 sps:$4 sm:$0xff]   ;;  %v2936_v4 = vld [vmem:[%s3989_s3 + $0x754] ss:$8 sps:$4 sm:$0xff]   ;;  %v2943_v15 = vld [vmem:[%s3989_s3 + $0x370] ss:$8 sps:$4 sm:$0xff]  }
  0xae   :  { %v2928_v2 = vld [vmem:[%s3989_s3 + $0x740] ss:$8 sps:$4 sm:$0xff]   ;;  %v2946_v16 = vld [vmem:[%s3989_s3 + $0x770] ss:$8 sps:$4 sm:$0xff]   ;;  %v2954_v18 = vld [vmem:[%s3989_s3 + $0x784] ss:$8 sps:$4 sm:$0xff]  }
  0xaf   :  { %2024 = vmatpush1.bf16.msra.mxu1 %v2871_v29  ;;  %v2903_v29 = vld [vmem:[%s3989_s3 + $0x304] ss:$8 sps:$4 sm:$0xff]   ;;  %v330_v6 = vmul.f32 0.2, %v298_v56  ;;  %v375_v36 = vpack.c.bf16 %v359_v25, %v343_v22  ;;  %v2952_v20 = vld [vmem:[%s3989_s3 + $0x780] ss:$8 sps:$4 sm:$0xff]  }
  0xb0   :  { %2196 = vmatpush1.bf16.msra.mxu0 %v2874_v24  ;;  %2025 = vmatprep.subr.bf16.mxu1 %v2879_v30  ;;  %v322_v24 = vmul.f32 0.2, %v290_v55  ;;  %v314_v30 = vmul.f32 0.2, %v282_v27  ;;  %v2960_v22 = vld [vmem:[%s3989_s3 + $0x794] ss:$8 sps:$4 sm:$0xff]  }
  0xb1   :  { %2197 = vmatprep.subr.bf16.mxu0 %v2882_v31  ;;  %v338_v31 = vmax.f32 %v274_v19, %v306_v32  ;;  %v2949_v19 = vld [vmem:[%s3989_s3 + $0x380] ss:$8 sps:$4 sm:$0xff]   ;;  %v2955_v25 = vld [vmem:[%s3989_s3 + $0x390] ss:$8 sps:$4 sm:$0xff]  }
  0xb2   :  { %v346_v38 = vmax.f32 %v282_v27, %v314_v30  ;;  %v2963_v27 = vld [vmem:[%s3989_s3 + $0x3a4] ss:$8 sps:$4 sm:$0xff]   ;;  %v2961_v32 = vld [vmem:[%s3989_s3 + $0x3a0] ss:$8 sps:$4 sm:$0xff]  }
  0xb3   :  { %2026 = vmatpush1.bf16.msra.mxu1 %v2877_v37  ;;  %v354_v37 = vmax.f32 %v290_v55, %v322_v24  ;;  %v2958_v55 = vld [vmem:[%s3989_s3 + $0x790] ss:$8 sps:$4 sm:$0xff]   ;;  %v41_v24 = vunpack.c.l.bf16 %v3734_v58 }
  0xb4   :  { %2198 = vmatpush1.bf16.msra.mxu0 %v2880_v43  ;;  %2027 = vmatprep.subr.bf16.mxu1 %v2885_v7  ;;  %v362_v43 = vmax.f32 %v298_v56, %v330_v6  ;;  %v2912_v7 = vld [vmem:[%s3989_s3 + $0x714] ss:$8 sps:$4 sm:$0xff]   ;;  %v2964_v56 = vld [vmem:[%s3989_s3 + $0x7a0] ss:$8 sps:$4 sm:$0xff]   ;;  %v49_v6 = vunpack.c.l.bf16 %v3747_v0  ;;  %v2970_v58 = vld [vmem:[%s3989_s3 + $0x7b0] ss:$8 sps:$4 sm:$0xff]  }
  0xb5   :  { %2199 = vmatprep.subr.bf16.mxu0 %v2888_v45  ;;  %v370_v45 = vpack.c.bf16 %v354_v37, %v338_v31  ;;  %v57_v31 = vunpack.c.l.bf16 %v3740_v61  ;;  %v2967_v37 = vld [vmem:[%s3989_s3 + $0x3b0] ss:$8 sps:$4 sm:$0xff]  }
  0xb6   :  { %v378_v46 = vpack.c.bf16 %v362_v43, %v346_v38  ;;  %v2973_v43 = vld [vmem:[%s3989_s3 + $0x3c0] ss:$8 sps:$4 sm:$0xff]  }
  0xb7   :  { %2028 = vmatpush1.bf16.msra.mxu1 %v2883_v47  ;;  %v2907_v47 = vld [vmem:[%s3989_s3 + $0x310] ss:$8 sps:$4 sm:$0xff]  }
  0xb8   :  { %2200 = vmatpush1.bf16.msra.mxu0 %v2886_v49  ;;  %2029 = vmatprep.subr.bf16.mxu1 %v2891_v52  ;;  %v2915_v49 = vld [vmem:[%s3989_s3 + $0x324] ss:$8 sps:$4 sm:$0xff]   ;;  %v2916_v52 = vld [vmem:[%s3989_s3 + $0x720] ss:$8 sps:$4 sm:$0xff]  }
  0xb9   :  { %2201 = vmatprep.subr.bf16.mxu0 %v2894_v54  ;;  %v2924_v54 = vld [vmem:[%s3989_s3 + $0x734] ss:$8 sps:$4 sm:$0xff]  }
  0xbb   :  { %2030 = vmatpush1.bf16.msra.mxu1 %v2889_v9  ;;  %v2939_v9 = vld [vmem:[%s3989_s3 + $0x364] ss:$8 sps:$4 sm:$0xff]  }
  0xbc   :  { %2202 = vmatpush1.bf16.msra.mxu0 %v2892_v10  ;;  %2031 = vmatprep.subr.bf16.mxu1 %v2897_v13  ;;  %v2942_v10 = vld [vmem:[%s3989_s3 + $0x764] ss:$8 sps:$4 sm:$0xff]   ;;  %v2945_v13 = vld [vmem:[%s3989_s3 + $0x374] ss:$8 sps:$4 sm:$0xff]  }
  0xbd   :  { %2203 = vmatprep.subr.bf16.mxu0 %v2900_v14  ;;  %v2948_v14 = vld [vmem:[%s3989_s3 + $0x774] ss:$8 sps:$4 sm:$0xff]  }
  0xbf   :  { %2032 = vmatpush1.bf16.msra.mxu1 %v2895_v21  ;;  %v2957_v21 = vld [vmem:[%s3989_s3 + $0x394] ss:$8 sps:$4 sm:$0xff]  }
  0xc0   :  { %2204 = vmatpush1.bf16.msra.mxu0 %v2898_v28  ;;  %2044 = vmatprep.subr.bf16.mxu1 %v2903_v29  ;;  %v2966_v28 = vld [vmem:[%s3989_s3 + $0x7a4] ss:$8 sps:$4 sm:$0xff]   ;;  %v97_v29 = vsub.s32 6, %v3154_v42  ;;  %v2972_v42 = vld [vmem:[%s3989_s3 + $0x7b4] ss:$8 sps:$4 sm:$0xff]  }
  0xc1   :  { %2216 = vmatprep.subr.bf16.mxu0 %v2906_v33  ;;  %v2969_v33 = vld [vmem:[%s3989_s3 + $0x3b4] ss:$8 sps:$4 sm:$0xff]  }
  0xc2   :  { %2034 = vmatmul.mubr.bf16.vlgmr.msra.gmra.mrb[0].mxu1 %v367_v35  ;;  %v98_v30 = vrot.slane %v3669_v26, %v97_v29  ;;  %v65_v35 = vunpack.c.l.bf16 %v3752_v1  ;;  %v2975_v26 = vld [vmem:[%s3989_s3 + $0x3c4] ss:$8 sps:$4 sm:$0xff]   ;;  %v214_v0 = vrot.slane %v3696_v34, %v97_v29  ;;  %v2981_v34 = vld [vmem:[%s3989_s3 + $0x3d4] ss:$8 sps:$4 sm:$0xff]  }
  0xc3   :  { %2206 = vmatmul.mubr.bf16.vlgmr.msra.gmra.mrb[0].mxu0 %v375_v36  ;;  %2045 = vmatpush1.bf16.msra.mxu1 %v2901_v39  ;;  %v130_v36 = vrot.slane %v3681_v23, %v97_v29  ;;  %v2978_v23 = vld [vmem:[%s3989_s3 + $0x7c4] ss:$8 sps:$4 sm:$0xff]  }
  0xc4   :  { %2217 = vmatpush1.bf16.msra.mxu0 %v2904_v41  ;;  %2046 = vmatprep.subr.bf16.mxu1 %v2909_v44  ;;  %v157_v61 = vmul.f32 %v98_v30, %v41_v24  ;;  %v173_v1 = vmul.f32 %v98_v30, %v57_v31  ;;  %v246_v41 = vrot.slane %v3705_v40, %v97_v29  ;;  %v2976_v44 = vld [vmem:[%s3989_s3 + $0x7c0] ss:$8 sps:$4 sm:$0xff]   ;;  %v2984_v40 = vld [vmem:[%s3989_s3 + $0x7d4] ss:$8 sps:$4 sm:$0xff]  }
  0xc5   :  { %2218 = vmatprep.subr.bf16.mxu0 %v2912_v7  ;;  %2076 = vmatprep.mubr.bf16.mxu1 %v370_v45  ;;  %v165_v38 = vmul.f32 %v130_v36, %v49_v6  ;;  %v181_v39 = vmul.f32 %v130_v36, %v65_v35 }
  0xc6   :  { %2248 = vmatprep.mubr.bf16.mxu0 %v378_v46  ;;  %v273_v7 = vadd.f32 %v214_v0, %v157_v61  ;;  %v289_v45 = vadd.f32 %v214_v0, %v173_v1 }
  0xc7   :  { %2047 = vmatpush1.bf16.msra.mxu1 %v2907_v47  ;;  %v281_v46 = vadd.f32 %v246_v41, %v165_v38  ;;  %v297_v47 = vadd.f32 %v246_v41, %v181_v39 }
  0xc8   :  { %2219 = vmatpush1.bf16.msra.mxu0 %v2910_v48  ;;  %2048 = vmatprep.subr.bf16.mxu1 %v2915_v49  ;;  %v2979_v48 = vld [vmem:[%s3989_s3 + $0x3d0] ss:$8 sps:$4 sm:$0xff]  }
  0xc9   :  { %2220 = vmatprep.subr.bf16.mxu0 %v2918_v50  ;;  %v2982_v49 = vld [vmem:[%s3989_s3 + $0x7d0] ss:$8 sps:$4 sm:$0xff]   ;;  %v2987_v50 = vld [vmem:[%s3989_s3 + $0x3e4] ss:$8 sps:$4 sm:$0xff]  }
  0xcb   :  { %2049 = vmatpush1.bf16.msra.mxu1 %v2913_v51  ;;  %v2990_v51 = vld [vmem:[%s3989_s3 + $0x7e4] ss:$8 sps:$4 sm:$0xff]  }
  0xcc   :  { %2221 = vmatpush1.bf16.msra.mxu0 %v2916_v52  ;;  %2050 = vmatprep.subr.bf16.mxu1 %v2921_v53  ;;  %v305_v52 = vmul.f32 0.2, %v273_v7  ;;  %v321_v53 = vmul.f32 0.2, %v289_v45 }
  0xcd   :  { %2222 = vmatprep.subr.bf16.mxu0 %v2924_v54  ;;  %v313_v54 = vmul.f32 0.2, %v281_v46 }
  0xcf   :  { %2051 = vmatpush1.bf16.msra.mxu1 %v2919_v57  ;;  %v329_v57 = vmul.f32 0.2, %v297_v47 }
  0xd0   :  { %2223 = vmatpush1.bf16.msra.mxu0 %v2922_v59  ;;  %2052 = vmatprep.subr.bf16.mxu1 %v2927_v60  ;;  %v2985_v59 = vld [vmem:[%s3989_s3 + $0x3e0] ss:$8 sps:$4 sm:$0xff]  }
  0xd1   :  { %2224 = vmatprep.subr.bf16.mxu0 %v2930_v62  ;;  %v2988_v60 = vld [vmem:[%s3989_s3 + $0x7e0] ss:$8 sps:$4 sm:$0xff]   ;;  %v2993_v62 = vld [vmem:[%s3989_s3 + $0x3f4] ss:$8 sps:$4 sm:$0xff]  }
  0xd3   :  { %2053 = vmatpush1.bf16.msra.mxu1 %v2925_v63  ;;  %v2996_v63 = vld [vmem:[%s3989_s3 + $0x7f4] ss:$8 sps:$4 sm:$0xff]  }
  0xd4   :  { %2225 = vmatpush1.bf16.msra.mxu0 %v2928_v2  ;;  %2054 = vmatprep.subr.bf16.mxu1 %v2933_v3  ;;  %v337_v2 = vmax.f32 %v273_v7, %v305_v52  ;;  %v353_v3 = vmax.f32 %v289_v45, %v321_v53 }
  0xd5   :  { %2226 = vmatprep.subr.bf16.mxu0 %v2936_v4  ;;  %v345_v4 = vmax.f32 %v281_v46, %v313_v54 }
  0xd7   :  { %2055 = vmatpush1.bf16.msra.mxu1 %v2931_v5  ;;  %v361_v5 = vmax.f32 %v297_v47, %v329_v57 }
  0xd8   :  { %2227 = vmatpush1.bf16.msra.mxu0 %v2934_v8  ;;  %2056 = vmatprep.subr.bf16.mxu1 %v2939_v9  ;;  %v2991_v8 = vld [vmem:[%s3989_s3 + $0x3f0] ss:$8 sps:$4 sm:$0xff]  }
  0xd9   :  { %2228 = vmatprep.subr.bf16.mxu0 %v2942_v10  ;;  %v2994_v9 = vld [vmem:[%s3989_s3 + $0x7f0] ss:$8 sps:$4 sm:$0xff]   ;;  %v369_v10 = vpack.c.bf16 %v353_v3, %v337_v2 }
  0xdb   :  { %2057 = vmatpush1.bf16.msra.mxu1 %v2937_v11  ;;  %v377_v11 = vpack.c.bf16 %v361_v5, %v345_v4 }
  0xdc   :  { %2229 = vmatpush1.bf16.msra.mxu0 %v2940_v12  ;;  %2058 = vmatprep.subr.bf16.mxu1 %v2945_v13 }
  0xdd   :  { %2230 = vmatprep.subr.bf16.mxu0 %v2948_v14 }
  0xdf   :  { %2059 = vmatpush1.bf16.msra.mxu1 %v2943_v15 }
  0xe0   :  { %2231 = vmatpush1.bf16.msra.mxu0 %v2946_v16  ;;  %2060 = vmatprep.subr.bf16.mxu1 %v2951_v17 }
  0xe1   :  { %2232 = vmatprep.subr.bf16.mxu0 %v2954_v18 }
  0xe3   :  { %2061 = vmatpush1.bf16.msra.mxu1 %v2949_v19 }
  0xe4   :  { %2233 = vmatpush1.bf16.msra.mxu0 %v2952_v20  ;;  %2062 = vmatprep.subr.bf16.mxu1 %v2957_v21 }
  0xe5   :  { %2234 = vmatprep.subr.bf16.mxu0 %v2960_v22 }
  0xe7   :  { %2063 = vmatpush1.bf16.msra.mxu1 %v2955_v25 }
  0xe8   :  { %2235 = vmatpush1.bf16.msra.mxu0 %v2958_v55  ;;  %2064 = vmatprep.subr.bf16.mxu1 %v2963_v27 }
  0xe9   :  { %2236 = vmatprep.subr.bf16.mxu0 %v2966_v28 }
  0xeb   :  { %2065 = vmatpush1.bf16.msra.mxu1 %v2961_v32 }
  0xec   :  { %2237 = vmatpush1.bf16.msra.mxu0 %v2964_v56  ;;  %2066 = vmatprep.subr.bf16.mxu1 %v2969_v33 }
  0xed   :  { %2238 = vmatprep.subr.bf16.mxu0 %v2972_v42 }
  0xef   :  { %2067 = vmatpush1.bf16.msra.mxu1 %v2967_v37 }
  0xf0   :  { %2239 = vmatpush1.bf16.msra.mxu0 %v2970_v58  ;;  %2068 = vmatprep.subr.bf16.mxu1 %v2975_v26 }
  0xf1   :  { %2240 = vmatprep.subr.bf16.mxu0 %v2978_v23 }
  0xf3   :  { %2069 = vmatpush1.bf16.msra.mxu1 %v2973_v43 }
  0xf4   :  { %2241 = vmatpush1.bf16.msra.mxu0 %v2976_v44  ;;  %2070 = vmatprep.subr.bf16.mxu1 %v2981_v34 }
  0xf5   :  { %2242 = vmatprep.subr.bf16.mxu0 %v2984_v40 }
  0xf7   :  { %2071 = vmatpush1.bf16.msra.mxu1 %v2979_v48 }
  0xf8   :  { %2243 = vmatpush1.bf16.msra.mxu0 %v2982_v49  ;;  %2072 = vmatprep.subr.bf16.mxu1 %v2987_v50 }
  0xf9   :  { %2244 = vmatprep.subr.bf16.mxu0 %v2990_v51 }
  0xfb   :  { %2073 = vmatpush1.bf16.msra.mxu1 %v2985_v59 }
  0xfc   :  { %2245 = vmatpush1.bf16.msra.mxu0 %v2988_v60  ;;  %2074 = vmatprep.subr.bf16.mxu1 %v2993_v62 }
  0xfd   :  { %2246 = vmatprep.subr.bf16.mxu0 %v2996_v63 }
  0xff   :  { %2075 = vmatpush1.bf16.msra.mxu1 %v2991_v8 }
 0x100   :  { %2247 = vmatpush1.bf16.msra.mxu0 %v2994_v9 }
 0x102   :  { %2077 = vmatmul.mubr.bf16.vlgmr.msra.gmra.mrb[0].mxu1 %v369_v10 }
 0x103   :  { %2249 = vmatmul.mubr.bf16.vlgmr.msra.gmra.mrb[0].mxu0 %v377_v11 }
 0x1d5   :  { %v2078_v12 = vpop.f32.mrb[0].mxu1 }
 0x1d6   :  { %v2250_v13 = vpop.f32.mrb[0].mxu0  ;;  %v2080_v15 = vpop.f32.mrb[1].mxu1 }
 0x1d7   :  { %v2585_v14 = vadd.f32 %v2250_v13, %v2078_v12  ;;  %v2252_v16 = vpop.f32.mrb[1].mxu0  ;;  %v2082_v18 = vpop.f32.mrb[2].mxu1 }
 0x1d8   :  { %v2586_v17 = vadd.f32 %v2252_v16, %v2080_v15  ;;  %v2254_v19 = vpop.f32.mrb[2].mxu0  ;;  %v2084_v21 = vpop.f32.mrb[3].mxu1 }
 0x1d9   :  { %v2587_v20 = vadd.f32 %v2254_v19, %v2082_v18  ;;  %v2256_v22 = vpop.f32.mrb[3].mxu0 }
 0x1da   :  { %v2583_v25 = vpack.c.bf16 %v2586_v17, %v2585_v14  ;;  %v2588_v55 = vadd.f32 %v2256_v22, %v2084_v21 }
 0x1db   :  { %v2259_v27 = vpack.c.bf16 %v2587_v20, %v2585_v14 }
 0x1dc   :  { %2271 = vst [vmem:[%s3993_s4] sm:$0xff] %v2583_v25  ;;  %v2260_v28 = vpack.c.bf16 %v2588_v55, %v2586_v17  ;;  %v2584_v29 = vpack.c.bf16 %v2588_v55, %v2587_v20 }
 0x1dd   :  { %v2273_v32 = vunpack.c.l.bf16 %v2259_v27  ;;  %v2275_v56 = vunpack.c.h.bf16 %v2259_v27 }
 0x1de   :  { %2272 = vst [vmem:[%s3993_s4 + $0x8] sm:$0xff] %v2584_v29  ;;  %v2274_v33 = vunpack.c.l.bf16 %v2260_v28  ;;  %v2276_v42 = vunpack.c.h.bf16 %v2260_v28 }
 0x1df   :  { %v2277_v24 = vadd.f32 %v2275_v56, %v2273_v32  ;;  %v2291_v30 = vmul.f32 %v2273_v32, %v2273_v32  ;;  %v2293_v31 = vmul.f32 %v2275_v56, %v2275_v56 }
 0x1e0   :  { %v2284_v6 = vadd.f32 %v2276_v42, %v2274_v33  ;;  %v2292_v35 = vmul.f32 %v2274_v33, %v2274_v33  ;;  %v2294_v36 = vmul.f32 %v2276_v42, %v2276_v42 }
 0x1e1   :  { %v2278_v37 = vrot.slane %v2277_v24, 4  ;;  %v2295_v58 = vadd.f32 %v2293_v31, %v2291_v30 }
 0x1e2   :  { %v2285_v26 = vrot.slane %v2284_v6, 4  ;;  %v2302_v23 = vadd.f32 %v2294_v36, %v2292_v35 }
 0x1e3   :  { %v2279_v61 = vadd.f32 %v2278_v37, %v2277_v24  ;;  %v2296_v0 = vrot.slane %v2295_v58, 4 }
 0x1e4   :  { %v2286_v1 = vadd.f32 %v2285_v26, %v2284_v6  ;;  %v2303_v38 = vrot.slane %v2302_v23, 4 }
 0x1e5   :  { %v2280_v39 = vrot.slane %v2279_v61, 2  ;;  %v2297_v41 = vadd.f32 %v2296_v0, %v2295_v58 }
 0x1e6   :  { %v2287_v43 = vrot.slane %v2286_v1, 2  ;;  %v2304_v44 = vadd.f32 %v2303_v38, %v2302_v23 }
 0x1e7   :  { %v2281_v34 = vadd.f32 %v2280_v39, %v2279_v61  ;;  %v2298_v40 = vrot.slane %v2297_v41, 2 }
 0x1e8   :  { %v2288_v7 = vadd.f32 %v2287_v43, %v2286_v1  ;;  %v2305_v45 = vrot.slane %v2304_v44, 2 }
 0x1e9   :  { %v2282_v46 = vrot.slane %v2281_v34, 1  ;;  %v2299_v47 = vadd.f32 %v2298_v40, %v2297_v41 }
 0x1ea   :  { %v2289_v48 = vrot.slane %v2288_v7, 1  ;;  %v2306_v49 = vadd.f32 %v2305_v45, %v2304_v44 }
 0x1eb   :  { %v2300_v50 = vrot.slane %v2299_v47, 1  ;;  %v2283_v52 = vadd.f32 %v2282_v46, %v2281_v34 }
 0x1ec   :  { %v2307_v51 = vrot.slane %v2306_v49, 1  ;;  %v2290_v54 = vadd.f32 %v2289_v48, %v2288_v7 }
 0x1ed   :  { %v2301_v53 = vadd.f32 %v2300_v50, %v2299_v47 }
 0x1ee   :  { %v2308_v57 = vadd.f32 %v2307_v51, %v2306_v49 }
 0x1ef   :  { %v2310_v59 = vsel %vm2309_vm0, %v2283_v52, %v2301_v53 }
 0x1f0   :  { %v2313_v60 = vsel %vm2312_vm1, %v2310_v59, 0.0  ;;  %v2311_v62 = vsel %vm2309_vm0, %v2290_v54, %v2308_v57 }
 0x1f1   :  { %2315 = vst [vmem:[%s3994_s5] sm:$0xff] %v2313_v60  ;;  %v2314_v63 = vsel %vm2312_vm1, %v2311_v62, 0.0 }
 0x1f2   :  { %2316 = vst [vmem:[%s3994_s5 + $0x8] sm:$0xff] %v2314_v63 }

// kernel: tile.55
= control target key start
LH: loop header
LB: loop body
LE: loop exit
PB: predicated region body
PF: predicated region fallthrough
CT: control target
= control target key end

     0   :  { %s64_s0 = inlined_call_operand.vmem [shape: f32[32], index: 0, kind: input, shape index: {}]   ;;  %s65_s1 = inlined_call_operand.vmem [shape: f32[64,32], index: 1, kind: output, shape index: {}]  }
   0x1   :  { %v4_v0 = vld [vmem:[%s64_s0] ss:$0 sm:$0xff] }
   0x2   :  { %5 = vst [vmem:[%s65_s1] sm:$0xff] %v4_v0  ;;  %20 = vst [vmem:[%s65_s1 + $0x8] sm:$0xff] %v4_v0 }
   0x3   :  { %21 = vst [vmem:[%s65_s1 + $0x10] sm:$0xff] %v4_v0  ;;  %22 = vst [vmem:[%s65_s1 + $0x18] sm:$0xff] %v4_v0 }
   0x4   :  { %23 = vst [vmem:[%s65_s1 + $0x20] sm:$0xff] %v4_v0  ;;  %24 = vst [vmem:[%s65_s1 + $0x28] sm:$0xff] %v4_v0 }
   0x5   :  { %25 = vst [vmem:[%s65_s1 + $0x30] sm:$0xff] %v4_v0  ;;  %26 = vst [vmem:[%s65_s1 + $0x38] sm:$0xff] %v4_v0 }

// kernel: tile.56
= control target key start
LH: loop header
LB: loop body
LE: loop exit
PB: predicated region body
PF: predicated region fallthrough
CT: control target
= control target key end

     0   :  { %s195_s10 = smov 64   ;;  %s196_s11 = smov 96   ;;  %vm3_vm0 = vcmask 261120   ;;  %vm17_vm1 = vcmask 1048320   ;;  %vm33_vm2 = vcmask 785920   ;;  %vm49_vm3 = vcmask 523520   ;;  %s280_s0 = inlined_call_operand.vmem [shape: f32[64,32], index: 0, kind: input, shape index: {}]   ;;  %s281_s1 = inlined_call_operand.vmem [shape: f32[1,2048], index: 1, kind: output, shape index: {}]  }
   0x1   :  { %v173_v0 = vld [vmem:[%s280_s0 + $0x2] ss:$4 sm:$0xff]   ;;  %v171_v1 = vld [vmem:[%s280_s0 + $0x3] ss:$4 sm:$0xff]   ;;  %v2_v4 = vld [vmem:[%s280_s0] ss:$4 sm:$0xff]  }
   0x2   :  { %31 = vrot.lane.b32.xlu1 %v173_v0, %s195_s10  ;;  %15 = vrot.lane.b32.xlu0 %v171_v1, %s196_s11  ;;  %v174_v2 = vld [vmem:[%s280_s0 + $0x22] ss:$4 sm:$0xff]   ;;  %v172_v3 = vld [vmem:[%s280_s0 + $0x23] ss:$4 sm:$0xff]  }
   0x3   :  { %v170_v5 = vld [vmem:[%s280_s0 + $0x20] ss:$4 sm:$0xff]   ;;  %4 = vst.msk [vmem:[#allocation0] ss:$8 sm:$0xf] %vm3_vm0, %v2_v4  }
   0x4   :  { %5 = vst.msk [vmem:[#allocation0] ss:$8 sm:$0xf0] %vm3_vm0, %v2_v4   ;;  %10 = vst.msk [vmem:[#allocation0 + $0x40] ss:$8 sm:$0xf] %vm3_vm0, %v170_v5  }
   0x5   :  { %12 = vst.msk [vmem:[#allocation0 + $0x40] ss:$8 sm:$0xf0] %vm3_vm0, %v170_v5   ;;  %v176_v6 = vld [vmem:[%s280_s0 + $0x21] ss:$4 sm:$0xff]  }
   0x6   :  { %38 = vrot.lane.b32.xlu1 %v174_v2, %s195_s10  ;;  %22 = vrot.lane.b32.xlu0 %v172_v3, %s196_s11  ;;  %v175_v7 = vld [vmem:[%s280_s0 + $0x1] ss:$4 sm:$0xff]   ;;  %s197_s0 = smov 32  }
   0xa   :  { %54 = vrot.lane.b32.xlu1 %v176_v6, %s197_s0  ;;  %47 = vrot.lane.b32.xlu0 %v175_v7, %s197_s0 }
  0x74   :  { %v32_v8 = vpop.permute.xlu1 %31   ;;  %v16_v9 = vpop.permute.xlu0 %15  }
  0x75   :  { %18 = vst.msk [vmem:[#allocation0] ss:$8 sm:$0xf] %vm17_vm1, %v16_v9   ;;  %19 = vst.msk [vmem:[#allocation0] ss:$8 sm:$0xf0] %vm17_vm1, %v16_v9  }
  0x76   :  { %34 = vst.msk [vmem:[#allocation0] ss:$8 sm:$0xf] %vm33_vm2, %v32_v8   ;;  %35 = vst.msk [vmem:[#allocation0] ss:$8 sm:$0xf0] %vm33_vm2, %v32_v8  }
  0x78   :  { %v39_v10 = vpop.permute.xlu1 %38   ;;  %v23_v11 = vpop.permute.xlu0 %22  }
  0x79   :  { %26 = vst.msk [vmem:[#allocation0 + $0x40] ss:$8 sm:$0xf] %vm17_vm1, %v23_v11   ;;  %28 = vst.msk [vmem:[#allocation0 + $0x40] ss:$8 sm:$0xf0] %vm17_vm1, %v23_v11  }
  0x7a   :  { %42 = vst.msk [vmem:[#allocation0 + $0x40] ss:$8 sm:$0xf] %vm33_vm2, %v39_v10   ;;  %44 = vst.msk [vmem:[#allocation0 + $0x40] ss:$8 sm:$0xf0] %vm33_vm2, %v39_v10  }
  0x7c   :  { %v55_v12 = vpop.permute.xlu1 %54   ;;  %v48_v13 = vpop.permute.xlu0 %47  }
  0x7d   :  { %58 = vst.msk [vmem:[#allocation0 + $0x40] ss:$8 sm:$0xf] %vm49_vm3, %v55_v12   ;;  %60 = vst.msk [vmem:[#allocation0 + $0x40] ss:$8 sm:$0xf0] %vm49_vm3, %v55_v12  }
  0x7e   :  { %50 = vst.msk [vmem:[#allocation0] ss:$8 sm:$0xf] %vm49_vm3, %v48_v13   ;;  %51 = vst.msk [vmem:[#allocation0] ss:$8 sm:$0xf0] %vm49_vm3, %v48_v13  }
  0x84   :  { %v109_v14 = vld [vmem:[#allocation0 + $0x40] sm:$0x1]  ;;  %v115_v15 = vld [vmem:[#allocation0 + $0x48] sm:$0x1]  ;;  %v121_v16 = vld [vmem:[#allocation0 + $0x50] sm:$0x1] }
  0x85   :  { %184 = vst [vmem:[%s281_s1 + $0x8] sm:$0x1] %v109_v14  ;;  %185 = vst [vmem:[%s281_s1 + $0x9] sm:$0x1] %v115_v15  ;;  %v127_v17 = vld [vmem:[#allocation0 + $0x58] sm:$0x1] }
  0x86   :  { %186 = vst [vmem:[%s281_s1 + $0xa] sm:$0x1] %v121_v16  ;;  %v133_v18 = vld [vmem:[#allocation0 + $0x60] sm:$0x1]  ;;  %v139_v19 = vld [vmem:[#allocation0 + $0x68] sm:$0x1] }
  0x87   :  { %187 = vst [vmem:[%s281_s1 + $0xb] sm:$0x1] %v127_v17  ;;  %188 = vst [vmem:[%s281_s1 + $0xc] sm:$0x1] %v133_v18  ;;  %v145_v20 = vld [vmem:[#allocation0 + $0x70] sm:$0x1] }
  0x88   :  { %189 = vst [vmem:[%s281_s1 + $0xd] sm:$0x1] %v139_v19  ;;  %v151_v21 = vld [vmem:[#allocation0 + $0x78] sm:$0x1]  ;;  %v64_v22 = vld [vmem:[#allocation0] sm:$0x1] }
  0x89   :  { %190 = vst [vmem:[%s281_s1 + $0xe] sm:$0x1] %v145_v20  ;;  %191 = vst [vmem:[%s281_s1 + $0xf] sm:$0x1] %v151_v21  ;;  %v68_v23 = vld [vmem:[#allocation0 + $0x8] sm:$0x1] }
  0x8a   :  { %66 = vst [vmem:[%s281_s1] sm:$0x1] %v64_v22  ;;  %v73_v24 = vld [vmem:[#allocation0 + $0x10] sm:$0x1]  ;;  %v79_v25 = vld [vmem:[#allocation0 + $0x18] sm:$0x1] }
  0x8b   :  { %177 = vst [vmem:[%s281_s1 + $0x1] sm:$0x1] %v68_v23  ;;  %178 = vst [vmem:[%s281_s1 + $0x2] sm:$0x1] %v73_v24  ;;  %v85_v26 = vld [vmem:[#allocation0 + $0x20] sm:$0x1] }
  0x8c   :  { %179 = vst [vmem:[%s281_s1 + $0x3] sm:$0x1] %v79_v25  ;;  %v91_v27 = vld [vmem:[#allocation0 + $0x28] sm:$0x1]  ;;  %v97_v28 = vld [vmem:[#allocation0 + $0x30] sm:$0x1] }
  0x8d   :  { %180 = vst [vmem:[%s281_s1 + $0x4] sm:$0x1] %v85_v26  ;;  %181 = vst [vmem:[%s281_s1 + $0x5] sm:$0x1] %v91_v27  ;;  %v103_v29 = vld [vmem:[#allocation0 + $0x38] sm:$0x1] }
  0x8e   :  { %182 = vst [vmem:[%s281_s1 + $0x6] sm:$0x1] %v97_v28  ;;  %183 = vst [vmem:[%s281_s1 + $0x7] sm:$0x1] %v103_v29 }

// kernel: dcgan_discriminator_forward.7
= control target key start
LH: loop header
LB: loop body
LE: loop exit
PB: predicated region body
PF: predicated region fallthrough
CT: control target
= control target key end

     0   :  { %v47_v37 = vlaneseq  ;;  %vm2192_vm0 = vcmask 1040384   ;;  %vm2195_vm1 = vcmask 1041408   ;;  %s3817_s3 = inlined_call_operand.vmem [shape: bf16[2048,256], index: 3, kind: input, shape index: {}]   ;;  %s3818_s0 = inlined_call_operand.vmem [shape: bf16[8,2048], index: 0, kind: input, shape index: {}]   ;;  %s3819_s1 = inlined_call_operand.vmem [shape: f32[1,2048], index: 1, kind: input, shape index: {}]   ;;  %s3820_s2 = inlined_call_operand.vmem [shape: f32[1,2048], index: 2, kind: input, shape index: {}]   ;;  %s3821_s4 = inlined_call_operand.vmem [shape: bf16[8,256], index: 4, kind: output, shape index: {0}]   ;;  %s3822_s5 = inlined_call_operand.vmem [shape: f32[1,8,256], index: 5, kind: output, shape index: {1}]  }
   0x1   :  { %v2492_v0 = vld [vmem:[%s3817_s3 + $0x4] ss:$8 sps:$4 sm:$0xff]   ;;  %v2496_v2 = vld [vmem:[%s3817_s3] ss:$8 sps:$4 sm:$0xff]   ;;  %v2498_v4 = vld [vmem:[%s3817_s3 + $0x14] ss:$8 sps:$4 sm:$0xff]  }
   0x2   :  { %v2494_v1 = vld [vmem:[%s3817_s3 + $0x404] ss:$8 sps:$4 sm:$0xff]   ;;  %1827 = vmatprep.subr.bf16.mxu1 %v2492_v0  ;;  %v2497_v3 = vld [vmem:[%s3817_s3 + $0x400] ss:$8 sps:$4 sm:$0xff]   ;;  %v2500_v5 = vld [vmem:[%s3817_s3 + $0x414] ss:$8 sps:$4 sm:$0xff]  }
   0x3   :  { %1991 = vmatprep.subr.bf16.mxu0 %v2494_v1  ;;  %1828 = vmatpush1.bf16.msra.mxu1 %v2496_v2  ;;  %v2502_v6 = vld [vmem:[%s3817_s3 + $0x10] ss:$8 sps:$4 sm:$0xff]   ;;  %v2504_v8 = vld [vmem:[%s3817_s3 + $0x24] ss:$8 sps:$4 sm:$0xff]   ;;  %v2508_v10 = vld [vmem:[%s3817_s3 + $0x20] ss:$8 sps:$4 sm:$0xff]  }
   0x4   :  { %1992 = vmatpush1.bf16.msra.mxu0 %v2497_v3  ;;  %1829 = vmatprep.subr.bf16.mxu1 %v2498_v4  ;;  %v2503_v7 = vld [vmem:[%s3817_s3 + $0x410] ss:$8 sps:$4 sm:$0xff]   ;;  %v2506_v9 = vld [vmem:[%s3817_s3 + $0x424] ss:$8 sps:$4 sm:$0xff]   ;;  %v2509_v11 = vld [vmem:[%s3817_s3 + $0x420] ss:$8 sps:$4 sm:$0xff]  }
   0x5   :  { %1993 = vmatprep.subr.bf16.mxu0 %v2500_v5  ;;  %v2510_v12 = vld [vmem:[%s3817_s3 + $0x34] ss:$8 sps:$4 sm:$0xff]   ;;  %v2514_v14 = vld [vmem:[%s3817_s3 + $0x30] ss:$8 sps:$4 sm:$0xff]   ;;  %v2516_v16 = vld [vmem:[%s3817_s3 + $0x44] ss:$8 sps:$4 sm:$0xff]  }
   0x6   :  { %v2512_v13 = vld [vmem:[%s3817_s3 + $0x434] ss:$8 sps:$4 sm:$0xff]   ;;  %v2515_v15 = vld [vmem:[%s3817_s3 + $0x430] ss:$8 sps:$4 sm:$0xff]   ;;  %v2518_v17 = vld [vmem:[%s3817_s3 + $0x444] ss:$8 sps:$4 sm:$0xff]  }
   0x7   :  { %1830 = vmatpush1.bf16.msra.mxu1 %v2502_v6  ;;  %v2520_v18 = vld [vmem:[%s3817_s3 + $0x40] ss:$8 sps:$4 sm:$0xff]   ;;  %v2522_v20 = vld [vmem:[%s3817_s3 + $0x54] ss:$8 sps:$4 sm:$0xff]   ;;  %v2526_v22 = vld [vmem:[%s3817_s3 + $0x50] ss:$8 sps:$4 sm:$0xff]  }
   0x8   :  { %1994 = vmatpush1.bf16.msra.mxu0 %v2503_v7  ;;  %1831 = vmatprep.subr.bf16.mxu1 %v2504_v8  ;;  %v2521_v19 = vld [vmem:[%s3817_s3 + $0x440] ss:$8 sps:$4 sm:$0xff]   ;;  %v2524_v21 = vld [vmem:[%s3817_s3 + $0x454] ss:$8 sps:$4 sm:$0xff]   ;;  %v2527_v23 = vld [vmem:[%s3817_s3 + $0x450] ss:$8 sps:$4 sm:$0xff]  }
   0x9   :  { %1995 = vmatprep.subr.bf16.mxu0 %v2506_v9  ;;  %v2528_v24 = vld [vmem:[%s3817_s3 + $0x64] ss:$8 sps:$4 sm:$0xff]   ;;  %v2532_v26 = vld [vmem:[%s3817_s3 + $0x60] ss:$8 sps:$4 sm:$0xff]   ;;  %v2534_v28 = vld [vmem:[%s3817_s3 + $0x74] ss:$8 sps:$4 sm:$0xff]  }
   0xa   :  { %v2530_v25 = vld [vmem:[%s3817_s3 + $0x464] ss:$8 sps:$4 sm:$0xff]   ;;  %v2533_v27 = vld [vmem:[%s3817_s3 + $0x460] ss:$8 sps:$4 sm:$0xff]   ;;  %v2536_v29 = vld [vmem:[%s3817_s3 + $0x474] ss:$8 sps:$4 sm:$0xff]  }
   0xb   :  { %1832 = vmatpush1.bf16.msra.mxu1 %v2508_v10  ;;  %v2538_v30 = vld [vmem:[%s3817_s3 + $0x70] ss:$8 sps:$4 sm:$0xff]   ;;  %v2540_v32 = vld [vmem:[%s3817_s3 + $0x84] ss:$8 sps:$4 sm:$0xff]   ;;  %v2544_v34 = vld [vmem:[%s3817_s3 + $0x80] ss:$8 sps:$4 sm:$0xff]  }
   0xc   :  { %1996 = vmatpush1.bf16.msra.mxu0 %v2509_v11  ;;  %1833 = vmatprep.subr.bf16.mxu1 %v2510_v12  ;;  %v2539_v31 = vld [vmem:[%s3817_s3 + $0x470] ss:$8 sps:$4 sm:$0xff]   ;;  %v2542_v33 = vld [vmem:[%s3817_s3 + $0x484] ss:$8 sps:$4 sm:$0xff]   ;;  %v2545_v35 = vld [vmem:[%s3817_s3 + $0x480] ss:$8 sps:$4 sm:$0xff]  }
   0xd   :  { %1997 = vmatprep.subr.bf16.mxu0 %v2512_v13  ;;  %v2546_v36 = vld [vmem:[%s3817_s3 + $0x94] ss:$8 sps:$4 sm:$0xff]   ;;  %v2550_v39 = vld [vmem:[%s3817_s3 + $0x90] ss:$8 sps:$4 sm:$0xff]   ;;  %v2552_v41 = vld [vmem:[%s3817_s3 + $0xa4] ss:$8 sps:$4 sm:$0xff]  }
   0xe   :  { %v2548_v38 = vld [vmem:[%s3817_s3 + $0x494] ss:$8 sps:$4 sm:$0xff]   ;;  %v2551_v40 = vld [vmem:[%s3817_s3 + $0x490] ss:$8 sps:$4 sm:$0xff]   ;;  %v3033_v42 = vshrl.u32 %v47_v37, 7  ;;  %v19_v52 = vld [vmem:[%s3818_s0] sm:$0xff] }
   0xf   :  { %1834 = vmatpush1.bf16.msra.mxu1 %v2514_v14  ;;  %v2554_v43 = vld [vmem:[%s3817_s3 + $0x4a4] ss:$8 sps:$4 sm:$0xff]   ;;  %v2556_v44 = vld [vmem:[%s3817_s3 + $0xa0] ss:$8 sps:$4 sm:$0xff]   ;;  %v2558_v46 = vld [vmem:[%s3817_s3 + $0xb4] ss:$8 sps:$4 sm:$0xff]   ;;  %v27_v53 = vunpack.c.l.bf16 %v19_v52  ;;  %v28_v54 = vunpack.c.h.bf16 %v19_v52 }
  0x10   :  { %1998 = vmatpush1.bf16.msra.mxu0 %v2515_v15  ;;  %1835 = vmatprep.subr.bf16.mxu1 %v2516_v16  ;;  %v2557_v45 = vld [vmem:[%s3817_s3 + $0x4a0] ss:$8 sps:$4 sm:$0xff]   ;;  %v53_v47 = vsub.s32 1, %v3033_v42  ;;  %v49_v48 = vsub.s32 0, %v3033_v42  ;;  %v2560_v49 = vld [vmem:[%s3817_s3 + $0x4b4] ss:$8 sps:$4 sm:$0xff]  }
  0x11   :  { %1999 = vmatprep.subr.bf16.mxu0 %v2518_v17  ;;  %v2562_v50 = vld [vmem:[%s3817_s3 + $0xb0] ss:$8 sps:$4 sm:$0xff]   ;;  %v3064_v55 = vld [vmem:[%s3819_s1] sm:$0xff]  ;;  %v3086_v63 = vld [vmem:[%s3819_s1 + $0x8] sm:$0xff] }
  0x12   :  { %v2563_v51 = vld [vmem:[%s3817_s3 + $0x4b0] ss:$8 sps:$4 sm:$0xff]   ;;  %v3069_v56 = vld [vmem:[%s3820_s2] sm:$0xff]  ;;  %v54_v59 = vrot.slane %v3064_v55, %v53_v47  ;;  %v50_v61 = vrot.slane %v3064_v55, %v49_v48  ;;  %v3091_v0 = vld [vmem:[%s3820_s2 + $0x8] sm:$0xff]  ;;  %v86_v5 = vrot.slane %v3086_v63, %v53_v47  ;;  %v82_v8 = vrot.slane %v3086_v63, %v49_v48 }
  0x13   :  { %1836 = vmatpush1.bf16.msra.mxu1 %v2520_v18  ;;  %v2564_v57 = vld [vmem:[%s3817_s3 + $0xc4] ss:$8 sps:$4 sm:$0xff]   ;;  %v154_v60 = vrot.slane %v3069_v56, %v53_v47  ;;  %v150_v1 = vrot.slane %v3069_v56, %v49_v48  ;;  %v186_v6 = vrot.slane %v3091_v0, %v53_v47  ;;  %v182_v9 = vrot.slane %v3091_v0, %v49_v48  ;;  %v2568_v10 = vld [vmem:[%s3817_s3 + $0xc0] ss:$8 sps:$4 sm:$0xff]   ;;  %v2570_v14 = vld [vmem:[%s3817_s3 + $0xd4] ss:$8 sps:$4 sm:$0xff]  }
  0x14   :  { %2000 = vmatpush1.bf16.msra.mxu0 %v2521_v19  ;;  %1837 = vmatprep.subr.bf16.mxu1 %v2522_v20  ;;  %v2566_v58 = vld [vmem:[%s3817_s3 + $0x4c4] ss:$8 sps:$4 sm:$0xff]   ;;  %v128_v2 = vmul.f32 %v54_v59, %v28_v54  ;;  %v127_v7 = vmul.f32 %v50_v61, %v27_v53  ;;  %v2569_v11 = vld [vmem:[%s3817_s3 + $0x4c0] ss:$8 sps:$4 sm:$0xff]   ;;  %v2572_v15 = vld [vmem:[%s3817_s3 + $0x4d4] ss:$8 sps:$4 sm:$0xff]  }
  0x15   :  { %2001 = vmatprep.subr.bf16.mxu0 %v2524_v21  ;;  %v23_v62 = vld [vmem:[%s3818_s0 + $0x20] sm:$0xff]  ;;  %v2574_v19 = vld [vmem:[%s3817_s3 + $0xd0] ss:$8 sps:$4 sm:$0xff]   ;;  %v2596_v47 = vld [vmem:[%s3817_s3 + $0x114] ss:$8 sps:$4 sm:$0xff]  }
  0x16   :  { %v35_v3 = vunpack.c.l.bf16 %v23_v62  ;;  %v36_v4 = vunpack.c.h.bf16 %v23_v62  ;;  %v228_v12 = vadd.f32 %v154_v60, %v128_v2  ;;  %v227_v20 = vadd.f32 %v150_v1, %v127_v7  ;;  %v2599_v48 = vld [vmem:[%s3817_s3 + $0x514] ss:$8 sps:$4 sm:$0xff]   ;;  %v2605_v52 = vld [vmem:[%s3817_s3 + $0x524] ss:$8 sps:$4 sm:$0xff]   ;;  %v2600_v53 = vld [vmem:[%s3817_s3 + $0x120] ss:$8 sps:$4 sm:$0xff]  }
  0x17   :  { %1838 = vmatpush1.bf16.msra.mxu1 %v2526_v22  ;;  %v2575_v22 = vld [vmem:[%s3817_s3 + $0x4d0] ss:$8 sps:$4 sm:$0xff]   ;;  %v2603_v54 = vld [vmem:[%s3817_s3 + $0x520] ss:$8 sps:$4 sm:$0xff]   ;;  %v2614_v61 = vld [vmem:[%s3817_s3 + $0x144] ss:$8 sps:$4 sm:$0xff]  }
  0x18   :  { %2002 = vmatpush1.bf16.msra.mxu0 %v2527_v23  ;;  %1839 = vmatprep.subr.bf16.mxu1 %v2528_v24  ;;  %v136_v13 = vmul.f32 %v86_v5, %v36_v4  ;;  %v135_v16 = vmul.f32 %v82_v8, %v35_v3  ;;  %v244_v17 = vmul.f32 0.2, %v228_v12  ;;  %v2576_v23 = vld [vmem:[%s3817_s3 + $0xe4] ss:$8 sps:$4 sm:$0xff]   ;;  %v2606_v59 = vld [vmem:[%s3817_s3 + $0x130] ss:$8 sps:$4 sm:$0xff]  }
  0x19   :  { %2003 = vmatprep.subr.bf16.mxu0 %v2530_v25  ;;  %v2609_v60 = vld [vmem:[%s3817_s3 + $0x530] ss:$8 sps:$4 sm:$0xff]   ;;  %v2617_v62 = vld [vmem:[%s3817_s3 + $0x544] ss:$8 sps:$4 sm:$0xff]   ;;  %v2612_v1 = vld [vmem:[%s3817_s3 + $0x140] ss:$8 sps:$4 sm:$0xff]  }
  0x1a   :  { %v236_v18 = vadd.f32 %v186_v6, %v136_v13  ;;  %v235_v21 = vadd.f32 %v182_v9, %v135_v16  ;;  %v260_v24 = vmax.f32 %v228_v12, %v244_v17  ;;  %v2615_v2 = vld [vmem:[%s3817_s3 + $0x540] ss:$8 sps:$4 sm:$0xff]   ;;  %v2620_v3 = vld [vmem:[%s3817_s3 + $0x154] ss:$8 sps:$4 sm:$0xff]   ;;  %v61_v5 = vsub.s32 3, %v3033_v42 }
  0x1b   :  { %1840 = vmatpush1.bf16.msra.mxu1 %v2532_v26  ;;  %v2578_v26 = vld [vmem:[%s3817_s3 + $0x4e4] ss:$8 sps:$4 sm:$0xff]   ;;  %v2623_v4 = vld [vmem:[%s3817_s3 + $0x554] ss:$8 sps:$4 sm:$0xff]   ;;  %v2618_v6 = vld [vmem:[%s3817_s3 + $0x150] ss:$8 sps:$4 sm:$0xff]  }
  0x1c   :  { %2004 = vmatpush1.bf16.msra.mxu0 %v2533_v27  ;;  %1841 = vmatprep.subr.bf16.mxu1 %v2534_v28  ;;  %v252_v25 = vmul.f32 0.2, %v236_v18  ;;  %v2580_v27 = vld [vmem:[%s3817_s3 + $0xe0] ss:$8 sps:$4 sm:$0xff]   ;;  %v276_v28 = vpack.c.bf16 %v260_v24, %v260_v24  ;;  %v2621_v7 = vld [vmem:[%s3817_s3 + $0x550] ss:$8 sps:$4 sm:$0xff]   ;;  %v162_v16 = vrot.slane %v3069_v56, %v61_v5  ;;  %v94_v17 = vrot.slane %v3086_v63, %v61_v5 }
  0x1d   :  { %2005 = vmatprep.subr.bf16.mxu0 %v2536_v29  ;;  %v2626_v8 = vld [vmem:[%s3817_s3 + $0x164] ss:$8 sps:$4 sm:$0xff]   ;;  %v2627_v12 = vld [vmem:[%s3817_s3 + $0x560] ss:$8 sps:$4 sm:$0xff]   ;;  %v2633_v24 = vld [vmem:[%s3817_s3 + $0x570] ss:$8 sps:$4 sm:$0xff]  }
  0x1e   :  { %v268_v29 = vmax.f32 %v236_v18, %v252_v25  ;;  %1859 = vmatprep.mubr.bf16.mxu1 %v276_v28  ;;  %v2629_v9 = vld [vmem:[%s3817_s3 + $0x564] ss:$8 sps:$4 sm:$0xff]   ;;  %v2635_v18 = vld [vmem:[%s3817_s3 + $0x574] ss:$8 sps:$4 sm:$0xff]  }
  0x1f   :  { %1842 = vmatpush1.bf16.msra.mxu1 %v2538_v30  ;;  %v243_v30 = vmul.f32 0.2, %v227_v20  ;;  %v3229_v13 = vld [vmem:[%s3818_s0 + $0x8] sm:$0xff] }
  0x20   :  { %2006 = vmatpush1.bf16.msra.mxu0 %v2539_v31  ;;  %1843 = vmatprep.subr.bf16.mxu1 %v2540_v32  ;;  %v251_v31 = vmul.f32 0.2, %v235_v21  ;;  %v2581_v32 = vld [vmem:[%s3817_s3 + $0x4e0] ss:$8 sps:$4 sm:$0xff]   ;;  %v2641_v28 = vld [vmem:[%s3817_s3 + $0x584] ss:$8 sps:$4 sm:$0xff]  }
  0x21   :  { %2007 = vmatprep.subr.bf16.mxu0 %v2542_v33  ;;  %v2582_v33 = vld [vmem:[%s3817_s3 + $0xf4] ss:$8 sps:$4 sm:$0xff]   ;;  %v259_v37 = vmax.f32 %v227_v20, %v243_v30 }
  0x23   :  { %1844 = vmatpush1.bf16.msra.mxu1 %v2544_v34  ;;  %v284_v34 = vpack.c.bf16 %v268_v29, %v268_v29 }
  0x24   :  { %2008 = vmatpush1.bf16.msra.mxu0 %v2545_v35  ;;  %1845 = vmatprep.subr.bf16.mxu1 %v2546_v36  ;;  %v2584_v35 = vld [vmem:[%s3817_s3 + $0x4f4] ss:$8 sps:$4 sm:$0xff]   ;;  %v2586_v36 = vld [vmem:[%s3817_s3 + $0xf0] ss:$8 sps:$4 sm:$0xff]  }
  0x25   :  { %2009 = vmatprep.subr.bf16.mxu0 %v2548_v38  ;;  %2023 = vmatprep.mubr.bf16.mxu0 %v284_v34  ;;  %v267_v38 = vmax.f32 %v235_v21, %v251_v31  ;;  %v2636_v31 = vld [vmem:[%s3817_s3 + $0x180] ss:$8 sps:$4 sm:$0xff]  }
  0x27   :  { %1846 = vmatpush1.bf16.msra.mxu1 %v2550_v39  ;;  %v2587_v39 = vld [vmem:[%s3817_s3 + $0x4f0] ss:$8 sps:$4 sm:$0xff]  }
  0x28   :  { %2010 = vmatpush1.bf16.msra.mxu0 %v2551_v40  ;;  %1847 = vmatprep.subr.bf16.mxu1 %v2552_v41  ;;  %v2590_v40 = vld [vmem:[%s3817_s3 + $0x104] ss:$8 sps:$4 sm:$0xff]  }
  0x29   :  { %2011 = vmatprep.subr.bf16.mxu0 %v2554_v43  ;;  %v2593_v41 = vld [vmem:[%s3817_s3 + $0x504] ss:$8 sps:$4 sm:$0xff]   ;;  %v2588_v43 = vld [vmem:[%s3817_s3 + $0x100] ss:$8 sps:$4 sm:$0xff]  }
  0x2b   :  { %1848 = vmatpush1.bf16.msra.mxu1 %v2556_v44  ;;  %v275_v44 = vpack.c.bf16 %v259_v37, %v259_v37 }
  0x2c   :  { %2012 = vmatpush1.bf16.msra.mxu0 %v2557_v45  ;;  %1849 = vmatprep.subr.bf16.mxu1 %v2558_v46  ;;  %v283_v45 = vpack.c.bf16 %v267_v38, %v267_v38  ;;  %v2591_v46 = vld [vmem:[%s3817_s3 + $0x500] ss:$8 sps:$4 sm:$0xff]  }
  0x2d   :  { %2013 = vmatprep.subr.bf16.mxu0 %v2560_v49  ;;  %v2594_v49 = vld [vmem:[%s3817_s3 + $0x110] ss:$8 sps:$4 sm:$0xff]  }
  0x2f   :  { %1850 = vmatpush1.bf16.msra.mxu1 %v2562_v50  ;;  %v2597_v50 = vld [vmem:[%s3817_s3 + $0x510] ss:$8 sps:$4 sm:$0xff]  }
  0x30   :  { %2014 = vmatpush1.bf16.msra.mxu0 %v2563_v51  ;;  %1851 = vmatprep.subr.bf16.mxu1 %v2564_v57  ;;  %v2602_v51 = vld [vmem:[%s3817_s3 + $0x124] ss:$8 sps:$4 sm:$0xff]   ;;  %v2608_v57 = vld [vmem:[%s3817_s3 + $0x134] ss:$8 sps:$4 sm:$0xff]  }
  0x31   :  { %2015 = vmatprep.subr.bf16.mxu0 %v2566_v58  ;;  %v2611_v58 = vld [vmem:[%s3817_s3 + $0x534] ss:$8 sps:$4 sm:$0xff]  }
  0x33   :  { %1852 = vmatpush1.bf16.msra.mxu1 %v2568_v10  ;;  %v62_v10 = vrot.slane %v3064_v55, %v61_v5 }
  0x34   :  { %2016 = vmatpush1.bf16.msra.mxu0 %v2569_v11  ;;  %1853 = vmatprep.subr.bf16.mxu1 %v2570_v14  ;;  %v2624_v11 = vld [vmem:[%s3817_s3 + $0x160] ss:$8 sps:$4 sm:$0xff]   ;;  %v2632_v14 = vld [vmem:[%s3817_s3 + $0x174] ss:$8 sps:$4 sm:$0xff]  }
  0x35   :  { %2017 = vmatprep.subr.bf16.mxu0 %v2572_v15  ;;  %v30_v15 = vunpack.c.h.bf16 %v3229_v13 }
  0x37   :  { %1854 = vmatpush1.bf16.msra.mxu1 %v2574_v19  ;;  %v3243_v19 = vld [vmem:[%s3818_s0 + $0x28] sm:$0xff]  ;;  %v130_v20 = vmul.f32 %v62_v10, %v30_v15 }
  0x38   :  { %2018 = vmatpush1.bf16.msra.mxu0 %v2575_v22  ;;  %1855 = vmatprep.subr.bf16.mxu1 %v2576_v23  ;;  %v38_v21 = vunpack.c.h.bf16 %v3243_v19  ;;  %v194_v22 = vrot.slane %v3091_v0, %v61_v5  ;;  %v2630_v23 = vld [vmem:[%s3817_s3 + $0x170] ss:$8 sps:$4 sm:$0xff]   ;;  %v2671_v5 = vld [vmem:[%s3817_s3 + $0x5d4] ss:$8 sps:$4 sm:$0xff]   ;;  %v2674_v10 = vld [vmem:[%s3817_s3 + $0x1e4] ss:$8 sps:$4 sm:$0xff]  }
  0x39   :  { %2019 = vmatprep.subr.bf16.mxu0 %v2578_v26  ;;  %v230_v25 = vadd.f32 %v162_v16, %v130_v20  ;;  %v2675_v15 = vld [vmem:[%s3817_s3 + $0x5e0] ss:$8 sps:$4 sm:$0xff]   ;;  %v2680_v16 = vld [vmem:[%s3817_s3 + $0x1f4] ss:$8 sps:$4 sm:$0xff]  }
  0x3a   :  { %v138_v26 = vmul.f32 %v94_v17, %v38_v21  ;;  %v2683_v17 = vld [vmem:[%s3817_s3 + $0x5f4] ss:$8 sps:$4 sm:$0xff]   ;;  %v2681_v21 = vld [vmem:[%s3817_s3 + $0x5f0] ss:$8 sps:$4 sm:$0xff]  }
  0x3b   :  { %1856 = vmatpush1.bf16.msra.mxu1 %v2580_v27  ;;  %v2638_v27 = vld [vmem:[%s3817_s3 + $0x184] ss:$8 sps:$4 sm:$0xff]   ;;  %v246_v29 = vmul.f32 0.2, %v230_v25 }
  0x3c   :  { %2020 = vmatpush1.bf16.msra.mxu0 %v2581_v32  ;;  %1857 = vmatprep.subr.bf16.mxu1 %v2582_v33  ;;  %v238_v30 = vadd.f32 %v194_v22, %v138_v26  ;;  %v2639_v32 = vld [vmem:[%s3817_s3 + $0x580] ss:$8 sps:$4 sm:$0xff]   ;;  %v2644_v33 = vld [vmem:[%s3817_s3 + $0x194] ss:$8 sps:$4 sm:$0xff]   ;;  %v2686_v22 = vld [vmem:[%s3817_s3 + $0x204] ss:$8 sps:$4 sm:$0xff]  }
  0x3d   :  { %2021 = vmatprep.subr.bf16.mxu0 %v2584_v35  ;;  %v262_v34 = vmax.f32 %v230_v25, %v246_v29  ;;  %v2684_v25 = vld [vmem:[%s3817_s3 + $0x200] ss:$8 sps:$4 sm:$0xff]   ;;  %v2692_v29 = vld [vmem:[%s3817_s3 + $0x214] ss:$8 sps:$4 sm:$0xff]  }
  0x3e   :  { %v254_v35 = vmul.f32 0.2, %v238_v30 }
  0x3f   :  { %1858 = vmatpush1.bf16.msra.mxu1 %v2586_v36  ;;  %v2647_v36 = vld [vmem:[%s3817_s3 + $0x594] ss:$8 sps:$4 sm:$0xff]   ;;  %v278_v37 = vpack.c.bf16 %v262_v34, %v262_v34 }
  0x40   :  { %2022 = vmatpush1.bf16.msra.mxu0 %v2587_v39  ;;  %1868 = vmatprep.subr.bf16.mxu1 %v2590_v40  ;;  %v270_v38 = vmax.f32 %v238_v30, %v254_v35  ;;  %v2642_v39 = vld [vmem:[%s3817_s3 + $0x190] ss:$8 sps:$4 sm:$0xff]   ;;  %v2695_v30 = vld [vmem:[%s3817_s3 + $0x614] ss:$8 sps:$4 sm:$0xff]  }
  0x41   :  { %2032 = vmatprep.subr.bf16.mxu0 %v2593_v41  ;;  %v2645_v40 = vld [vmem:[%s3817_s3 + $0x590] ss:$8 sps:$4 sm:$0xff]   ;;  %v2650_v41 = vld [vmem:[%s3817_s3 + $0x1a4] ss:$8 sps:$4 sm:$0xff]  }
  0x42   :  { %1860 = vmatmul.mubr.bf16.vlgmr.msra.gmra.mrb[0].mxu1 %v275_v44  ;;  %v2653_v44 = vld [vmem:[%s3817_s3 + $0x5a4] ss:$8 sps:$4 sm:$0xff]   ;;  %v3385_v34 = vld [vmem:[%s3818_s0 + $0x10] sm:$0xff] }
  0x43   :  { %2024 = vmatmul.mubr.bf16.vlgmr.msra.gmra.mrb[0].mxu0 %v283_v45  ;;  %1869 = vmatpush1.bf16.msra.mxu1 %v2588_v43  ;;  %v286_v43 = vpack.c.bf16 %v270_v38, %v270_v38  ;;  %v2648_v45 = vld [vmem:[%s3817_s3 + $0x1a0] ss:$8 sps:$4 sm:$0xff]   ;;  %v32_v35 = vunpack.c.h.bf16 %v3385_v34  ;;  %v2701_v38 = vld [vmem:[%s3817_s3 + $0x624] ss:$8 sps:$4 sm:$0xff]  }
  0x44   :  { %2033 = vmatpush1.bf16.msra.mxu0 %v2591_v46  ;;  %1870 = vmatprep.subr.bf16.mxu1 %v2596_v47  ;;  %v57_v46 = vsub.s32 2, %v3033_v42  ;;  %v2651_v47 = vld [vmem:[%s3817_s3 + $0x5a0] ss:$8 sps:$4 sm:$0xff]  }
  0x45   :  { %2034 = vmatprep.subr.bf16.mxu0 %v2599_v48  ;;  %1900 = vmatprep.mubr.bf16.mxu1 %v278_v37  ;;  %v2656_v48 = vld [vmem:[%s3817_s3 + $0x1b4] ss:$8 sps:$4 sm:$0xff]  }
  0x46   :  { %2064 = vmatprep.mubr.bf16.mxu0 %v286_v43 }
  0x47   :  { %1871 = vmatpush1.bf16.msra.mxu1 %v2594_v49  ;;  %v2659_v49 = vld [vmem:[%s3817_s3 + $0x5b4] ss:$8 sps:$4 sm:$0xff]  }
  0x48   :  { %2035 = vmatpush1.bf16.msra.mxu0 %v2597_v50  ;;  %1872 = vmatprep.subr.bf16.mxu1 %v2602_v51  ;;  %v2654_v50 = vld [vmem:[%s3817_s3 + $0x1b0] ss:$8 sps:$4 sm:$0xff]   ;;  %v29_v51 = vunpack.c.l.bf16 %v3229_v13 }
  0x49   :  { %2036 = vmatprep.subr.bf16.mxu0 %v2605_v52  ;;  %v37_v52 = vunpack.c.l.bf16 %v3243_v19 }
  0x4b   :  { %1873 = vmatpush1.bf16.msra.mxu1 %v2600_v53  ;;  %v58_v53 = vrot.slane %v3064_v55, %v57_v46 }
  0x4c   :  { %2037 = vmatpush1.bf16.msra.mxu0 %v2603_v54  ;;  %1874 = vmatprep.subr.bf16.mxu1 %v2608_v57  ;;  %v90_v54 = vrot.slane %v3086_v63, %v57_v46  ;;  %v2657_v57 = vld [vmem:[%s3817_s3 + $0x5b0] ss:$8 sps:$4 sm:$0xff]  }
  0x4d   :  { %2038 = vmatprep.subr.bf16.mxu0 %v2611_v58  ;;  %v2662_v58 = vld [vmem:[%s3817_s3 + $0x1c4] ss:$8 sps:$4 sm:$0xff]  }
  0x4f   :  { %1875 = vmatpush1.bf16.msra.mxu1 %v2606_v59  ;;  %v2665_v59 = vld [vmem:[%s3817_s3 + $0x5c4] ss:$8 sps:$4 sm:$0xff]  }
  0x50   :  { %2039 = vmatpush1.bf16.msra.mxu0 %v2609_v60  ;;  %1876 = vmatprep.subr.bf16.mxu1 %v2614_v61  ;;  %v2660_v60 = vld [vmem:[%s3817_s3 + $0x1c0] ss:$8 sps:$4 sm:$0xff]   ;;  %v129_v61 = vmul.f32 %v58_v53, %v29_v51  ;;  %v2710_v51 = vld [vmem:[%s3817_s3 + $0x244] ss:$8 sps:$4 sm:$0xff]  }
  0x51   :  { %2040 = vmatprep.subr.bf16.mxu0 %v2617_v62  ;;  %v158_v62 = vrot.slane %v3069_v56, %v57_v46 }
  0x53   :  { %1877 = vmatpush1.bf16.msra.mxu1 %v2612_v1  ;;  %v137_v1 = vmul.f32 %v90_v54, %v37_v52  ;;  %v2713_v54 = vld [vmem:[%s3817_s3 + $0x644] ss:$8 sps:$4 sm:$0xff]  }
  0x54   :  { %2041 = vmatpush1.bf16.msra.mxu0 %v2615_v2  ;;  %1878 = vmatprep.subr.bf16.mxu1 %v2620_v3  ;;  %v190_v2 = vrot.slane %v3091_v0, %v57_v46  ;;  %v2663_v3 = vld [vmem:[%s3817_s3 + $0x5c0] ss:$8 sps:$4 sm:$0xff]   ;;  %v2704_v46 = vld [vmem:[%s3817_s3 + $0x234] ss:$8 sps:$4 sm:$0xff]  }
  0x55   :  { %2042 = vmatprep.subr.bf16.mxu0 %v2623_v4  ;;  %v2668_v4 = vld [vmem:[%s3817_s3 + $0x1d4] ss:$8 sps:$4 sm:$0xff]  }
  0x57   :  { %1879 = vmatpush1.bf16.msra.mxu1 %v2618_v6  ;;  %v2666_v6 = vld [vmem:[%s3817_s3 + $0x1d0] ss:$8 sps:$4 sm:$0xff]  }
  0x58   :  { %2043 = vmatpush1.bf16.msra.mxu0 %v2621_v7  ;;  %1880 = vmatprep.subr.bf16.mxu1 %v2626_v8  ;;  %v229_v7 = vadd.f32 %v158_v62, %v129_v61  ;;  %v237_v8 = vadd.f32 %v190_v2, %v137_v1  ;;  %v2716_v61 = vld [vmem:[%s3817_s3 + $0x254] ss:$8 sps:$4 sm:$0xff]   ;;  %v2714_v2 = vld [vmem:[%s3817_s3 + $0x250] ss:$8 sps:$4 sm:$0xff]  }
  0x59   :  { %2044 = vmatprep.subr.bf16.mxu0 %v2629_v9  ;;  %v2669_v9 = vld [vmem:[%s3817_s3 + $0x5d0] ss:$8 sps:$4 sm:$0xff]   ;;  %v2719_v1 = vld [vmem:[%s3817_s3 + $0x654] ss:$8 sps:$4 sm:$0xff]  }
  0x5a   :  { %v245_v13 = vmul.f32 0.2, %v229_v7 }
  0x5b   :  { %1881 = vmatpush1.bf16.msra.mxu1 %v2624_v11  ;;  %v2677_v11 = vld [vmem:[%s3817_s3 + $0x5e4] ss:$8 sps:$4 sm:$0xff]  }
  0x5c   :  { %2045 = vmatpush1.bf16.msra.mxu0 %v2627_v12  ;;  %1882 = vmatprep.subr.bf16.mxu1 %v2632_v14  ;;  %v2672_v12 = vld [vmem:[%s3817_s3 + $0x1e0] ss:$8 sps:$4 sm:$0xff]   ;;  %v253_v14 = vmul.f32 0.2, %v237_v8  ;;  %v261_v19 = vmax.f32 %v229_v7, %v245_v13  ;;  %v2737_v13 = vld [vmem:[%s3817_s3 + $0x684] ss:$8 sps:$4 sm:$0xff]  }
  0x5d   :  { %2046 = vmatprep.subr.bf16.mxu0 %v2635_v18  ;;  %v2678_v18 = vld [vmem:[%s3817_s3 + $0x1f0] ss:$8 sps:$4 sm:$0xff]   ;;  %v2723_v7 = vld [vmem:[%s3817_s3 + $0x660] ss:$8 sps:$4 sm:$0xff]  }
  0x5e   :  { %v269_v20 = vmax.f32 %v237_v8, %v253_v14  ;;  %v277_v26 = vpack.c.bf16 %v261_v19, %v261_v19  ;;  %v2728_v8 = vld [vmem:[%s3817_s3 + $0x274] ss:$8 sps:$4 sm:$0xff]   ;;  %v2732_v14 = vld [vmem:[%s3817_s3 + $0x280] ss:$8 sps:$4 sm:$0xff]   ;;  %v2741_v19 = vld [vmem:[%s3817_s3 + $0x690] ss:$8 sps:$4 sm:$0xff]  }
  0x5f   :  { %1883 = vmatpush1.bf16.msra.mxu1 %v2630_v23  ;;  %v2689_v23 = vld [vmem:[%s3817_s3 + $0x604] ss:$8 sps:$4 sm:$0xff]  }
  0x60   :  { %2047 = vmatpush1.bf16.msra.mxu0 %v2633_v24  ;;  %1884 = vmatprep.subr.bf16.mxu1 %v2638_v27  ;;  %v69_v24 = vsub.s32 5, %v3033_v42  ;;  %v285_v27 = vpack.c.bf16 %v269_v20, %v269_v20  ;;  %v2746_v20 = vld [vmem:[%s3817_s3 + $0x2a4] ss:$8 sps:$4 sm:$0xff]  }
  0x61   :  { %2048 = vmatprep.subr.bf16.mxu0 %v2641_v28  ;;  %v2687_v28 = vld [vmem:[%s3817_s3 + $0x600] ss:$8 sps:$4 sm:$0xff]  }
  0x62   :  { %v102_v37 = vrot.slane %v3086_v63, %v69_v24  ;;  %v202_v43 = vrot.slane %v3091_v0, %v69_v24  ;;  %v2699_v63 = vld [vmem:[%s3817_s3 + $0x620] ss:$8 sps:$4 sm:$0xff]   ;;  %v2707_v0 = vld [vmem:[%s3817_s3 + $0x634] ss:$8 sps:$4 sm:$0xff]  }
  0x63   :  { %1885 = vmatpush1.bf16.msra.mxu1 %v2636_v31  ;;  %v70_v31 = vrot.slane %v3064_v55, %v69_v24  ;;  %v2698_v55 = vld [vmem:[%s3817_s3 + $0x224] ss:$8 sps:$4 sm:$0xff]  }
  0x64   :  { %2049 = vmatpush1.bf16.msra.mxu0 %v2639_v32  ;;  %1886 = vmatprep.subr.bf16.mxu1 %v2644_v33  ;;  %v2690_v32 = vld [vmem:[%s3817_s3 + $0x210] ss:$8 sps:$4 sm:$0xff]  }
  0x65   :  { %2050 = vmatprep.subr.bf16.mxu0 %v2647_v36  ;;  %v2693_v33 = vld [vmem:[%s3817_s3 + $0x610] ss:$8 sps:$4 sm:$0xff]   ;;  %v170_v36 = vrot.slane %v3069_v56, %v69_v24  ;;  %v2696_v56 = vld [vmem:[%s3817_s3 + $0x220] ss:$8 sps:$4 sm:$0xff]  }
  0x66   :  { %v2747_v24 = vld [vmem:[%s3817_s3 + $0x6a0] ss:$8 sps:$4 sm:$0xff]  }
  0x67   :  { %1887 = vmatpush1.bf16.msra.mxu1 %v2642_v39  ;;  %v3399_v39 = vld [vmem:[%s3818_s0 + $0x30] sm:$0xff] }
  0x68   :  { %2051 = vmatpush1.bf16.msra.mxu0 %v2645_v40  ;;  %1888 = vmatprep.subr.bf16.mxu1 %v2650_v41  ;;  %v132_v40 = vmul.f32 %v70_v31, %v32_v35  ;;  %v40_v41 = vunpack.c.h.bf16 %v3399_v39  ;;  %v3521_v31 = vld [vmem:[%s3819_s1] sm:$0xff] }
  0x69   :  { %2052 = vmatprep.subr.bf16.mxu0 %v2653_v44  ;;  %v2758_v35 = vld [vmem:[%s3817_s3 + $0x2c4] ss:$8 sps:$4 sm:$0xff]  }
  0x6a   :  { %v232_v44 = vadd.f32 %v170_v36, %v132_v40  ;;  %v2761_v36 = vld [vmem:[%s3817_s3 + $0x6c4] ss:$8 sps:$4 sm:$0xff]  }
  0x6b   :  { %1889 = vmatpush1.bf16.msra.mxu1 %v2648_v45  ;;  %v140_v45 = vmul.f32 %v102_v37, %v40_v41  ;;  %v3542_v37 = vld [vmem:[%s3820_s2] sm:$0xff] }
  0x6c   :  { %2053 = vmatpush1.bf16.msra.mxu0 %v2651_v47  ;;  %1890 = vmatprep.subr.bf16.mxu1 %v2656_v48  ;;  %v248_v47 = vmul.f32 0.2, %v232_v44 }
  0x6d   :  { %2054 = vmatprep.subr.bf16.mxu0 %v2659_v49  ;;  %v240_v48 = vadd.f32 %v202_v43, %v140_v45  ;;  %v2702_v49 = vld [vmem:[%s3817_s3 + $0x230] ss:$8 sps:$4 sm:$0xff]   ;;  %v3549_v43 = vld [vmem:[%s3820_s2 + $0x8] sm:$0xff] }
  0x6e   :  { %v264_v52 = vmax.f32 %v232_v44, %v248_v47  ;;  %v2756_v45 = vld [vmem:[%s3817_s3 + $0x2c0] ss:$8 sps:$4 sm:$0xff]   ;;  %v3568_v47 = vld [vmem:[%s3818_s0 + $0x38] sm:$0xff] }
  0x6f   :  { %1891 = vmatpush1.bf16.msra.mxu1 %v2654_v50  ;;  %v2705_v50 = vld [vmem:[%s3817_s3 + $0x630] ss:$8 sps:$4 sm:$0xff]   ;;  %v256_v53 = vmul.f32 0.2, %v240_v48 }
  0x70   :  { %2055 = vmatpush1.bf16.msra.mxu0 %v2657_v57  ;;  %1892 = vmatprep.subr.bf16.mxu1 %v2662_v58  ;;  %v280_v57 = vpack.c.bf16 %v264_v52, %v264_v52 }
  0x71   :  { %2056 = vmatprep.subr.bf16.mxu0 %v2665_v59  ;;  %v272_v58 = vmax.f32 %v240_v48, %v256_v53  ;;  %v2708_v59 = vld [vmem:[%s3817_s3 + $0x240] ss:$8 sps:$4 sm:$0xff]   ;;  %v2764_v48 = vld [vmem:[%s3817_s3 + $0x2d4] ss:$8 sps:$4 sm:$0xff]  }
  0x73   :  { %1893 = vmatpush1.bf16.msra.mxu1 %v2660_v60  ;;  %v2711_v60 = vld [vmem:[%s3817_s3 + $0x640] ss:$8 sps:$4 sm:$0xff]   ;;  %v288_v62 = vpack.c.bf16 %v272_v58, %v272_v58 }
  0x74   :  { %2057 = vmatpush1.bf16.msra.mxu0 %v2663_v3  ;;  %1894 = vmatprep.subr.bf16.mxu1 %v2668_v4  ;;  %v2717_v3 = vld [vmem:[%s3817_s3 + $0x650] ss:$8 sps:$4 sm:$0xff]   ;;  %v2722_v4 = vld [vmem:[%s3817_s3 + $0x264] ss:$8 sps:$4 sm:$0xff]  }
  0x75   :  { %2058 = vmatprep.subr.bf16.mxu0 %v2671_v5  ;;  %v2725_v5 = vld [vmem:[%s3817_s3 + $0x664] ss:$8 sps:$4 sm:$0xff]  }
  0x77   :  { %1895 = vmatpush1.bf16.msra.mxu1 %v2666_v6  ;;  %v2720_v6 = vld [vmem:[%s3817_s3 + $0x260] ss:$8 sps:$4 sm:$0xff]  }
  0x78   :  { %2059 = vmatpush1.bf16.msra.mxu0 %v2669_v9  ;;  %1896 = vmatprep.subr.bf16.mxu1 %v2674_v10  ;;  %v2731_v9 = vld [vmem:[%s3817_s3 + $0x674] ss:$8 sps:$4 sm:$0xff]   ;;  %v2726_v10 = vld [vmem:[%s3817_s3 + $0x270] ss:$8 sps:$4 sm:$0xff]  }
  0x79   :  { %2060 = vmatprep.subr.bf16.mxu0 %v2677_v11  ;;  %v2729_v11 = vld [vmem:[%s3817_s3 + $0x670] ss:$8 sps:$4 sm:$0xff]  }
  0x7b   :  { %1897 = vmatpush1.bf16.msra.mxu1 %v2672_v12  ;;  %v2734_v12 = vld [vmem:[%s3817_s3 + $0x284] ss:$8 sps:$4 sm:$0xff]  }
  0x7c   :  { %2061 = vmatpush1.bf16.msra.mxu0 %v2675_v15  ;;  %1898 = vmatprep.subr.bf16.mxu1 %v2680_v16  ;;  %v2735_v15 = vld [vmem:[%s3817_s3 + $0x680] ss:$8 sps:$4 sm:$0xff]   ;;  %v2740_v16 = vld [vmem:[%s3817_s3 + $0x294] ss:$8 sps:$4 sm:$0xff]  }
  0x7d   :  { %2062 = vmatprep.subr.bf16.mxu0 %v2683_v17  ;;  %v2743_v17 = vld [vmem:[%s3817_s3 + $0x694] ss:$8 sps:$4 sm:$0xff]  }
  0x7f   :  { %1899 = vmatpush1.bf16.msra.mxu1 %v2678_v18  ;;  %v2738_v18 = vld [vmem:[%s3817_s3 + $0x290] ss:$8 sps:$4 sm:$0xff]  }
  0x80   :  { %2063 = vmatpush1.bf16.msra.mxu0 %v2681_v21  ;;  %1909 = vmatprep.subr.bf16.mxu1 %v2686_v22  ;;  %v2749_v21 = vld [vmem:[%s3817_s3 + $0x6a4] ss:$8 sps:$4 sm:$0xff]   ;;  %v2744_v22 = vld [vmem:[%s3817_s3 + $0x2a0] ss:$8 sps:$4 sm:$0xff]  }
  0x81   :  { %2073 = vmatprep.subr.bf16.mxu0 %v2689_v23  ;;  %v65_v23 = vsub.s32 4, %v3033_v42 }
  0x82   :  { %1901 = vmatmul.mubr.bf16.vlgmr.msra.gmra.mrb[0].mxu1 %v277_v26  ;;  %v2755_v26 = vld [vmem:[%s3817_s3 + $0x6b4] ss:$8 sps:$4 sm:$0xff]  }
  0x83   :  { %2065 = vmatmul.mubr.bf16.vlgmr.msra.gmra.mrb[0].mxu0 %v285_v27  ;;  %1910 = vmatpush1.bf16.msra.mxu1 %v2684_v25  ;;  %v2752_v25 = vld [vmem:[%s3817_s3 + $0x2b4] ss:$8 sps:$4 sm:$0xff]   ;;  %v77_v27 = vsub.s32 7, %v3033_v42 }
  0x84   :  { %2074 = vmatpush1.bf16.msra.mxu0 %v2687_v28  ;;  %1911 = vmatprep.subr.bf16.mxu1 %v2692_v29  ;;  %v2750_v28 = vld [vmem:[%s3817_s3 + $0x2b0] ss:$8 sps:$4 sm:$0xff]   ;;  %v31_v29 = vunpack.c.l.bf16 %v3385_v34 }
  0x85   :  { %2075 = vmatprep.subr.bf16.mxu0 %v2695_v30  ;;  %1941 = vmatprep.mubr.bf16.mxu1 %v280_v57  ;;  %v39_v30 = vunpack.c.l.bf16 %v3399_v39  ;;  %v2753_v34 = vld [vmem:[%s3817_s3 + $0x6b0] ss:$8 sps:$4 sm:$0xff]   ;;  %v78_v39 = vrot.slane %v3521_v31, %v77_v27  ;;  %v178_v52 = vrot.slane %v3542_v37, %v77_v27  ;;  %v210_v53 = vrot.slane %v3549_v43, %v77_v27 }
  0x86   :  { %2105 = vmatprep.mubr.bf16.mxu0 %v288_v62  ;;  %v2773_v62 = vld [vmem:[%s3817_s3 + $0x6e4] ss:$8 sps:$4 sm:$0xff]  }
  0x87   :  { %1912 = vmatpush1.bf16.msra.mxu1 %v2690_v32  ;;  %v66_v32 = vrot.slane %v3521_v31, %v65_v23 }
  0x88   :  { %2076 = vmatpush1.bf16.msra.mxu0 %v2693_v33  ;;  %1913 = vmatprep.subr.bf16.mxu1 %v2698_v55  ;;  %v3527_v33 = vld [vmem:[%s3819_s1 + $0x8] sm:$0xff] }
  0x89   :  { %2077 = vmatprep.subr.bf16.mxu0 %v2701_v38  ;;  %v98_v55 = vrot.slane %v3527_v33, %v65_v23  ;;  %v166_v38 = vrot.slane %v3542_v37, %v65_v23  ;;  %v131_v40 = vmul.f32 %v66_v32, %v31_v29  ;;  %v110_v44 = vrot.slane %v3527_v33, %v77_v27  ;;  %v2786_v27 = vld [vmem:[%s3817_s3 + $0x310] ss:$8 sps:$4 sm:$0xff]   ;;  %v2794_v29 = vld [vmem:[%s3817_s3 + $0x324] ss:$8 sps:$4 sm:$0xff]   ;;  %v2792_v32 = vld [vmem:[%s3817_s3 + $0x320] ss:$8 sps:$4 sm:$0xff]  }
  0x8b   :  { %1914 = vmatpush1.bf16.msra.mxu1 %v2696_v56  ;;  %v139_v41 = vmul.f32 %v98_v55, %v39_v30  ;;  %v198_v56 = vrot.slane %v3549_v43, %v65_v23  ;;  %v2788_v23 = vld [vmem:[%s3817_s3 + $0x314] ss:$8 sps:$4 sm:$0xff]   ;;  %v2797_v30 = vld [vmem:[%s3817_s3 + $0x724] ss:$8 sps:$4 sm:$0xff]   ;;  %v2795_v55 = vld [vmem:[%s3817_s3 + $0x720] ss:$8 sps:$4 sm:$0xff]  }
  0x8c   :  { %2078 = vmatpush1.bf16.msra.mxu0 %v2699_v63  ;;  %1915 = vmatprep.subr.bf16.mxu1 %v2704_v46  ;;  %v3555_v63 = vld [vmem:[%s3818_s0 + $0x18] sm:$0xff]  ;;  %v2759_v46 = vld [vmem:[%s3817_s3 + $0x6c0] ss:$8 sps:$4 sm:$0xff]  }
  0x8d   :  { %2079 = vmatprep.subr.bf16.mxu0 %v2707_v0  ;;  %v34_v0 = vunpack.c.h.bf16 %v3555_v63  ;;  %v239_v57 = vadd.f32 %v198_v56, %v139_v41  ;;  %v2804_v41 = vld [vmem:[%s3817_s3 + $0x340] ss:$8 sps:$4 sm:$0xff]  }
  0x8e   :  { %v2807_v56 = vld [vmem:[%s3817_s3 + $0x740] ss:$8 sps:$4 sm:$0xff]  }
  0x8f   :  { %1916 = vmatpush1.bf16.msra.mxu1 %v2702_v49  ;;  %v2767_v49 = vld [vmem:[%s3817_s3 + $0x6d4] ss:$8 sps:$4 sm:$0xff]  }
  0x90   :  { %2080 = vmatpush1.bf16.msra.mxu0 %v2705_v50  ;;  %1917 = vmatprep.subr.bf16.mxu1 %v2710_v51  ;;  %v42_v50 = vunpack.c.h.bf16 %v3568_v47  ;;  %v134_v51 = vmul.f32 %v78_v39, %v34_v0  ;;  %v2806_v39 = vld [vmem:[%s3817_s3 + $0x344] ss:$8 sps:$4 sm:$0xff]   ;;  %v2813_v0 = vld [vmem:[%s3817_s3 + $0x750] ss:$8 sps:$4 sm:$0xff]  }
  0x91   :  { %2081 = vmatprep.subr.bf16.mxu0 %v2713_v54  ;;  %v231_v54 = vadd.f32 %v166_v38, %v131_v40  ;;  %v2801_v38 = vld [vmem:[%s3817_s3 + $0x730] ss:$8 sps:$4 sm:$0xff]   ;;  %v2809_v40 = vld [vmem:[%s3817_s3 + $0x744] ss:$8 sps:$4 sm:$0xff]  }
  0x92   :  { %v142_v58 = vmul.f32 %v110_v44, %v42_v50  ;;  %v2812_v44 = vld [vmem:[%s3817_s3 + $0x354] ss:$8 sps:$4 sm:$0xff]   ;;  %v2816_v50 = vld [vmem:[%s3817_s3 + $0x360] ss:$8 sps:$4 sm:$0xff]  }
  0x93   :  { %1918 = vmatpush1.bf16.msra.mxu1 %v2708_v59  ;;  %v2762_v59 = vld [vmem:[%s3817_s3 + $0x2d0] ss:$8 sps:$4 sm:$0xff]  }
  0x94   :  { %2082 = vmatpush1.bf16.msra.mxu0 %v2711_v60  ;;  %1919 = vmatprep.subr.bf16.mxu1 %v2716_v61  ;;  %v2765_v60 = vld [vmem:[%s3817_s3 + $0x6d0] ss:$8 sps:$4 sm:$0xff]   ;;  %v2770_v61 = vld [vmem:[%s3817_s3 + $0x2e4] ss:$8 sps:$4 sm:$0xff]  }
  0x95   :  { %2083 = vmatprep.subr.bf16.mxu0 %v2719_v1  ;;  %v234_v1 = vadd.f32 %v178_v52, %v134_v51  ;;  %v2819_v51 = vld [vmem:[%s3817_s3 + $0x760] ss:$8 sps:$4 sm:$0xff]   ;;  %v2824_v52 = vld [vmem:[%s3817_s3 + $0x374] ss:$8 sps:$4 sm:$0xff]  }
  0x97   :  { %1920 = vmatpush1.bf16.msra.mxu1 %v2714_v2  ;;  %v242_v2 = vadd.f32 %v210_v53, %v142_v58  ;;  %v2827_v53 = vld [vmem:[%s3817_s3 + $0x774] ss:$8 sps:$4 sm:$0xff]   ;;  %v2830_v58 = vld [vmem:[%s3817_s3 + $0x384] ss:$8 sps:$4 sm:$0xff]  }
  0x98   :  { %2084 = vmatpush1.bf16.msra.mxu0 %v2717_v3  ;;  %1921 = vmatprep.subr.bf16.mxu1 %v2722_v4  ;;  %v247_v3 = vmul.f32 0.2, %v231_v54  ;;  %v255_v4 = vmul.f32 0.2, %v239_v57 }
  0x99   :  { %2085 = vmatprep.subr.bf16.mxu0 %v2725_v5  ;;  %v2768_v5 = vld [vmem:[%s3817_s3 + $0x2e0] ss:$8 sps:$4 sm:$0xff]  }
  0x9b   :  { %1922 = vmatpush1.bf16.msra.mxu1 %v2720_v6  ;;  %v2771_v6 = vld [vmem:[%s3817_s3 + $0x6e0] ss:$8 sps:$4 sm:$0xff]  }
  0x9c   :  { %2086 = vmatpush1.bf16.msra.mxu0 %v2723_v7  ;;  %1923 = vmatprep.subr.bf16.mxu1 %v2728_v8  ;;  %v2776_v7 = vld [vmem:[%s3817_s3 + $0x2f4] ss:$8 sps:$4 sm:$0xff]  }
  0x9d   :  { %2087 = vmatprep.subr.bf16.mxu0 %v2731_v9  ;;  %v2779_v8 = vld [vmem:[%s3817_s3 + $0x6f4] ss:$8 sps:$4 sm:$0xff]   ;;  %v250_v9 = vmul.f32 0.2, %v234_v1 }
  0x9f   :  { %1924 = vmatpush1.bf16.msra.mxu1 %v2726_v10  ;;  %v258_v10 = vmul.f32 0.2, %v242_v2 }
  0xa0   :  { %2088 = vmatpush1.bf16.msra.mxu0 %v2729_v11  ;;  %1925 = vmatprep.subr.bf16.mxu1 %v2734_v12  ;;  %v263_v11 = vmax.f32 %v231_v54, %v247_v3  ;;  %v271_v12 = vmax.f32 %v239_v57, %v255_v4  ;;  %v2822_v54 = vld [vmem:[%s3817_s3 + $0x370] ss:$8 sps:$4 sm:$0xff]   ;;  %v2842_v4 = vld [vmem:[%s3817_s3 + $0x3a4] ss:$8 sps:$4 sm:$0xff]  }
  0xa1   :  { %2089 = vmatprep.subr.bf16.mxu0 %v2737_v13  ;;  %v2774_v13 = vld [vmem:[%s3817_s3 + $0x2f0] ss:$8 sps:$4 sm:$0xff]  }
  0xa2   :  { %v2825_v57 = vld [vmem:[%s3817_s3 + $0x770] ss:$8 sps:$4 sm:$0xff]  }
  0xa3   :  { %1926 = vmatpush1.bf16.msra.mxu1 %v2732_v14  ;;  %v2777_v14 = vld [vmem:[%s3817_s3 + $0x6f0] ss:$8 sps:$4 sm:$0xff]  }
  0xa4   :  { %2090 = vmatpush1.bf16.msra.mxu0 %v2735_v15  ;;  %1927 = vmatprep.subr.bf16.mxu1 %v2740_v16  ;;  %v2782_v15 = vld [vmem:[%s3817_s3 + $0x304] ss:$8 sps:$4 sm:$0xff]   ;;  %v2837_v3 = vld [vmem:[%s3817_s3 + $0x790] ss:$8 sps:$4 sm:$0xff]  }
  0xa5   :  { %2091 = vmatprep.subr.bf16.mxu0 %v2743_v17  ;;  %v2785_v16 = vld [vmem:[%s3817_s3 + $0x704] ss:$8 sps:$4 sm:$0xff]   ;;  %v266_v17 = vmax.f32 %v234_v1, %v250_v9  ;;  %v2839_v1 = vld [vmem:[%s3817_s3 + $0x794] ss:$8 sps:$4 sm:$0xff]  }
  0xa6   :  { %v2848_v9 = vld [vmem:[%s3817_s3 + $0x3b4] ss:$8 sps:$4 sm:$0xff]  }
  0xa7   :  { %1928 = vmatpush1.bf16.msra.mxu1 %v2738_v18  ;;  %v274_v18 = vmax.f32 %v242_v2, %v258_v10  ;;  %v2834_v2 = vld [vmem:[%s3817_s3 + $0x390] ss:$8 sps:$4 sm:$0xff]   ;;  %v33_v10 = vunpack.c.l.bf16 %v3555_v63  ;;  %v2854_v63 = vld [vmem:[%s3817_s3 + $0x3c4] ss:$8 sps:$4 sm:$0xff]  }
  0xa8   :  { %2092 = vmatpush1.bf16.msra.mxu0 %v2741_v19  ;;  %1929 = vmatprep.subr.bf16.mxu1 %v2746_v20  ;;  %v279_v19 = vpack.c.bf16 %v263_v11, %v263_v11  ;;  %v287_v20 = vpack.c.bf16 %v271_v12, %v271_v12  ;;  %v41_v11 = vunpack.c.l.bf16 %v3568_v47 }
  0xa9   :  { %2093 = vmatprep.subr.bf16.mxu0 %v2749_v21  ;;  %v2780_v21 = vld [vmem:[%s3817_s3 + $0x300] ss:$8 sps:$4 sm:$0xff]  }
  0xab   :  { %1930 = vmatpush1.bf16.msra.mxu1 %v2744_v22  ;;  %v2783_v22 = vld [vmem:[%s3817_s3 + $0x700] ss:$8 sps:$4 sm:$0xff]  }
  0xac   :  { %2094 = vmatpush1.bf16.msra.mxu0 %v2747_v24  ;;  %1931 = vmatprep.subr.bf16.mxu1 %v2752_v25  ;;  %v2791_v24 = vld [vmem:[%s3817_s3 + $0x714] ss:$8 sps:$4 sm:$0xff]   ;;  %v282_v25 = vpack.c.bf16 %v266_v17, %v266_v17 }
  0xad   :  { %2095 = vmatprep.subr.bf16.mxu0 %v2755_v26  ;;  %v290_v26 = vpack.c.bf16 %v274_v18, %v274_v18  ;;  %v2852_v18 = vld [vmem:[%s3817_s3 + $0x3c0] ss:$8 sps:$4 sm:$0xff]  }
  0xaf   :  { %1932 = vmatpush1.bf16.msra.mxu1 %v2750_v28  ;;  %v2789_v28 = vld [vmem:[%s3817_s3 + $0x710] ss:$8 sps:$4 sm:$0xff]  }
  0xb0   :  { %2096 = vmatpush1.bf16.msra.mxu0 %v2753_v34  ;;  %1933 = vmatprep.subr.bf16.mxu1 %v2758_v35  ;;  %v2800_v34 = vld [vmem:[%s3817_s3 + $0x334] ss:$8 sps:$4 sm:$0xff]  }
  0xb1   :  { %2097 = vmatprep.subr.bf16.mxu0 %v2761_v36  ;;  %v2803_v35 = vld [vmem:[%s3817_s3 + $0x734] ss:$8 sps:$4 sm:$0xff]   ;;  %v2798_v36 = vld [vmem:[%s3817_s3 + $0x330] ss:$8 sps:$4 sm:$0xff]  }
  0xb3   :  { %1934 = vmatpush1.bf16.msra.mxu1 %v2756_v45  ;;  %v2815_v45 = vld [vmem:[%s3817_s3 + $0x754] ss:$8 sps:$4 sm:$0xff]  }
  0xb4   :  { %2098 = vmatpush1.bf16.msra.mxu0 %v2759_v46  ;;  %1935 = vmatprep.subr.bf16.mxu1 %v2764_v48  ;;  %v2810_v46 = vld [vmem:[%s3817_s3 + $0x350] ss:$8 sps:$4 sm:$0xff]   ;;  %v2818_v48 = vld [vmem:[%s3817_s3 + $0x364] ss:$8 sps:$4 sm:$0xff]  }
  0xb5   :  { %2099 = vmatprep.subr.bf16.mxu0 %v2767_v49  ;;  %v2821_v49 = vld [vmem:[%s3817_s3 + $0x764] ss:$8 sps:$4 sm:$0xff]  }
  0xb7   :  { %1936 = vmatpush1.bf16.msra.mxu1 %v2762_v59  ;;  %v2833_v59 = vld [vmem:[%s3817_s3 + $0x784] ss:$8 sps:$4 sm:$0xff]  }
  0xb8   :  { %2100 = vmatpush1.bf16.msra.mxu0 %v2765_v60  ;;  %1937 = vmatprep.subr.bf16.mxu1 %v2770_v61  ;;  %v2828_v60 = vld [vmem:[%s3817_s3 + $0x380] ss:$8 sps:$4 sm:$0xff]  }
  0xb9   :  { %2101 = vmatprep.subr.bf16.mxu0 %v2773_v62  ;;  %v2831_v61 = vld [vmem:[%s3817_s3 + $0x780] ss:$8 sps:$4 sm:$0xff]   ;;  %v2836_v62 = vld [vmem:[%s3817_s3 + $0x394] ss:$8 sps:$4 sm:$0xff]  }
  0xbb   :  { %1938 = vmatpush1.bf16.msra.mxu1 %v2768_v5  ;;  %v2845_v5 = vld [vmem:[%s3817_s3 + $0x7a4] ss:$8 sps:$4 sm:$0xff]  }
  0xbc   :  { %2102 = vmatpush1.bf16.msra.mxu0 %v2771_v6  ;;  %1939 = vmatprep.subr.bf16.mxu1 %v2776_v7  ;;  %v73_v6 = vsub.s32 6, %v3033_v42  ;;  %v2840_v7 = vld [vmem:[%s3817_s3 + $0x3a0] ss:$8 sps:$4 sm:$0xff]   ;;  %v2851_v42 = vld [vmem:[%s3817_s3 + $0x7b4] ss:$8 sps:$4 sm:$0xff]  }
  0xbd   :  { %2103 = vmatprep.subr.bf16.mxu0 %v2779_v8  ;;  %v2843_v8 = vld [vmem:[%s3817_s3 + $0x7a0] ss:$8 sps:$4 sm:$0xff]  }
  0xbe   :  { %v74_v12 = vrot.slane %v3521_v31, %v73_v6  ;;  %v2857_v31 = vld [vmem:[%s3817_s3 + $0x7c4] ss:$8 sps:$4 sm:$0xff]   ;;  %v174_v47 = vrot.slane %v3542_v37, %v73_v6  ;;  %v206_v17 = vrot.slane %v3549_v43, %v73_v6  ;;  %v2863_v37 = vld [vmem:[%s3817_s3 + $0x7d4] ss:$8 sps:$4 sm:$0xff]  }
  0xbf   :  { %1940 = vmatpush1.bf16.msra.mxu1 %v2774_v13  ;;  %v106_v13 = vrot.slane %v3527_v33, %v73_v6 }
  0xc0   :  { %2104 = vmatpush1.bf16.msra.mxu0 %v2777_v14  ;;  %1950 = vmatprep.subr.bf16.mxu1 %v2782_v15  ;;  %v2846_v14 = vld [vmem:[%s3817_s3 + $0x3b0] ss:$8 sps:$4 sm:$0xff]   ;;  %v133_v33 = vmul.f32 %v74_v12, %v33_v10 }
  0xc1   :  { %2114 = vmatprep.subr.bf16.mxu0 %v2785_v16  ;;  %v2849_v15 = vld [vmem:[%s3817_s3 + $0x7b0] ss:$8 sps:$4 sm:$0xff]   ;;  %v141_v16 = vmul.f32 %v106_v13, %v41_v11 }
  0xc2   :  { %1942 = vmatmul.mubr.bf16.vlgmr.msra.gmra.mrb[0].mxu1 %v279_v19  ;;  %v2855_v19 = vld [vmem:[%s3817_s3 + $0x7c0] ss:$8 sps:$4 sm:$0xff]   ;;  %v233_v43 = vadd.f32 %v174_v47, %v133_v33 }
  0xc3   :  { %2106 = vmatmul.mubr.bf16.vlgmr.msra.gmra.mrb[0].mxu0 %v287_v20  ;;  %1951 = vmatpush1.bf16.msra.mxu1 %v2780_v21  ;;  %v2860_v20 = vld [vmem:[%s3817_s3 + $0x3d4] ss:$8 sps:$4 sm:$0xff]   ;;  %v241_v21 = vadd.f32 %v206_v17, %v141_v16 }
  0xc4   :  { %2115 = vmatpush1.bf16.msra.mxu0 %v2783_v22  ;;  %1952 = vmatprep.subr.bf16.mxu1 %v2788_v23  ;;  %v2858_v22 = vld [vmem:[%s3817_s3 + $0x3d0] ss:$8 sps:$4 sm:$0xff]  }
  0xc5   :  { %2116 = vmatprep.subr.bf16.mxu0 %v2791_v24  ;;  %1982 = vmatprep.mubr.bf16.mxu1 %v282_v25  ;;  %v2861_v23 = vld [vmem:[%s3817_s3 + $0x7d0] ss:$8 sps:$4 sm:$0xff]   ;;  %v2866_v24 = vld [vmem:[%s3817_s3 + $0x3e4] ss:$8 sps:$4 sm:$0xff]  }
  0xc6   :  { %2146 = vmatprep.mubr.bf16.mxu0 %v290_v26  ;;  %v2869_v25 = vld [vmem:[%s3817_s3 + $0x7e4] ss:$8 sps:$4 sm:$0xff]   ;;  %v249_v26 = vmul.f32 0.2, %v233_v43 }
  0xc7   :  { %1953 = vmatpush1.bf16.msra.mxu1 %v2786_v27  ;;  %v257_v27 = vmul.f32 0.2, %v241_v21 }
  0xc8   :  { %2117 = vmatpush1.bf16.msra.mxu0 %v2789_v28  ;;  %1954 = vmatprep.subr.bf16.mxu1 %v2794_v29  ;;  %v2864_v28 = vld [vmem:[%s3817_s3 + $0x3e0] ss:$8 sps:$4 sm:$0xff]  }
  0xc9   :  { %2118 = vmatprep.subr.bf16.mxu0 %v2797_v30  ;;  %v2867_v29 = vld [vmem:[%s3817_s3 + $0x7e0] ss:$8 sps:$4 sm:$0xff]   ;;  %v2872_v30 = vld [vmem:[%s3817_s3 + $0x3f4] ss:$8 sps:$4 sm:$0xff]  }
  0xcb   :  { %1955 = vmatpush1.bf16.msra.mxu1 %v2792_v32  ;;  %v2875_v32 = vld [vmem:[%s3817_s3 + $0x7f4] ss:$8 sps:$4 sm:$0xff]  }
  0xcc   :  { %2119 = vmatpush1.bf16.msra.mxu0 %v2795_v55  ;;  %1956 = vmatprep.subr.bf16.mxu1 %v2800_v34  ;;  %v265_v55 = vmax.f32 %v233_v43, %v249_v26  ;;  %v273_v34 = vmax.f32 %v241_v21, %v257_v27 }
  0xcd   :  { %2120 = vmatprep.subr.bf16.mxu0 %v2803_v35  ;;  %v2870_v35 = vld [vmem:[%s3817_s3 + $0x3f0] ss:$8 sps:$4 sm:$0xff]  }
  0xcf   :  { %1957 = vmatpush1.bf16.msra.mxu1 %v2798_v36  ;;  %v2873_v36 = vld [vmem:[%s3817_s3 + $0x7f0] ss:$8 sps:$4 sm:$0xff]  }
  0xd0   :  { %2121 = vmatpush1.bf16.msra.mxu0 %v2801_v38  ;;  %1958 = vmatprep.subr.bf16.mxu1 %v2806_v39  ;;  %v281_v38 = vpack.c.bf16 %v265_v55, %v265_v55  ;;  %v289_v39 = vpack.c.bf16 %v273_v34, %v273_v34 }
  0xd1   :  { %2122 = vmatprep.subr.bf16.mxu0 %v2809_v40 }
  0xd3   :  { %1959 = vmatpush1.bf16.msra.mxu1 %v2804_v41 }
  0xd4   :  { %2123 = vmatpush1.bf16.msra.mxu0 %v2807_v56  ;;  %1960 = vmatprep.subr.bf16.mxu1 %v2812_v44 }
  0xd5   :  { %2124 = vmatprep.subr.bf16.mxu0 %v2815_v45 }
  0xd7   :  { %1961 = vmatpush1.bf16.msra.mxu1 %v2810_v46 }
  0xd8   :  { %2125 = vmatpush1.bf16.msra.mxu0 %v2813_v0  ;;  %1962 = vmatprep.subr.bf16.mxu1 %v2818_v48 }
  0xd9   :  { %2126 = vmatprep.subr.bf16.mxu0 %v2821_v49 }
  0xdb   :  { %1963 = vmatpush1.bf16.msra.mxu1 %v2816_v50 }
  0xdc   :  { %2127 = vmatpush1.bf16.msra.mxu0 %v2819_v51  ;;  %1964 = vmatprep.subr.bf16.mxu1 %v2824_v52 }
  0xdd   :  { %2128 = vmatprep.subr.bf16.mxu0 %v2827_v53 }
  0xdf   :  { %1965 = vmatpush1.bf16.msra.mxu1 %v2822_v54 }
  0xe0   :  { %2129 = vmatpush1.bf16.msra.mxu0 %v2825_v57  ;;  %1966 = vmatprep.subr.bf16.mxu1 %v2830_v58 }
  0xe1   :  { %2130 = vmatprep.subr.bf16.mxu0 %v2833_v59 }
  0xe3   :  { %1967 = vmatpush1.bf16.msra.mxu1 %v2828_v60 }
  0xe4   :  { %2131 = vmatpush1.bf16.msra.mxu0 %v2831_v61  ;;  %1968 = vmatprep.subr.bf16.mxu1 %v2836_v62 }
  0xe5   :  { %2132 = vmatprep.subr.bf16.mxu0 %v2839_v1 }
  0xe7   :  { %1969 = vmatpush1.bf16.msra.mxu1 %v2834_v2 }
  0xe8   :  { %2133 = vmatpush1.bf16.msra.mxu0 %v2837_v3  ;;  %1970 = vmatprep.subr.bf16.mxu1 %v2842_v4 }
  0xe9   :  { %2134 = vmatprep.subr.bf16.mxu0 %v2845_v5 }
  0xeb   :  { %1971 = vmatpush1.bf16.msra.mxu1 %v2840_v7 }
  0xec   :  { %2135 = vmatpush1.bf16.msra.mxu0 %v2843_v8  ;;  %1972 = vmatprep.subr.bf16.mxu1 %v2848_v9 }
  0xed   :  { %2136 = vmatprep.subr.bf16.mxu0 %v2851_v42 }
  0xef   :  { %1973 = vmatpush1.bf16.msra.mxu1 %v2846_v14 }
  0xf0   :  { %2137 = vmatpush1.bf16.msra.mxu0 %v2849_v15  ;;  %1974 = vmatprep.subr.bf16.mxu1 %v2854_v63 }
  0xf1   :  { %2138 = vmatprep.subr.bf16.mxu0 %v2857_v31 }
  0xf3   :  { %1975 = vmatpush1.bf16.msra.mxu1 %v2852_v18 }
  0xf4   :  { %2139 = vmatpush1.bf16.msra.mxu0 %v2855_v19  ;;  %1976 = vmatprep.subr.bf16.mxu1 %v2860_v20 }
  0xf5   :  { %2140 = vmatprep.subr.bf16.mxu0 %v2863_v37 }
  0xf7   :  { %1977 = vmatpush1.bf16.msra.mxu1 %v2858_v22 }
  0xf8   :  { %2141 = vmatpush1.bf16.msra.mxu0 %v2861_v23  ;;  %1978 = vmatprep.subr.bf16.mxu1 %v2866_v24 }
  0xf9   :  { %2142 = vmatprep.subr.bf16.mxu0 %v2869_v25 }
  0xfb   :  { %1979 = vmatpush1.bf16.msra.mxu1 %v2864_v28 }
  0xfc   :  { %2143 = vmatpush1.bf16.msra.mxu0 %v2867_v29  ;;  %1980 = vmatprep.subr.bf16.mxu1 %v2872_v30 }
  0xfd   :  { %2144 = vmatprep.subr.bf16.mxu0 %v2875_v32 }
  0xff   :  { %1981 = vmatpush1.bf16.msra.mxu1 %v2870_v35 }
 0x100   :  { %2145 = vmatpush1.bf16.msra.mxu0 %v2873_v36 }
 0x102   :  { %1983 = vmatmul.mubr.bf16.vlgmr.msra.gmra.mrb[0].mxu1 %v281_v38 }
 0x103   :  { %2147 = vmatmul.mubr.bf16.vlgmr.msra.gmra.mrb[0].mxu0 %v289_v39 }
 0x1d5   :  { %v1984_v40 = vpop.f32.mrb[0].mxu1 }
 0x1d6   :  { %v2148_v41 = vpop.f32.mrb[0].mxu0  ;;  %v1986_v44 = vpop.f32.mrb[1].mxu1 }
 0x1d7   :  { %v2466_v56 = vadd.f32 %v2148_v41, %v1984_v40  ;;  %v2150_v45 = vpop.f32.mrb[1].mxu0  ;;  %v1988_v0 = vpop.f32.mrb[2].mxu1 }
 0x1d8   :  { %v2467_v46 = vadd.f32 %v2150_v45, %v1986_v44  ;;  %v2152_v48 = vpop.f32.mrb[2].mxu0  ;;  %v1989_v50 = vpop.f32.mrb[3].mxu1 }
 0x1d9   :  { %v2155_v49 = vpack.c.bf16 %v2466_v56, %v2466_v56  ;;  %v2153_v51 = vpop.f32.mrb[3].mxu0 }
 0x1da   :  { %v2156_v52 = vpack.c.bf16 %v2467_v46, %v2467_v46  ;;  %v2465_v53 = vpack.c.bf16 %v2467_v46, %v2466_v56 }
 0x1db   :  { %v2164_v54 = vunpack.c.l.bf16 %v2155_v49 }
 0x1dc   :  { %2163 = vst [vmem:[%s3821_s4] sm:$0xff] %v2465_v53  ;;  %v2165_v57 = vunpack.c.l.bf16 %v2156_v52 }
 0x1dd   :  { %v2166_v58 = vrot.slane %v2164_v54, 4  ;;  %v2178_v59 = vmul.f32 %v2164_v54, %v2164_v54 }
 0x1de   :  { %v2172_v60 = vrot.slane %v2165_v57, 4  ;;  %v2179_v61 = vmul.f32 %v2165_v57, %v2165_v57 }
 0x1df   :  { %v2167_v62 = vadd.f32 %v2166_v58, %v2164_v54  ;;  %v2180_v1 = vrot.slane %v2178_v59, 4 }
 0x1e0   :  { %v2173_v2 = vadd.f32 %v2172_v60, %v2165_v57  ;;  %v2186_v3 = vrot.slane %v2179_v61, 4 }
 0x1e1   :  { %v2168_v4 = vrot.slane %v2167_v62, 2  ;;  %v2181_v5 = vadd.f32 %v2180_v1, %v2178_v59 }
 0x1e2   :  { %v2174_v6 = vrot.slane %v2173_v2, 2  ;;  %v2187_v7 = vadd.f32 %v2186_v3, %v2179_v61 }
 0x1e3   :  { %v2169_v8 = vadd.f32 %v2168_v4, %v2167_v62  ;;  %v2182_v9 = vrot.slane %v2181_v5, 2 }
 0x1e4   :  { %v2175_v42 = vadd.f32 %v2174_v6, %v2173_v2  ;;  %v2188_v10 = vrot.slane %v2187_v7, 2 }
 0x1e5   :  { %v2170_v11 = vrot.slane %v2169_v8, 1  ;;  %v2183_v12 = vadd.f32 %v2182_v9, %v2181_v5 }
 0x1e6   :  { %v2176_v13 = vrot.slane %v2175_v42, 1  ;;  %v2189_v14 = vadd.f32 %v2188_v10, %v2187_v7 }
 0x1e7   :  { %v2184_v15 = vrot.slane %v2183_v12, 1  ;;  %v2171_v31 = vadd.f32 %v2170_v11, %v2169_v8 }
 0x1e8   :  { %v2190_v63 = vrot.slane %v2189_v14, 1  ;;  %v2177_v47 = vadd.f32 %v2176_v13, %v2175_v42 }
 0x1e9   :  { %v2185_v33 = vadd.f32 %v2184_v15, %v2183_v12 }
 0x1ea   :  { %v2191_v16 = vadd.f32 %v2190_v63, %v2189_v14 }
 0x1eb   :  { %v2193_v17 = vsel %vm2192_vm0, %v2171_v31, %v2185_v33 }
 0x1ec   :  { %v2196_v18 = vsel %vm2195_vm1, %v2193_v17, 0.0  ;;  %v2194_v19 = vsel %vm2192_vm0, %v2177_v47, %v2191_v16 }
 0x1ed   :  { %2198 = vst [vmem:[%s3822_s5] sm:$0xff] %v2196_v18  ;;  %v2197_v20 = vsel %vm2195_vm1, %v2194_v19, 0.0 }
 0x1ee   :  { %2199 = vst [vmem:[%s3822_s5 + $0x8] sm:$0xff] %v2197_v20 }

// kernel: tile.70
= control target key start
LH: loop header
LB: loop body
LE: loop exit
PB: predicated region body
PF: predicated region fallthrough
CT: control target
= control target key end

     0   :  { %s22_s0 = inlined_call_operand.vmem [shape: f32[64], index: 0, kind: input, shape index: {}]   ;;  %s23_s1 = inlined_call_operand.vmem [shape: f32[4,64], index: 1, kind: output, shape index: {}]  }
   0x1   :  { %v4_v0 = vld [vmem:[%s22_s0] ss:$0 sm:$0xff] }
   0x2   :  { %5 = vst [vmem:[%s23_s1] sm:$0xf] %v4_v0 }

</bundles_post_ra>
